<compile_context>
chip_gen: v5e
topology: v5e:2x2
jax: 0.10.0
libtpu: 0.0.40
codegen_flags: <defaults>
</compile_context>

<pallas_src>
import jax
import jax.numpy as jnp
from jax.experimental import pallas as pl
from jax.experimental.pallas import tpu as pltpu

HIDDEN = 768
VOCAB = 30000
VOCAB_PAD = 30720           # 30000 rounded up to a multiple of TILE_V (15 * 2048)
TILE_V = 2048               # multiple of 256: clean MXU tiles on v6e/v7x, lane-dense
MAX_TILE_N = 128            # keeps per-tile f32 logits slab v7x-safe (~42 MB total)


def _round_up(x, m):
    return (x + m - 1) // m * m


def _mlm_head_kernel(x_ref, w_ref, b_ref, o_ref, m_ref, s_ref):
    j = pl.program_id(1)
    n_vtiles = pl.num_programs(1)

    @pl.when(j == 0)
    def _():
        m_ref[...] = jnp.full_like(m_ref, -jnp.inf)
        s_ref[...] = jnp.zeros_like(s_ref)

    # MXU matmul, bf16 inputs, f32 accumulation: (TILE_N,768) @ (768,TILE_V)
    logits = jnp.dot(x_ref[...], w_ref[...],
                     preferred_element_type=jnp.float32) + b_ref[...]

    # Stash raw logits into this row-tile's resident output slab.
    start = pl.multiple_of(j * TILE_V, 128)
    o_ref[:, pl.ds(start, TILE_V)] = logits

    # Online max / sum-exp update over the vocab axis.
    m_old = m_ref[...]
    m_new = jnp.maximum(m_old, logits.max(axis=-1, keepdims=True))
    s_ref[...] = (s_ref[...] * jnp.exp(m_old - m_new)
                  + jnp.exp(logits - m_new).sum(axis=-1, keepdims=True))
    m_ref[...] = m_new

    @pl.when(j == n_vtiles - 1)
    def _():
        # log_softmax = logits - (max + log(sum exp(logits - max)))
        # Single broadcast subtract over the slab (lse computed once).
        lse = m_ref[...] + jnp.log(s_ref[...])
        o_ref[...] = o_ref[...] - lse


def prepare_mlm_head_params(weight, bias):
    """Call ONCE at parameter-load time (hoisted out of the per-call path).

    weight: (768, 30000) f32, bias: (30000,) f32
    Returns (w_pad bf16 (768, 30720), b_pad f32 (1, 30720)); padded bias
    columns are -1e30 so they vanish in the softmax sum.
    """
    w_pad = jnp.zeros((HIDDEN, VOCAB_PAD), jnp.bfloat16)
    w_pad = w_pad.at[:, :VOCAB].set(weight.astype(jnp.bfloat16))
    b_pad = jnp.full((1, VOCAB_PAD), -1e30, jnp.float32)
    b_pad = b_pad.at[0, :VOCAB].set(bias.astype(jnp.float32))
    return w_pad, b_pad


@jax.jit
def albert_mlm_head(inputs, w_pad, b_pad):
    """inputs: (B, S, 768); w_pad: (768, 30720) bf16; b_pad: (1, 30720) f32."""
    B, S, H = inputs.shape
    assert H == HIDDEN
    N = B * S

    # Row tile: multiple of 8 (sublane), capped for VMEM (v7x = 64 MiB/TC).
    tile_n = min(MAX_TILE_N, _round_up(N, 8))
    n_pad = _round_up(N, tile_n)

    x = inputs.reshape(N, H).astype(jnp.bfloat16)
    if n_pad != N:
        x = jnp.pad(x, ((0, n_pad - N), (0, 0)))

    n_row_tiles = n_pad // tile_n
    n_vocab_tiles = VOCAB_PAD // TILE_V

    # Right-sized VMEM request: resident logits slab (x2 output buffering),
    # double-buffered bf16 W/X tiles, bias tiles, scratch, + headroom.
    vmem_bytes = (2 * tile_n * VOCAB_PAD * 4
                  + 2 * HIDDEN * TILE_V * 2
                  + 2 * tile_n * HIDDEN * 2
                  + 2 * TILE_V * 4
                  + 4 * tile_n * 4
                  + (4 << 20))
    vmem_limit = int(max(vmem_bytes, 32 << 20))

    out = pl.pallas_call(
        _mlm_head_kernel,
        out_shape=jax.ShapeDtypeStruct((n_pad, VOCAB_PAD), jnp.float32),
        grid_spec=pltpu.PrefetchScalarGridSpec(
            num_scalar_prefetch=0,
            grid=(n_row_tiles, n_vocab_tiles),          # reduction (vocab) axis last
            in_specs=[
                pl.BlockSpec((tile_n, H), lambda i, j: (i, 0)),     # X row tile
                pl.BlockSpec((H, TILE_V), lambda i, j: (0, j)),     # W vocab tile
                pl.BlockSpec((1, TILE_V), lambda i, j: (0, j)),     # bias vocab tile
            ],
            out_specs=pl.BlockSpec((tile_n, VOCAB_PAD), lambda i, j: (i, 0)),
            scratch_shapes=[
                pltpu.VMEM((tile_n, 1), jnp.float32),   # running max
                pltpu.VMEM((tile_n, 1), jnp.float32),   # running sum-exp
            ],
        ),
        compiler_params=pltpu.CompilerParams(
            dimension_semantics=("parallel", "arbitrary"),
            vmem_limit_bytes=vmem_limit,
        ),
    )(x, w_pad, b_pad)

    return out[:N, :VOCAB].reshape(B, S, VOCAB)


if __name__ == "__main__":
    key = jax.random.PRNGKey(0)
    k_x, k_w, k_b = jax.random.split(key, 3)

    B, S = 2, 8
    # nn.Linear default init: U(-1/sqrt(in_features), 1/sqrt(in_features))
    bound = 1.0 / (HIDDEN ** 0.5)
    weight = jax.random.uniform(k_w, (HIDDEN, VOCAB), jnp.float32, -bound, bound)
    bias = jax.random.uniform(k_b, (VOCAB,), jnp.float32, -bound, bound)
    x = jax.random.normal(k_x, (B, S, HIDDEN), jnp.float32)

    # Pad/cast parameters once (out of the per-call path).
    w_pad, b_pad = jax.block_until_ready(prepare_mlm_head_params(weight, bias))

    out = albert_mlm_head(x, w_pad, b_pad)
    out = jax.block_until_ready(out)

    # Reference check (plain JAX, f32). Kernel uses bf16 X/W with f32
    # accumulation, so the tolerance is loosened vs the f32 reference.
    logits_ref = jnp.dot(x.reshape(-1, HIDDEN), weight,
                         precision=jax.lax.Precision.HIGHEST) + bias
    ref = jax.nn.log_softmax(logits_ref, axis=-1).reshape(B, S, VOCAB)

    assert out.shape == (B, S, VOCAB), out.shape
    max_err = float(jnp.max(jnp.abs(out - ref)))
    assert jnp.allclose(out, ref, atol=5e-2, rtol=5e-2), max_err

    print("KERNEL_OK")
</pallas_src>

<mosaic_0001>
module attributes {stable_mosaic.version = 11 : i64} {
  func.func @_mlm_head_kernel(%arg0: i32, %arg1: i32, %arg2: memref<16x768xbf16, #tpu.memory_space<vmem>>, %arg3: memref<768x2048xbf16, #tpu.memory_space<vmem>>, %arg4: memref<1x2048xf32, #tpu.memory_space<vmem>>, %arg5: memref<16x30720xf32, #tpu.memory_space<vmem>>, %arg6: memref<16x1xf32, #tpu.memory_space<vmem>>, %arg7: memref<16x1xf32, #tpu.memory_space<vmem>>) attributes {dimension_semantics = [#tpu.dimension_semantics<parallel>, #tpu.dimension_semantics<arbitrary>], iteration_bounds = array<i64: 1, 15>, scalar_prefetch = 0 : i64, scratch_operands = 2 : i64, tpu.core_type = #tpu.core_type<tc>, window_params = [{transform_indices = @transform_0, window_bounds = array<i64: 16, 768>}, {transform_indices = @transform_1, window_bounds = array<i64: 768, 2048>}, {transform_indices = @transform_2, window_bounds = array<i64: 1, 2048>}, {transform_indices = @transform_3, window_bounds = array<i64: 16, 30720>}]} {
    %c0_i32 = arith.constant 0 : i32
    %0 = arith.cmpi eq, %arg1, %c0_i32 : i32
    %1 = arith.extui %0 : i1 to i32
    %c0_i32_0 = arith.constant 0 : i32
    %2 = arith.cmpi ne, %1, %c0_i32_0 : i32
    scf.if %2 {
      %cst_18 = arith.constant 0xFF800000 : f32
      %32 = vector.broadcast %cst_18 : f32 to vector<16x1xf32>
      %c0_19 = arith.constant 0 : index
      %c0_20 = arith.constant 0 : index
      %33 = vector.load %arg6[%c0_19, %c0_20] : memref<16x1xf32, #tpu.memory_space<vmem>>, vector<16x1xf32>
      tpu.vector_store %arg6[%c0_19, %c0_20], %32 {strides = array<i32>} : memref<16x1xf32, #tpu.memory_space<vmem>>, vector<16x1xf32>,
      %cst_21 = arith.constant 0.000000e+00 : f32
      %34 = vector.broadcast %cst_21 : f32 to vector<16x1xf32>
      %c0_22 = arith.constant 0 : index
      %c0_23 = arith.constant 0 : index
      %35 = vector.load %arg7[%c0_22, %c0_23] : memref<16x1xf32, #tpu.memory_space<vmem>>, vector<16x1xf32>
      tpu.vector_store %arg7[%c0_22, %c0_23], %34 {strides = array<i32>} : memref<16x1xf32, #tpu.memory_space<vmem>>, vector<16x1xf32>,
    } else {
    }
    %c0 = arith.constant 0 : index
    %c0_1 = arith.constant 0 : index
    %3 = vector.load %arg2[%c0, %c0_1] : memref<16x768xbf16, #tpu.memory_space<vmem>>, vector<16x768xbf16>
    %c0_2 = arith.constant 0 : index
    %c0_3 = arith.constant 0 : index
    %4 = vector.load %arg3[%c0_2, %c0_3] : memref<768x2048xbf16, #tpu.memory_space<vmem>>, vector<768x2048xbf16>
    %cst = arith.constant dense<0.000000e+00> : vector<16x2048xf32>
    %5 = tpu.matmul %3, %4, %cst {dimension_numbers = #tpu.dot_dimension_numbers<[1], [0], [0], [1], [0, 0, 1, 1], [], []>} : vector<16x768xbf16>, vector<768x2048xbf16>, vector<16x2048xf32> -> vector<16x2048xf32>
    %c0_4 = arith.constant 0 : index
    %c0_5 = arith.constant 0 : index
    %6 = vector.load %arg4[%c0_4, %c0_5] : memref<1x2048xf32, #tpu.memory_space<vmem>>, vector<1x2048xf32>
    %7 = vector.broadcast %6 : vector<1x2048xf32> to vector<16x2048xf32>
    %8 = arith.addf %5, %7 : vector<16x2048xf32>
    %c2048_i32 = arith.constant 2048 : i32
    %9 = arith.muli %arg1, %c2048_i32 : i32
    %10 = tpu.assume_multiple %9, 128 : i32
    %c0_6 = arith.constant 0 : index
    %11 = arith.index_cast %10 : i32 to index
    %12 = vector.load %arg5[%c0_6, %11] : memref<16x30720xf32, #tpu.memory_space<vmem>>, vector<16x2048xf32>
    tpu.vector_store %arg5[%c0_6, %11], %8 {strides = array<i32>} : memref<16x30720xf32, #tpu.memory_space<vmem>>, vector<16x2048xf32>,
    %c0_7 = arith.constant 0 : index
    %c0_8 = arith.constant 0 : index
    %13 = vector.load %arg6[%c0_7, %c0_8] : memref<16x1xf32, #tpu.memory_space<vmem>>, vector<16x1xf32>
    %cst_9 = arith.constant dense<0xFF800000> : vector<16xf32>
    %14 = vector.multi_reduction <maximumf>, %8, %cst_9 [1] : vector<16x2048xf32> to vector<16xf32>
    %15 = vector.shape_cast %14 : vector<16xf32> to vector<16x1xf32>
    %16 = arith.maximumf %13, %15 : vector<16x1xf32>
    %c0_10 = arith.constant 0 : index
    %c0_11 = arith.constant 0 : index
    %17 = vector.load %arg7[%c0_10, %c0_11] : memref<16x1xf32, #tpu.memory_space<vmem>>, vector<16x1xf32>
    %18 = arith.subf %13, %16 : vector<16x1xf32>
    %19 = math.exp %18 : vector<16x1xf32>
    %20 = arith.mulf %17, %19 : vector<16x1xf32>
    %21 = vector.broadcast %16 : vector<16x1xf32> to vector<16x2048xf32>
    %22 = arith.subf %8, %21 : vector<16x2048xf32>
    %23 = math.exp %22 : vector<16x2048xf32>
    %cst_12 = arith.constant dense<0.000000e+00> : vector<16xf32>
    %24 = vector.multi_reduction <add>, %23, %cst_12 [1] : vector<16x2048xf32> to vector<16xf32>
    %25 = vector.shape_cast %24 : vector<16xf32> to vector<16x1xf32>
    %26 = arith.addf %20, %25 : vector<16x1xf32>
    %c0_13 = arith.constant 0 : index
    %c0_14 = arith.constant 0 : index
    %27 = vector.load %arg7[%c0_13, %c0_14] : memref<16x1xf32, #tpu.memory_space<vmem>>, vector<16x1xf32>
    tpu.vector_store %arg7[%c0_13, %c0_14], %26 {strides = array<i32>} : memref<16x1xf32, #tpu.memory_space<vmem>>, vector<16x1xf32>,
    %c0_15 = arith.constant 0 : index
    %c0_16 = arith.constant 0 : index
    %28 = vector.load %arg6[%c0_15, %c0_16] : memref<16x1xf32, #tpu.memory_space<vmem>>, vector<16x1xf32>
    tpu.vector_store %arg6[%c0_15, %c0_16], %16 {strides = array<i32>} : memref<16x1xf32, #tpu.memory_space<vmem>>, vector<16x1xf32>,
    %c14_i32 = arith.constant 14 : i32
    %29 = arith.cmpi eq, %arg1, %c14_i32 : i32
    %30 = arith.extui %29 : i1 to i32
    %c0_i32_17 = arith.constant 0 : i32
    %31 = arith.cmpi ne, %30, %c0_i32_17 : i32
    scf.if %31 {
      %c0_18 = arith.constant 0 : index
      %c0_19 = arith.constant 0 : index
      %32 = vector.load %arg6[%c0_18, %c0_19] : memref<16x1xf32, #tpu.memory_space<vmem>>, vector<16x1xf32>
      %c0_20 = arith.constant 0 : index
      %c0_21 = arith.constant 0 : index
      %33 = vector.load %arg7[%c0_20, %c0_21] : memref<16x1xf32, #tpu.memory_space<vmem>>, vector<16x1xf32>
      %34 = math.log %33 : vector<16x1xf32>
      %35 = arith.addf %32, %34 : vector<16x1xf32>
      %c0_22 = arith.constant 0 : index
      %c0_23 = arith.constant 0 : index
      %36 = vector.load %arg5[%c0_22, %c0_23] : memref<16x30720xf32, #tpu.memory_space<vmem>>, vector<16x30720xf32>
      %37 = vector.broadcast %35 : vector<16x1xf32> to vector<16x30720xf32>
      %38 = arith.subf %36, %37 : vector<16x30720xf32>
      %c0_24 = arith.constant 0 : index
      %c0_25 = arith.constant 0 : index
      %39 = vector.load %arg5[%c0_24, %c0_25] : memref<16x30720xf32, #tpu.memory_space<vmem>>, vector<16x30720xf32>
      tpu.vector_store %arg5[%c0_24, %c0_25], %38 {strides = array<i32>} : memref<16x30720xf32, #tpu.memory_space<vmem>>, vector<16x30720xf32>,
    } else {
    }
    return
  }
  func.func @transform_0(%arg0: i32, %arg1: i32) -> (i32, i32) {
    %c0_i32 = arith.constant 0 : i32
    %c0_i32_0 = arith.constant 0 : i32
    return %arg0, %c0_i32 : i32, i32
  }
  func.func @transform_1(%arg0: i32, %arg1: i32) -> (i32, i32) {
    %c0_i32 = arith.constant 0 : i32
    %c0_i32_0 = arith.constant 0 : i32
    return %c0_i32, %arg1 : i32, i32
  }
  func.func @transform_2(%arg0: i32, %arg1: i32) -> (i32, i32) {
    %c0_i32 = arith.constant 0 : i32
    %c0_i32_0 = arith.constant 0 : i32
    return %c0_i32, %arg1 : i32, i32
  }
  func.func @transform_3(%arg0: i32, %arg1: i32) -> (i32, i32) {
    %c0_i32 = arith.constant 0 : i32
    %c0_i32_0 = arith.constant 0 : i32
    return %arg0, %c0_i32 : i32, i32
  }
}

</mosaic_0001>

<bundles_post_ra>
// kernel: albert_mlm_head.1
= control target key start
LH: loop header
LB: loop body
LE: loop exit
PB: predicated region body
PF: predicated region fallthrough
CT: control target
= control target key end

     0   :  { %8 = vsyncpa [#allocation5], 0  ;;  %s17812_s0 = inlined_call_operand.vmem [shape: bf16[16,768], index: 0, kind: input, shape index: {}]   ;;  %s17813_s1 = inlined_call_operand.hbm [shape: bf16[768,30720], index: 1, kind: input, shape index: {}]   ;;  %s17814_s2 = inlined_call_operand.hbm [shape: f32[1,30720], index: 2, kind: input, shape index: {}]   ;;  %s17815_s3 = inlined_call_operand.vmem [shape: f32[16,30720], index: 3, kind: output, shape index: {}]  }
   0x1   :  { %10 = vsyncpa [#allocation5 + $0x1], 0 }
   0x2   :  { %11 = vsyncpa [#allocation7], 0 }
   0x3   :  { %13 = vsyncpa [#allocation7 + $0x1], 0  ;;  %s12319_s12 = smov 0   ;;  %s12321_s13 = smov 0  }
   0x4   :  { %s12323_s14 = smov 0   ;;  %s12325_s15 = smov 0  }
   0x5   :  { %s12327_s16 = smov 0   ;;  %s12329_s17 = smov 0  }
   0x6 LB: > { %s8118_s18 = sadd.s32 4294967295, %s12290_s17   ;;  %s28_s19 = sadd.s32 1, %s12286_s16  ;;  %s12290_s17 = sphi %s12329_s17, %s19_s17   ;;  %s12286_s16 = sphi %s12327_s16, %s17822_s16   ;;  %s12282_s15 = sphi %s12325_s15, %s17821_s15   ;;  %s12278_s14 = sphi %s12323_s14, %s17820_s14   ;;  %s12274_s13 = sphi %s12321_s13, %s17819_s13   ;;  %s12270_s12 = sphi %s12319_s12, %s17818_s12  }
   0x7   : > { %p29_p0 = scmp.ge.s32.totalorder %s28_s19, 15  ;;  %s64_s20 = sadd.s32 1, %s12278_s14 }
   0x8   : > { %p71_p1 = scmp.ne.s32.totalorder %s12278_s14, %s12274_s13  ;;  %p72_p2 = scmp.eq.s32.totalorder %s12290_s17, 0 }
   0x9   : > { %s17824_s19 = smov (%p29_p0, %s28_s19), 0  ;;  %p77_p4 = scmp.ne.s32.totalorder %s12274_s13, %s12270_s12 }
   0xa   : > { %p73_p3 = por %p72_p2, %p71_p1  ;;  %s61_s21 = ssub.s32 %s12286_s16, %s17824_s19 }
   0xb   : > { %p78_p5 = scmp.eq.s32.totalorder %s8118_s18, 0  ;;  %p62_p6 = scmp.eq.s32.totalorder %s61_s21, 0 }
   0xc   : > { %p12020_p8 = scmp.lt.s32.totalorder %s12290_s17, 15  ;;  %s12367_s24 = sand.u32 1, %s12278_s14  }
   0xd   : > { %p12358_p7 = por %p78_p5, %p77_p4  ;;  %s11232_s25 = sshll.u32 %s12286_s16, 6 }
   0xe   : > { %s12364_s23 = scalar_select %p62_p6, %s12278_s14, %s64_s20  }
   0xf   : > { %s12007_s26 = smul.u32 6144, %s12367_s24  ;;  %s172_s29 = scalar_lea.hbm %s17813_s1, %s11232_s25 }
  0x10   : > { %p12374_p9 = pnand %p12020_p8, %p73_p3  ;;  %s173_s4 = sshll.u32 %s172_s29, 4  ;;  %s174_s4 = int_to_ptr.hbm [resolvable:$true] %s173_s4 }
  0x11   : > { %s167_s5 = scalar_lea.vmem [#allocation4], %s12007_s26  ;;  %p8126_p10 = scmp.ge.s32.totalorder %s12290_s17, 1 }
  0x12   : > { %s175_s6 = sshll.u32 %s167_s5, 4  ;;  %s164_s7 = scalar_lea.sflag [#allocation5], %s12367_s24  ;;  %s176_s6 = int_to_ptr.vmem [resolvable:$true] %s175_s6 }
  0x13   : > { %s12292_s8 = smov 15360   ;;  %s12293_s9 = smov 1024  }
  0x14   : > { %s12294_s10 = smov 64   ;;  %p202_p11 = scmp.lt.s32.totalorder %s12290_s17, 16 }
  0x15   : > { %12016 = dma.hbm_to_vmem [thread:$0]  (!%p12374_p9), %s174_s4, 98304, %s176_s6, %s164_s7, %s12292_s8, %s12293_s9, %s12294_s10  }
  0x16   : > { %s8124_s11 = sshll.u32 %s12367_s24, 4  ;;  %s8125_s12 = sshll.u32 %s12286_s16, 4 }
  0x17   : > { %p203_p12 = pnand %p8126_p10, %p202_p11  ;;  %s193_s21 = scalar_lea.hbm %s17814_s2, %s8125_s12 }
  0x18   : > { %s189_s25 = scalar_lea.vmem [#allocation6], %s8124_s11  ;;  %s195_s27 = sshll.u32 %s193_s21, 4  ;;  %s196_s27 = int_to_ptr.hbm [resolvable:$true] %s195_s27 }
  0x19   : > { %s197_s26 = sshll.u32 %s189_s25, 4  ;;  %s186_s28 = scalar_lea.sflag [#allocation7], %s12367_s24  ;;  %s198_s26 = int_to_ptr.vmem [resolvable:$true] %s197_s26 }
  0x1a   : > { %12019 = dma.hbm_to_vmem [thread:$0]  (!%p12374_p9), %s196_s27, 256, %s198_s26, %s186_s28  }
  0x1b   : > { %206 = sbr.rel (%p203_p12) target bundleno = 2102 (0x836), region = 32  ;;  %s208_s29 = sand.u32 (!%p203_p12), 1, %s12274_s13  }
  0x1c   : > { %s12008_s4 = smul.u32 (!%p203_p12), 6144, %s208_s29  ;;  %s209_s5 = scalar_lea.sflag (!%p203_p12), [#allocation5], %s208_s29 }
  0x1e   : > { %s12392_s6 = scalar_lea.vmem (!%p203_p12), [#allocation4], %s12008_s4 }
  0x20   : > { %12261 = dma.done.wait (%p12358_p7), %s209_s5, 98304  }
  0x21   : > { %12263 = vsyncadd (%p12358_p7), %s209_s5, 4294868992  ;;  %s8127_s7 = sshll.u32 %s208_s29, 4  ;;  %s219_s8 = scalar_lea.sflag [#allocation7], %s208_s29 }
  0x22   : > { %s12398_s9 = scalar_lea.vmem [#allocation6], %s8127_s7 }
  0x23   : > { %12265 = dma.done.wait (%p12358_p7), %s219_s8, 256  }
  0x24   : > { %12267 = vsyncadd (%p12358_p7), %s219_s8, 4294967040  ;;  %p8128_p13 = scmp.ne.s32.totalorder %s12282_s15, 0 }
  0x26   : > { %277 = sbr.rel (%p8128_p13) target bundleno = 48 (0x30), region = 44 }
  0x2b   : > { %vm278_vm0 = vcmask 7168   ;;  %v12295_v0 = vmov -inf   ;;  %v12296_v1 = vmov 0.0  }
  0x2c   : > { %279 = vst.msk [vmem:[#allocation2] sm:$0xff] %vm278_vm0, %v12295_v0 }
  0x2d   : > { %280 = vst.msk [vmem:[#allocation2 + $0x8] sm:$0xff] %vm278_vm0, %v12295_v0 }
  0x2e   : > { %281 = vst.msk [vmem:[#allocation3] sm:$0xff] %vm278_vm0, %v12296_v1 }
  0x2f   : > { %282 = vst.msk [vmem:[#allocation3 + $0x8] sm:$0xff] %vm278_vm0, %v12296_v1 }
  0x30 PF: > { %v8603_v2 = vld [vmem:[%s12392_s6 + $0x380] sm:$0xf]  ;;  %s11225_s18 = sshll.u32 %s12282_s15, 11  ;;  %vm6534_vm1 = vcmask 7168   ;;  %p11227_p0 = scmp.ne.s32.totalorder %s12282_s15, 14 }
  0x31   : > { %v11359_v3 = vld [vmem:[%s12392_s6 + $0x3bc] sm:$0xf0]  ;;  %s12882_s20 = sshra.s32 %s11225_s18, 7 }
  0x32   : > { %v9115_v4 = vld [vmem:[%s12392_s6 + $0x780] sm:$0xf]  ;;  %v8604_v5 = vor.u32 %v11359_v3, %v8603_v2  ;;  %s11226_s21 = sshll.u32 %s12882_s20, 3 }
  0x33   : > { %v11487_v6 = vld [vmem:[%s12392_s6 + $0x7bc] sm:$0xf0]  ;;  %s12908_s27 = scalar_lea.vmem %s17815_s3, %s11226_s21 }
  0x34   : > { %v9627_v7 = vld [vmem:[%s12392_s6 + $0xb80] sm:$0xf]  ;;  %v9116_v9 = vor.u32 %v11487_v6, %v9115_v4  ;;  %4963 = vmatpush.bf16.msra.mxu0 %v8604_v5 }
  0x35   : > { %v11615_v8 = vld [vmem:[%s12392_s6 + $0xbbc] sm:$0xf0] }
  0x36   : > { %v9628_v10 = vor.u32 %v11615_v8, %v9627_v7  ;;  %v10139_v11 = vld [vmem:[%s12392_s6 + $0xf80] sm:$0xf]  ;;  %4977 = vmatpush.bf16.msra.mxu1 %v9116_v9 }
  0x37   : > { %v11743_v12 = vld [vmem:[%s12392_s6 + $0xfbc] sm:$0xf0] }
  0x38   : > { %v8539_v13 = vld [vmem:[%s12392_s6 + $0x300] sm:$0xf]  ;;  %v10140_v14 = vor.u32 %v11743_v12, %v10139_v11  ;;  %4991 = vmatpush.bf16.msra.mxu2 %v9628_v10 }
  0x39   : > { %v11343_v15 = vld [vmem:[%s12392_s6 + $0x33c] sm:$0xf0] }
  0x3a   : > { %v9051_v16 = vld [vmem:[%s12392_s6 + $0x700] sm:$0xf]  ;;  %v8540_v18 = vor.u32 %v11343_v15, %v8539_v13  ;;  %5005 = vmatpush.bf16.msra.mxu3 %v10140_v14 }
  0x3b   : > { %v11471_v17 = vld [vmem:[%s12392_s6 + $0x73c] sm:$0xf0] }
  0x3c   : > { %v9052_v19 = vor.u32 %v11471_v17, %v9051_v16  ;;  %v9563_v20 = vld [vmem:[%s12392_s6 + $0xb00] sm:$0xf]  ;;  %4964 = vmatpush.bf16.msra.mxu0 %v8540_v18 }
  0x3d   : > { %v11599_v21 = vld [vmem:[%s12392_s6 + $0xb3c] sm:$0xf0] }
  0x3e   : > { %v10075_v22 = vld [vmem:[%s12392_s6 + $0xf00] sm:$0xf]  ;;  %v9564_v23 = vor.u32 %v11599_v21, %v9563_v20  ;;  %4978 = vmatpush.bf16.msra.mxu1 %v9052_v19 }
  0x3f   : > { %v11727_v24 = vld [vmem:[%s12392_s6 + $0xf3c] sm:$0xf0] }
  0x40   : > { %v8475_v25 = vld [vmem:[%s12392_s6 + $0x280] sm:$0xf]  ;;  %v10076_v27 = vor.u32 %v11727_v24, %v10075_v22  ;;  %4992 = vmatpush.bf16.msra.mxu2 %v9564_v23 }
  0x41   : > { %v11327_v26 = vld [vmem:[%s12392_s6 + $0x2bc] sm:$0xf0] }
  0x42   : > { %v8987_v28 = vld [vmem:[%s12392_s6 + $0x680] sm:$0xf]  ;;  %v8476_v31 = vor.u32 %v11327_v26, %v8475_v25  ;;  %5006 = vmatpush.bf16.msra.mxu3 %v10076_v27 }
  0x43   : > { %v11455_v29 = vld [vmem:[%s12392_s6 + $0x6bc] sm:$0xf0] }
  0x44   : > { %v9499_v30 = vld [vmem:[%s12392_s6 + $0xa80] sm:$0xf]  ;;  %v8988_v35 = vor.u32 %v11455_v29, %v8987_v28  ;;  %4965 = vmatpush.bf16.msra.mxu0 %v8476_v31 }
  0x45   : > { %v11583_v32 = vld [vmem:[%s12392_s6 + $0xabc] sm:$0xf0] }
  0x46   : > { %v10011_v33 = vld [vmem:[%s12392_s6 + $0xe80] sm:$0xf]  ;;  %v9500_v36 = vor.u32 %v11583_v32, %v9499_v30  ;;  %4979 = vmatpush.bf16.msra.mxu1 %v8988_v35  ;;  %v11351_v35 = vld [vmem:[%s12392_s6 + $0x384] sm:$0xf] }
  0x47   : > { %v11711_v34 = vld [vmem:[%s12392_s6 + $0xebc] sm:$0xf0] }
  0x48   : > { %v8411_v37 = vld [vmem:[%s12392_s6 + $0x200] sm:$0xf]  ;;  %v10012_v40 = vor.u32 %v11711_v34, %v10011_v33  ;;  %4993 = vmatpush.bf16.msra.mxu2 %v9500_v36  ;;  %v8605_v36 = vld [vmem:[%s12392_s6 + $0x3c0] sm:$0xf0] }
  0x49   : > { %v11311_v38 = vld [vmem:[%s12392_s6 + $0x23c] sm:$0xf0] }
  0x4a   : > { %v8923_v39 = vld [vmem:[%s12392_s6 + $0x600] sm:$0xf]  ;;  %v8412_v46 = vor.u32 %v11311_v38, %v8411_v37  ;;  %5007 = vmatpush.bf16.msra.mxu3 %v10012_v40  ;;  %v9117_v40 = vld [vmem:[%s12392_s6 + $0x7c0] sm:$0xf0] }
  0x4b   : > { %v11439_v41 = vld [vmem:[%s12392_s6 + $0x63c] sm:$0xf0] }
  0x4c   : > { %v9435_v42 = vld [vmem:[%s12392_s6 + $0xa00] sm:$0xf]  ;;  %v8924_v47 = vor.u32 %v11439_v41, %v8923_v39  ;;  %4966 = vmatpush.bf16.msra.mxu0 %v8412_v46  ;;  %v11479_v39 = vld [vmem:[%s12392_s6 + $0x784] sm:$0xf] }
  0x4d   : > { %v11567_v43 = vld [vmem:[%s12392_s6 + $0xa3c] sm:$0xf0] }
  0x4e   : > { %v9947_v44 = vld [vmem:[%s12392_s6 + $0xe00] sm:$0xf]  ;;  %v9436_v48 = vor.u32 %v11567_v43, %v9435_v42  ;;  %4980 = vmatpush.bf16.msra.mxu1 %v8924_v47 }
  0x4f   : > { %v11695_v45 = vld [vmem:[%s12392_s6 + $0xe3c] sm:$0xf0] }
  0x50   : > { %v8347_v49 = vld [vmem:[%s12392_s6 + $0x180] sm:$0xf]  ;;  %v9948_v52 = vor.u32 %v11695_v45, %v9947_v44  ;;  %4994 = vmatpush.bf16.msra.mxu2 %v9436_v48  ;;  %v8608_v45 = vor.u32 %v11351_v35, %v8605_v36  ;;  %v8349_v35 = vld [vmem:[%s12392_s6 + $0x1c0] sm:$0xf0] }
  0x51   : > { %v11295_v50 = vld [vmem:[%s12392_s6 + $0x1bc] sm:$0xf0]  ;;  %v11415_v36 = vld [vmem:[%s12392_s6 + $0x584] sm:$0xf] }
  0x52   : > { %v8859_v51 = vld [vmem:[%s12392_s6 + $0x580] sm:$0xf]  ;;  %v8348_v58 = vor.u32 %v11295_v50, %v8347_v49  ;;  %5008 = vmatpush.bf16.msra.mxu3 %v9948_v52  ;;  %v9120_v49 = vor.u32 %v11479_v39, %v9117_v40  ;;  %v11335_v50 = vld [vmem:[%s12392_s6 + $0x304] sm:$0xf] }
  0x53   : > { %v11423_v53 = vld [vmem:[%s12392_s6 + $0x5bc] sm:$0xf0]  ;;  %v11463_v52 = vld [vmem:[%s12392_s6 + $0x704] sm:$0xf] }
  0x54   : > { %v9371_v54 = vld [vmem:[%s12392_s6 + $0x980] sm:$0xf]  ;;  %v8860_v59 = vor.u32 %v11423_v53, %v8859_v51  ;;  %4967 = vmatpush.bf16.msra.mxu0 %v8348_v58  ;;  %v8541_v51 = vld [vmem:[%s12392_s6 + $0x340] sm:$0xf0] }
  0x55   : > { %v11551_v55 = vld [vmem:[%s12392_s6 + $0x9bc] sm:$0xf0]  ;;  %v9053_v53 = vld [vmem:[%s12392_s6 + $0x740] sm:$0xf0] }
  0x56   : > { %v9883_v56 = vld [vmem:[%s12392_s6 + $0xd80] sm:$0xf]  ;;  %v9372_v60 = vor.u32 %v11551_v55, %v9371_v54  ;;  %4981 = vmatpush.bf16.msra.mxu1 %v8860_v59  ;;  %v11236_v55 = vld [vmem:[%s17812_s0 + $0x14] sm:$0xf0] }
  0x57   : > { %v11679_v57 = vld [vmem:[%s12392_s6 + $0xdbc] sm:$0xf0] }
  0x58   : > { %v8283_v61 = vld [vmem:[%s12392_s6 + $0x100] sm:$0xf]  ;;  %v9884_v0 = vor.u32 %v11679_v57, %v9883_v56  ;;  %4995 = vmatpush.bf16.msra.mxu2 %v9372_v60 }
  0x59   : > { %v11279_v62 = vld [vmem:[%s12392_s6 + $0x13c] sm:$0xf0] }
  0x5a   : > { %v8795_v63 = vld [vmem:[%s12392_s6 + $0x500] sm:$0xf]  ;;  %v8284_v6 = vor.u32 %v11279_v62, %v8283_v61  ;;  %5009 = vmatpush.bf16.msra.mxu3 %v9884_v0  ;;  %v8544_v61 = vor.u32 %v11335_v50, %v8541_v51  ;;  %v11319_v0 = vld [vmem:[%s12392_s6 + $0x284] sm:$0xf] }
  0x5b   : > { %v11407_v1 = vld [vmem:[%s12392_s6 + $0x53c] sm:$0xf0] }
  0x5c   : > { %v9307_v2 = vld [vmem:[%s12392_s6 + $0x900] sm:$0xf]  ;;  %v8796_v7 = vor.u32 %v11407_v1, %v8795_v63  ;;  %4968 = vmatpush.bf16.msra.mxu0 %v8284_v6  ;;  %v9056_v1 = vor.u32 %v11463_v52, %v9053_v53  ;;  %v8989_v6 = vld [vmem:[%s12392_s6 + $0x6c0] sm:$0xf0] }
  0x5d   : > { %v11535_v3 = vld [vmem:[%s12392_s6 + $0x93c] sm:$0xf0] }
  0x5e   : > { %v9819_v4 = vld [vmem:[%s12392_s6 + $0xd00] sm:$0xf]  ;;  %v9308_v8 = vor.u32 %v11535_v3, %v9307_v2  ;;  %4982 = vmatpush.bf16.msra.mxu1 %v8796_v7  ;;  %v8477_v2 = vld [vmem:[%s12392_s6 + $0x2c0] sm:$0xf0] }
  0x5f   : > { %v11663_v5 = vld [vmem:[%s12392_s6 + $0xd3c] sm:$0xf0]  ;;  %v11233_v3 = vld [vmem:[%s17812_s0 + $0x4] sm:$0xf] }
  0x60   : > { %v8219_v9 = vld [vmem:[%s12392_s6 + $0x80] sm:$0xf]  ;;  %v9820_v12 = vor.u32 %v11663_v5, %v9819_v4  ;;  %4996 = vmatpush.bf16.msra.mxu2 %v9308_v8  ;;  %v8133_v4 = vld [vmem:[%s17812_s0 + $0x18] sm:$0xf0]  ;;  %v11447_v5 = vld [vmem:[%s12392_s6 + $0x684] sm:$0xf] }
  0x61   : > { %v11263_v10 = vld [vmem:[%s12392_s6 + $0xbc] sm:$0xf0]  ;;  %v12509_v8 = vor.u32 %v11233_v3, %v8133_v4 }
  0x62   : > { %v8731_v11 = vld [vmem:[%s12392_s6 + $0x480] sm:$0xf]  ;;  %v8220_v18 = vor.u32 %v11263_v10, %v8219_v9  ;;  %5010 = vmatpush.bf16.msra.mxu3 %v9820_v12 }
  0x63   : > { %v11391_v13 = vld [vmem:[%s12392_s6 + $0x4bc] sm:$0xf0] }
  0x64   : > { %v9243_v14 = vld [vmem:[%s12392_s6 + $0x880] sm:$0xf]  ;;  %v8732_v21 = vor.u32 %v11391_v13, %v8731_v11  ;;  %4969 = vmatpush.bf16.msra.mxu0 %v8220_v18  ;;  %v8992_v18 = vor.u32 %v11447_v5, %v8989_v6  ;;  %v11239_v6 = vld [vmem:[%s12392_s6 + $0x4] sm:$0xf] }
  0x65   : > { %v11519_v15 = vld [vmem:[%s12392_s6 + $0x8bc] sm:$0xf0] }
  0x66   : > { %v9755_v16 = vld [vmem:[%s12392_s6 + $0xc80] sm:$0xf]  ;;  %v9244_v22 = vor.u32 %v11519_v15, %v9243_v14  ;;  %4983 = vmatpush.bf16.msra.mxu1 %v8732_v21  ;;  %v8480_v14 = vor.u32 %v11319_v0, %v8477_v2  ;;  %v11303_v15 = vld [vmem:[%s12392_s6 + $0x204] sm:$0xf] }
  0x67   : > { %v11647_v17 = vld [vmem:[%s12392_s6 + $0xcbc] sm:$0xf0]  ;;  %v8141_v21 = vld [vmem:[%s17812_s0 + $0x20] sm:$0xf0] }
  0x68   : > { %v8155_v19 = vld [vmem:[%s12392_s6] sm:$0xf]  ;;  %v9756_v26 = vor.u32 %v11647_v17, %v9755_v16  ;;  %4997 = vmatpush.bf16.msra.mxu2 %v9244_v22  ;;  %v8413_v16 = vld [vmem:[%s12392_s6 + $0x240] sm:$0xf0]  ;;  %v8139_v17 = vld [vmem:[%s17812_s0 + $0x8] sm:$0xf] }
  0x69   : > { %v11247_v20 = vld [vmem:[%s12392_s6 + $0x3c] sm:$0xf0]  ;;  %v11431_v22 = vld [vmem:[%s12392_s6 + $0x604] sm:$0xf] }
  0x6a   : > { %v8667_v23 = vld [vmem:[%s12392_s6 + $0x400] sm:$0xf]  ;;  %v8156_v33 = vor.u32 %v11247_v20, %v8155_v19  ;;  %5011 = vmatpush.bf16.msra.mxu3 %v9756_v26  ;;  %v11234_v20 = vld [vmem:[%s17812_s0 + $0xc] sm:$0xf] }
  0x6b   : > { %v11375_v24 = vld [vmem:[%s12392_s6 + $0x43c] sm:$0xf0] }
  0x6c   : > { %v9179_v25 = vld [vmem:[%s12392_s6 + $0x800] sm:$0xf]  ;;  %v8668_v37 = vor.u32 %v11375_v24, %v8667_v23  ;;  %4970 = vmatpush.bf16.msra.mxu0 %v8156_v33  ;;  %v8925_v23 = vld [vmem:[%s12392_s6 + $0x640] sm:$0xf0] }
  0x6d   : > { %v11503_v27 = vld [vmem:[%s12392_s6 + $0x83c] sm:$0xf0] }
  0x6e   : > { %v9691_v28 = vld [vmem:[%s12392_s6 + $0xc00] sm:$0xf]  ;;  %v9180_v38 = vor.u32 %v11503_v27, %v9179_v25  ;;  %4984 = vmatpush.bf16.msra.mxu1 %v8668_v37  ;;  %v12533_v25 = vor.u32 %v11234_v20, %v8141_v21  ;;  %v8861_v37 = vld [vmem:[%s12392_s6 + $0x5c0] sm:$0xf0] }
  0x6f   : > { %v11631_v29 = vld [vmem:[%s12392_s6 + $0xc3c] sm:$0xf0] }
  0x70   : > { %v10651_v30 = vld [vmem:[%s12392_s6 + $0x1380] sm:$0xf]  ;;  %v9692_v41 = vor.u32 %v11631_v29, %v9691_v28  ;;  %4998 = vmatpush.bf16.msra.mxu2 %v9180_v38  ;;  %v8416_v28 = vor.u32 %v11303_v15, %v8413_v16  ;;  %v10141_v15 = vld [vmem:[%s12392_s6 + $0xfc0] sm:$0xf0] }
  0x71   : > { %v11871_v31 = vld [vmem:[%s12392_s6 + $0x13bc] sm:$0xf0]  ;;  %4985 = vmatmul.bf16.vlgmr.msra.gmra.mxu1 %v12509_v8 }
  0x72   : > { %v11163_v32 = vld [vmem:[%s12392_s6 + $0x1780] sm:$0xf]  ;;  %v10652_v42 = vor.u32 %v11871_v31, %v10651_v30  ;;  %5012 = vmatpush.bf16.msra.mxu3 %v9692_v41 }
  0x73   : > { %v11999_v34 = vld [vmem:[%s12392_s6 + $0x17bc] sm:$0xf0] }
  0x74   : > { %v10587_v43 = vld [vmem:[%s12392_s6 + $0x1300] sm:$0xf]  ;;  %v11164_v44 = vor.u32 %v11999_v34, %v11163_v32  ;;  %5019 = vmatpush.bf16.msrb.mxu0 %v10652_v42  ;;  %5047 = vmatpush.bf16.msrb.mxu2 %v8608_v45  ;;  %v8928_v32 = vor.u32 %v11431_v22, %v8925_v23  ;;  %v11287_v34 = vld [vmem:[%s12392_s6 + $0x184] sm:$0xf]  ;;  %v8147_v23 = vld [vmem:[%s17812_s0 + $0x10] sm:$0xf] }
  0x75   : > { %v11855_v46 = vld [vmem:[%s12392_s6 + $0x133c] sm:$0xf0]  ;;  %5013 = vmatmul.bf16.vlgmr.msra.gmra.mxu3 %v12533_v25  ;;  %v8352_v40 = vor.u32 %v11287_v34, %v8349_v35  ;;  %v11165_v22 = vld [vmem:[%s12392_s6 + $0x17c0] sm:$0xf0] }
  0x76   : > { %v11099_v47 = vld [vmem:[%s12392_s6 + $0x1700] sm:$0xf]  ;;  %v10588_v56 = vor.u32 %v11855_v46, %v10587_v43  ;;  %5033 = vmatpush.bf16.msrb.mxu1 %v11164_v44  ;;  %5061 = vmatpush.bf16.msrb.mxu3 %v9120_v49  ;;  %v8864_v44 = vor.u32 %v11415_v36, %v8861_v37  ;;  %v11271_v46 = vld [vmem:[%s12392_s6 + $0x104] sm:$0xf] }
  0x77   : > { %v11983_v48 = vld [vmem:[%s12392_s6 + $0x173c] sm:$0xf0]  ;;  %v8797_v49 = vld [vmem:[%s12392_s6 + $0x540] sm:$0xf0] }
  0x78   : > { %v8131_v54 = vld [vmem:[%s17812_s0] sm:$0xf]  ;;  %v11100_v60 = vor.u32 %v11983_v48, %v11099_v47  ;;  %5020 = vmatpush.bf16.msrb.mxu0 %v10588_v56  ;;  %5048 = vmatpush.bf16.msrb.mxu2 %v8544_v61  ;;  %v8285_v47 = vld [vmem:[%s12392_s6 + $0x140] sm:$0xf0] }
  0x79   : > { %v10523_v57 = vld [vmem:[%s12392_s6 + $0x1280] sm:$0xf]  ;;  %v12493_v59 = vor.u32 %v11236_v55, %v8131_v54  ;;  %v11399_v48 = vld [vmem:[%s12392_s6 + $0x504] sm:$0xf]  ;;  %v8288_v52 = vor.u32 %v11271_v46, %v8285_v47 }
  0x7a   : > { %v11839_v58 = vld [vmem:[%s12392_s6 + $0x12bc] sm:$0xf0]  ;;  %5034 = vmatpush.bf16.msrb.mxu1 %v11100_v60  ;;  %5062 = vmatpush.bf16.msrb.mxu3 %v9056_v1  ;;  %v8800_v56 = vor.u32 %v11399_v48, %v8797_v49  ;;  %v8221_v60 = vld [vmem:[%s12392_s6 + $0xc0] sm:$0xf0] }
  0x7b   : > { %v11035_v62 = vld [vmem:[%s12392_s6 + $0x1680] sm:$0xf]  ;;  %4971 = vmatmul.bf16.vlgmr.msra.gmra.mxu0 %v12493_v59  ;;  %v10524_v9 = vor.u32 %v11839_v58, %v10523_v57  ;;  %v11255_v58 = vld [vmem:[%s12392_s6 + $0x84] sm:$0xf] }
  0x7c   : > { %v11967_v63 = vld [vmem:[%s12392_s6 + $0x16bc] sm:$0xf0]  ;;  %5049 = vmatpush.bf16.msrb.mxu2 %v8480_v14  ;;  %v11383_v61 = vld [vmem:[%s12392_s6 + $0x484] sm:$0xf]  ;;  %v8224_v4 = vor.u32 %v11255_v58, %v8221_v60 }
  0x7d   : > { %v10459_v7 = vld [vmem:[%s12392_s6 + $0x1200] sm:$0xf]  ;;  %v11036_v13 = vor.u32 %v11967_v63, %v11035_v62  ;;  %5021 = vmatpush.bf16.msrb.mxu0 %v10524_v9  ;;  %v8733_v62 = vld [vmem:[%s12392_s6 + $0x4c0] sm:$0xf0] }
  0x7e   : > { %v11823_v10 = vld [vmem:[%s12392_s6 + $0x123c] sm:$0xf0]  ;;  %5063 = vmatpush.bf16.msrb.mxu3 %v8992_v18  ;;  %v8736_v9 = vor.u32 %v11383_v61, %v8733_v62  ;;  %v11735_v14 = vld [vmem:[%s12392_s6 + $0xf84] sm:$0xf] }
  0x7f   : > { %v10971_v11 = vld [vmem:[%s12392_s6 + $0x1600] sm:$0xf]  ;;  %v10460_v26 = vor.u32 %v11823_v10, %v10459_v7  ;;  %5035 = vmatpush.bf16.msrb.mxu1 %v11036_v13  ;;  %v8157_v7 = vld [vmem:[%s12392_s6 + $0x40] sm:$0xf0] }
  0x80   : > { %v11951_v12 = vld [vmem:[%s12392_s6 + $0x163c] sm:$0xf0]  ;;  %5050 = vmatpush.bf16.msrb.mxu2 %v8416_v28  ;;  %v11367_v10 = vld [vmem:[%s12392_s6 + $0x404] sm:$0xf]  ;;  %v8160_v21 = vor.u32 %v11239_v6, %v8157_v7 }
  0x81   : > { %v11237_v19 = vld [vmem:[%s17812_s0 + $0x1c] sm:$0xf0]  ;;  %v10972_v27 = vor.u32 %v11951_v12, %v10971_v11  ;;  %5022 = vmatpush.bf16.msrb.mxu0 %v10460_v26  ;;  %v8669_v11 = vld [vmem:[%s12392_s6 + $0x440] sm:$0xf0]  ;;  %v11238_v26 = vld [vmem:[%s17812_s0 + $0x24] sm:$0xf0] }
  0x82   : > { %v12531_v24 = vor.u32 %v11237_v19, %v8139_v17  ;;  %v10395_v29 = vld [vmem:[%s12392_s6 + $0x1180] sm:$0xf]  ;;  %5064 = vmatpush.bf16.msrb.mxu3 %v8928_v32  ;;  %v11607_v12 = vld [vmem:[%s12392_s6 + $0xb84] sm:$0xf]  ;;  %v12592_v37 = vor.u32 %v11238_v26, %v8147_v23 }
  0x83   : > { %v11807_v30 = vld [vmem:[%s12392_s6 + $0x11bc] sm:$0xf0]  ;;  %5036 = vmatpush.bf16.msrb.mxu1 %v10972_v27  ;;  %v9629_v13 = vld [vmem:[%s12392_s6 + $0xbc0] sm:$0xf0]  ;;  %v8672_v27 = vor.u32 %v11367_v10, %v8669_v11 }
  0x84   : > { %v10907_v31 = vld [vmem:[%s12392_s6 + $0x1580] sm:$0xf]  ;;  %4999 = vmatmul.bf16.vlgmr.msra.gmra.mxu2 %v12531_v24  ;;  %v10396_v38 = vor.u32 %v11807_v30, %v10395_v29  ;;  %v11863_v17 = vld [vmem:[%s12392_s6 + $0x1384] sm:$0xf]  ;;  %v9632_v28 = vor.u32 %v11607_v12, %v9629_v13  ;;  %v11235_v29 = vld [vmem:[%s17812_s0 + $0x14] sm:$0xf] }
  0x85   : > { %v11935_v33 = vld [vmem:[%s12392_s6 + $0x15bc] sm:$0xf0]  ;;  %5051 = vmatpush.bf16.msrb.mxu2 %v8352_v40  ;;  %v10653_v18 = vld [vmem:[%s12392_s6 + $0x13c0] sm:$0xf0]  ;;  %v8149_v30 = vld [vmem:[%s17812_s0 + $0x28] sm:$0xf0] }
  0x86   : > { %v10908_v39 = vor.u32 %v11935_v33, %v10907_v31  ;;  %v10331_v41 = vld [vmem:[%s12392_s6 + $0x1100] sm:$0xf]  ;;  %5023 = vmatpush.bf16.msrb.mxu0 %v10396_v38  ;;  %5065 = vmatpush.bf16.msrb.mxu3 %v8864_v44  ;;  %v11991_v19 = vld [vmem:[%s12392_s6 + $0x1784] sm:$0xf]  ;;  %v10144_v31 = vor.u32 %v11735_v14, %v10141_v15  ;;  %v10656_v32 = vor.u32 %v11863_v17, %v10653_v18 }
  0x87   : > { %v11791_v42 = vld [vmem:[%s12392_s6 + $0x113c] sm:$0xf0]  ;;  %v11591_v33 = vld [vmem:[%s12392_s6 + $0xb04] sm:$0xf]  ;;  %v11168_v36 = vor.u32 %v11991_v19, %v11165_v22 }
  0x88   : > { %v10843_v43 = vld [vmem:[%s12392_s6 + $0x1500] sm:$0xf]  ;;  %v10332_v50 = vor.u32 %v11791_v42, %v10331_v41  ;;  %5037 = vmatpush.bf16.msrb.mxu1 %v10908_v39  ;;  %v9565_v34 = vld [vmem:[%s12392_s6 + $0xb40] sm:$0xf0]  ;;  %v12597_v41 = vor.u32 %v11235_v29, %v8149_v30 }
  0x89   : > { %v11919_v45 = vld [vmem:[%s12392_s6 + $0x153c] sm:$0xf0]  ;;  %5052 = vmatpush.bf16.msrb.mxu2 %v8288_v52  ;;  %v11719_v35 = vld [vmem:[%s12392_s6 + $0xf04] sm:$0xf]  ;;  %v9568_v44 = vor.u32 %v11591_v33, %v9565_v34 }
  0x8a   : > { %v10844_v51 = vor.u32 %v11919_v45, %v10843_v43  ;;  %v10267_v53 = vld [vmem:[%s12392_s6 + $0x1080] sm:$0xf]  ;;  %5024 = vmatpush.bf16.msrb.mxu0 %v10332_v50  ;;  %5066 = vmatpush.bf16.msrb.mxu3 %v8800_v56  ;;  %v10077_v38 = vld [vmem:[%s12392_s6 + $0xf40] sm:$0xf0] }
  0x8b   : > { %v11775_v54 = vld [vmem:[%s12392_s6 + $0x10bc] sm:$0xf0]  ;;  %v11847_v39 = vld [vmem:[%s12392_s6 + $0x1304] sm:$0xf]  ;;  %v10080_v45 = vor.u32 %v11719_v35, %v10077_v38 }
  0x8c   : > { %v10779_v55 = vld [vmem:[%s12392_s6 + $0x1480] sm:$0xf]  ;;  %v10268_v63 = vor.u32 %v11775_v54, %v10267_v53  ;;  %5038 = vmatpush.bf16.msrb.mxu1 %v10844_v51  ;;  %v10589_v40 = vld [vmem:[%s12392_s6 + $0x1340] sm:$0xf0] }
  0x8d   : > { %v11903_v57 = vld [vmem:[%s12392_s6 + $0x14bc] sm:$0xf0]  ;;  %5053 = vmatpush.bf16.msrb.mxu2 %v8224_v4  ;;  %v11975_v42 = vld [vmem:[%s12392_s6 + $0x1704] sm:$0xf]  ;;  %v10592_v46 = vor.u32 %v11847_v39, %v10589_v40 }
  0x8e   : > { %v10203_v0 = vld [vmem:[%s12392_s6 + $0x1000] sm:$0xf]  ;;  %v10780_v3 = vor.u32 %v11903_v57, %v10779_v55  ;;  %5025 = vmatpush.bf16.msrb.mxu0 %v10268_v63  ;;  %5067 = vmatpush.bf16.msrb.mxu3 %v8736_v9  ;;  %v11101_v43 = vld [vmem:[%s12392_s6 + $0x1740] sm:$0xf0] }
  0x8f   : > { %v11759_v1 = vld [vmem:[%s12392_s6 + $0x103c] sm:$0xf0]  ;;  %v11575_v47 = vld [vmem:[%s12392_s6 + $0xa84] sm:$0xf]  ;;  %v11104_v50 = vor.u32 %v11975_v42, %v11101_v43 }
  0x90   : > { %v10715_v2 = vld [vmem:[%s12392_s6 + $0x1400] sm:$0xf]  ;;  %v10204_v16 = vor.u32 %v11759_v1, %v10203_v0  ;;  %5039 = vmatpush.bf16.msrb.mxu1 %v10780_v3  ;;  %v9501_v48 = vld [vmem:[%s12392_s6 + $0xac0] sm:$0xf0] }
  0x91   : > { %v11887_v5 = vld [vmem:[%s12392_s6 + $0x143c] sm:$0xf0]  ;;  %5054 = vmatpush.bf16.msrb.mxu2 %v8160_v21  ;;  %v11703_v49 = vld [vmem:[%s12392_s6 + $0xe84] sm:$0xf]  ;;  %v9504_v56 = vor.u32 %v11575_v47, %v9501_v48 }
  0x92   : > { %v10716_v20 = vor.u32 %v11887_v5, %v10715_v2  ;;  %5026 = vmatpush.bf16.msrb.mxu0 %v10204_v16  ;;  %5068 = vmatpush.bf16.msrb.mxu3 %v8672_v27  ;;  %v10013_v51 = vld [vmem:[%s12392_s6 + $0xec0] sm:$0xf0] }
  0x93   : > { %v11831_v52 = vld [vmem:[%s12392_s6 + $0x1284] sm:$0xf]  ;;  %v10016_v57 = vor.u32 %v11703_v49, %v10013_v51 }
  0x94   : > { %5040 = vmatpush.bf16.msrb.mxu1 %v10716_v20  ;;  %v10525_v53 = vld [vmem:[%s12392_s6 + $0x12c0] sm:$0xf0]  ;;  %5055 = vmatmul.bf16.vlgmr.msrb.gmra.mxu2 %v12493_v59 }
  0x95   : > { %5103 = vmatpush.bf16.msra.mxu2 %v10656_v32  ;;  %5027 = vmatmul.bf16.vlgmr.msrb.gmra.mxu0 %v12592_v37  ;;  %v11959_v54 = vld [vmem:[%s12392_s6 + $0x1684] sm:$0xf]  ;;  %v10528_v58 = vor.u32 %v11831_v52, %v10525_v53 }
  0x96   : > { %5075 = vmatpush.bf16.msra.mxu0 %v9632_v28  ;;  %5117 = vmatpush.bf16.msra.mxu3 %v11168_v36  ;;  %v11037_v55 = vld [vmem:[%s12392_s6 + $0x16c0] sm:$0xf0] }
  0x97   : > { %5041 = vmatmul.bf16.vlgmr.msrb.gmra.mxu1 %v12597_v41  ;;  %5069 = vmatmul.bf16.vlgmr.msrb.gmra.mxu3 %v12509_v8  ;;  %v11559_v60 = vld [vmem:[%s12392_s6 + $0xa04] sm:$0xf]  ;;  %v11040_v63 = vor.u32 %v11959_v54, %v11037_v55 }
  0x98   : > { %5089 = vmatpush.bf16.msra.mxu1 %v10144_v31  ;;  %v9437_v61 = vld [vmem:[%s12392_s6 + $0xa40] sm:$0xf0] }
  0x99   : > { %5104 = vmatpush.bf16.msra.mxu2 %v10592_v46  ;;  %v11687_v62 = vld [vmem:[%s12392_s6 + $0xe04] sm:$0xf]  ;;  %v9440_v5 = vor.u32 %v11559_v60, %v9437_v61  ;;  %v11360_v60 = vld [vmem:[%s12392_s6 + $0x3c4] sm:$0xf0] }
  0x9a   : > { %5076 = vmatpush.bf16.msra.mxu0 %v9568_v44  ;;  %5118 = vmatpush.bf16.msra.mxu3 %v11104_v50  ;;  %v9949_v0 = vld [vmem:[%s12392_s6 + $0xe40] sm:$0xf0]  ;;  %v9123_v61 = vld [vmem:[%s12392_s6 + $0x788] sm:$0xf] }
  0x9b   : > { %v11815_v1 = vld [vmem:[%s12392_s6 + $0x1204] sm:$0xf]  ;;  %v9952_v6 = vor.u32 %v11687_v62, %v9949_v0  ;;  %v9635_v0 = vld [vmem:[%s12392_s6 + $0xb88] sm:$0xf] }
  0x9c   : > { %5090 = vmatpush.bf16.msra.mxu1 %v10080_v45  ;;  %v10461_v2 = vld [vmem:[%s12392_s6 + $0x1240] sm:$0xf0] }
  0x9d   : > { %v11943_v3 = vld [vmem:[%s12392_s6 + $0x1604] sm:$0xf]  ;;  %5105 = vmatpush.bf16.msra.mxu2 %v10528_v58  ;;  %v10464_v7 = vor.u32 %v11815_v1, %v10461_v2  ;;  %v8611_v58 = vld [vmem:[%s12392_s6 + $0x388] sm:$0xf] }
  0x9e   : > { %v10973_v4 = vld [vmem:[%s12392_s6 + $0x1640] sm:$0xf0]  ;;  %5077 = vmatpush.bf16.msra.mxu0 %v9504_v56  ;;  %5119 = vmatpush.bf16.msra.mxu3 %v11040_v63  ;;  %v11488_v63 = vld [vmem:[%s12392_s6 + $0x7c4] sm:$0xf0] }
  0x9f   : > { %v11543_v9 = vld [vmem:[%s12392_s6 + $0x984] sm:$0xf]  ;;  %v10976_v12 = vor.u32 %v11943_v3, %v10973_v4  ;;  %v11616_v1 = vld [vmem:[%s12392_s6 + $0xbc4] sm:$0xf0] }
  0xa0   : > { %5091 = vmatpush.bf16.msra.mxu1 %v10016_v57  ;;  %v9373_v10 = vld [vmem:[%s12392_s6 + $0x9c0] sm:$0xf0]  ;;  %v10147_v4 = vld [vmem:[%s12392_s6 + $0xf88] sm:$0xf] }
  0xa1   : > { %v11671_v11 = vld [vmem:[%s12392_s6 + $0xd84] sm:$0xf]  ;;  %v9376_v18 = vor.u32 %v11543_v9, %v9373_v10  ;;  %5106 = vmatpush.bf16.msra.mxu2 %v10464_v7  ;;  %v8612_v7 = vor.u32 %v11360_v60, %v8611_v58  ;;  %v9124_v9 = vor.u32 %v11488_v63, %v9123_v61  ;;  %v9636_v10 = vor.u32 %v11616_v1, %v9635_v0  ;;  %v9891_v58 = vld [vmem:[%s12392_s6 + $0xd88] sm:$0xf] }
  0xa2   : > { %v9885_v13 = vld [vmem:[%s12392_s6 + $0xdc0] sm:$0xf0]  ;;  %5078 = vmatpush.bf16.msra.mxu0 %v9440_v5  ;;  %5120 = vmatpush.bf16.msra.mxu3 %v10976_v12  ;;  %v11744_v5 = vld [vmem:[%s12392_s6 + $0xfc4] sm:$0xf0] }
  0xa3   : > { %v11799_v14 = vld [vmem:[%s12392_s6 + $0x1184] sm:$0xf]  ;;  %v9888_v19 = vor.u32 %v11671_v11, %v9885_v13  ;;  %v8547_v11 = vld [vmem:[%s12392_s6 + $0x308] sm:$0xf] }
  0xa4   : > { %v10397_v15 = vld [vmem:[%s12392_s6 + $0x11c0] sm:$0xf0]  ;;  %5092 = vmatpush.bf16.msra.mxu1 %v9952_v6  ;;  %v11344_v12 = vld [vmem:[%s12392_s6 + $0x344] sm:$0xf0] }
  0xa5   : > { %v11927_v16 = vld [vmem:[%s12392_s6 + $0x1584] sm:$0xf]  ;;  %v10400_v20 = vor.u32 %v11799_v14, %v10397_v15  ;;  %v9059_v13 = vld [vmem:[%s12392_s6 + $0x708] sm:$0xf]  ;;  %v10148_v14 = vor.u32 %v11744_v5, %v10147_v4 }
  0xa6   : > { %v10909_v17 = vld [vmem:[%s12392_s6 + $0x15c0] sm:$0xf0]  ;;  %5079 = vmatpush.bf16.msra.mxu0 %v9376_v18  ;;  %v11472_v15 = vld [vmem:[%s12392_s6 + $0x744] sm:$0xf0] }
  0xa7   : > { %v11527_v21 = vld [vmem:[%s12392_s6 + $0x904] sm:$0xf]  ;;  %v10912_v26 = vor.u32 %v11927_v16, %v10909_v17  ;;  %5107 = vmatpush.bf16.msra.mxu2 %v10400_v20  ;;  %v9571_v16 = vld [vmem:[%s12392_s6 + $0xb08] sm:$0xf]  ;;  %v8548_v20 = vor.u32 %v11344_v12, %v8547_v11 }
  0xa8   : > { %v9309_v22 = vld [vmem:[%s12392_s6 + $0x940] sm:$0xf0]  ;;  %5093 = vmatpush.bf16.msra.mxu1 %v9888_v19  ;;  %v11600_v17 = vld [vmem:[%s12392_s6 + $0xb44] sm:$0xf0] }
  0xa9   : > { %v11655_v23 = vld [vmem:[%s12392_s6 + $0xd04] sm:$0xf]  ;;  %v9312_v32 = vor.u32 %v11527_v21, %v9309_v22  ;;  %5121 = vmatpush.bf16.msra.mxu3 %v10912_v26  ;;  %v10083_v18 = vld [vmem:[%s12392_s6 + $0xf08] sm:$0xf]  ;;  %v9060_v21 = vor.u32 %v11472_v15, %v9059_v13  ;;  %v9572_v22 = vor.u32 %v11600_v17, %v9571_v16 }
  0xaa   : > { %v9821_v27 = vld [vmem:[%s12392_s6 + $0xd40] sm:$0xf0]  ;;  %v11728_v19 = vld [vmem:[%s12392_s6 + $0xf44] sm:$0xf0] }
  0xab   : > { %v11783_v28 = vld [vmem:[%s12392_s6 + $0x1104] sm:$0xf]  ;;  %v9824_v33 = vor.u32 %v11655_v23, %v9821_v27  ;;  %5080 = vmatpush.bf16.msra.mxu0 %v9312_v32  ;;  %v8483_v23 = vld [vmem:[%s12392_s6 + $0x288] sm:$0xf] }
  0xac   : > { %v10333_v29 = vld [vmem:[%s12392_s6 + $0x1140] sm:$0xf0]  ;;  %v11328_v26 = vld [vmem:[%s12392_s6 + $0x2c4] sm:$0xf0] }
  0xad   : > { %v11911_v30 = vld [vmem:[%s12392_s6 + $0x1504] sm:$0xf]  ;;  %v10336_v34 = vor.u32 %v11783_v28, %v10333_v29  ;;  %5094 = vmatpush.bf16.msra.mxu1 %v9824_v33  ;;  %v8995_v27 = vld [vmem:[%s12392_s6 + $0x688] sm:$0xf]  ;;  %v10084_v28 = vor.u32 %v11728_v19, %v10083_v18 }
  0xae   : > { %v10845_v31 = vld [vmem:[%s12392_s6 + $0x1540] sm:$0xf0]  ;;  %v11456_v29 = vld [vmem:[%s12392_s6 + $0x6c4] sm:$0xf0] }
  0xaf   : > { %v11511_v35 = vld [vmem:[%s12392_s6 + $0x884] sm:$0xf]  ;;  %v10848_v39 = vor.u32 %v11911_v30, %v10845_v31  ;;  %5108 = vmatpush.bf16.msra.mxu2 %v10336_v34  ;;  %v9507_v30 = vld [vmem:[%s12392_s6 + $0xa88] sm:$0xf]  ;;  %v8484_v34 = vor.u32 %v11328_v26, %v8483_v23 }
  0xb0   : > { %v9245_v36 = vld [vmem:[%s12392_s6 + $0x8c0] sm:$0xf0]  ;;  %v11584_v31 = vld [vmem:[%s12392_s6 + $0xac4] sm:$0xf0] }
  0xb1   : > { %v11639_v38 = vld [vmem:[%s12392_s6 + $0xc84] sm:$0xf]  ;;  %v9248_v46 = vor.u32 %v11511_v35, %v9245_v36  ;;  %5122 = vmatpush.bf16.msra.mxu3 %v10848_v39  ;;  %v10019_v32 = vld [vmem:[%s12392_s6 + $0xe88] sm:$0xf]  ;;  %v8996_v35 = vor.u32 %v11456_v29, %v8995_v27  ;;  %v9508_v36 = vor.u32 %v11584_v31, %v9507_v30 }
  0xb2   : > { %v9757_v40 = vld [vmem:[%s12392_s6 + $0xcc0] sm:$0xf0]  ;;  %v11712_v33 = vld [vmem:[%s12392_s6 + $0xec4] sm:$0xf0] }
  0xb3   : > { %v11767_v42 = vld [vmem:[%s12392_s6 + $0x1084] sm:$0xf]  ;;  %v9760_v49 = vor.u32 %v11639_v38, %v9757_v40  ;;  %5081 = vmatpush.bf16.msra.mxu0 %v9248_v46  ;;  %v8419_v38 = vld [vmem:[%s12392_s6 + $0x208] sm:$0xf] }
  0xb4   : > { %v10269_v43 = vld [vmem:[%s12392_s6 + $0x10c0] sm:$0xf0]  ;;  %v11312_v39 = vld [vmem:[%s12392_s6 + $0x244] sm:$0xf0] }
  0xb5   : > { %v11895_v44 = vld [vmem:[%s12392_s6 + $0x1484] sm:$0xf]  ;;  %v10272_v50 = vor.u32 %v11767_v42, %v10269_v43  ;;  %5095 = vmatpush.bf16.msra.mxu1 %v9760_v49  ;;  %v8931_v40 = vld [vmem:[%s12392_s6 + $0x608] sm:$0xf]  ;;  %v10020_v42 = vor.u32 %v11712_v33, %v10019_v32 }
  0xb6   : > { %v10781_v45 = vld [vmem:[%s12392_s6 + $0x14c0] sm:$0xf0]  ;;  %v11440_v43 = vld [vmem:[%s12392_s6 + $0x644] sm:$0xf0] }
  0xb7   : > { %v11495_v47 = vld [vmem:[%s12392_s6 + $0x804] sm:$0xf]  ;;  %v10784_v54 = vor.u32 %v11895_v44, %v10781_v45  ;;  %5109 = vmatpush.bf16.msra.mxu2 %v10272_v50  ;;  %v9443_v44 = vld [vmem:[%s12392_s6 + $0xa08] sm:$0xf]  ;;  %v8932_v49 = vor.u32 %v11440_v43, %v8931_v40  ;;  %v11352_v43 = vld [vmem:[%s12392_s6 + $0x38c] sm:$0xf] }
  0xb8   : > { %v9181_v48 = vld [vmem:[%s12392_s6 + $0x840] sm:$0xf0]  ;;  %v11568_v45 = vld [vmem:[%s12392_s6 + $0xa44] sm:$0xf0] }
  0xb9   : > { %v11623_v51 = vld [vmem:[%s12392_s6 + $0xc04] sm:$0xf]  ;;  %v9184_v62 = vor.u32 %v11495_v47, %v9181_v48  ;;  %5123 = vmatpush.bf16.msra.mxu3 %v10784_v54  ;;  %v9955_v46 = vld [vmem:[%s12392_s6 + $0xe08] sm:$0xf]  ;;  %v8420_v48 = vor.u32 %v11312_v39, %v8419_v38  ;;  %v9444_v50 = vor.u32 %v11568_v45, %v9443_v44  ;;  %v8613_v44 = vld [vmem:[%s12392_s6 + $0x3c8] sm:$0xf0] }
  0xba   : > { %v9693_v52 = vld [vmem:[%s12392_s6 + $0xc40] sm:$0xf0]  ;;  %v11696_v47 = vld [vmem:[%s12392_s6 + $0xe44] sm:$0xf0] }
  0xbb   : > { %v11751_v53 = vld [vmem:[%s12392_s6 + $0x1004] sm:$0xf]  ;;  %v9696_v2 = vor.u32 %v11623_v51, %v9693_v52  ;;  %5082 = vmatpush.bf16.msra.mxu0 %v9184_v62  ;;  %v8355_v51 = vld [vmem:[%s12392_s6 + $0x188] sm:$0xf]  ;;  %v9956_v54 = vor.u32 %v11696_v47, %v9955_v46  ;;  %v11480_v47 = vld [vmem:[%s12392_s6 + $0x78c] sm:$0xf] }
  0xbc   : > { %v10205_v55 = vld [vmem:[%s12392_s6 + $0x1040] sm:$0xf0]  ;;  %v11296_v52 = vld [vmem:[%s12392_s6 + $0x1c4] sm:$0xf0] }
  0xbd   : > { %v11879_v56 = vld [vmem:[%s12392_s6 + $0x1404] sm:$0xf]  ;;  %v10208_v3 = vor.u32 %v11751_v53, %v10205_v55  ;;  %5096 = vmatpush.bf16.msra.mxu1 %v9696_v2  ;;  %v8867_v53 = vld [vmem:[%s12392_s6 + $0x588] sm:$0xf]  ;;  %v8356_v61 = vor.u32 %v11296_v52, %v8355_v51  ;;  %v8616_v52 = vor.u32 %v11352_v43, %v8613_v44 }
  0xbe   : > { %v10717_v57 = vld [vmem:[%s12392_s6 + $0x1440] sm:$0xf0]  ;;  %5083 = vmatmul.bf16.vlgmr.msra.gmra.mxu0 %v12531_v24  ;;  %v11424_v55 = vld [vmem:[%s12392_s6 + $0x5c4] sm:$0xf0] }
  0xbf   : > { %v10720_v6 = vor.u32 %v11879_v56, %v10717_v57  ;;  %5110 = vmatpush.bf16.msra.mxu2 %v10208_v3  ;;  %5131 = vmatpush.bf16.msrb.mxu0 %v8612_v7  ;;  %v9379_v56 = vld [vmem:[%s12392_s6 + $0x988] sm:$0xf]  ;;  %v8868_v62 = vor.u32 %v11424_v55, %v8867_v53 }
  0xc0   : > { %5097 = vmatmul.bf16.vlgmr.msra.gmra.mxu1 %v12533_v25  ;;  %v11552_v57 = vld [vmem:[%s12392_s6 + $0x9c4] sm:$0xf0] }
  0xc1   : > { %5124 = vmatpush.bf16.msra.mxu3 %v10720_v6  ;;  %5145 = vmatpush.bf16.msrb.mxu1 %v9124_v9  ;;  %v11680_v60 = vld [vmem:[%s12392_s6 + $0xdc4] sm:$0xf0]  ;;  %v9380_v63 = vor.u32 %v11552_v57, %v9379_v56 }
  0xc2   : > { %5111 = vmatmul.bf16.vlgmr.msra.gmra.mxu2 %v12592_v37  ;;  %v8291_v0 = vld [vmem:[%s12392_s6 + $0x108] sm:$0xf]  ;;  %v9892_v3 = vor.u32 %v11680_v60, %v9891_v58  ;;  %v11336_v58 = vld [vmem:[%s12392_s6 + $0x30c] sm:$0xf] }
  0xc3   : > { %5159 = vmatpush.bf16.msrb.mxu2 %v9636_v10  ;;  %5132 = vmatpush.bf16.msrb.mxu0 %v8548_v20  ;;  %v11280_v1 = vld [vmem:[%s12392_s6 + $0x144] sm:$0xf0]  ;;  %v8549_v60 = vld [vmem:[%s12392_s6 + $0x348] sm:$0xf0] }
  0xc4   : > { %5125 = vmatmul.bf16.vlgmr.msra.gmra.mxu3 %v12597_v41  ;;  %v8803_v2 = vld [vmem:[%s12392_s6 + $0x508] sm:$0xf]  ;;  %v8292_v10 = vor.u32 %v11280_v1, %v8291_v0  ;;  %v8552_v1 = vor.u32 %v11336_v58, %v8549_v60 }
  0xc5   : > { %5173 = vmatpush.bf16.msrb.mxu3 %v10148_v14  ;;  %5146 = vmatpush.bf16.msrb.mxu1 %v9060_v21  ;;  %v11408_v4 = vld [vmem:[%s12392_s6 + $0x544] sm:$0xf0] }
  0xc6   : > { %v9315_v5 = vld [vmem:[%s12392_s6 + $0x908] sm:$0xf]  ;;  %v8804_v11 = vor.u32 %v11408_v4, %v8803_v2 }
  0xc7   : > { %5160 = vmatpush.bf16.msrb.mxu2 %v9572_v22  ;;  %5133 = vmatpush.bf16.msrb.mxu0 %v8484_v34  ;;  %v11536_v6 = vld [vmem:[%s12392_s6 + $0x944] sm:$0xf0] }
  0xc8   : > { %v9827_v7 = vld [vmem:[%s12392_s6 + $0xd08] sm:$0xf]  ;;  %v9316_v12 = vor.u32 %v11536_v6, %v9315_v5 }
  0xc9   : > { %5174 = vmatpush.bf16.msrb.mxu3 %v10084_v28  ;;  %5147 = vmatpush.bf16.msrb.mxu1 %v8996_v35  ;;  %v11664_v9 = vld [vmem:[%s12392_s6 + $0xd44] sm:$0xf0] }
  0xca   : > { %v8227_v13 = vld [vmem:[%s12392_s6 + $0x88] sm:$0xf]  ;;  %v9828_v16 = vor.u32 %v11664_v9, %v9827_v7  ;;  %v11320_v7 = vld [vmem:[%s12392_s6 + $0x28c] sm:$0xf] }
  0xcb   : > { %5161 = vmatpush.bf16.msrb.mxu2 %v9508_v36  ;;  %5134 = vmatpush.bf16.msrb.mxu0 %v8420_v48  ;;  %v11264_v14 = vld [vmem:[%s12392_s6 + $0xc4] sm:$0xf0]  ;;  %v9125_v48 = vld [vmem:[%s12392_s6 + $0x7c8] sm:$0xf0] }
  0xcc   : > { %v8739_v15 = vld [vmem:[%s12392_s6 + $0x488] sm:$0xf]  ;;  %v8228_v22 = vor.u32 %v11264_v14, %v8227_v13  ;;  %v9128_v56 = vor.u32 %v11480_v47, %v9125_v48  ;;  %v8485_v9 = vld [vmem:[%s12392_s6 + $0x2c8] sm:$0xf0] }
  0xcd   : > { %5175 = vmatpush.bf16.msrb.mxu3 %v10020_v42  ;;  %5148 = vmatpush.bf16.msrb.mxu1 %v8932_v49  ;;  %v11392_v17 = vld [vmem:[%s12392_s6 + $0x4c4] sm:$0xf0]  ;;  %v8488_v14 = vor.u32 %v11320_v7, %v8485_v9  ;;  %v11272_v48 = vld [vmem:[%s12392_s6 + $0x10c] sm:$0xf] }
  0xce   : > { %v9251_v18 = vld [vmem:[%s12392_s6 + $0x888] sm:$0xf]  ;;  %v8740_v27 = vor.u32 %v11392_v17, %v8739_v15  ;;  %v11240_v9 = vld [vmem:[%s12392_s6 + $0xc] sm:$0xf] }
  0xcf   : > { %5162 = vmatpush.bf16.msrb.mxu2 %v9444_v50  ;;  %5135 = vmatpush.bf16.msrb.mxu0 %v8356_v61  ;;  %v11520_v19 = vld [vmem:[%s12392_s6 + $0x8c4] sm:$0xf0]  ;;  %v11464_v61 = vld [vmem:[%s12392_s6 + $0x70c] sm:$0xf] }
  0xd0   : > { %v9763_v20 = vld [vmem:[%s12392_s6 + $0xc88] sm:$0xf]  ;;  %v9252_v28 = vor.u32 %v11520_v19, %v9251_v18 }
  0xd1   : > { %5176 = vmatpush.bf16.msrb.mxu3 %v9956_v54  ;;  %5149 = vmatpush.bf16.msrb.mxu1 %v8868_v62  ;;  %v11648_v21 = vld [vmem:[%s12392_s6 + $0xcc4] sm:$0xf0]  ;;  %v9061_v62 = vld [vmem:[%s12392_s6 + $0x748] sm:$0xf0] }
  0xd2   : > { %v8163_v23 = vld [vmem:[%s12392_s6 + $0x8] sm:$0xf]  ;;  %v9764_v32 = vor.u32 %v11648_v21, %v9763_v20  ;;  %v9064_v5 = vor.u32 %v11464_v61, %v9061_v62  ;;  %v11304_v20 = vld [vmem:[%s12392_s6 + $0x20c] sm:$0xf] }
  0xd3   : > { %5163 = vmatpush.bf16.msrb.mxu2 %v9380_v63  ;;  %5136 = vmatpush.bf16.msrb.mxu0 %v8292_v10  ;;  %v11248_v26 = vld [vmem:[%s12392_s6 + $0x44] sm:$0xf0]  ;;  %v11448_v10 = vld [vmem:[%s12392_s6 + $0x68c] sm:$0xf] }
  0xd4   : > { %v8675_v29 = vld [vmem:[%s12392_s6 + $0x408] sm:$0xf]  ;;  %v8164_v40 = vor.u32 %v11248_v26, %v8163_v23  ;;  %v8421_v21 = vld [vmem:[%s12392_s6 + $0x248] sm:$0xf0] }
  0xd5   : > { %5177 = vmatpush.bf16.msrb.mxu3 %v9892_v3  ;;  %5150 = vmatpush.bf16.msrb.mxu1 %v8804_v11  ;;  %v11376_v30 = vld [vmem:[%s12392_s6 + $0x444] sm:$0xf0]  ;;  %v8997_v11 = vld [vmem:[%s12392_s6 + $0x6c8] sm:$0xf0] }
  0xd6   : > { %v9187_v31 = vld [vmem:[%s12392_s6 + $0x808] sm:$0xf]  ;;  %v8676_v45 = vor.u32 %v11376_v30, %v8675_v29  ;;  %v9000_v18 = vor.u32 %v11448_v10, %v8997_v11  ;;  %v8933_v23 = vld [vmem:[%s12392_s6 + $0x648] sm:$0xf0] }
  0xd7   : > { %5164 = vmatpush.bf16.msrb.mxu2 %v9316_v12  ;;  %v11504_v33 = vld [vmem:[%s12392_s6 + $0x844] sm:$0xf0]  ;;  %5137 = vmatpush.bf16.msrb.mxu0 %v8228_v22  ;;  %v11432_v22 = vld [vmem:[%s12392_s6 + $0x60c] sm:$0xf] }
  0xd8   : > { %v9699_v34 = vld [vmem:[%s12392_s6 + $0xc08] sm:$0xf]  ;;  %v9188_v46 = vor.u32 %v11504_v33, %v9187_v31  ;;  %v11256_v61 = vld [vmem:[%s12392_s6 + $0x8c] sm:$0xf] }
  0xd9   : > { %5178 = vmatpush.bf16.msrb.mxu3 %v9828_v16  ;;  %v11632_v35 = vld [vmem:[%s12392_s6 + $0xc44] sm:$0xf0]  ;;  %5151 = vmatpush.bf16.msrb.mxu1 %v8740_v27  ;;  %v8229_v62 = vld [vmem:[%s12392_s6 + $0xc8] sm:$0xf0] }
  0xda   : > { %v10659_v36 = vld [vmem:[%s12392_s6 + $0x1388] sm:$0xf]  ;;  %v9700_v49 = vor.u32 %v11632_v35, %v9699_v34  ;;  %v11288_v34 = vld [vmem:[%s12392_s6 + $0x18c] sm:$0xf] }
  0xdb   : > { %v11872_v38 = vld [vmem:[%s12392_s6 + $0x13c4] sm:$0xf0]  ;;  %5165 = vmatpush.bf16.msrb.mxu2 %v9252_v28  ;;  %5138 = vmatpush.bf16.msrb.mxu0 %v8164_v40  ;;  %v8424_v28 = vor.u32 %v11304_v20, %v8421_v21  ;;  %v8357_v35 = vld [vmem:[%s12392_s6 + $0x1c8] sm:$0xf0] }
  0xdc   : > { %v11171_v39 = vld [vmem:[%s12392_s6 + $0x1788] sm:$0xf]  ;;  %v10660_v50 = vor.u32 %v11872_v38, %v10659_v36  ;;  %v11416_v36 = vld [vmem:[%s12392_s6 + $0x58c] sm:$0xf] }
  0xdd   : > { %v12000_v42 = vld [vmem:[%s12392_s6 + $0x17c4] sm:$0xf0]  ;;  %5179 = vmatpush.bf16.msrb.mxu3 %v9764_v32  ;;  %5152 = vmatpush.bf16.msrb.mxu1 %v8676_v45  ;;  %v8936_v32 = vor.u32 %v11432_v22, %v8933_v23  ;;  %v8869_v38 = vld [vmem:[%s12392_s6 + $0x5c8] sm:$0xf0] }
  0xde   : > { %v11172_v51 = vor.u32 %v12000_v42, %v11171_v39  ;;  %v10595_v53 = vld [vmem:[%s12392_s6 + $0x1308] sm:$0xf]  ;;  %5139 = vmatmul.bf16.vlgmr.msrb.gmra.mxu0 %v12493_v59  ;;  %v8360_v42 = vor.u32 %v11288_v34, %v8357_v35  ;;  %v8165_v11 = vld [vmem:[%s12392_s6 + $0x48] sm:$0xf0] }
  0xdf   : > { %v11856_v54 = vld [vmem:[%s12392_s6 + $0x1344] sm:$0xf0]  ;;  %5166 = vmatpush.bf16.msrb.mxu2 %v9188_v46  ;;  %5187 = vmatpush.bf16.msra.mxu0 %v10660_v50  ;;  %v8872_v46 = vor.u32 %v11416_v36, %v8869_v38  ;;  %v11400_v50 = vld [vmem:[%s12392_s6 + $0x50c] sm:$0xf]  ;;  %v8168_v22 = vor.u32 %v11240_v9, %v8165_v11 }
  0xe0   : > { %v11107_v55 = vld [vmem:[%s12392_s6 + $0x1708] sm:$0xf]  ;;  %v10596_v63 = vor.u32 %v11856_v54, %v10595_v53  ;;  %5153 = vmatmul.bf16.vlgmr.msrb.gmra.mxu1 %v12509_v8  ;;  %v10661_v20 = vld [vmem:[%s12392_s6 + $0x13c8] sm:$0xf0] }
  0xe1   : > { %v11984_v57 = vld [vmem:[%s12392_s6 + $0x1744] sm:$0xf0]  ;;  %5180 = vmatpush.bf16.msrb.mxu3 %v9700_v49  ;;  %5201 = vmatpush.bf16.msra.mxu1 %v11172_v51  ;;  %v8293_v49 = vld [vmem:[%s12392_s6 + $0x148] sm:$0xf0] }
  0xe2   : > { %v11108_v0 = vor.u32 %v11984_v57, %v11107_v55  ;;  %v10531_v2 = vld [vmem:[%s12392_s6 + $0x1288] sm:$0xf]  ;;  %5167 = vmatmul.bf16.vlgmr.msrb.gmra.mxu2 %v12531_v24  ;;  %v8805_v51 = vld [vmem:[%s12392_s6 + $0x548] sm:$0xf0]  ;;  %v8296_v54 = vor.u32 %v11272_v48, %v8293_v49 }
  0xe3   : > { %5215 = vmatpush.bf16.msra.mxu2 %v8616_v52  ;;  %v11840_v3 = vld [vmem:[%s12392_s6 + $0x12c4] sm:$0xf0]  ;;  %5188 = vmatpush.bf16.msra.mxu0 %v10596_v63  ;;  %v8808_v58 = vor.u32 %v11400_v50, %v8805_v51  ;;  %v11384_v63 = vld [vmem:[%s12392_s6 + $0x48c] sm:$0xf] }
  0xe4   : > { %v11043_v4 = vld [vmem:[%s12392_s6 + $0x1688] sm:$0xf]  ;;  %v10532_v12 = vor.u32 %v11840_v3, %v10531_v2  ;;  %5181 = vmatmul.bf16.vlgmr.msrb.gmra.mxu3 %v12533_v25  ;;  %v11992_v23 = vld [vmem:[%s12392_s6 + $0x178c] sm:$0xf] }
  0xe5   : > { %5229 = vmatpush.bf16.msra.mxu3 %v9128_v56  ;;  %v11968_v6 = vld [vmem:[%s12392_s6 + $0x16c4] sm:$0xf0]  ;;  %5202 = vmatpush.bf16.msra.mxu1 %v11108_v0  ;;  %v8741_v0 = vld [vmem:[%s12392_s6 + $0x4c8] sm:$0xf0] }
  0xe6   : > { %v11044_v13 = vor.u32 %v11968_v6, %v11043_v4  ;;  %v10467_v15 = vld [vmem:[%s12392_s6 + $0x1208] sm:$0xf]  ;;  %v8744_v10 = vor.u32 %v11384_v63, %v8741_v0  ;;  %v10085_v35 = vld [vmem:[%s12392_s6 + $0xf48] sm:$0xf0] }
  0xe7   : > { %5216 = vmatpush.bf16.msra.mxu2 %v8552_v1  ;;  %v11824_v16 = vld [vmem:[%s12392_s6 + $0x1244] sm:$0xf0]  ;;  %5189 = vmatpush.bf16.msra.mxu0 %v10532_v12  ;;  %v11368_v12 = vld [vmem:[%s12392_s6 + $0x40c] sm:$0xf] }
  0xe8   : > { %v10979_v17 = vld [vmem:[%s12392_s6 + $0x1608] sm:$0xf]  ;;  %v10468_v26 = vor.u32 %v11824_v16, %v10467_v15  ;;  %v9637_v15 = vld [vmem:[%s12392_s6 + $0xbc8] sm:$0xf0] }
  0xe9   : > { %5230 = vmatpush.bf16.msra.mxu3 %v9064_v5  ;;  %v11952_v19 = vld [vmem:[%s12392_s6 + $0x1644] sm:$0xf0]  ;;  %5203 = vmatpush.bf16.msra.mxu1 %v11044_v13  ;;  %v8232_v5 = vor.u32 %v11256_v61, %v8229_v62  ;;  %v8677_v13 = vld [vmem:[%s12392_s6 + $0x448] sm:$0xf0] }
  0xea   : > { %v10980_v27 = vor.u32 %v11952_v19, %v10979_v17  ;;  %v10403_v29 = vld [vmem:[%s12392_s6 + $0x1188] sm:$0xf]  ;;  %v11736_v16 = vld [vmem:[%s12392_s6 + $0xf8c] sm:$0xf] }
  0xeb   : > { %5217 = vmatpush.bf16.msra.mxu2 %v8488_v14  ;;  %v11808_v30 = vld [vmem:[%s12392_s6 + $0x11c4] sm:$0xf0]  ;;  %5190 = vmatpush.bf16.msra.mxu0 %v10468_v26  ;;  %v11608_v14 = vld [vmem:[%s12392_s6 + $0xb8c] sm:$0xf] }
  0xec   : > { %v10915_v31 = vld [vmem:[%s12392_s6 + $0x1588] sm:$0xf]  ;;  %v10404_v39 = vor.u32 %v11808_v30, %v10403_v29  ;;  %v11864_v19 = vld [vmem:[%s12392_s6 + $0x138c] sm:$0xf] }
  0xed   : > { %5231 = vmatpush.bf16.msra.mxu3 %v9000_v18  ;;  %v11936_v33 = vld [vmem:[%s12392_s6 + $0x15c4] sm:$0xf0]  ;;  %5204 = vmatpush.bf16.msra.mxu1 %v10980_v27  ;;  %v10149_v18 = vld [vmem:[%s12392_s6 + $0xfc8] sm:$0xf0]  ;;  %v8680_v27 = vor.u32 %v11368_v12, %v8677_v13  ;;  %v10664_v30 = vor.u32 %v11864_v19, %v10661_v20 }
  0xee   : > { %v10916_v40 = vor.u32 %v11936_v33, %v10915_v31  ;;  %v10339_v43 = vld [vmem:[%s12392_s6 + $0x1108] sm:$0xf]  ;;  %v11173_v26 = vld [vmem:[%s12392_s6 + $0x17c8] sm:$0xf0]  ;;  %v10152_v29 = vor.u32 %v11736_v16, %v10149_v18 }
  0xef   : > { %5218 = vmatpush.bf16.msra.mxu2 %v8424_v28  ;;  %v11792_v44 = vld [vmem:[%s12392_s6 + $0x1144] sm:$0xf0]  ;;  %5191 = vmatpush.bf16.msra.mxu0 %v10404_v39  ;;  %v9640_v28 = vor.u32 %v11608_v14, %v9637_v15  ;;  %v11592_v31 = vld [vmem:[%s12392_s6 + $0xb0c] sm:$0xf]  ;;  %v11176_v34 = vor.u32 %v11992_v23, %v11173_v26 }
  0xf0   : > { %v10851_v45 = vld [vmem:[%s12392_s6 + $0x1508] sm:$0xf]  ;;  %v10340_v52 = vor.u32 %v11792_v44, %v10339_v43  ;;  %v11720_v33 = vld [vmem:[%s12392_s6 + $0xf0c] sm:$0xf] }
  0xf1   : > { %5232 = vmatpush.bf16.msra.mxu3 %v8936_v32  ;;  %v11920_v47 = vld [vmem:[%s12392_s6 + $0x1544] sm:$0xf0]  ;;  %5205 = vmatpush.bf16.msra.mxu1 %v10916_v40  ;;  %v9573_v32 = vld [vmem:[%s12392_s6 + $0xb48] sm:$0xf0]  ;;  %v10088_v43 = vor.u32 %v11720_v33, %v10085_v35 }
  0xf2   : > { %v10852_v53 = vor.u32 %v11920_v47, %v10851_v45  ;;  %v10275_v55 = vld [vmem:[%s12392_s6 + $0x1088] sm:$0xf]  ;;  %v11848_v36 = vld [vmem:[%s12392_s6 + $0x130c] sm:$0xf] }
  0xf3   : > { %5219 = vmatpush.bf16.msra.mxu2 %v8360_v42  ;;  %v11776_v56 = vld [vmem:[%s12392_s6 + $0x10c4] sm:$0xf0]  ;;  %5192 = vmatpush.bf16.msra.mxu0 %v10340_v52  ;;  %v10597_v38 = vld [vmem:[%s12392_s6 + $0x1348] sm:$0xf0]  ;;  %v9576_v42 = vor.u32 %v11592_v31, %v9573_v32 }
  0xf4   : > { %v10787_v57 = vld [vmem:[%s12392_s6 + $0x1488] sm:$0xf]  ;;  %v10276_v1 = vor.u32 %v11776_v56, %v10275_v55  ;;  %v11976_v39 = vld [vmem:[%s12392_s6 + $0x170c] sm:$0xf]  ;;  %v10600_v44 = vor.u32 %v11848_v36, %v10597_v38 }
  0xf5   : > { %5233 = vmatpush.bf16.msra.mxu3 %v8872_v46  ;;  %v11904_v60 = vld [vmem:[%s12392_s6 + $0x14c4] sm:$0xf0]  ;;  %5206 = vmatpush.bf16.msra.mxu1 %v10852_v53  ;;  %v11109_v40 = vld [vmem:[%s12392_s6 + $0x1748] sm:$0xf0] }
  0xf6   : > { %v10211_v2 = vld [vmem:[%s12392_s6 + $0x1008] sm:$0xf]  ;;  %v10788_v4 = vor.u32 %v11904_v60, %v10787_v57  ;;  %v11576_v45 = vld [vmem:[%s12392_s6 + $0xa8c] sm:$0xf]  ;;  %v11112_v48 = vor.u32 %v11976_v39, %v11109_v40 }
  0xf7   : > { %v11760_v3 = vld [vmem:[%s12392_s6 + $0x1044] sm:$0xf0]  ;;  %5220 = vmatpush.bf16.msra.mxu2 %v8296_v54  ;;  %5193 = vmatpush.bf16.msra.mxu0 %v10276_v1  ;;  %v9509_v46 = vld [vmem:[%s12392_s6 + $0xac8] sm:$0xf0] }
  0xf8   : > { %v10723_v6 = vld [vmem:[%s12392_s6 + $0x1408] sm:$0xf]  ;;  %v10212_v17 = vor.u32 %v11760_v3, %v10211_v2  ;;  %v11704_v47 = vld [vmem:[%s12392_s6 + $0xe8c] sm:$0xf]  ;;  %v9512_v54 = vor.u32 %v11576_v45, %v9509_v46  ;;  %v4972_v36 = vpop.f32.mrf.mxu0  ;;  %v4986_v45 = vpop.f32.mrf.mxu1 }
  0xf9   : > { %v11888_v7 = vld [vmem:[%s12392_s6 + $0x1444] sm:$0xf0]  ;;  %5234 = vmatpush.bf16.msra.mxu3 %v8808_v58  ;;  %5207 = vmatpush.bf16.msra.mxu1 %v10788_v4  ;;  %v10021_v49 = vld [vmem:[%s12392_s6 + $0xec8] sm:$0xf0] }
  0xfa   : > { %v10724_v21 = vor.u32 %v11888_v7, %v10723_v6  ;;  %v11832_v50 = vld [vmem:[%s12392_s6 + $0x128c] sm:$0xf]  ;;  %v10024_v55 = vor.u32 %v11704_v47, %v10021_v49 }
  0xfb   : > { %5221 = vmatpush.bf16.msra.mxu2 %v8232_v5  ;;  %5194 = vmatpush.bf16.msra.mxu0 %v10212_v17  ;;  %v10533_v51 = vld [vmem:[%s12392_s6 + $0x12c8] sm:$0xf0] }
  0xfc   : > { %v11960_v52 = vld [vmem:[%s12392_s6 + $0x168c] sm:$0xf]  ;;  %v10536_v56 = vor.u32 %v11832_v50, %v10533_v51 }
  0xfd   : > { %5235 = vmatpush.bf16.msra.mxu3 %v8744_v10  ;;  %5208 = vmatpush.bf16.msra.mxu1 %v10724_v21  ;;  %v11045_v53 = vld [vmem:[%s12392_s6 + $0x16c8] sm:$0xf0] }
  0xfe   : > { %5195 = vmatmul.bf16.vlgmr.msra.gmra.mxu0 %v12592_v37  ;;  %v11560_v57 = vld [vmem:[%s12392_s6 + $0xa0c] sm:$0xf]  ;;  %v11048_v61 = vor.u32 %v11960_v52, %v11045_v53 }
  0xff   : > { %5222 = vmatpush.bf16.msra.mxu2 %v8168_v22  ;;  %5243 = vmatpush.bf16.msrb.mxu0 %v9640_v28  ;;  %v9445_v58 = vld [vmem:[%s12392_s6 + $0xa48] sm:$0xf0]  ;;  %v12840_v28 = vld [vmem:[%s12398_s9] sm:$0xff] }
 0x100   : > { %5209 = vmatmul.bf16.vlgmr.msra.gmra.mxu1 %v12597_v41  ;;  %v11688_v60 = vld [vmem:[%s12392_s6 + $0xe0c] sm:$0xf]  ;;  %v9448_v3 = vor.u32 %v11560_v57, %v9445_v58  ;;  %v1061_v35 = vperm.slane %v12840_v28, 0 }
 0x101   : > { %5236 = vmatpush.bf16.msra.mxu3 %v8680_v27  ;;  %5257 = vmatpush.bf16.msrb.mxu1 %v10152_v29  ;;  %v9957_v62 = vld [vmem:[%s12392_s6 + $0xe48] sm:$0xf0] }
 0x102   : > { %5223 = vmatmul.bf16.vlgmr.msra.gmra.mxu2 %v12493_v59  ;;  %v11816_v63 = vld [vmem:[%s12392_s6 + $0x120c] sm:$0xf]  ;;  %v9960_v4 = vor.u32 %v11688_v60, %v9957_v62  ;;  %v8619_v62 = vld [vmem:[%s12392_s6 + $0x390] sm:$0xf] }
 0x103   : > { %5271 = vmatpush.bf16.msrb.mxu2 %v10664_v30  ;;  %5244 = vmatpush.bf16.msrb.mxu0 %v9576_v42  ;;  %v10469_v0 = vld [vmem:[%s12392_s6 + $0x1248] sm:$0xf0] }
 0x104   : > { %5237 = vmatmul.bf16.vlgmr.msra.gmra.mxu3 %v12509_v8  ;;  %v11944_v1 = vld [vmem:[%s12392_s6 + $0x160c] sm:$0xf]  ;;  %v10472_v5 = vor.u32 %v11816_v63, %v10469_v0  ;;  %v11361_v63 = vld [vmem:[%s12392_s6 + $0x3cc] sm:$0xf0] }
 0x105   : > { %5285 = vmatpush.bf16.msrb.mxu3 %v11176_v34  ;;  %5258 = vmatpush.bf16.msrb.mxu1 %v10088_v43  ;;  %v10981_v2 = vld [vmem:[%s12392_s6 + $0x1648] sm:$0xf0]  ;;  %v9131_v0 = vld [vmem:[%s12392_s6 + $0x790] sm:$0xf] }
 0x106   : > { %v11544_v6 = vld [vmem:[%s12392_s6 + $0x98c] sm:$0xf]  ;;  %v10984_v10 = vor.u32 %v11944_v1, %v10981_v2  ;;  %v11489_v2 = vld [vmem:[%s12392_s6 + $0x7cc] sm:$0xf0] }
 0x107   : > { %5272 = vmatpush.bf16.msrb.mxu2 %v10600_v44  ;;  %5245 = vmatpush.bf16.msrb.mxu0 %v9512_v54  ;;  %v9381_v7 = vld [vmem:[%s12392_s6 + $0x9c8] sm:$0xf0] }
 0x108   : > { %v11672_v9 = vld [vmem:[%s12392_s6 + $0xd8c] sm:$0xf]  ;;  %v9384_v16 = vor.u32 %v11544_v6, %v9381_v7  ;;  %v10155_v7 = vld [vmem:[%s12392_s6 + $0xf90] sm:$0xf] }
 0x109   : > { %5286 = vmatpush.bf16.msrb.mxu3 %v11112_v48  ;;  %5259 = vmatpush.bf16.msrb.mxu1 %v10024_v55  ;;  %v9893_v11 = vld [vmem:[%s12392_s6 + $0xdc8] sm:$0xf0] }
 0x10a   : > { %v11800_v12 = vld [vmem:[%s12392_s6 + $0x118c] sm:$0xf]  ;;  %v9896_v18 = vor.u32 %v11672_v9, %v9893_v11  ;;  %v11745_v9 = vld [vmem:[%s12392_s6 + $0xfcc] sm:$0xf0] }
 0x10b   : > { %5273 = vmatpush.bf16.msrb.mxu2 %v10536_v56  ;;  %v10405_v13 = vld [vmem:[%s12392_s6 + $0x11c8] sm:$0xf0]  ;;  %5246 = vmatpush.bf16.msrb.mxu0 %v9448_v3  ;;  %v4973_v56 = vadd.f32 %v4972_v36, %v1061_v35  ;;  %v9643_v3 = vld [vmem:[%s12392_s6 + $0xb90] sm:$0xf] }
 0x10c   : > { %v11928_v14 = vld [vmem:[%s12392_s6 + $0x158c] sm:$0xf]  ;;  %v10408_v19 = vor.u32 %v11800_v12, %v10405_v13  ;;  %v8620_v13 = vor.u32 %v11361_v63, %v8619_v62  ;;  %v9963_v62 = vld [vmem:[%s12392_s6 + $0xe10] sm:$0xf] }
 0x10d   : > { %5287 = vmatpush.bf16.msrb.mxu3 %v11048_v61  ;;  %v10917_v15 = vld [vmem:[%s12392_s6 + $0x15c8] sm:$0xf0]  ;;  %5260 = vmatpush.bf16.msrb.mxu1 %v9960_v4  ;;  %v11617_v4 = vld [vmem:[%s12392_s6 + $0xbcc] sm:$0xf0]  ;;  %v4987_v11 = vadd.f32 %v4986_v45, %v4973_v56 }
 0x10e   : > { %v11528_v17 = vld [vmem:[%s12392_s6 + $0x90c] sm:$0xf]  ;;  %v10920_v23 = vor.u32 %v11928_v14, %v10917_v15  ;;  %v9132_v14 = vor.u32 %v11489_v2, %v9131_v0  ;;  %v9644_v15 = vor.u32 %v11617_v4, %v9643_v3  ;;  %v10027_v45 = vld [vmem:[%s12392_s6 + $0xe90] sm:$0xf] }
 0x10f   : > { %5274 = vmatpush.bf16.msrb.mxu2 %v10472_v5  ;;  %v9317_v20 = vld [vmem:[%s12392_s6 + $0x948] sm:$0xf0]  ;;  %5247 = vmatpush.bf16.msrb.mxu0 %v9384_v16  ;;  %v4974_v16 = vpop.f32.mrf.mxu0  ;;  %v11697_v63 = vld [vmem:[%s12392_s6 + $0xe4c] sm:$0xf0] }
 0x110   : > { %v11656_v21 = vld [vmem:[%s12392_s6 + $0xd0c] sm:$0xf]  ;;  %v9320_v31 = vor.u32 %v11528_v17, %v9317_v20  ;;  %v8555_v17 = vld [vmem:[%s12392_s6 + $0x310] sm:$0xf]  ;;  %v10156_v20 = vor.u32 %v11745_v9, %v10155_v7 }
 0x111   : > { %v9829_v22 = vld [vmem:[%s12392_s6 + $0xd48] sm:$0xf0]  ;;  %5288 = vmatpush.bf16.msrb.mxu3 %v10984_v10  ;;  %5261 = vmatpush.bf16.msrb.mxu1 %v9896_v18  ;;  %v5000_v10 = vpop.f32.mrf.mxu2  ;;  %v11345_v18 = vld [vmem:[%s12392_s6 + $0x34c] sm:$0xf0] }
 0x112   : > { %v11784_v26 = vld [vmem:[%s12392_s6 + $0x110c] sm:$0xf]  ;;  %v9832_v33 = vor.u32 %v11656_v21, %v9829_v22  ;;  %v11473_v21 = vld [vmem:[%s12392_s6 + $0x74c] sm:$0xf0] }
 0x113   : > { %v10341_v27 = vld [vmem:[%s12392_s6 + $0x1148] sm:$0xf0]  ;;  %5275 = vmatpush.bf16.msrb.mxu2 %v10408_v19  ;;  %5248 = vmatpush.bf16.msrb.mxu0 %v9320_v31  ;;  %v9067_v19 = vld [vmem:[%s12392_s6 + $0x710] sm:$0xf]  ;;  %v4975_v31 = vadd.f32 %v4974_v16, %v1061_v35 }
 0x114   : > { %v11912_v29 = vld [vmem:[%s12392_s6 + $0x150c] sm:$0xf]  ;;  %v10344_v34 = vor.u32 %v11784_v26, %v10341_v27  ;;  %v9579_v22 = vld [vmem:[%s12392_s6 + $0xb10] sm:$0xf]  ;;  %v4988_v26 = vpop.f32.mrf.mxu1 }
 0x115   : > { %v10853_v30 = vld [vmem:[%s12392_s6 + $0x1548] sm:$0xf0]  ;;  %5289 = vmatpush.bf16.msrb.mxu3 %v10920_v23  ;;  %5262 = vmatpush.bf16.msrb.mxu1 %v9832_v33  ;;  %v11601_v23 = vld [vmem:[%s12392_s6 + $0xb4c] sm:$0xf0]  ;;  %v5001_v33 = vadd.f32 %v5000_v10, %v4987_v11  ;;  %v9964_v11 = vor.u32 %v11697_v63, %v9963_v62 }
 0x116   : > { %v11512_v32 = vld [vmem:[%s12392_s6 + $0x88c] sm:$0xf]  ;;  %v10856_v40 = vor.u32 %v11912_v29, %v10853_v30  ;;  %v10091_v27 = vld [vmem:[%s12392_s6 + $0xf10] sm:$0xf]  ;;  %v5014_v30 = vpop.f32.mrf.mxu3  ;;  %v9580_v36 = vor.u32 %v11601_v23, %v9579_v22 }
 0x117   : > { %v9253_v38 = vld [vmem:[%s12392_s6 + $0x8c8] sm:$0xf0]  ;;  %5276 = vmatpush.bf16.msrb.mxu2 %v10344_v34  ;;  %v11729_v29 = vld [vmem:[%s12392_s6 + $0xf4c] sm:$0xf0]  ;;  %v9068_v34 = vor.u32 %v11473_v21, %v9067_v19 }
 0x118   : > { %v11640_v39 = vld [vmem:[%s12392_s6 + $0xc8c] sm:$0xf]  ;;  %v9256_v48 = vor.u32 %v11512_v32, %v9253_v38  ;;  %v8556_v32 = vor.u32 %v11345_v18, %v8555_v17  ;;  %v8491_v38 = vld [vmem:[%s12392_s6 + $0x290] sm:$0xf] }
 0x119   : > { %v9765_v42 = vld [vmem:[%s12392_s6 + $0xcc8] sm:$0xf0]  ;;  %5290 = vmatpush.bf16.msrb.mxu3 %v10856_v40  ;;  %v9003_v40 = vld [vmem:[%s12392_s6 + $0x690] sm:$0xf] }
 0x11a   : > { %v11768_v43 = vld [vmem:[%s12392_s6 + $0x108c] sm:$0xf]  ;;  %v9768_v51 = vor.u32 %v11640_v39, %v9765_v42  ;;  %5249 = vmatpush.bf16.msrb.mxu0 %v9256_v48  ;;  %v11329_v39 = vld [vmem:[%s12392_s6 + $0x2cc] sm:$0xf0]  ;;  %v10092_v42 = vor.u32 %v11729_v29, %v10091_v27 }
 0x11b   : > { %v10277_v44 = vld [vmem:[%s12392_s6 + $0x10c8] sm:$0xf0]  ;;  %v11457_v35 = vld [vmem:[%s12392_s6 + $0x6cc] sm:$0xf0]  ;;  %v8492_v48 = vor.u32 %v11329_v39, %v8491_v38 }
 0x11c   : > { %v11896_v46 = vld [vmem:[%s12392_s6 + $0x148c] sm:$0xf]  ;;  %v10280_v52 = vor.u32 %v11768_v43, %v10277_v44  ;;  %5263 = vmatpush.bf16.msrb.mxu1 %v9768_v51  ;;  %v9515_v43 = vld [vmem:[%s12392_s6 + $0xa90] sm:$0xf]  ;;  %v5042_v2 = vpop.f32.mrf.mxu1 }
 0x11d   : > { %v10789_v47 = vld [vmem:[%s12392_s6 + $0x14c8] sm:$0xf0]  ;;  %v11585_v44 = vld [vmem:[%s12392_s6 + $0xacc] sm:$0xf0] }
 0x11e   : > { %v11496_v49 = vld [vmem:[%s12392_s6 + $0x80c] sm:$0xf]  ;;  %v10792_v57 = vor.u32 %v11896_v46, %v10789_v47  ;;  %5277 = vmatpush.bf16.msrb.mxu2 %v10280_v52  ;;  %v11713_v46 = vld [vmem:[%s12392_s6 + $0xecc] sm:$0xf0]  ;;  %v4989_v47 = vadd.f32 %v4988_v26, %v4975_v31  ;;  %v9516_v51 = vor.u32 %v11585_v44, %v9515_v43  ;;  %v5016_v10 = vpop.f32.mrf.mxu3 }
 0x11f   : > { %v9189_v50 = vld [vmem:[%s12392_s6 + $0x848] sm:$0xf0]  ;;  %v8427_v52 = vld [vmem:[%s12392_s6 + $0x210] sm:$0xf]  ;;  %v10028_v56 = vor.u32 %v11713_v46, %v10027_v45 }
 0x120   : > { %v11624_v53 = vld [vmem:[%s12392_s6 + $0xc0c] sm:$0xf]  ;;  %v9192_v1 = vor.u32 %v11496_v49, %v9189_v50  ;;  %5291 = vmatpush.bf16.msrb.mxu3 %v10792_v57  ;;  %v5015_v49 = vadd.f32 %v5014_v30, %v5001_v33  ;;  %v9004_v50 = vor.u32 %v11457_v35, %v9003_v40  ;;  %v11441_v57 = vld [vmem:[%s12392_s6 + $0x64c] sm:$0xf0] }
 0x121   : > { %v9701_v54 = vld [vmem:[%s12392_s6 + $0xc48] sm:$0xf0]  ;;  %v11297_v7 = vld [vmem:[%s12392_s6 + $0x1cc] sm:$0xf0] }
 0x122   : > { %v11752_v55 = vld [vmem:[%s12392_s6 + $0x100c] sm:$0xf]  ;;  %v9704_v5 = vor.u32 %v11624_v53, %v9701_v54  ;;  %5250 = vmatpush.bf16.msrb.mxu0 %v9192_v1  ;;  %v11313_v53 = vld [vmem:[%s12392_s6 + $0x24c] sm:$0xf0] }
 0x123   : > { %v10213_v58 = vld [vmem:[%s12392_s6 + $0x1048] sm:$0xf0]  ;;  %v8939_v54 = vld [vmem:[%s12392_s6 + $0x610] sm:$0xf]  ;;  %v8428_v1 = vor.u32 %v11313_v53, %v8427_v52 }
 0x124   : > { %v11880_v60 = vld [vmem:[%s12392_s6 + $0x140c] sm:$0xf]  ;;  %v10216_v6 = vor.u32 %v11752_v55, %v10213_v58  ;;  %5264 = vmatpush.bf16.msrb.mxu1 %v9704_v5  ;;  %v5002_v55 = vpop.f32.mrf.mxu2  ;;  %v9451_v58 = vld [vmem:[%s12392_s6 + $0xa10] sm:$0xf]  ;;  %v8940_v4 = vor.u32 %v11441_v57, %v8939_v54  ;;  %v5044_v39 = vpop.f32.mrf.mxu1 }
 0x125   : > { %v10725_v61 = vld [vmem:[%s12392_s6 + $0x1448] sm:$0xf0]  ;;  %5251 = vmatmul.bf16.vlgmr.msrb.gmra.mxu0 %v12531_v24  ;;  %v5003_v3 = vadd.f32 %v5002_v55, %v4989_v47  ;;  %v8875_v9 = vld [vmem:[%s12392_s6 + $0x590] sm:$0xf] }
 0x126   : > { %v10728_v12 = vor.u32 %v11880_v60, %v10725_v61  ;;  %5278 = vmatpush.bf16.msrb.mxu2 %v10216_v6  ;;  %5299 = vmatpush.bf16.msra.mxu0 %v8620_v13  ;;  %v11569_v60 = vld [vmem:[%s12392_s6 + $0xa4c] sm:$0xf0]  ;;  %v5028_v61 = vpop.f32.mrf.mxu0 }
 0x127   : > { %5265 = vmatmul.bf16.vlgmr.msrb.gmra.mxu1 %v12533_v25  ;;  %v5029_v0 = vadd.f32 %v5028_v61, %v5015_v49  ;;  %v9452_v5 = vor.u32 %v11569_v60, %v9451_v58  ;;  %v8363_v6 = vld [vmem:[%s12392_s6 + $0x190] sm:$0xf]  ;;  %v5017_v19 = vadd.f32 %v5016_v10, %v5003_v3 }
 0x128   : > { %5292 = vmatpush.bf16.msrb.mxu3 %v10728_v12  ;;  %5313 = vmatpush.bf16.msra.mxu1 %v9132_v14  ;;  %v11425_v13 = vld [vmem:[%s12392_s6 + $0x5cc] sm:$0xf0]  ;;  %v8364_v18 = vor.u32 %v11297_v7, %v8363_v6  ;;  %v11353_v6 = vld [vmem:[%s12392_s6 + $0x394] sm:$0xf] }
 0x129   : > { %5279 = vmatmul.bf16.vlgmr.msrb.gmra.mxu2 %v12592_v37  ;;  %v5043_v12 = vadd.f32 %v5042_v2, %v5029_v0  ;;  %v9387_v14 = vld [vmem:[%s12392_s6 + $0x990] sm:$0xf]  ;;  %v8621_v7 = vld [vmem:[%s12392_s6 + $0x3d0] sm:$0xf0] }
 0x12a   : > { %5327 = vmatpush.bf16.msra.mxu2 %v9644_v15  ;;  %5300 = vmatpush.bf16.msra.mxu0 %v8556_v32  ;;  %v11553_v15 = vld [vmem:[%s12392_s6 + $0x9cc] sm:$0xf0] }
 0x12b   : > { %5293 = vmatmul.bf16.vlgmr.msrb.gmra.mxu3 %v12597_v41  ;;  %v9899_v16 = vld [vmem:[%s12392_s6 + $0xd90] sm:$0xf]  ;;  %6312 = vst [vmem:[%s12908_s27] sm:$0xff] %v5043_v12  ;;  %v9388_v21 = vor.u32 %v11553_v15, %v9387_v14  ;;  %v11481_v12 = vld [vmem:[%s12392_s6 + $0x794] sm:$0xf]  ;;  %v5070_v14 = vpop.f32.mrf.mxu3 }
 0x12c   : > { %5341 = vmatpush.bf16.msra.mxu3 %v10156_v20  ;;  %5314 = vmatpush.bf16.msra.mxu1 %v9068_v34  ;;  %v11681_v17 = vld [vmem:[%s12392_s6 + $0xdcc] sm:$0xf0]  ;;  %v8876_v20 = vor.u32 %v11425_v13, %v8875_v9  ;;  %v5056_v9 = vpop.f32.mrf.mxu2  ;;  %v9133_v13 = vld [vmem:[%s12392_s6 + $0x7d0] sm:$0xf0] }
 0x12d   : > { %v8299_v22 = vld [vmem:[%s12392_s6 + $0x110] sm:$0xf]  ;;  %v9900_v27 = vor.u32 %v11681_v17, %v9899_v16  ;;  %v1062_v17 = vperm.slane %v12840_v28, 1 }
 0x12e   : > { %5328 = vmatpush.bf16.msra.mxu2 %v9580_v36  ;;  %5301 = vmatpush.bf16.msra.mxu0 %v8492_v48  ;;  %v11281_v23 = vld [vmem:[%s12392_s6 + $0x14c] sm:$0xf0]  ;;  %v5030_v32 = vpop.f32.mrf.mxu0 }
 0x12f   : > { %v8811_v26 = vld [vmem:[%s12392_s6 + $0x510] sm:$0xf]  ;;  %v5031_v36 = vadd.f32 %v5030_v32, %v5017_v19  ;;  %v8300_v38 = vor.u32 %v11281_v23, %v8299_v22  ;;  %v8624_v19 = vor.u32 %v11353_v6, %v8621_v7  ;;  %v9136_v23 = vor.u32 %v11481_v12, %v9133_v13  ;;  %v11289_v12 = vld [vmem:[%s12392_s6 + $0x194] sm:$0xf] }
 0x130   : > { %5342 = vmatpush.bf16.msra.mxu3 %v10092_v42  ;;  %5315 = vmatpush.bf16.msra.mxu1 %v9004_v50  ;;  %v11409_v29 = vld [vmem:[%s12392_s6 + $0x54c] sm:$0xf0]  ;;  %v5057_v32 = vadd.f32 %v5056_v9, %v1062_v17  ;;  %v8365_v13 = vld [vmem:[%s12392_s6 + $0x1d0] sm:$0xf0] }
 0x131   : > { %v9323_v30 = vld [vmem:[%s12392_s6 + $0x910] sm:$0xf]  ;;  %v8812_v40 = vor.u32 %v11409_v29, %v8811_v26  ;;  %v5045_v46 = vadd.f32 %v5044_v39, %v5031_v36  ;;  %v8557_v29 = vld [vmem:[%s12392_s6 + $0x350] sm:$0xf0] }
 0x132   : > { %5329 = vmatpush.bf16.msra.mxu2 %v9516_v51  ;;  %5302 = vmatpush.bf16.msra.mxu0 %v8428_v1  ;;  %v11537_v31 = vld [vmem:[%s12392_s6 + $0x94c] sm:$0xf0] }
 0x133   : > { %v9835_v33 = vld [vmem:[%s12392_s6 + $0xd10] sm:$0xf]  ;;  %v9324_v42 = vor.u32 %v11537_v31, %v9323_v30  ;;  %6328 = vst [vmem:[%s12908_s27 + $0x780] sm:$0xff] %v5045_v46  ;;  %v11465_v30 = vld [vmem:[%s12392_s6 + $0x714] sm:$0xf] }
 0x134   : > { %5343 = vmatpush.bf16.msra.mxu3 %v10028_v56  ;;  %5316 = vmatpush.bf16.msra.mxu1 %v8940_v4  ;;  %v11665_v34 = vld [vmem:[%s12392_s6 + $0xd4c] sm:$0xf0]  ;;  %v9069_v31 = vld [vmem:[%s12392_s6 + $0x750] sm:$0xf0] }
 0x135   : > { %v8235_v35 = vld [vmem:[%s12392_s6 + $0x90] sm:$0xf]  ;;  %v9836_v45 = vor.u32 %v11665_v34, %v9835_v33  ;;  %v9005_v46 = vld [vmem:[%s12392_s6 + $0x6d0] sm:$0xf0] }
 0x136   : > { %5330 = vmatpush.bf16.msra.mxu2 %v9452_v5  ;;  %5303 = vmatpush.bf16.msra.mxu0 %v8364_v18  ;;  %v11265_v43 = vld [vmem:[%s12392_s6 + $0xcc] sm:$0xf0] }
 0x137   : > { %v8747_v44 = vld [vmem:[%s12392_s6 + $0x490] sm:$0xf]  ;;  %v8236_v52 = vor.u32 %v11265_v43, %v8235_v35  ;;  %v11321_v43 = vld [vmem:[%s12392_s6 + $0x294] sm:$0xf] }
 0x138   : > { %5344 = vmatpush.bf16.msra.mxu3 %v9964_v11  ;;  %5317 = vmatpush.bf16.msra.mxu1 %v8876_v20  ;;  %v11393_v47 = vld [vmem:[%s12392_s6 + $0x4cc] sm:$0xf0] }
 0x139   : > { %v9259_v48 = vld [vmem:[%s12392_s6 + $0x890] sm:$0xf]  ;;  %v8748_v55 = vor.u32 %v11393_v47, %v8747_v44  ;;  %v8493_v44 = vld [vmem:[%s12392_s6 + $0x2d0] sm:$0xf0]  ;;  %v5071_v47 = vadd.f32 %v5070_v14, %v5057_v32 }
 0x13a   : > { %5331 = vmatpush.bf16.msra.mxu2 %v9388_v21  ;;  %v11521_v49 = vld [vmem:[%s12392_s6 + $0x8cc] sm:$0xf0]  ;;  %5304 = vmatpush.bf16.msra.mxu0 %v8300_v38 }
 0x13b   : > { %v9771_v50 = vld [vmem:[%s12392_s6 + $0xc90] sm:$0xf]  ;;  %v9260_v56 = vor.u32 %v11521_v49, %v9259_v48  ;;  %v5058_v49 = vpop.f32.mrf.mxu2 }
 0x13c   : > { %5345 = vmatpush.bf16.msra.mxu3 %v9900_v27  ;;  %v11649_v51 = vld [vmem:[%s12392_s6 + $0xccc] sm:$0xf0]  ;;  %5318 = vmatpush.bf16.msra.mxu1 %v8812_v40  ;;  %v11337_v27 = vld [vmem:[%s12392_s6 + $0x314] sm:$0xf] }
 0x13d   : > { %v8171_v53 = vld [vmem:[%s12392_s6 + $0x10] sm:$0xf]  ;;  %v9772_v61 = vor.u32 %v11649_v51, %v9771_v50  ;;  %v8560_v36 = vor.u32 %v11337_v27, %v8557_v29  ;;  %v8496_v51 = vor.u32 %v11321_v43, %v8493_v44 }
 0x13e   : > { %v11249_v54 = vld [vmem:[%s12392_s6 + $0x4c] sm:$0xf0]  ;;  %5332 = vmatpush.bf16.msra.mxu2 %v9324_v42  ;;  %5305 = vmatpush.bf16.msra.mxu0 %v8236_v52  ;;  %v9072_v42 = vor.u32 %v11465_v30, %v9069_v31  ;;  %v5072_v52 = vpop.f32.mrf.mxu3  ;;  %v11273_v30 = vld [vmem:[%s12392_s6 + $0x114] sm:$0xf] }
 0x13f   : > { %v8683_v57 = vld [vmem:[%s12392_s6 + $0x410] sm:$0xf]  ;;  %v8172_v4 = vor.u32 %v11249_v54, %v8171_v53  ;;  %v8301_v31 = vld [vmem:[%s12392_s6 + $0x150] sm:$0xf0] }
 0x140   : > { %v11377_v58 = vld [vmem:[%s12392_s6 + $0x44c] sm:$0xf0]  ;;  %5346 = vmatpush.bf16.msra.mxu3 %v9836_v45  ;;  %5319 = vmatpush.bf16.msra.mxu1 %v8748_v55  ;;  %v11449_v45 = vld [vmem:[%s12392_s6 + $0x694] sm:$0xf]  ;;  %v8304_v43 = vor.u32 %v11273_v30, %v8301_v31 }
 0x141   : > { %v9195_v60 = vld [vmem:[%s12392_s6 + $0x810] sm:$0xf]  ;;  %v8684_v10 = vor.u32 %v11377_v58, %v8683_v57  ;;  %v11305_v58 = vld [vmem:[%s12392_s6 + $0x214] sm:$0xf] }
 0x142   : > { %v11505_v62 = vld [vmem:[%s12392_s6 + $0x84c] sm:$0xf0]  ;;  %5333 = vmatpush.bf16.msra.mxu2 %v9260_v56  ;;  %5306 = vmatpush.bf16.msra.mxu0 %v8172_v4  ;;  %v9008_v56 = vor.u32 %v11449_v45, %v9005_v46  ;;  %v10093_v31 = vld [vmem:[%s12392_s6 + $0xf50] sm:$0xf0] }
 0x143   : > { %v9707_v63 = vld [vmem:[%s12392_s6 + $0xc10] sm:$0xf]  ;;  %v9196_v11 = vor.u32 %v11505_v62, %v9195_v60  ;;  %v8429_v60 = vld [vmem:[%s12392_s6 + $0x250] sm:$0xf0] }
 0x144   : > { %v11633_v0 = vld [vmem:[%s12392_s6 + $0xc4c] sm:$0xf0]  ;;  %5347 = vmatpush.bf16.msra.mxu3 %v9772_v61  ;;  %5320 = vmatpush.bf16.msra.mxu1 %v8684_v10  ;;  %v5084_v61 = vpop.f32.mrf.mxu0  ;;  %v11433_v62 = vld [vmem:[%s12392_s6 + $0x614] sm:$0xf] }
 0x145   : > { %v10667_v1 = vld [vmem:[%s12392_s6 + $0x1390] sm:$0xf]  ;;  %v9708_v15 = vor.u32 %v11633_v0, %v9707_v63  ;;  %5307 = vmatmul.bf16.vlgmr.msra.gmra.mxu0 %v12493_v59  ;;  %v8941_v63 = vld [vmem:[%s12392_s6 + $0x650] sm:$0xf0]  ;;  %v5085_v0 = vadd.f32 %v5084_v61, %v5071_v47  ;;  %v5112_v29 = vpop.f32.mrf.mxu2 }
 0x146   : > { %v11873_v2 = vld [vmem:[%s12392_s6 + $0x13cc] sm:$0xf0]  ;;  %5334 = vmatpush.bf16.msra.mxu2 %v9196_v11  ;;  %v8944_v10 = vor.u32 %v11433_v62, %v8941_v63  ;;  %v11241_v63 = vld [vmem:[%s12392_s6 + $0x14] sm:$0xf] }
 0x147   : > { %v11179_v3 = vld [vmem:[%s12392_s6 + $0x1790] sm:$0xf]  ;;  %v10668_v16 = vor.u32 %v11873_v2, %v10667_v1  ;;  %5321 = vmatmul.bf16.vlgmr.msra.gmra.mxu1 %v12509_v8  ;;  %v5098_v2 = vpop.f32.mrf.mxu1 }
 0x148   : > { %v12001_v5 = vld [vmem:[%s12392_s6 + $0x17cc] sm:$0xf0]  ;;  %5348 = vmatpush.bf16.msra.mxu3 %v9708_v15  ;;  %v5099_v14 = vadd.f32 %v5098_v2, %v5085_v0  ;;  %v11417_v15 = vld [vmem:[%s12392_s6 + $0x594] sm:$0xf] }
 0x149   : > { %v11180_v18 = vor.u32 %v12001_v5, %v11179_v3  ;;  %v10603_v20 = vld [vmem:[%s12392_s6 + $0x1310] sm:$0xf]  ;;  %5355 = vmatpush.bf16.msrb.mxu0 %v10668_v16  ;;  %5335 = vmatmul.bf16.vlgmr.msra.gmra.mxu2 %v12531_v24  ;;  %v5059_v3 = vadd.f32 %v5058_v49, %v1062_v17  ;;  %v8432_v5 = vor.u32 %v11305_v58, %v8429_v60  ;;  %v8877_v16 = vld [vmem:[%s12392_s6 + $0x5d0] sm:$0xf0] }
 0x14a   : > { %v11857_v21 = vld [vmem:[%s12392_s6 + $0x134c] sm:$0xf0]  ;;  %5383 = vmatpush.bf16.msrb.mxu2 %v8624_v19  ;;  %v8880_v27 = vor.u32 %v11417_v15, %v8877_v16  ;;  %v5113_v32 = vadd.f32 %v5112_v29, %v5099_v14  ;;  %v8173_v2 = vld [vmem:[%s12392_s6 + $0x50] sm:$0xf0] }
 0x14b   : > { %v11115_v22 = vld [vmem:[%s12392_s6 + $0x1710] sm:$0xf]  ;;  %v10604_v33 = vor.u32 %v11857_v21, %v10603_v20  ;;  %5369 = vmatpush.bf16.msrb.mxu1 %v11180_v18  ;;  %5349 = vmatmul.bf16.vlgmr.msra.gmra.mxu3 %v12533_v25  ;;  %v5073_v19 = vadd.f32 %v5072_v52, %v5059_v3  ;;  %v8368_v21 = vor.u32 %v11289_v12, %v8365_v13  ;;  %v11385_v52 = vld [vmem:[%s12392_s6 + $0x494] sm:$0xf] }
 0x14c   : > { %v11985_v26 = vld [vmem:[%s12392_s6 + $0x174c] sm:$0xf0]  ;;  %5397 = vmatpush.bf16.msrb.mxu3 %v9136_v23  ;;  %v11369_v3 = vld [vmem:[%s12392_s6 + $0x414] sm:$0xf] }
 0x14d   : > { %v11116_v34 = vor.u32 %v11985_v26, %v11115_v22  ;;  %v10539_v38 = vld [vmem:[%s12392_s6 + $0x1290] sm:$0xf]  ;;  %5356 = vmatpush.bf16.msrb.mxu0 %v10604_v33  ;;  %v5086_v33 = vpop.f32.mrf.mxu0  ;;  %v10157_v12 = vld [vmem:[%s12392_s6 + $0xfd0] sm:$0xf0] }
 0x14e   : > { %v11841_v39 = vld [vmem:[%s12392_s6 + $0x12cc] sm:$0xf0]  ;;  %5384 = vmatpush.bf16.msrb.mxu2 %v8560_v36  ;;  %v11401_v36 = vld [vmem:[%s12392_s6 + $0x514] sm:$0xf] }
 0x14f   : > { %v11051_v40 = vld [vmem:[%s12392_s6 + $0x1690] sm:$0xf]  ;;  %v10540_v48 = vor.u32 %v11841_v39, %v10539_v38  ;;  %5370 = vmatpush.bf16.msrb.mxu1 %v11116_v34  ;;  %v5126_v34 = vpop.f32.mrf.mxu3  ;;  %v8813_v38 = vld [vmem:[%s12392_s6 + $0x550] sm:$0xf0] }
 0x150   : > { %v11969_v35 = vld [vmem:[%s12392_s6 + $0x16cc] sm:$0xf0]  ;;  %5398 = vmatpush.bf16.msrb.mxu3 %v9072_v42  ;;  %v5087_v42 = vadd.f32 %v5086_v33, %v5073_v19  ;;  %v8816_v47 = vor.u32 %v11401_v36, %v8813_v38  ;;  %v11865_v13 = vld [vmem:[%s12392_s6 + $0x1394] sm:$0xf] }
 0x151   : > { %v11052_v50 = vor.u32 %v11969_v35, %v11051_v40  ;;  %v10475_v53 = vld [vmem:[%s12392_s6 + $0x1210] sm:$0xf]  ;;  %5357 = vmatpush.bf16.msrb.mxu0 %v10540_v48  ;;  %v5127_v35 = vadd.f32 %v5126_v34, %v5113_v32  ;;  %v5100_v48 = vpop.f32.mrf.mxu1  ;;  %v10669_v14 = vld [vmem:[%s12392_s6 + $0x13d0] sm:$0xf0] }
 0x152   : > { %v11825_v54 = vld [vmem:[%s12392_s6 + $0x124c] sm:$0xf0]  ;;  %5385 = vmatpush.bf16.msrb.mxu2 %v8496_v51  ;;  %v8237_v51 = vld [vmem:[%s12392_s6 + $0xd0] sm:$0xf0] }
 0x153   : > { %v10987_v55 = vld [vmem:[%s12392_s6 + $0x1610] sm:$0xf]  ;;  %v10476_v1 = vor.u32 %v11825_v54, %v10475_v53  ;;  %5371 = vmatpush.bf16.msrb.mxu1 %v11052_v50  ;;  %v11257_v50 = vld [vmem:[%s12392_s6 + $0x94] sm:$0xf]  ;;  %6313 = vst [vmem:[%s12908_s27 + $0x8] sm:$0xff] %v5127_v35 }
 0x154   : > { %v11953_v57 = vld [vmem:[%s12392_s6 + $0x164c] sm:$0xf0]  ;;  %5399 = vmatpush.bf16.msrb.mxu3 %v9008_v56  ;;  %v8749_v53 = vld [vmem:[%s12392_s6 + $0x4d0] sm:$0xf0]  ;;  %v8240_v60 = vor.u32 %v11257_v50, %v8237_v51 }
 0x155   : > { %v10988_v4 = vor.u32 %v11953_v57, %v10987_v55  ;;  %v10411_v6 = vld [vmem:[%s12392_s6 + $0x1190] sm:$0xf]  ;;  %5358 = vmatpush.bf16.msrb.mxu0 %v10476_v1  ;;  %v5101_v57 = vadd.f32 %v5100_v48, %v5087_v42  ;;  %v8752_v0 = vor.u32 %v11385_v52, %v8749_v53  ;;  %v5114_v1 = vpop.f32.mrf.mxu2  ;;  %v11181_v19 = vld [vmem:[%s12392_s6 + $0x17d0] sm:$0xf0] }
 0x156   : > { %v11809_v7 = vld [vmem:[%s12392_s6 + $0x11cc] sm:$0xf0]  ;;  %5386 = vmatpush.bf16.msrb.mxu2 %v8432_v5  ;;  %v11721_v29 = vld [vmem:[%s12392_s6 + $0xf14] sm:$0xf] }
 0x157   : > { %v10923_v9 = vld [vmem:[%s12392_s6 + $0x1590] sm:$0xf]  ;;  %v10412_v17 = vor.u32 %v11809_v7, %v10411_v6  ;;  %5372 = vmatpush.bf16.msrb.mxu1 %v10988_v4  ;;  %v8685_v4 = vld [vmem:[%s12392_s6 + $0x450] sm:$0xf0]  ;;  %v5115_v5 = vadd.f32 %v5114_v1, %v5101_v57  ;;  %v5128_v6 = vpop.f32.mrf.mxu3 }
 0x158   : > { %v11937_v11 = vld [vmem:[%s12392_s6 + $0x15cc] sm:$0xf0]  ;;  %5400 = vmatpush.bf16.msrb.mxu3 %v8944_v10  ;;  %v11609_v7 = vld [vmem:[%s12392_s6 + $0xb94] sm:$0xf] }
 0x159   : > { %v10347_v18 = vld [vmem:[%s12392_s6 + $0x1110] sm:$0xf]  ;;  %v10924_v20 = vor.u32 %v11937_v11, %v10923_v9  ;;  %5359 = vmatpush.bf16.msrb.mxu0 %v10412_v17  ;;  %v9645_v9 = vld [vmem:[%s12392_s6 + $0xbd0] sm:$0xf0]  ;;  %v5129_v15 = vadd.f32 %v5128_v6, %v5115_v5  ;;  %v8176_v17 = vor.u32 %v11241_v63, %v8173_v2 }
 0x15a   : > { %v11793_v22 = vld [vmem:[%s12392_s6 + $0x114c] sm:$0xf0]  ;;  %5387 = vmatpush.bf16.msrb.mxu2 %v8368_v21  ;;  %v11737_v10 = vld [vmem:[%s12392_s6 + $0xf94] sm:$0xf]  ;;  %v9648_v21 = vor.u32 %v11609_v7, %v9645_v9 }
 0x15b   : > { %v10859_v23 = vld [vmem:[%s12392_s6 + $0x1510] sm:$0xf]  ;;  %v10348_v39 = vor.u32 %v11793_v22, %v10347_v18  ;;  %5373 = vmatpush.bf16.msrb.mxu1 %v10924_v20  ;;  %v11993_v18 = vld [vmem:[%s12392_s6 + $0x1794] sm:$0xf]  ;;  %v8688_v20 = vor.u32 %v11369_v3, %v8685_v4  ;;  %6329 = vst [vmem:[%s12908_s27 + $0x788] sm:$0xff] %v5129_v15 }
 0x15c   : > { %v11921_v26 = vld [vmem:[%s12392_s6 + $0x154c] sm:$0xf0]  ;;  %5401 = vmatpush.bf16.msrb.mxu3 %v8880_v27  ;;  %v11593_v22 = vld [vmem:[%s12392_s6 + $0xb14] sm:$0xf]  ;;  %v11184_v30 = vor.u32 %v11993_v18, %v11181_v19 }
 0x15d   : > { %v10860_v40 = vor.u32 %v11921_v26, %v10859_v23  ;;  %v10283_v44 = vld [vmem:[%s12392_s6 + $0x1090] sm:$0xf]  ;;  %5360 = vmatpush.bf16.msrb.mxu0 %v10348_v39  ;;  %v10160_v23 = vor.u32 %v11737_v10, %v10157_v12  ;;  %v10672_v26 = vor.u32 %v11865_v13, %v10669_v14  ;;  %v9581_v27 = vld [vmem:[%s12392_s6 + $0xb50] sm:$0xf0]  ;;  %v10096_v39 = vor.u32 %v11721_v29, %v10093_v31  ;;  %v5140_v31 = vpop.f32.mrf.mxu0 }
 0x15e   : > { %v11777_v45 = vld [vmem:[%s12392_s6 + $0x10cc] sm:$0xf0]  ;;  %5388 = vmatpush.bf16.msrb.mxu2 %v8304_v43  ;;  %v11849_v32 = vld [vmem:[%s12392_s6 + $0x1314] sm:$0xf]  ;;  %v9584_v38 = vor.u32 %v11593_v22, %v9581_v27  ;;  %v1063_v27 = vperm.slane %v12840_v28, 2 }
 0x15f   : > { %v10795_v46 = vld [vmem:[%s12392_s6 + $0x1490] sm:$0xf]  ;;  %v10284_v54 = vor.u32 %v11777_v45, %v10283_v44  ;;  %5374 = vmatpush.bf16.msrb.mxu1 %v10860_v40  ;;  %v10605_v33 = vld [vmem:[%s12392_s6 + $0x1350] sm:$0xf0]  ;;  %v9523_v28 = vld [vmem:[%s12392_s6 + $0xa98] sm:$0xf] }
 0x160   : > { %v11905_v49 = vld [vmem:[%s12392_s6 + $0x14cc] sm:$0xf0]  ;;  %5402 = vmatpush.bf16.msrb.mxu3 %v8816_v47  ;;  %v11977_v34 = vld [vmem:[%s12392_s6 + $0x1714] sm:$0xf]  ;;  %v10608_v40 = vor.u32 %v11849_v32, %v10605_v33 }
 0x161   : > { %v10219_v55 = vld [vmem:[%s12392_s6 + $0x1010] sm:$0xf]  ;;  %v10796_v58 = vor.u32 %v11905_v49, %v10795_v46  ;;  %5361 = vmatpush.bf16.msrb.mxu0 %v10284_v54  ;;  %v11117_v36 = vld [vmem:[%s12392_s6 + $0x1750] sm:$0xf0] }
 0x162   : > { %v11761_v56 = vld [vmem:[%s12392_s6 + $0x104c] sm:$0xf0]  ;;  %5389 = vmatpush.bf16.msrb.mxu2 %v8240_v60  ;;  %v11577_v42 = vld [vmem:[%s12392_s6 + $0xa94] sm:$0xf]  ;;  %v11120_v44 = vor.u32 %v11977_v34, %v11117_v36 }
 0x163   : > { %v10731_v61 = vld [vmem:[%s12392_s6 + $0x1410] sm:$0xf]  ;;  %v10220_v11 = vor.u32 %v11761_v56, %v10219_v55  ;;  %5375 = vmatpush.bf16.msrb.mxu1 %v10796_v58  ;;  %v9517_v35 = vld [vmem:[%s12392_s6 + $0xad0] sm:$0xf0] }
 0x164   : > { %v11889_v62 = vld [vmem:[%s12392_s6 + $0x144c] sm:$0xf0]  ;;  %5403 = vmatpush.bf16.msrb.mxu3 %v8752_v0  ;;  %v11705_v43 = vld [vmem:[%s12392_s6 + $0xe94] sm:$0xf]  ;;  %v9520_v50 = vor.u32 %v11577_v42, %v9517_v35  ;;  %v5154_v42 = vpop.f32.mrf.mxu1 }
 0x165   : > { %v10732_v16 = vor.u32 %v11889_v62, %v10731_v61  ;;  %5362 = vmatpush.bf16.msrb.mxu0 %v10220_v11  ;;  %v10029_v45 = vld [vmem:[%s12392_s6 + $0xed0] sm:$0xf0] }
 0x166   : > { %5390 = vmatpush.bf16.msrb.mxu2 %v8176_v17  ;;  %v11833_v46 = vld [vmem:[%s12392_s6 + $0x1294] sm:$0xf]  ;;  %v10032_v51 = vor.u32 %v11705_v43, %v10029_v45 }
 0x167   : > { %5376 = vmatpush.bf16.msrb.mxu1 %v10732_v16  ;;  %v10541_v47 = vld [vmem:[%s12392_s6 + $0x12d0] sm:$0xf0] }
 0x168   : > { %5404 = vmatpush.bf16.msrb.mxu3 %v8688_v20  ;;  %5363 = vmatmul.bf16.vlgmr.msrb.gmra.mxu0 %v12592_v37  ;;  %v11961_v48 = vld [vmem:[%s12392_s6 + $0x1694] sm:$0xf]  ;;  %v10544_v52 = vor.u32 %v11833_v46, %v10541_v47 }
 0x169   : > { %5411 = vmatpush.bf16.msra.mxu0 %v9648_v21  ;;  %v11053_v49 = vld [vmem:[%s12392_s6 + $0x16d0] sm:$0xf0]  ;;  %5391 = vmatmul.bf16.vlgmr.msrb.gmra.mxu2 %v12493_v59 }
 0x16a   : > { %5439 = vmatpush.bf16.msra.mxu2 %v10672_v26  ;;  %5377 = vmatmul.bf16.vlgmr.msrb.gmra.mxu1 %v12597_v41  ;;  %v11561_v53 = vld [vmem:[%s12392_s6 + $0xa14] sm:$0xf]  ;;  %v11056_v56 = vor.u32 %v11961_v48, %v11053_v49 }
 0x16b   : > { %5425 = vmatpush.bf16.msra.mxu1 %v10160_v23  ;;  %5405 = vmatmul.bf16.vlgmr.msrb.gmra.mxu3 %v12509_v8  ;;  %v9453_v54 = vld [vmem:[%s12392_s6 + $0xa50] sm:$0xf0] }
 0x16c   : > { %5453 = vmatpush.bf16.msra.mxu3 %v11184_v30  ;;  %v11689_v55 = vld [vmem:[%s12392_s6 + $0xe14] sm:$0xf]  ;;  %v9456_v63 = vor.u32 %v11561_v53, %v9453_v54 }
 0x16d   : > { %5412 = vmatpush.bf16.msra.mxu0 %v9584_v38  ;;  %v9965_v57 = vld [vmem:[%s12392_s6 + $0xe50] sm:$0xf0] }
 0x16e   : > { %5440 = vmatpush.bf16.msra.mxu2 %v10608_v40  ;;  %v11817_v58 = vld [vmem:[%s12392_s6 + $0x1214] sm:$0xf]  ;;  %v9968_v0 = vor.u32 %v11689_v55, %v9965_v57  ;;  %v8627_v57 = vld [vmem:[%s12392_s6 + $0x398] sm:$0xf] }
 0x16f   : > { %5426 = vmatpush.bf16.msra.mxu1 %v10096_v39  ;;  %v10477_v60 = vld [vmem:[%s12392_s6 + $0x1250] sm:$0xf0] }
 0x170   : > { %5454 = vmatpush.bf16.msra.mxu3 %v11120_v44  ;;  %v11945_v61 = vld [vmem:[%s12392_s6 + $0x1614] sm:$0xf]  ;;  %v10480_v1 = vor.u32 %v11817_v58, %v10477_v60  ;;  %v11362_v58 = vld [vmem:[%s12392_s6 + $0x3d4] sm:$0xf0] }
 0x171   : > { %v10989_v62 = vld [vmem:[%s12392_s6 + $0x1650] sm:$0xf0]  ;;  %5413 = vmatpush.bf16.msra.mxu0 %v9520_v50  ;;  %v9139_v60 = vld [vmem:[%s12392_s6 + $0x798] sm:$0xf] }
 0x172   : > { %5441 = vmatpush.bf16.msra.mxu2 %v10544_v52  ;;  %v11545_v2 = vld [vmem:[%s12392_s6 + $0x994] sm:$0xf]  ;;  %v10992_v5 = vor.u32 %v11945_v61, %v10989_v62  ;;  %v5141_v52 = vadd.f32 %v5140_v31, %v1063_v27  ;;  %v11490_v62 = vld [vmem:[%s12392_s6 + $0x7d4] sm:$0xf0] }
 0x173   : > { %5427 = vmatpush.bf16.msra.mxu1 %v10032_v51  ;;  %v9389_v3 = vld [vmem:[%s12392_s6 + $0x9d0] sm:$0xf0] }
 0x174   : > { %v11673_v4 = vld [vmem:[%s12392_s6 + $0xd94] sm:$0xf]  ;;  %5455 = vmatpush.bf16.msra.mxu3 %v11056_v56  ;;  %v9392_v12 = vor.u32 %v11545_v2, %v9389_v3  ;;  %v10163_v3 = vld [vmem:[%s12392_s6 + $0xf98] sm:$0xf] }
 0x175   : > { %v9901_v6 = vld [vmem:[%s12392_s6 + $0xdd0] sm:$0xf0]  ;;  %5414 = vmatpush.bf16.msra.mxu0 %v9456_v63  ;;  %v9651_v63 = vld [vmem:[%s12392_s6 + $0xb98] sm:$0xf] }
 0x176   : > { %v11801_v7 = vld [vmem:[%s12392_s6 + $0x1194] sm:$0xf]  ;;  %5442 = vmatpush.bf16.msra.mxu2 %v10480_v1  ;;  %v9904_v13 = vor.u32 %v11673_v4, %v9901_v6  ;;  %v11746_v4 = vld [vmem:[%s12392_s6 + $0xfd4] sm:$0xf0]  ;;  %v5155_v6 = vadd.f32 %v5154_v42, %v5141_v52 }
 0x177   : > { %v10413_v9 = vld [vmem:[%s12392_s6 + $0x11d0] sm:$0xf0]  ;;  %5428 = vmatpush.bf16.msra.mxu1 %v9968_v0  ;;  %v11618_v0 = vld [vmem:[%s12392_s6 + $0xbd4] sm:$0xf0] }
 0x178   : > { %v11929_v10 = vld [vmem:[%s12392_s6 + $0x1594] sm:$0xf]  ;;  %v10416_v14 = vor.u32 %v11801_v7, %v10413_v9  ;;  %5456 = vmatpush.bf16.msra.mxu3 %v10992_v5  ;;  %v5168_v5 = vpop.f32.mrf.mxu2  ;;  %v8628_v9 = vor.u32 %v11362_v58, %v8627_v57  ;;  %v11714_v42 = vld [vmem:[%s12392_s6 + $0xed4] sm:$0xf0] }
 0x179   : > { %v10925_v11 = vld [vmem:[%s12392_s6 + $0x15d0] sm:$0xf0]  ;;  %5415 = vmatpush.bf16.msra.mxu0 %v9392_v12  ;;  %v5142_v12 = vpop.f32.mrf.mxu0  ;;  %v11442_v52 = vld [vmem:[%s12392_s6 + $0x654] sm:$0xf0] }
 0x17a   : > { %v11529_v15 = vld [vmem:[%s12392_s6 + $0x914] sm:$0xf]  ;;  %v10928_v18 = vor.u32 %v11929_v10, %v10925_v11  ;;  %5443 = vmatpush.bf16.msra.mxu2 %v10416_v14  ;;  %v9140_v10 = vor.u32 %v11490_v62, %v9139_v60  ;;  %v9652_v11 = vor.u32 %v11618_v0, %v9651_v63  ;;  %v11346_v14 = vld [vmem:[%s12392_s6 + $0x354] sm:$0xf0] }
 0x17b   : > { %v9325_v16 = vld [vmem:[%s12392_s6 + $0x950] sm:$0xf0]  ;;  %5429 = vmatpush.bf16.msra.mxu1 %v9904_v13  ;;  %v8563_v13 = vld [vmem:[%s12392_s6 + $0x318] sm:$0xf] }
 0x17c   : > { %v11657_v17 = vld [vmem:[%s12392_s6 + $0xd14] sm:$0xf]  ;;  %v9328_v26 = vor.u32 %v11529_v15, %v9325_v16  ;;  %5457 = vmatpush.bf16.msra.mxu3 %v10928_v18  ;;  %v9075_v15 = vld [vmem:[%s12392_s6 + $0x718] sm:$0xf]  ;;  %v10164_v16 = vor.u32 %v11746_v4, %v10163_v3 }
 0x17d   : > { %v9837_v19 = vld [vmem:[%s12392_s6 + $0xd50] sm:$0xf0]  ;;  %v9587_v18 = vld [vmem:[%s12392_s6 + $0xb18] sm:$0xf] }
 0x17e   : > { %v11785_v20 = vld [vmem:[%s12392_s6 + $0x1114] sm:$0xf]  ;;  %v9840_v29 = vor.u32 %v11657_v17, %v9837_v19  ;;  %5416 = vmatpush.bf16.msra.mxu0 %v9328_v26  ;;  %v11474_v17 = vld [vmem:[%s12392_s6 + $0x754] sm:$0xf0]  ;;  %v5143_v26 = vadd.f32 %v5142_v12, %v1063_v27 }
 0x17f   : > { %v10349_v21 = vld [vmem:[%s12392_s6 + $0x1150] sm:$0xf0]  ;;  %v11602_v19 = vld [vmem:[%s12392_s6 + $0xb54] sm:$0xf0]  ;;  %v9076_v31 = vor.u32 %v11474_v17, %v9075_v15 }
 0x180   : > { %v11913_v22 = vld [vmem:[%s12392_s6 + $0x1514] sm:$0xf]  ;;  %v10352_v30 = vor.u32 %v11785_v20, %v10349_v21  ;;  %5430 = vmatpush.bf16.msra.mxu1 %v9840_v29  ;;  %v5156_v20 = vpop.f32.mrf.mxu1  ;;  %v10099_v21 = vld [vmem:[%s12392_s6 + $0xf18] sm:$0xf]  ;;  %v8564_v29 = vor.u32 %v11346_v14, %v8563_v13 }
 0x181   : > { %v10861_v23 = vld [vmem:[%s12392_s6 + $0x1550] sm:$0xf0]  ;;  %v11586_v27 = vld [vmem:[%s12392_s6 + $0xad4] sm:$0xf0] }
 0x182   : > { %v11513_v32 = vld [vmem:[%s12392_s6 + $0x894] sm:$0xf]  ;;  %v10864_v36 = vor.u32 %v11913_v22, %v10861_v23  ;;  %5444 = vmatpush.bf16.msra.mxu2 %v10352_v30  ;;  %v11730_v22 = vld [vmem:[%s12392_s6 + $0xf54] sm:$0xf0]  ;;  %v5182_v23 = vpop.f32.mrf.mxu3  ;;  %v5169_v30 = vadd.f32 %v5168_v5, %v5155_v6 }
 0x183   : > { %v9261_v33 = vld [vmem:[%s12392_s6 + $0x8d0] sm:$0xf0]  ;;  %v11698_v57 = vld [vmem:[%s12392_s6 + $0xe54] sm:$0xf0] }
 0x184   : > { %v11641_v34 = vld [vmem:[%s12392_s6 + $0xc94] sm:$0xf]  ;;  %v9264_v44 = vor.u32 %v11513_v32, %v9261_v33  ;;  %5458 = vmatpush.bf16.msra.mxu3 %v10864_v36  ;;  %v9588_v32 = vor.u32 %v11602_v19, %v9587_v18  ;;  %v8499_v33 = vld [vmem:[%s12392_s6 + $0x298] sm:$0xf] }
 0x185   : > { %v9773_v38 = vld [vmem:[%s12392_s6 + $0xcd0] sm:$0xf0]  ;;  %v9011_v36 = vld [vmem:[%s12392_s6 + $0x698] sm:$0xf] }
 0x186   : > { %v11769_v39 = vld [vmem:[%s12392_s6 + $0x1094] sm:$0xf]  ;;  %v9776_v47 = vor.u32 %v11641_v34, %v9773_v38  ;;  %5417 = vmatpush.bf16.msra.mxu0 %v9264_v44  ;;  %v11330_v34 = vld [vmem:[%s12392_s6 + $0x2d4] sm:$0xf0]  ;;  %v10100_v38 = vor.u32 %v11730_v22, %v10099_v21  ;;  %v5183_v44 = vadd.f32 %v5182_v23, %v5169_v30 }
 0x187   : > { %v10285_v40 = vld [vmem:[%s12392_s6 + $0x10d0] sm:$0xf0]  ;;  %v8883_v3 = vld [vmem:[%s12392_s6 + $0x598] sm:$0xf] }
 0x188   : > { %v11897_v35 = vld [vmem:[%s12392_s6 + $0x1494] sm:$0xf]  ;;  %v10288_v48 = vor.u32 %v11769_v39, %v10285_v40  ;;  %5431 = vmatpush.bf16.msra.mxu1 %v9776_v47  ;;  %v11458_v39 = vld [vmem:[%s12392_s6 + $0x6d4] sm:$0xf0] }
 0x189   : > { %v10797_v43 = vld [vmem:[%s12392_s6 + $0x14d0] sm:$0xf0]  ;;  %v10035_v40 = vld [vmem:[%s12392_s6 + $0xe98] sm:$0xf] }
 0x18a   : > { %v11497_v45 = vld [vmem:[%s12392_s6 + $0x814] sm:$0xf]  ;;  %v10800_v53 = vor.u32 %v11897_v35, %v10797_v43  ;;  %5445 = vmatpush.bf16.msra.mxu2 %v10288_v48  ;;  %v5157_v35 = vadd.f32 %v5156_v20, %v5143_v26  ;;  %v8500_v43 = vor.u32 %v11330_v34, %v8499_v33  ;;  %v8435_v47 = vld [vmem:[%s12392_s6 + $0x218] sm:$0xf]  ;;  %v5184_v4 = vpop.f32.mrf.mxu3 }
 0x18b   : > { %v9197_v46 = vld [vmem:[%s12392_s6 + $0x850] sm:$0xf0]  ;;  %v11314_v48 = vld [vmem:[%s12392_s6 + $0x254] sm:$0xf0] }
 0x18c   : > { %v11625_v49 = vld [vmem:[%s12392_s6 + $0xc14] sm:$0xf]  ;;  %v9200_v61 = vor.u32 %v11497_v45, %v9197_v46  ;;  %5459 = vmatpush.bf16.msra.mxu3 %v10800_v53  ;;  %v9012_v45 = vor.u32 %v11458_v39, %v9011_v36  ;;  %v9524_v46 = vor.u32 %v11586_v27, %v9523_v28  ;;  %v9459_v53 = vld [vmem:[%s12392_s6 + $0xa18] sm:$0xf]  ;;  %v8436_v60 = vor.u32 %v11314_v48, %v8435_v47 }
 0x18d   : > { %v9709_v50 = vld [vmem:[%s12392_s6 + $0xc50] sm:$0xf0]  ;;  %v11682_v12 = vld [vmem:[%s12392_s6 + $0xdd4] sm:$0xf0] }
 0x18e   : > { %v11753_v51 = vld [vmem:[%s12392_s6 + $0x1014] sm:$0xf]  ;;  %v9712_v1 = vor.u32 %v11625_v49, %v9709_v50  ;;  %5418 = vmatpush.bf16.msra.mxu0 %v9200_v61  ;;  %v8947_v49 = vld [vmem:[%s12392_s6 + $0x618] sm:$0xf]  ;;  %v5170_v50 = vpop.f32.mrf.mxu2  ;;  %v5210_v61 = vpop.f32.mrf.mxu1 }
 0x18f   : > { %v10221_v54 = vld [vmem:[%s12392_s6 + $0x1050] sm:$0xf0]  ;;  %v5171_v62 = vadd.f32 %v5170_v50, %v5157_v35  ;;  %v8948_v63 = vor.u32 %v11442_v52, %v8947_v49  ;;  %v8307_v17 = vld [vmem:[%s12392_s6 + $0x118] sm:$0xf] }
 0x190   : > { %v11881_v55 = vld [vmem:[%s12392_s6 + $0x1414] sm:$0xf]  ;;  %v10224_v2 = vor.u32 %v11753_v51, %v10221_v54  ;;  %5432 = vmatpush.bf16.msra.mxu1 %v9712_v1  ;;  %v10036_v51 = vor.u32 %v11714_v42, %v10035_v40  ;;  %v11570_v54 = vld [vmem:[%s12392_s6 + $0xa54] sm:$0xf0] }
 0x191   : > { %v10733_v56 = vld [vmem:[%s12392_s6 + $0x1450] sm:$0xf0]  ;;  %5419 = vmatmul.bf16.vlgmr.msra.gmra.mxu0 %v12531_v24  ;;  %v9460_v0 = vor.u32 %v11570_v54, %v9459_v53  ;;  %v8371_v1 = vld [vmem:[%s12392_s6 + $0x198] sm:$0xf]  ;;  %v5185_v14 = vadd.f32 %v5184_v4, %v5171_v62 }
 0x192   : > { %v10736_v7 = vor.u32 %v11881_v55, %v10733_v56  ;;  %5446 = vmatpush.bf16.msra.mxu2 %v10224_v2  ;;  %5467 = vmatpush.bf16.msrb.mxu0 %v8628_v9  ;;  %v5196_v55 = vpop.f32.mrf.mxu0  ;;  %v9971_v56 = vld [vmem:[%s12392_s6 + $0xe18] sm:$0xf] }
 0x193   : > { %5433 = vmatmul.bf16.vlgmr.msra.gmra.mxu1 %v12533_v25  ;;  %v5197_v58 = vadd.f32 %v5196_v55, %v5183_v44  ;;  %v11298_v2 = vld [vmem:[%s12392_s6 + $0x1d4] sm:$0xf0]  ;;  %v9972_v5 = vor.u32 %v11698_v57, %v9971_v56 }
 0x194   : > { %5460 = vmatpush.bf16.msra.mxu3 %v10736_v7  ;;  %5481 = vmatpush.bf16.msrb.mxu1 %v9140_v10  ;;  %v11426_v7 = vld [vmem:[%s12392_s6 + $0x5d4] sm:$0xf0]  ;;  %v8372_v13 = vor.u32 %v11298_v2, %v8371_v1  ;;  %v8629_v1 = vld [vmem:[%s12392_s6 + $0x3d8] sm:$0xf0] }
 0x195   : > { %5447 = vmatmul.bf16.vlgmr.msra.gmra.mxu2 %v12592_v37  ;;  %v5211_v6 = vadd.f32 %v5210_v61, %v5197_v58  ;;  %v9395_v9 = vld [vmem:[%s12392_s6 + $0x998] sm:$0xf]  ;;  %v8884_v15 = vor.u32 %v11426_v7, %v8883_v3  ;;  %v5238_v7 = vpop.f32.mrf.mxu3 }
 0x196   : > { %5495 = vmatpush.bf16.msrb.mxu2 %v9652_v11  ;;  %5468 = vmatpush.bf16.msrb.mxu0 %v8564_v29  ;;  %v11554_v10 = vld [vmem:[%s12392_s6 + $0x9d4] sm:$0xf0]  ;;  %v5212_v33 = vpop.f32.mrf.mxu1  ;;  %v5224_v2 = vpop.f32.mrf.mxu2 }
 0x197   : > { %5461 = vmatmul.bf16.vlgmr.msra.gmra.mxu3 %v12597_v41  ;;  %v9907_v11 = vld [vmem:[%s12392_s6 + $0xd98] sm:$0xf]  ;;  %6314 = vst [vmem:[%s12908_s27 + $0x10] sm:$0xff] %v5211_v6  ;;  %v9141_v6 = vld [vmem:[%s12392_s6 + $0x7d8] sm:$0xf0] }
 0x198   : > { %5509 = vmatpush.bf16.msrb.mxu3 %v10164_v16  ;;  %5482 = vmatpush.bf16.msrb.mxu1 %v9076_v31  ;;  %v9396_v16 = vor.u32 %v11554_v10, %v9395_v9  ;;  %v11282_v18 = vld [vmem:[%s12392_s6 + $0x154] sm:$0xf0]  ;;  %v9908_v20 = vor.u32 %v11682_v12, %v9907_v11  ;;  %v13171_v11 = vld [vmem:[%s12398_s9] sm:$0xff] }
 0x199   : > { %v8819_v19 = vld [vmem:[%s12392_s6 + $0x518] sm:$0xf]  ;;  %v1064_v12 = vperm.slane %v13171_v11, 3 }
 0x19a   : > { %5496 = vmatpush.bf16.msrb.mxu2 %v9588_v32  ;;  %5469 = vmatpush.bf16.msrb.mxu0 %v8500_v43  ;;  %v11410_v21 = vld [vmem:[%s12392_s6 + $0x554] sm:$0xf0]  ;;  %v5198_v26 = vpop.f32.mrf.mxu0  ;;  %v8308_v32 = vor.u32 %v11282_v18, %v8307_v17 }
 0x19b   : > { %v9331_v22 = vld [vmem:[%s12392_s6 + $0x918] sm:$0xf]  ;;  %v5199_v31 = vadd.f32 %v5198_v26, %v5185_v14  ;;  %v8820_v34 = vor.u32 %v11410_v21, %v8819_v19  ;;  %v8565_v21 = vld [vmem:[%s12392_s6 + $0x358] sm:$0xf0]  ;;  %v5225_v26 = vadd.f32 %v5224_v2, %v1064_v12 }
 0x19c   : > { %5510 = vmatpush.bf16.msrb.mxu3 %v10100_v38  ;;  %5483 = vmatpush.bf16.msrb.mxu1 %v9012_v45  ;;  %v11538_v23 = vld [vmem:[%s12392_s6 + $0x954] sm:$0xf0] }
 0x19d   : > { %v9843_v29 = vld [vmem:[%s12392_s6 + $0xd18] sm:$0xf]  ;;  %v9332_v36 = vor.u32 %v11538_v23, %v9331_v22  ;;  %v5213_v40 = vadd.f32 %v5212_v33, %v5199_v31  ;;  %v11466_v22 = vld [vmem:[%s12392_s6 + $0x71c] sm:$0xf] }
 0x19e   : > { %5497 = vmatpush.bf16.msrb.mxu2 %v9524_v46  ;;  %5470 = vmatpush.bf16.msrb.mxu0 %v8436_v60  ;;  %v11666_v30 = vld [vmem:[%s12392_s6 + $0xd54] sm:$0xf0]  ;;  %v9077_v23 = vld [vmem:[%s12392_s6 + $0x758] sm:$0xf0] }
 0x19f   : > { %v8243_v38 = vld [vmem:[%s12392_s6 + $0x98] sm:$0xf]  ;;  %v9844_v27 = vor.u32 %v11666_v30, %v9843_v29  ;;  %6330 = vst [vmem:[%s12908_s27 + $0x790] sm:$0xff] %v5213_v40  ;;  %v9013_v40 = vld [vmem:[%s12392_s6 + $0x6d8] sm:$0xf0] }
 0x1a0   : > { %5511 = vmatpush.bf16.msrb.mxu3 %v10036_v51  ;;  %5484 = vmatpush.bf16.msrb.mxu1 %v8948_v63  ;;  %v11266_v39 = vld [vmem:[%s12392_s6 + $0xd4] sm:$0xf0] }
 0x1a1   : > { %v8755_v28 = vld [vmem:[%s12392_s6 + $0x498] sm:$0xf]  ;;  %v8244_v46 = vor.u32 %v11266_v39, %v8243_v38  ;;  %v11322_v39 = vld [vmem:[%s12392_s6 + $0x29c] sm:$0xf] }
 0x1a2   : > { %5498 = vmatpush.bf16.msrb.mxu2 %v9460_v0  ;;  %5471 = vmatpush.bf16.msrb.mxu0 %v8372_v13  ;;  %v11394_v42 = vld [vmem:[%s12392_s6 + $0x4d4] sm:$0xf0]  ;;  %v11354_v0 = vld [vmem:[%s12392_s6 + $0x39c] sm:$0xf] }
 0x1a3   : > { %v9267_v35 = vld [vmem:[%s12392_s6 + $0x898] sm:$0xf]  ;;  %v8756_v49 = vor.u32 %v11394_v42, %v8755_v28  ;;  %v8632_v14 = vor.u32 %v11354_v0, %v8629_v1  ;;  %v8501_v28 = vld [vmem:[%s12392_s6 + $0x2d8] sm:$0xf0]  ;;  %v5239_v42 = vadd.f32 %v5238_v7, %v5225_v26 }
 0x1a4   : > { %5512 = vmatpush.bf16.msrb.mxu3 %v9972_v5  ;;  %5485 = vmatpush.bf16.msrb.mxu1 %v8884_v15  ;;  %v11522_v43 = vld [vmem:[%s12392_s6 + $0x8d4] sm:$0xf0]  ;;  %v11482_v5 = vld [vmem:[%s12392_s6 + $0x79c] sm:$0xf] }
 0x1a5   : > { %v9779_v44 = vld [vmem:[%s12392_s6 + $0xc98] sm:$0xf]  ;;  %v9268_v50 = vor.u32 %v11522_v43, %v9267_v35  ;;  %v9144_v18 = vor.u32 %v11482_v5, %v9141_v6  ;;  %v5226_v43 = vpop.f32.mrf.mxu2  ;;  %v11290_v5 = vld [vmem:[%s12392_s6 + $0x19c] sm:$0xf] }
 0x1a6   : > { %5499 = vmatpush.bf16.msrb.mxu2 %v9396_v16  ;;  %v11650_v45 = vld [vmem:[%s12392_s6 + $0xcd4] sm:$0xf0]  ;;  %5472 = vmatpush.bf16.msrb.mxu0 %v8308_v32  ;;  %v8373_v6 = vld [vmem:[%s12392_s6 + $0x1d8] sm:$0xf0] }
 0x1a7   : > { %v8179_v47 = vld [vmem:[%s12392_s6 + $0x18] sm:$0xf]  ;;  %v9780_v54 = vor.u32 %v11650_v45, %v9779_v44  ;;  %v8504_v45 = vor.u32 %v11322_v39, %v8501_v28 }
 0x1a8   : > { %5513 = vmatpush.bf16.msrb.mxu3 %v9908_v20  ;;  %v11250_v48 = vld [vmem:[%s12392_s6 + $0x54] sm:$0xf0]  ;;  %5486 = vmatpush.bf16.msrb.mxu1 %v8820_v34  ;;  %v11338_v20 = vld [vmem:[%s12392_s6 + $0x31c] sm:$0xf] }
 0x1a9   : > { %v8691_v51 = vld [vmem:[%s12392_s6 + $0x418] sm:$0xf]  ;;  %v8180_v62 = vor.u32 %v11250_v48, %v8179_v47  ;;  %v8568_v31 = vor.u32 %v11338_v20, %v8565_v21 }
 0x1aa   : > { %5500 = vmatpush.bf16.msrb.mxu2 %v9332_v36  ;;  %v11378_v52 = vld [vmem:[%s12392_s6 + $0x454] sm:$0xf0]  ;;  %5473 = vmatpush.bf16.msrb.mxu0 %v8244_v46  ;;  %v9080_v36 = vor.u32 %v11466_v22, %v9077_v23  ;;  %v5240_v46 = vpop.f32.mrf.mxu3  ;;  %v11274_v22 = vld [vmem:[%s12392_s6 + $0x11c] sm:$0xf] }
 0x1ab   : > { %v9203_v53 = vld [vmem:[%s12392_s6 + $0x818] sm:$0xf]  ;;  %v8692_v3 = vor.u32 %v11378_v52, %v8691_v51  ;;  %v11306_v52 = vld [vmem:[%s12392_s6 + $0x21c] sm:$0xf] }
 0x1ac   : > { %5514 = vmatpush.bf16.msrb.mxu3 %v9844_v27  ;;  %v11506_v55 = vld [vmem:[%s12392_s6 + $0x854] sm:$0xf0]  ;;  %5487 = vmatpush.bf16.msrb.mxu1 %v8756_v49  ;;  %v11450_v27 = vld [vmem:[%s12392_s6 + $0x69c] sm:$0xf] }
 0x1ad   : > { %v9715_v56 = vld [vmem:[%s12392_s6 + $0xc18] sm:$0xf]  ;;  %v9204_v4 = vor.u32 %v11506_v55, %v9203_v53  ;;  %v8437_v53 = vld [vmem:[%s12392_s6 + $0x258] sm:$0xf0]  ;;  %v5280_v21 = vpop.f32.mrf.mxu2 }
 0x1ae   : > { %v11634_v57 = vld [vmem:[%s12392_s6 + $0xc54] sm:$0xf0]  ;;  %5501 = vmatpush.bf16.msrb.mxu2 %v9268_v50  ;;  %5474 = vmatpush.bf16.msrb.mxu0 %v8180_v62  ;;  %v9016_v50 = vor.u32 %v11450_v27, %v9013_v40  ;;  %v11434_v55 = vld [vmem:[%s12392_s6 + $0x61c] sm:$0xf] }
 0x1af   : > { %v10675_v58 = vld [vmem:[%s12392_s6 + $0x1398] sm:$0xf]  ;;  %v9716_v9 = vor.u32 %v11634_v57, %v9715_v56  ;;  %v8949_v56 = vld [vmem:[%s12392_s6 + $0x658] sm:$0xf0] }
 0x1b0   : > { %v11874_v60 = vld [vmem:[%s12392_s6 + $0x13d4] sm:$0xf0]  ;;  %5515 = vmatpush.bf16.msrb.mxu3 %v9780_v54  ;;  %5488 = vmatpush.bf16.msrb.mxu1 %v8692_v3  ;;  %v5252_v54 = vpop.f32.mrf.mxu0  ;;  %v8952_v3 = vor.u32 %v11434_v55, %v8949_v56  ;;  %v8309_v23 = vld [vmem:[%s12392_s6 + $0x158] sm:$0xf0] }
 0x1b1   : > { %v11187_v61 = vld [vmem:[%s12392_s6 + $0x1798] sm:$0xf]  ;;  %v10676_v10 = vor.u32 %v11874_v60, %v10675_v58  ;;  %5475 = vmatmul.bf16.vlgmr.msrb.gmra.mxu0 %v12493_v59  ;;  %v5253_v57 = vadd.f32 %v5252_v54, %v5239_v42  ;;  %v5266_v60 = vpop.f32.mrf.mxu1  ;;  %v8312_v39 = vor.u32 %v11274_v22, %v8309_v23  ;;  %v11242_v56 = vld [vmem:[%s12392_s6 + $0x1c] sm:$0xf] }
 0x1b2   : > { %v12002_v63 = vld [vmem:[%s12392_s6 + $0x17d4] sm:$0xf0]  ;;  %5502 = vmatpush.bf16.msrb.mxu2 %v9204_v4  ;;  %v10101_v23 = vld [vmem:[%s12392_s6 + $0xf58] sm:$0xf0] }
 0x1b3   : > { %v11188_v13 = vor.u32 %v12002_v63, %v11187_v61  ;;  %v10611_v15 = vld [vmem:[%s12392_s6 + $0x1318] sm:$0xf]  ;;  %5523 = vmatpush.bf16.msra.mxu0 %v10676_v10  ;;  %5489 = vmatmul.bf16.vlgmr.msrb.gmra.mxu1 %v12509_v8  ;;  %v5227_v61 = vadd.f32 %v5226_v43, %v1064_v12  ;;  %v8440_v63 = vor.u32 %v11306_v52, %v8437_v53  ;;  %v8885_v10 = vld [vmem:[%s12392_s6 + $0x5d8] sm:$0xf0] }
 0x1b4   : > { %v11858_v16 = vld [vmem:[%s12392_s6 + $0x1354] sm:$0xf0]  ;;  %5516 = vmatpush.bf16.msrb.mxu3 %v9716_v9  ;;  %v5267_v7 = vadd.f32 %v5266_v60, %v5253_v57  ;;  %v11418_v9 = vld [vmem:[%s12392_s6 + $0x59c] sm:$0xf] }
 0x1b5   : > { %v11123_v17 = vld [vmem:[%s12392_s6 + $0x1718] sm:$0xf]  ;;  %v10612_v29 = vor.u32 %v11858_v16, %v10611_v15  ;;  %5537 = vmatpush.bf16.msra.mxu1 %v11188_v13  ;;  %5503 = vmatmul.bf16.vlgmr.msrb.gmra.mxu2 %v12531_v24  ;;  %v8376_v16 = vor.u32 %v11290_v5, %v8373_v6  ;;  %v8888_v20 = vor.u32 %v11418_v9, %v8885_v10  ;;  %v8181_v60 = vld [vmem:[%s12392_s6 + $0x58] sm:$0xf0] }
 0x1b6   : > { %v11986_v19 = vld [vmem:[%s12392_s6 + $0x1754] sm:$0xf0]  ;;  %5551 = vmatpush.bf16.msra.mxu2 %v8632_v14  ;;  %v5241_v14 = vadd.f32 %v5240_v46, %v5227_v61  ;;  %v5281_v26 = vadd.f32 %v5280_v21, %v5267_v7  ;;  %v11386_v46 = vld [vmem:[%s12392_s6 + $0x49c] sm:$0xf] }
 0x1b7   : > { %v11124_v30 = vor.u32 %v11986_v19, %v11123_v17  ;;  %v10547_v32 = vld [vmem:[%s12392_s6 + $0x1298] sm:$0xf]  ;;  %5524 = vmatpush.bf16.msra.mxu0 %v10612_v29  ;;  %5517 = vmatmul.bf16.vlgmr.msrb.gmra.mxu3 %v12533_v25  ;;  %v11370_v61 = vld [vmem:[%s12392_s6 + $0x41c] sm:$0xf] }
 0x1b8   : > { %v11842_v33 = vld [vmem:[%s12392_s6 + $0x12d4] sm:$0xf0]  ;;  %5565 = vmatpush.bf16.msra.mxu3 %v9144_v18  ;;  %v5254_v29 = vpop.f32.mrf.mxu0  ;;  %v10165_v5 = vld [vmem:[%s12392_s6 + $0xfd8] sm:$0xf0] }
 0x1b9   : > { %v11059_v34 = vld [vmem:[%s12392_s6 + $0x1698] sm:$0xf]  ;;  %v10548_v35 = vor.u32 %v11842_v33, %v10547_v32  ;;  %5538 = vmatpush.bf16.msra.mxu1 %v11124_v30  ;;  %v5294_v30 = vpop.f32.mrf.mxu3  ;;  %v8821_v32 = vld [vmem:[%s12392_s6 + $0x558] sm:$0xf0] }
 0x1ba   : > { %v11970_v38 = vld [vmem:[%s12392_s6 + $0x16d4] sm:$0xf0]  ;;  %5552 = vmatpush.bf16.msra.mxu2 %v8568_v31  ;;  %v11402_v31 = vld [vmem:[%s12392_s6 + $0x51c] sm:$0xf] }
 0x1bb   : > { %v11060_v44 = vor.u32 %v11970_v38, %v11059_v34  ;;  %v10483_v47 = vld [vmem:[%s12392_s6 + $0x1218] sm:$0xf]  ;;  %5525 = vmatpush.bf16.msra.mxu0 %v10548_v35  ;;  %v5295_v38 = vadd.f32 %v5294_v30, %v5281_v26  ;;  %v8824_v42 = vor.u32 %v11402_v31, %v8821_v32  ;;  %v5268_v35 = vpop.f32.mrf.mxu1  ;;  %v11866_v6 = vld [vmem:[%s12392_s6 + $0x139c] sm:$0xf] }
 0x1bc   : > { %v11826_v48 = vld [vmem:[%s12392_s6 + $0x1254] sm:$0xf0]  ;;  %5566 = vmatpush.bf16.msra.mxu3 %v9080_v36  ;;  %v5255_v36 = vadd.f32 %v5254_v29, %v5241_v14  ;;  %v10677_v7 = vld [vmem:[%s12392_s6 + $0x13d8] sm:$0xf0] }
 0x1bd   : > { %v10995_v49 = vld [vmem:[%s12392_s6 + $0x1618] sm:$0xf]  ;;  %v10484_v58 = vor.u32 %v11826_v48, %v10483_v47  ;;  %5539 = vmatpush.bf16.msra.mxu1 %v11060_v44  ;;  %v11258_v44 = vld [vmem:[%s12392_s6 + $0x9c] sm:$0xf]  ;;  %6315 = vst [vmem:[%s12908_s27 + $0x18] sm:$0xff] %v5295_v38 }
 0x1be   : > { %v11954_v51 = vld [vmem:[%s12392_s6 + $0x1654] sm:$0xf0]  ;;  %5553 = vmatpush.bf16.msra.mxu2 %v8504_v45  ;;  %v8245_v45 = vld [vmem:[%s12392_s6 + $0xd8] sm:$0xf0] }
 0x1bf   : > { %v10996_v62 = vor.u32 %v11954_v51, %v10995_v49  ;;  %v10419_v0 = vld [vmem:[%s12392_s6 + $0x1198] sm:$0xf]  ;;  %5526 = vmatpush.bf16.msra.mxu0 %v10484_v58  ;;  %v8757_v47 = vld [vmem:[%s12392_s6 + $0x4d8] sm:$0xf0]  ;;  %v5269_v51 = vadd.f32 %v5268_v35, %v5255_v36  ;;  %v8248_v53 = vor.u32 %v11258_v44, %v8245_v45  ;;  %v5282_v58 = vpop.f32.mrf.mxu2 }
 0x1c0   : > { %v11810_v1 = vld [vmem:[%s12392_s6 + $0x11d4] sm:$0xf0]  ;;  %5567 = vmatpush.bf16.msra.mxu3 %v9016_v50  ;;  %v8760_v57 = vor.u32 %v11386_v46, %v8757_v47  ;;  %v11189_v14 = vld [vmem:[%s12392_s6 + $0x17d8] sm:$0xf0] }
 0x1c1   : > { %v10931_v2 = vld [vmem:[%s12392_s6 + $0x1598] sm:$0xf]  ;;  %v10420_v12 = vor.u32 %v11810_v1, %v10419_v0  ;;  %5540 = vmatpush.bf16.msra.mxu1 %v10996_v62  ;;  %v8693_v62 = vld [vmem:[%s12392_s6 + $0x458] sm:$0xf0]  ;;  %v5296_v0 = vpop.f32.mrf.mxu3 }
 0x1c2   : > { %v11938_v4 = vld [vmem:[%s12392_s6 + $0x15d4] sm:$0xf0]  ;;  %5554 = vmatpush.bf16.msra.mxu2 %v8440_v63  ;;  %v5283_v63 = vadd.f32 %v5282_v58, %v5269_v51  ;;  %v11610_v1 = vld [vmem:[%s12392_s6 + $0xb9c] sm:$0xf] }
 0x1c3   : > { %v10355_v13 = vld [vmem:[%s12392_s6 + $0x1118] sm:$0xf]  ;;  %v10932_v15 = vor.u32 %v11938_v4, %v10931_v2  ;;  %5527 = vmatpush.bf16.msra.mxu0 %v10420_v12  ;;  %v9653_v2 = vld [vmem:[%s12392_s6 + $0xbd8] sm:$0xf0]  ;;  %v8184_v12 = vor.u32 %v11242_v56, %v8181_v60 }
 0x1c4   : > { %v11794_v17 = vld [vmem:[%s12392_s6 + $0x1154] sm:$0xf0]  ;;  %5568 = vmatpush.bf16.msra.mxu3 %v8952_v3  ;;  %v11738_v3 = vld [vmem:[%s12392_s6 + $0xf9c] sm:$0xf]  ;;  %v5297_v9 = vadd.f32 %v5296_v0, %v5283_v63 }
 0x1c5   : > { %v10867_v18 = vld [vmem:[%s12392_s6 + $0x1518] sm:$0xf]  ;;  %v10356_v33 = vor.u32 %v11794_v17, %v10355_v13  ;;  %5541 = vmatpush.bf16.msra.mxu1 %v10932_v15  ;;  %v11994_v13 = vld [vmem:[%s12392_s6 + $0x179c] sm:$0xf]  ;;  %v8696_v15 = vor.u32 %v11370_v61, %v8693_v62 }
 0x1c6   : > { %v11922_v19 = vld [vmem:[%s12392_s6 + $0x1554] sm:$0xf0]  ;;  %5555 = vmatpush.bf16.msra.mxu2 %v8376_v16  ;;  %v9656_v16 = vor.u32 %v11610_v1, %v9653_v2  ;;  %v11594_v17 = vld [vmem:[%s12392_s6 + $0xb1c] sm:$0xf]  ;;  %6331 = vst [vmem:[%s12908_s27 + $0x798] sm:$0xff] %v5297_v9  ;;  %v11192_v22 = vor.u32 %v11994_v13, %v11189_v14 }
 0x1c7   : > { %v10868_v34 = vor.u32 %v11922_v19, %v10867_v18  ;;  %v10291_v28 = vld [vmem:[%s12392_s6 + $0x1098] sm:$0xf]  ;;  %5528 = vmatpush.bf16.msra.mxu0 %v10356_v33  ;;  %v10168_v18 = vor.u32 %v11738_v3, %v10165_v5  ;;  %v10680_v19 = vor.u32 %v11866_v6, %v10677_v7  ;;  %v11722_v21 = vld [vmem:[%s12392_s6 + $0xf1c] sm:$0xf] }
 0x1c8   : > { %v11778_v27 = vld [vmem:[%s12392_s6 + $0x10d4] sm:$0xf0]  ;;  %5569 = vmatpush.bf16.msra.mxu3 %v8888_v20  ;;  %v9589_v20 = vld [vmem:[%s12392_s6 + $0xb58] sm:$0xf0]  ;;  %v10104_v33 = vor.u32 %v11722_v21, %v10101_v23  ;;  %v5308_v23 = vpop.f32.mrf.mxu0 }
 0x1c9   : > { %v10803_v40 = vld [vmem:[%s12392_s6 + $0x1498] sm:$0xf]  ;;  %v10292_v48 = vor.u32 %v11778_v27, %v10291_v28  ;;  %5542 = vmatpush.bf16.msra.mxu1 %v10868_v34  ;;  %v11850_v26 = vld [vmem:[%s12392_s6 + $0x131c] sm:$0xf]  ;;  %v9592_v32 = vor.u32 %v11594_v17, %v9589_v20  ;;  %v1065_v20 = vperm.slane %v13171_v11, 4 }
 0x1ca   : > { %v11906_v43 = vld [vmem:[%s12392_s6 + $0x14d4] sm:$0xf0]  ;;  %5556 = vmatpush.bf16.msra.mxu2 %v8312_v39  ;;  %v10613_v29 = vld [vmem:[%s12392_s6 + $0x1358] sm:$0xf0] }
 0x1cb   : > { %v10227_v49 = vld [vmem:[%s12392_s6 + $0x1018] sm:$0xf]  ;;  %v10804_v52 = vor.u32 %v11906_v43, %v10803_v40  ;;  %5529 = vmatpush.bf16.msra.mxu0 %v10292_v48  ;;  %v11978_v30 = vld [vmem:[%s12392_s6 + $0x171c] sm:$0xf]  ;;  %v10616_v34 = vor.u32 %v11850_v26, %v10613_v29 }
 0x1cc   : > { %v11762_v50 = vld [vmem:[%s12392_s6 + $0x1054] sm:$0xf0]  ;;  %5570 = vmatpush.bf16.msra.mxu3 %v8824_v42  ;;  %v11125_v31 = vld [vmem:[%s12392_s6 + $0x1758] sm:$0xf0] }
 0x1cd   : > { %v10739_v54 = vld [vmem:[%s12392_s6 + $0x1418] sm:$0xf]  ;;  %v10228_v4 = vor.u32 %v11762_v50, %v10227_v49  ;;  %5543 = vmatpush.bf16.msra.mxu1 %v10804_v52  ;;  %v11578_v36 = vld [vmem:[%s12392_s6 + $0xa9c] sm:$0xf]  ;;  %v11128_v28 = vor.u32 %v11978_v30, %v11125_v31 }
 0x1ce   : > { %v11890_v55 = vld [vmem:[%s12392_s6 + $0x1454] sm:$0xf0]  ;;  %5557 = vmatpush.bf16.msra.mxu2 %v8248_v53  ;;  %v9525_v38 = vld [vmem:[%s12392_s6 + $0xad8] sm:$0xf0] }
 0x1cf   : > { %v10740_v10 = vor.u32 %v11890_v55, %v10739_v54  ;;  %5530 = vmatpush.bf16.msra.mxu0 %v10228_v4  ;;  %v11706_v39 = vld [vmem:[%s12392_s6 + $0xe9c] sm:$0xf]  ;;  %v9528_v44 = vor.u32 %v11578_v36, %v9525_v38  ;;  %v5322_v36 = vpop.f32.mrf.mxu1 }
 0x1d0   : > { %5571 = vmatpush.bf16.msra.mxu3 %v8760_v57  ;;  %v10037_v27 = vld [vmem:[%s12392_s6 + $0xed8] sm:$0xf0] }
 0x1d1   : > { %5544 = vmatpush.bf16.msra.mxu1 %v10740_v10  ;;  %v11834_v40 = vld [vmem:[%s12392_s6 + $0x129c] sm:$0xf]  ;;  %v10040_v45 = vor.u32 %v11706_v39, %v10037_v27 }
 0x1d2   : > { %5558 = vmatpush.bf16.msra.mxu2 %v8184_v12  ;;  %5531 = vmatmul.bf16.vlgmr.msra.gmra.mxu0 %v12592_v37  ;;  %v10549_v42 = vld [vmem:[%s12392_s6 + $0x12d8] sm:$0xf0] }
 0x1d3   : > { %5579 = vmatpush.bf16.msrb.mxu0 %v9656_v16  ;;  %v11962_v35 = vld [vmem:[%s12392_s6 + $0x169c] sm:$0xf]  ;;  %v10552_v46 = vor.u32 %v11834_v40, %v10549_v42 }
 0x1d4   : > { %5572 = vmatpush.bf16.msra.mxu3 %v8696_v15  ;;  %5545 = vmatmul.bf16.vlgmr.msra.gmra.mxu1 %v12597_v41  ;;  %v11061_v43 = vld [vmem:[%s12392_s6 + $0x16d8] sm:$0xf0] }
 0x1d5   : > { %5593 = vmatpush.bf16.msrb.mxu1 %v10168_v18  ;;  %5559 = vmatmul.bf16.vlgmr.msra.gmra.mxu2 %v12493_v59  ;;  %v11562_v47 = vld [vmem:[%s12392_s6 + $0xa1c] sm:$0xf]  ;;  %v11064_v50 = vor.u32 %v11962_v35, %v11061_v43 }
 0x1d6   : > { %5607 = vmatpush.bf16.msrb.mxu2 %v10680_v19  ;;  %v9461_v48 = vld [vmem:[%s12392_s6 + $0xa58] sm:$0xf0] }
 0x1d7   : > { %5580 = vmatpush.bf16.msrb.mxu0 %v9592_v32  ;;  %5573 = vmatmul.bf16.vlgmr.msra.gmra.mxu3 %v12509_v8  ;;  %v11690_v49 = vld [vmem:[%s12392_s6 + $0xe1c] sm:$0xf]  ;;  %v9464_v56 = vor.u32 %v11562_v47, %v9461_v48 }
 0x1d8   : > { %5621 = vmatpush.bf16.msrb.mxu3 %v11192_v22  ;;  %v9973_v51 = vld [vmem:[%s12392_s6 + $0xe58] sm:$0xf0] }
 0x1d9   : > { %5594 = vmatpush.bf16.msrb.mxu1 %v10104_v33  ;;  %v11818_v52 = vld [vmem:[%s12392_s6 + $0x121c] sm:$0xf]  ;;  %v9976_v57 = vor.u32 %v11690_v49, %v9973_v51  ;;  %v8635_v51 = vld [vmem:[%s12392_s6 + $0x3a0] sm:$0xf] }
 0x1da   : > { %5608 = vmatpush.bf16.msrb.mxu2 %v10616_v34  ;;  %v10485_v53 = vld [vmem:[%s12392_s6 + $0x1258] sm:$0xf0] }
 0x1db   : > { %v11946_v54 = vld [vmem:[%s12392_s6 + $0x161c] sm:$0xf]  ;;  %5581 = vmatpush.bf16.msrb.mxu0 %v9528_v44  ;;  %v10488_v58 = vor.u32 %v11818_v52, %v10485_v53  ;;  %v11363_v52 = vld [vmem:[%s12392_s6 + $0x3dc] sm:$0xf0] }
 0x1dc   : > { %5622 = vmatpush.bf16.msrb.mxu3 %v11128_v28  ;;  %v10997_v55 = vld [vmem:[%s12392_s6 + $0x1658] sm:$0xf0]  ;;  %v9147_v53 = vld [vmem:[%s12392_s6 + $0x7a0] sm:$0xf] }
 0x1dd   : > { %5595 = vmatpush.bf16.msrb.mxu1 %v10040_v45  ;;  %v11546_v60 = vld [vmem:[%s12392_s6 + $0x99c] sm:$0xf]  ;;  %v11000_v63 = vor.u32 %v11946_v54, %v10997_v55  ;;  %v11491_v55 = vld [vmem:[%s12392_s6 + $0x7dc] sm:$0xf0] }
 0x1de   : > { %5609 = vmatpush.bf16.msrb.mxu2 %v10552_v46  ;;  %v9397_v61 = vld [vmem:[%s12392_s6 + $0x9d8] sm:$0xf0]  ;;  %v5309_v46 = vadd.f32 %v5308_v23, %v1065_v20 }
 0x1df   : > { %v11674_v62 = vld [vmem:[%s12392_s6 + $0xd9c] sm:$0xf]  ;;  %5582 = vmatpush.bf16.msrb.mxu0 %v9464_v56  ;;  %v9400_v5 = vor.u32 %v11546_v60, %v9397_v61  ;;  %v9659_v56 = vld [vmem:[%s12392_s6 + $0xba0] sm:$0xf] }
 0x1e0   : > { %5623 = vmatpush.bf16.msrb.mxu3 %v11064_v50  ;;  %v9909_v0 = vld [vmem:[%s12392_s6 + $0xdd8] sm:$0xf0]  ;;  %v10171_v61 = vld [vmem:[%s12392_s6 + $0xfa0] sm:$0xf] }
 0x1e1   : > { %v11802_v1 = vld [vmem:[%s12392_s6 + $0x119c] sm:$0xf]  ;;  %5596 = vmatpush.bf16.msrb.mxu1 %v9976_v57  ;;  %v9912_v6 = vor.u32 %v11674_v62, %v9909_v0  ;;  %v11619_v57 = vld [vmem:[%s12392_s6 + $0xbdc] sm:$0xf0]  ;;  %v5323_v0 = vadd.f32 %v5322_v36, %v5309_v46 }
 0x1e2   : > { %v10421_v2 = vld [vmem:[%s12392_s6 + $0x11d8] sm:$0xf0]  ;;  %5610 = vmatpush.bf16.msrb.mxu2 %v10488_v58  ;;  %v11747_v62 = vld [vmem:[%s12392_s6 + $0xfdc] sm:$0xf0] }
 0x1e3   : > { %v11930_v3 = vld [vmem:[%s12392_s6 + $0x159c] sm:$0xf]  ;;  %v10424_v7 = vor.u32 %v11802_v1, %v10421_v2  ;;  %5583 = vmatpush.bf16.msrb.mxu0 %v9400_v5  ;;  %v8636_v2 = vor.u32 %v11363_v52, %v8635_v51  ;;  %v5310_v5 = vpop.f32.mrf.mxu0  ;;  %v10043_v36 = vld [vmem:[%s12392_s6 + $0xea0] sm:$0xf] }
 0x1e4   : > { %v10933_v4 = vld [vmem:[%s12392_s6 + $0x15d8] sm:$0xf0]  ;;  %5624 = vmatpush.bf16.msrb.mxu3 %v11000_v63  ;;  %v5336_v63 = vpop.f32.mrf.mxu2  ;;  %v9979_v51 = vld [vmem:[%s12392_s6 + $0xe20] sm:$0xf] }
 0x1e5   : > { %v11530_v9 = vld [vmem:[%s12392_s6 + $0x91c] sm:$0xf]  ;;  %v10936_v13 = vor.u32 %v11930_v3, %v10933_v4  ;;  %5597 = vmatpush.bf16.msrb.mxu1 %v9912_v6  ;;  %v9148_v3 = vor.u32 %v11491_v55, %v9147_v53  ;;  %v9660_v4 = vor.u32 %v11619_v57, %v9659_v56  ;;  %v8571_v6 = vld [vmem:[%s12392_s6 + $0x320] sm:$0xf] }
 0x1e6   : > { %v9333_v10 = vld [vmem:[%s12392_s6 + $0x958] sm:$0xf0]  ;;  %5611 = vmatpush.bf16.msrb.mxu2 %v10424_v7  ;;  %v11347_v7 = vld [vmem:[%s12392_s6 + $0x35c] sm:$0xf0] }
 0x1e7   : > { %v11658_v12 = vld [vmem:[%s12392_s6 + $0xd1c] sm:$0xf]  ;;  %v9336_v19 = vor.u32 %v11530_v9, %v9333_v10  ;;  %v9083_v9 = vld [vmem:[%s12392_s6 + $0x720] sm:$0xf]  ;;  %v10172_v10 = vor.u32 %v11747_v62, %v10171_v61 }
 0x1e8   : > { %v9845_v14 = vld [vmem:[%s12392_s6 + $0xd58] sm:$0xf0]  ;;  %5625 = vmatpush.bf16.msrb.mxu3 %v10936_v13  ;;  %v9595_v13 = vld [vmem:[%s12392_s6 + $0xb20] sm:$0xf] }
 0x1e9   : > { %v11786_v15 = vld [vmem:[%s12392_s6 + $0x111c] sm:$0xf]  ;;  %v9848_v21 = vor.u32 %v11658_v12, %v9845_v14  ;;  %5584 = vmatpush.bf16.msrb.mxu0 %v9336_v19  ;;  %v11475_v12 = vld [vmem:[%s12392_s6 + $0x75c] sm:$0xf0]  ;;  %v5311_v19 = vadd.f32 %v5310_v5, %v1065_v20 }
 0x1ea   : > { %v10357_v16 = vld [vmem:[%s12392_s6 + $0x1158] sm:$0xf0]  ;;  %v11603_v14 = vld [vmem:[%s12392_s6 + $0xb5c] sm:$0xf0]  ;;  %v9084_v23 = vor.u32 %v11475_v12, %v9083_v9 }
 0x1eb   : > { %v11914_v17 = vld [vmem:[%s12392_s6 + $0x151c] sm:$0xf]  ;;  %v10360_v22 = vor.u32 %v11786_v15, %v10357_v16  ;;  %5598 = vmatpush.bf16.msrb.mxu1 %v9848_v21  ;;  %v5324_v15 = vpop.f32.mrf.mxu1  ;;  %v10107_v16 = vld [vmem:[%s12392_s6 + $0xf20] sm:$0xf]  ;;  %v8572_v21 = vor.u32 %v11347_v7, %v8571_v6 }
 0x1ec   : > { %v10869_v18 = vld [vmem:[%s12392_s6 + $0x1558] sm:$0xf0]  ;;  %v11587_v20 = vld [vmem:[%s12392_s6 + $0xadc] sm:$0xf0] }
 0x1ed   : > { %v11514_v26 = vld [vmem:[%s12392_s6 + $0x89c] sm:$0xf]  ;;  %v10872_v31 = vor.u32 %v11914_v17, %v10869_v18  ;;  %5612 = vmatpush.bf16.msrb.mxu2 %v10360_v22  ;;  %v11731_v17 = vld [vmem:[%s12392_s6 + $0xf5c] sm:$0xf0]  ;;  %v5350_v18 = vpop.f32.mrf.mxu3  ;;  %v5337_v22 = vadd.f32 %v5336_v63, %v5323_v0 }
 0x1ee   : > { %v9269_v29 = vld [vmem:[%s12392_s6 + $0x8d8] sm:$0xf0]  ;;  %v11699_v52 = vld [vmem:[%s12392_s6 + $0xe5c] sm:$0xf0] }
 0x1ef   : > { %v11642_v30 = vld [vmem:[%s12392_s6 + $0xc9c] sm:$0xf]  ;;  %v9272_v28 = vor.u32 %v11514_v26, %v9269_v29  ;;  %5626 = vmatpush.bf16.msrb.mxu3 %v10872_v31  ;;  %v9596_v26 = vor.u32 %v11603_v14, %v9595_v13  ;;  %v8507_v29 = vld [vmem:[%s12392_s6 + $0x2a0] sm:$0xf]  ;;  %v9980_v0 = vor.u32 %v11699_v52, %v9979_v51 }
 0x1f0   : > { %v9781_v32 = vld [vmem:[%s12392_s6 + $0xcd8] sm:$0xf0]  ;;  %v9019_v31 = vld [vmem:[%s12392_s6 + $0x6a0] sm:$0xf] }
 0x1f1   : > { %v11770_v33 = vld [vmem:[%s12392_s6 + $0x109c] sm:$0xf]  ;;  %v9784_v42 = vor.u32 %v11642_v30, %v9781_v32  ;;  %5585 = vmatpush.bf16.msrb.mxu0 %v9272_v28  ;;  %v11331_v30 = vld [vmem:[%s12392_s6 + $0x2dc] sm:$0xf0]  ;;  %v10108_v32 = vor.u32 %v11731_v17, %v10107_v16 }
 0x1f2   : > { %v10293_v34 = vld [vmem:[%s12392_s6 + $0x10d8] sm:$0xf0]  ;;  %v8508_v28 = vor.u32 %v11331_v30, %v8507_v29  ;;  %v11299_v61 = vld [vmem:[%s12392_s6 + $0x1dc] sm:$0xf0] }
 0x1f3   : > { %v11898_v38 = vld [vmem:[%s12392_s6 + $0x149c] sm:$0xf]  ;;  %v10296_v35 = vor.u32 %v11770_v33, %v10293_v34  ;;  %5599 = vmatpush.bf16.msrb.mxu1 %v9784_v42  ;;  %v11459_v33 = vld [vmem:[%s12392_s6 + $0x6dc] sm:$0xf0]  ;;  %v5378_v55 = vpop.f32.mrf.mxu1 }
 0x1f4   : > { %v10805_v39 = vld [vmem:[%s12392_s6 + $0x14d8] sm:$0xf0]  ;;  %v9531_v34 = vld [vmem:[%s12392_s6 + $0xaa0] sm:$0xf] }
 0x1f5   : > { %v11498_v27 = vld [vmem:[%s12392_s6 + $0x81c] sm:$0xf]  ;;  %v10808_v47 = vor.u32 %v11898_v38, %v10805_v39  ;;  %5613 = vmatpush.bf16.msrb.mxu2 %v10296_v35  ;;  %v11715_v38 = vld [vmem:[%s12392_s6 + $0xedc] sm:$0xf0]  ;;  %v5325_v39 = vadd.f32 %v5324_v15, %v5311_v19  ;;  %v9532_v42 = vor.u32 %v11587_v20, %v9531_v34  ;;  %v5352_v63 = vpop.f32.mrf.mxu3 }
 0x1f6   : > { %v9205_v40 = vld [vmem:[%s12392_s6 + $0x858] sm:$0xf0]  ;;  %v8443_v35 = vld [vmem:[%s12392_s6 + $0x220] sm:$0xf]  ;;  %v10044_v46 = vor.u32 %v11715_v38, %v10043_v36 }
 0x1f7   : > { %v11626_v43 = vld [vmem:[%s12392_s6 + $0xc1c] sm:$0xf]  ;;  %v9208_v54 = vor.u32 %v11498_v27, %v9205_v40  ;;  %5627 = vmatpush.bf16.msrb.mxu3 %v10808_v47  ;;  %v5351_v27 = vadd.f32 %v5350_v18, %v5337_v22  ;;  %v9020_v40 = vor.u32 %v11459_v33, %v9019_v31  ;;  %v11443_v47 = vld [vmem:[%s12392_s6 + $0x65c] sm:$0xf0] }
 0x1f8   : > { %v9717_v44 = vld [vmem:[%s12392_s6 + $0xc58] sm:$0xf0]  ;;  %v8891_v62 = vld [vmem:[%s12392_s6 + $0x5a0] sm:$0xf] }
 0x1f9   : > { %v11754_v45 = vld [vmem:[%s12392_s6 + $0x101c] sm:$0xf]  ;;  %v9720_v58 = vor.u32 %v11626_v43, %v9717_v44  ;;  %5586 = vmatpush.bf16.msrb.mxu0 %v9208_v54  ;;  %v11315_v43 = vld [vmem:[%s12392_s6 + $0x25c] sm:$0xf0] }
 0x1fa   : > { %v10229_v48 = vld [vmem:[%s12392_s6 + $0x1058] sm:$0xf0]  ;;  %v8955_v44 = vld [vmem:[%s12392_s6 + $0x620] sm:$0xf]  ;;  %v8444_v54 = vor.u32 %v11315_v43, %v8443_v35 }
 0x1fb   : > { %v11882_v49 = vld [vmem:[%s12392_s6 + $0x141c] sm:$0xf]  ;;  %v10232_v60 = vor.u32 %v11754_v45, %v10229_v48  ;;  %5600 = vmatpush.bf16.msrb.mxu1 %v9720_v58  ;;  %v5338_v45 = vpop.f32.mrf.mxu2  ;;  %v9467_v48 = vld [vmem:[%s12392_s6 + $0xa20] sm:$0xf]  ;;  %v8956_v57 = vor.u32 %v11443_v47, %v8955_v44  ;;  %v5380_v30 = vpop.f32.mrf.mxu1 }
 0x1fc   : > { %v10741_v50 = vld [vmem:[%s12392_s6 + $0x1458] sm:$0xf0]  ;;  %5587 = vmatmul.bf16.vlgmr.msrb.gmra.mxu0 %v12531_v24  ;;  %v5339_v56 = vadd.f32 %v5338_v45, %v5325_v39  ;;  %v9915_v5 = vld [vmem:[%s12392_s6 + $0xda0] sm:$0xf] }
 0x1fd   : > { %v10744_v1 = vor.u32 %v11882_v49, %v10741_v50  ;;  %5614 = vmatpush.bf16.msrb.mxu2 %v10232_v60  ;;  %5635 = vmatpush.bf16.msra.mxu0 %v8636_v2  ;;  %v11571_v49 = vld [vmem:[%s12392_s6 + $0xa5c] sm:$0xf0]  ;;  %v5364_v50 = vpop.f32.mrf.mxu0 }
 0x1fe   : > { %5601 = vmatmul.bf16.vlgmr.msrb.gmra.mxu1 %v12533_v25  ;;  %v5365_v53 = vadd.f32 %v5364_v50, %v5351_v27  ;;  %v9468_v58 = vor.u32 %v11571_v49, %v9467_v48  ;;  %v8379_v60 = vld [vmem:[%s12392_s6 + $0x1a0] sm:$0xf]  ;;  %v5353_v9 = vadd.f32 %v5352_v63, %v5339_v56 }
 0x1ff   : > { %5628 = vmatpush.bf16.msrb.mxu3 %v10744_v1  ;;  %5649 = vmatpush.bf16.msra.mxu1 %v9148_v3  ;;  %v11427_v2 = vld [vmem:[%s12392_s6 + $0x5dc] sm:$0xf0]  ;;  %v8380_v7 = vor.u32 %v11299_v61, %v8379_v60  ;;  %v11355_v60 = vld [vmem:[%s12392_s6 + $0x3a4] sm:$0xf] }
 0x200   : > { %5615 = vmatmul.bf16.vlgmr.msrb.gmra.mxu2 %v12592_v37  ;;  %v5379_v1 = vadd.f32 %v5378_v55, %v5365_v53  ;;  %v9403_v3 = vld [vmem:[%s12392_s6 + $0x9a0] sm:$0xf]  ;;  %v8637_v61 = vld [vmem:[%s12392_s6 + $0x3e0] sm:$0xf0] }
 0x201   : > { %5663 = vmatpush.bf16.msra.mxu2 %v9660_v4  ;;  %5636 = vmatpush.bf16.msra.mxu0 %v8572_v21  ;;  %v11555_v4 = vld [vmem:[%s12392_s6 + $0x9dc] sm:$0xf0] }
 0x202   : > { %5629 = vmatmul.bf16.vlgmr.msrb.gmra.mxu3 %v12597_v41  ;;  %v11683_v6 = vld [vmem:[%s12392_s6 + $0xddc] sm:$0xf0]  ;;  %6316 = vst [vmem:[%s12908_s27 + $0x20] sm:$0xff] %v5379_v1  ;;  %v9404_v12 = vor.u32 %v11555_v4, %v9403_v3  ;;  %v11483_v1 = vld [vmem:[%s12392_s6 + $0x7a4] sm:$0xf]  ;;  %v5406_v3 = vpop.f32.mrf.mxu3 }
 0x203   : > { %5677 = vmatpush.bf16.msra.mxu3 %v10172_v10  ;;  %5650 = vmatpush.bf16.msra.mxu1 %v9084_v23  ;;  %v8892_v10 = vor.u32 %v11427_v2, %v8891_v62  ;;  %v8315_v13 = vld [vmem:[%s12392_s6 + $0x120] sm:$0xf]  ;;  %v9916_v16 = vor.u32 %v11683_v6, %v9915_v5  ;;  %v5392_v62 = vpop.f32.mrf.mxu2  ;;  %v9149_v2 = vld [vmem:[%s12392_s6 + $0x7e0] sm:$0xf0]  ;;  %v1066_v6 = vperm.slane %v13171_v11, 5 }
 0x204   : > { %v11283_v14 = vld [vmem:[%s12392_s6 + $0x15c] sm:$0xf0] }
 0x205   : > { %5664 = vmatpush.bf16.msra.mxu2 %v9596_v26  ;;  %5637 = vmatpush.bf16.msra.mxu0 %v8508_v28  ;;  %v8827_v15 = vld [vmem:[%s12392_s6 + $0x520] sm:$0xf]  ;;  %v5366_v21 = vpop.f32.mrf.mxu0  ;;  %v8316_v29 = vor.u32 %v11283_v14, %v8315_v13  ;;  %v9152_v14 = vor.u32 %v11483_v1, %v9149_v2  ;;  %v11291_v1 = vld [vmem:[%s12392_s6 + $0x1a4] sm:$0xf] }
 0x206   : > { %v11411_v17 = vld [vmem:[%s12392_s6 + $0x55c] sm:$0xf0]  ;;  %v5367_v26 = vadd.f32 %v5366_v21, %v5353_v9  ;;  %v8640_v9 = vor.u32 %v11355_v60, %v8637_v61  ;;  %v5393_v21 = vadd.f32 %v5392_v62, %v1066_v6  ;;  %v8381_v2 = vld [vmem:[%s12392_s6 + $0x1e0] sm:$0xf0] }
 0x207   : > { %5678 = vmatpush.bf16.msra.mxu3 %v10108_v32  ;;  %5651 = vmatpush.bf16.msra.mxu1 %v9020_v40  ;;  %v9339_v18 = vld [vmem:[%s12392_s6 + $0x920] sm:$0xf]  ;;  %v8828_v31 = vor.u32 %v11411_v17, %v8827_v15  ;;  %v8573_v17 = vld [vmem:[%s12392_s6 + $0x360] sm:$0xf0] }
 0x208   : > { %v11539_v19 = vld [vmem:[%s12392_s6 + $0x95c] sm:$0xf0]  ;;  %v5381_v38 = vadd.f32 %v5380_v30, %v5367_v26 }
 0x209   : > { %5665 = vmatpush.bf16.msra.mxu2 %v9532_v42  ;;  %5638 = vmatpush.bf16.msra.mxu0 %v8444_v54  ;;  %v9851_v22 = vld [vmem:[%s12392_s6 + $0xd20] sm:$0xf]  ;;  %v9340_v32 = vor.u32 %v11539_v19, %v9339_v18  ;;  %v11467_v18 = vld [vmem:[%s12392_s6 + $0x724] sm:$0xf] }
 0x20a   : > { %v11667_v23 = vld [vmem:[%s12392_s6 + $0xd5c] sm:$0xf0]  ;;  %6332 = vst [vmem:[%s12908_s27 + $0x7a0] sm:$0xff] %v5381_v38  ;;  %v9085_v19 = vld [vmem:[%s12392_s6 + $0x760] sm:$0xf0] }
 0x20b   : > { %5679 = vmatpush.bf16.msra.mxu3 %v10044_v46  ;;  %5652 = vmatpush.bf16.msra.mxu1 %v8956_v57  ;;  %v8251_v33 = vld [vmem:[%s12392_s6 + $0xa0] sm:$0xf]  ;;  %v9852_v36 = vor.u32 %v11667_v23, %v9851_v22  ;;  %v9021_v38 = vld [vmem:[%s12392_s6 + $0x6e0] sm:$0xf0] }
 0x20c   : > { %v11267_v34 = vld [vmem:[%s12392_s6 + $0xdc] sm:$0xf0] }
 0x20d   : > { %5666 = vmatpush.bf16.msra.mxu2 %v9468_v58  ;;  %5639 = vmatpush.bf16.msra.mxu0 %v8380_v7  ;;  %v8763_v20 = vld [vmem:[%s12392_s6 + $0x4a0] sm:$0xf]  ;;  %v8252_v35 = vor.u32 %v11267_v34, %v8251_v33  ;;  %v11323_v34 = vld [vmem:[%s12392_s6 + $0x2a4] sm:$0xf] }
 0x20e   : > { %v11395_v39 = vld [vmem:[%s12392_s6 + $0x4dc] sm:$0xf0] }
 0x20f   : > { %5680 = vmatpush.bf16.msra.mxu3 %v9980_v0  ;;  %5653 = vmatpush.bf16.msra.mxu1 %v8892_v10  ;;  %v9275_v28 = vld [vmem:[%s12392_s6 + $0x8a0] sm:$0xf]  ;;  %v8764_v45 = vor.u32 %v11395_v39, %v8763_v20  ;;  %v8509_v20 = vld [vmem:[%s12392_s6 + $0x2e0] sm:$0xf0]  ;;  %v5407_v39 = vadd.f32 %v5406_v3, %v5393_v21 }
 0x210   : > { %v11523_v27 = vld [vmem:[%s12392_s6 + $0x8dc] sm:$0xf0] }
 0x211   : > { %5667 = vmatpush.bf16.msra.mxu2 %v9404_v12  ;;  %v9787_v40 = vld [vmem:[%s12392_s6 + $0xca0] sm:$0xf]  ;;  %5640 = vmatpush.bf16.msra.mxu0 %v8316_v29  ;;  %v9276_v46 = vor.u32 %v11523_v27, %v9275_v28  ;;  %v5394_v27 = vpop.f32.mrf.mxu2 }
 0x212   : > { %v11651_v42 = vld [vmem:[%s12392_s6 + $0xcdc] sm:$0xf0] }
 0x213   : > { %5681 = vmatpush.bf16.msra.mxu3 %v9916_v16  ;;  %v8187_v43 = vld [vmem:[%s12392_s6 + $0x20] sm:$0xf]  ;;  %5654 = vmatpush.bf16.msra.mxu1 %v8828_v31  ;;  %v9788_v50 = vor.u32 %v11651_v42, %v9787_v40  ;;  %v11339_v16 = vld [vmem:[%s12392_s6 + $0x324] sm:$0xf]  ;;  %v8512_v42 = vor.u32 %v11323_v34, %v8509_v20 }
 0x214   : > { %v11251_v44 = vld [vmem:[%s12392_s6 + $0x5c] sm:$0xf0]  ;;  %v8576_v26 = vor.u32 %v11339_v16, %v8573_v17  ;;  %v11275_v17 = vld [vmem:[%s12392_s6 + $0x124] sm:$0xf] }
 0x215   : > { %5668 = vmatpush.bf16.msra.mxu2 %v9340_v32  ;;  %v8699_v47 = vld [vmem:[%s12392_s6 + $0x420] sm:$0xf]  ;;  %5641 = vmatpush.bf16.msra.mxu0 %v8252_v35  ;;  %v8188_v57 = vor.u32 %v11251_v44, %v8187_v43  ;;  %v9088_v32 = vor.u32 %v11467_v18, %v9085_v19  ;;  %v5408_v35 = vpop.f32.mrf.mxu3  ;;  %v8317_v18 = vld [vmem:[%s12392_s6 + $0x160] sm:$0xf0] }
 0x216   : > { %v11379_v48 = vld [vmem:[%s12392_s6 + $0x45c] sm:$0xf0] }
 0x217   : > { %v9211_v49 = vld [vmem:[%s12392_s6 + $0x820] sm:$0xf]  ;;  %5682 = vmatpush.bf16.msra.mxu3 %v9852_v36  ;;  %5655 = vmatpush.bf16.msra.mxu1 %v8764_v45  ;;  %v8700_v63 = vor.u32 %v11379_v48, %v8699_v47  ;;  %v11451_v36 = vld [vmem:[%s12392_s6 + $0x6a4] sm:$0xf] }
 0x218   : > { %v11507_v51 = vld [vmem:[%s12392_s6 + $0x85c] sm:$0xf0]  ;;  %v11307_v48 = vld [vmem:[%s12392_s6 + $0x224] sm:$0xf] }
 0x219   : > { %v9723_v52 = vld [vmem:[%s12392_s6 + $0xc20] sm:$0xf]  ;;  %5669 = vmatpush.bf16.msra.mxu2 %v9276_v46  ;;  %v9212_v0 = vor.u32 %v11507_v51, %v9211_v49  ;;  %5642 = vmatpush.bf16.msra.mxu0 %v8188_v57  ;;  %v9024_v46 = vor.u32 %v11451_v36, %v9021_v38  ;;  %v8445_v49 = vld [vmem:[%s12392_s6 + $0x260] sm:$0xf0]  ;;  %v5448_v16 = vpop.f32.mrf.mxu2 }
 0x21a   : > { %v11635_v53 = vld [vmem:[%s12392_s6 + $0xc5c] sm:$0xf0]  ;;  %v11435_v51 = vld [vmem:[%s12392_s6 + $0x624] sm:$0xf] }
 0x21b   : > { %v10683_v54 = vld [vmem:[%s12392_s6 + $0x13a0] sm:$0xf]  ;;  %5683 = vmatpush.bf16.msra.mxu3 %v9788_v50  ;;  %v9724_v4 = vor.u32 %v11635_v53, %v9723_v52  ;;  %5656 = vmatpush.bf16.msra.mxu1 %v8700_v63  ;;  %v5420_v50 = vpop.f32.mrf.mxu0  ;;  %v8957_v52 = vld [vmem:[%s12392_s6 + $0x660] sm:$0xf0] }
 0x21c   : > { %v11875_v55 = vld [vmem:[%s12392_s6 + $0x13dc] sm:$0xf0]  ;;  %5643 = vmatmul.bf16.vlgmr.msra.gmra.mxu0 %v12493_v59  ;;  %v5421_v53 = vadd.f32 %v5420_v50, %v5407_v39  ;;  %v8960_v63 = vor.u32 %v11435_v51, %v8957_v52  ;;  %v11243_v51 = vld [vmem:[%s12392_s6 + $0x24] sm:$0xf] }
 0x21d   : > { %v11195_v56 = vld [vmem:[%s12392_s6 + $0x17a0] sm:$0xf]  ;;  %v10684_v5 = vor.u32 %v11875_v55, %v10683_v54  ;;  %5670 = vmatpush.bf16.msra.mxu2 %v9212_v0  ;;  %v5434_v55 = vpop.f32.mrf.mxu1 }
 0x21e   : > { %v12003_v58 = vld [vmem:[%s12392_s6 + $0x17dc] sm:$0xf0]  ;;  %5657 = vmatmul.bf16.vlgmr.msra.gmra.mxu1 %v12509_v8  ;;  %v5435_v3 = vadd.f32 %v5434_v55, %v5421_v53  ;;  %v11371_v55 = vld [vmem:[%s12392_s6 + $0x424] sm:$0xf] }
 0x21f   : > { %v11196_v7 = vor.u32 %v12003_v58, %v11195_v56  ;;  %v10619_v10 = vld [vmem:[%s12392_s6 + $0x1320] sm:$0xf]  ;;  %5684 = vmatpush.bf16.msra.mxu3 %v9724_v4  ;;  %5691 = vmatpush.bf16.msrb.mxu0 %v10684_v5  ;;  %v5395_v56 = vadd.f32 %v5394_v27, %v1066_v6  ;;  %v8448_v58 = vor.u32 %v11307_v48, %v8445_v49  ;;  %v11419_v4 = vld [vmem:[%s12392_s6 + $0x5a4] sm:$0xf] }
 0x220   : > { %v11859_v12 = vld [vmem:[%s12392_s6 + $0x135c] sm:$0xf0]  ;;  %5671 = vmatmul.bf16.vlgmr.msra.gmra.mxu2 %v12531_v24  ;;  %v8893_v5 = vld [vmem:[%s12392_s6 + $0x5e0] sm:$0xf0]  ;;  %v5449_v19 = vadd.f32 %v5448_v16, %v5435_v3 }
 0x221   : > { %v11131_v13 = vld [vmem:[%s12392_s6 + $0x1720] sm:$0xf]  ;;  %v10620_v22 = vor.u32 %v11859_v12, %v10619_v10  ;;  %5705 = vmatpush.bf16.msrb.mxu1 %v11196_v7  ;;  %5719 = vmatpush.bf16.msrb.mxu2 %v8640_v9  ;;  %v5409_v7 = vadd.f32 %v5408_v35, %v5395_v56  ;;  %v8384_v10 = vor.u32 %v11291_v1, %v8381_v2  ;;  %v11259_v27 = vld [vmem:[%s12392_s6 + $0xa4] sm:$0xf]  ;;  %v5450_v53 = vpop.f32.mrf.mxu2 }
 0x222   : > { %v11987_v15 = vld [vmem:[%s12392_s6 + $0x175c] sm:$0xf0]  ;;  %5685 = vmatmul.bf16.vlgmr.msra.gmra.mxu3 %v12533_v25  ;;  %v8765_v35 = vld [vmem:[%s12392_s6 + $0x4e0] sm:$0xf0] }
 0x223   : > { %v11132_v23 = vor.u32 %v11987_v15, %v11131_v13  ;;  %v10555_v29 = vld [vmem:[%s12392_s6 + $0x12a0] sm:$0xf]  ;;  %5733 = vmatpush.bf16.msrb.mxu3 %v9152_v14  ;;  %5692 = vmatpush.bf16.msrb.mxu0 %v10620_v22  ;;  %v8896_v15 = vor.u32 %v11419_v4, %v8893_v5  ;;  %v5422_v21 = vpop.f32.mrf.mxu0  ;;  %v5462_v22 = vpop.f32.mrf.mxu3  ;;  %v8701_v56 = vld [vmem:[%s12392_s6 + $0x460] sm:$0xf0] }
 0x224   : > { %v11843_v30 = vld [vmem:[%s12392_s6 + $0x12dc] sm:$0xf0]  ;;  %v11867_v1 = vld [vmem:[%s12392_s6 + $0x13a4] sm:$0xf] }
 0x225   : > { %v11067_v31 = vld [vmem:[%s12392_s6 + $0x16a0] sm:$0xf]  ;;  %v10556_v28 = vor.u32 %v11843_v30, %v10555_v29  ;;  %5706 = vmatpush.bf16.msrb.mxu1 %v11132_v23  ;;  %5720 = vmatpush.bf16.msrb.mxu2 %v8576_v26  ;;  %v11403_v23 = vld [vmem:[%s12392_s6 + $0x524] sm:$0xf]  ;;  %v5436_v39 = vpop.f32.mrf.mxu1 }
 0x226   : > { %v11971_v33 = vld [vmem:[%s12392_s6 + $0x16dc] sm:$0xf0]  ;;  %v8829_v26 = vld [vmem:[%s12392_s6 + $0x560] sm:$0xf0] }
 0x227   : > { %v11068_v40 = vor.u32 %v11971_v33, %v11067_v31  ;;  %v10491_v43 = vld [vmem:[%s12392_s6 + $0x1220] sm:$0xf]  ;;  %5734 = vmatpush.bf16.msrb.mxu3 %v9088_v32  ;;  %5693 = vmatpush.bf16.msrb.mxu0 %v10556_v28  ;;  %v5423_v31 = vadd.f32 %v5422_v21, %v5409_v7  ;;  %v5463_v32 = vadd.f32 %v5462_v22, %v5449_v19  ;;  %v10685_v2 = vld [vmem:[%s12392_s6 + $0x13e0] sm:$0xf0] }
 0x228   : > { %v11827_v44 = vld [vmem:[%s12392_s6 + $0x125c] sm:$0xf0]  ;;  %v8320_v33 = vor.u32 %v11275_v17, %v8317_v18  ;;  %v8832_v38 = vor.u32 %v11403_v23, %v8829_v26  ;;  %v8704_v7 = vor.u32 %v11371_v55, %v8701_v56  ;;  %v10109_v17 = vld [vmem:[%s12392_s6 + $0xf60] sm:$0xf0] }
 0x229   : > { %v11003_v45 = vld [vmem:[%s12392_s6 + $0x1620] sm:$0xf]  ;;  %v10492_v54 = vor.u32 %v11827_v44, %v10491_v43  ;;  %5707 = vmatpush.bf16.msrb.mxu1 %v11068_v40  ;;  %5721 = vmatpush.bf16.msrb.mxu2 %v8512_v42  ;;  %v8253_v40 = vld [vmem:[%s12392_s6 + $0xe0] sm:$0xf0]  ;;  %6317 = vst [vmem:[%s12908_s27 + $0x28] sm:$0xff] %v5463_v32 }
 0x22a   : > { %v11955_v47 = vld [vmem:[%s12392_s6 + $0x165c] sm:$0xf0]  ;;  %v11387_v42 = vld [vmem:[%s12392_s6 + $0x4a4] sm:$0xf]  ;;  %v8256_v48 = vor.u32 %v11259_v27, %v8253_v40 }
 0x22b   : > { %v11004_v57 = vor.u32 %v11955_v47, %v11003_v45  ;;  %v10427_v60 = vld [vmem:[%s12392_s6 + $0x11a0] sm:$0xf]  ;;  %5735 = vmatpush.bf16.msrb.mxu3 %v9024_v46  ;;  %5694 = vmatpush.bf16.msrb.mxu0 %v10492_v54  ;;  %v5437_v46 = vadd.f32 %v5436_v39, %v5423_v31  ;;  %v8768_v52 = vor.u32 %v11387_v42, %v8765_v35  ;;  %v8189_v54 = vld [vmem:[%s12392_s6 + $0x60] sm:$0xf0] }
 0x22c   : > { %v11811_v61 = vld [vmem:[%s12392_s6 + $0x11dc] sm:$0xf0]  ;;  %v8192_v5 = vor.u32 %v11243_v51, %v8189_v54  ;;  %v11851_v18 = vld [vmem:[%s12392_s6 + $0x1324] sm:$0xf] }
 0x22d   : > { %v10939_v62 = vld [vmem:[%s12392_s6 + $0x15a0] sm:$0xf]  ;;  %v10428_v11 = vor.u32 %v11811_v61, %v10427_v60  ;;  %5708 = vmatpush.bf16.msrb.mxu1 %v11004_v57  ;;  %5722 = vmatpush.bf16.msrb.mxu2 %v8448_v58  ;;  %v5451_v57 = vadd.f32 %v5450_v53, %v5437_v46  ;;  %v5464_v58 = vpop.f32.mrf.mxu3  ;;  %v11611_v60 = vld [vmem:[%s12392_s6 + $0xba4] sm:$0xf] }
 0x22e   : > { %v11939_v0 = vld [vmem:[%s12392_s6 + $0x15dc] sm:$0xf0]  ;;  %v9661_v61 = vld [vmem:[%s12392_s6 + $0xbe0] sm:$0xf0] }
 0x22f   : > { %v10363_v6 = vld [vmem:[%s12392_s6 + $0x1120] sm:$0xf]  ;;  %v10940_v9 = vor.u32 %v11939_v0, %v10939_v62  ;;  %5736 = vmatpush.bf16.msrb.mxu3 %v8960_v63  ;;  %5695 = vmatpush.bf16.msrb.mxu0 %v10428_v11  ;;  %v11739_v62 = vld [vmem:[%s12392_s6 + $0xfa4] sm:$0xf]  ;;  %v5465_v3 = vadd.f32 %v5464_v58, %v5451_v57 }
 0x230   : > { %v11795_v12 = vld [vmem:[%s12392_s6 + $0x115c] sm:$0xf0]  ;;  %v10173_v0 = vld [vmem:[%s12392_s6 + $0xfe0] sm:$0xf0] }
 0x231   : > { %v10875_v13 = vld [vmem:[%s12392_s6 + $0x1520] sm:$0xf]  ;;  %v10364_v29 = vor.u32 %v11795_v12, %v10363_v6  ;;  %5709 = vmatpush.bf16.msrb.mxu1 %v10940_v9  ;;  %5723 = vmatpush.bf16.msrb.mxu2 %v8384_v10  ;;  %v11995_v11 = vld [vmem:[%s12392_s6 + $0x17a4] sm:$0xf]  ;;  %v9664_v9 = vor.u32 %v11611_v60, %v9661_v61  ;;  %6333 = vst [vmem:[%s12908_s27 + $0x7a8] sm:$0xff] %v5465_v3 }
 0x232   : > { %v11923_v14 = vld [vmem:[%s12392_s6 + $0x155c] sm:$0xf0]  ;;  %v11197_v6 = vld [vmem:[%s12392_s6 + $0x17e0] sm:$0xf0]  ;;  %v10176_v12 = vor.u32 %v11739_v62, %v10173_v0 }
 0x233   : > { %v10876_v30 = vor.u32 %v11923_v14, %v10875_v13  ;;  %v10299_v34 = vld [vmem:[%s12392_s6 + $0x10a0] sm:$0xf]  ;;  %5737 = vmatpush.bf16.msrb.mxu3 %v8896_v15  ;;  %5696 = vmatpush.bf16.msrb.mxu0 %v10364_v29  ;;  %v11595_v10 = vld [vmem:[%s12392_s6 + $0xb24] sm:$0xf]  ;;  %v10688_v13 = vor.u32 %v11867_v1, %v10685_v2  ;;  %v11200_v16 = vor.u32 %v11995_v11, %v11197_v6 }
 0x234   : > { %v11779_v20 = vld [vmem:[%s12392_s6 + $0x10dc] sm:$0xf0]  ;;  %v9597_v14 = vld [vmem:[%s12392_s6 + $0xb60] sm:$0xf0] }
 0x235   : > { %v10811_v36 = vld [vmem:[%s12392_s6 + $0x14a0] sm:$0xf]  ;;  %v10300_v43 = vor.u32 %v11779_v20, %v10299_v34  ;;  %5710 = vmatpush.bf16.msrb.mxu1 %v10876_v30  ;;  %5724 = vmatpush.bf16.msrb.mxu2 %v8320_v33  ;;  %v11723_v15 = vld [vmem:[%s12392_s6 + $0xf24] sm:$0xf]  ;;  %v9600_v23 = vor.u32 %v11595_v10, %v9597_v14 }
 0x236   : > { %v11907_v28 = vld [vmem:[%s12392_s6 + $0x14dc] sm:$0xf0]  ;;  %v10621_v19 = vld [vmem:[%s12392_s6 + $0x1360] sm:$0xf0]  ;;  %v10112_v26 = vor.u32 %v11723_v15, %v10109_v17  ;;  %v5476_v17 = vpop.f32.mrf.mxu0 }
 0x237   : > { %v10235_v44 = vld [vmem:[%s12392_s6 + $0x1020] sm:$0xf]  ;;  %v10812_v47 = vor.u32 %v11907_v28, %v10811_v36  ;;  %5738 = vmatpush.bf16.msrb.mxu3 %v8832_v38  ;;  %5697 = vmatpush.bf16.msrb.mxu0 %v10300_v43  ;;  %v11979_v21 = vld [vmem:[%s12392_s6 + $0x1724] sm:$0xf]  ;;  %v10624_v29 = vor.u32 %v11851_v18, %v10621_v19 }
 0x238   : > { %v11763_v45 = vld [vmem:[%s12392_s6 + $0x105c] sm:$0xf0]  ;;  %v11133_v22 = vld [vmem:[%s12392_s6 + $0x1760] sm:$0xf0] }
 0x239   : > { %v10747_v49 = vld [vmem:[%s12392_s6 + $0x1420] sm:$0xf]  ;;  %v10236_v63 = vor.u32 %v11763_v45, %v10235_v44  ;;  %5711 = vmatpush.bf16.msrb.mxu1 %v10812_v47  ;;  %5725 = vmatpush.bf16.msrb.mxu2 %v8256_v48  ;;  %v11579_v30 = vld [vmem:[%s12392_s6 + $0xaa4] sm:$0xf]  ;;  %v11136_v33 = vor.u32 %v11979_v21, %v11133_v22 }
 0x23a   : > { %v11891_v50 = vld [vmem:[%s12392_s6 + $0x145c] sm:$0xf0]  ;;  %v9533_v31 = vld [vmem:[%s12392_s6 + $0xae0] sm:$0xf0] }
 0x23b   : > { %v10748_v4 = vor.u32 %v11891_v50, %v10747_v49  ;;  %5739 = vmatpush.bf16.msrb.mxu3 %v8768_v52  ;;  %5698 = vmatpush.bf16.msrb.mxu0 %v10236_v63  ;;  %v11707_v32 = vld [vmem:[%s12392_s6 + $0xea4] sm:$0xf]  ;;  %v9536_v28 = vor.u32 %v11579_v30, %v9533_v31  ;;  %v5490_v30 = vpop.f32.mrf.mxu1 }
 0x23c   : > { %v10045_v34 = vld [vmem:[%s12392_s6 + $0xee0] sm:$0xf0] }
 0x23d   : > { %5712 = vmatpush.bf16.msrb.mxu1 %v10748_v4  ;;  %5726 = vmatpush.bf16.msrb.mxu2 %v8192_v5  ;;  %v11835_v20 = vld [vmem:[%s12392_s6 + $0x12a4] sm:$0xf]  ;;  %v10048_v27 = vor.u32 %v11707_v32, %v10045_v34 }
 0x23e   : > { %5699 = vmatmul.bf16.vlgmr.msrb.gmra.mxu0 %v12592_v37  ;;  %v10557_v36 = vld [vmem:[%s12392_s6 + $0x12e0] sm:$0xf0] }
 0x23f   : > { %5740 = vmatpush.bf16.msrb.mxu3 %v8704_v7  ;;  %5747 = vmatpush.bf16.msra.mxu0 %v9664_v9  ;;  %v11963_v38 = vld [vmem:[%s12392_s6 + $0x16a4] sm:$0xf]  ;;  %v10560_v40 = vor.u32 %v11835_v20, %v10557_v36 }
 0x240   : > { %5713 = vmatmul.bf16.vlgmr.msrb.gmra.mxu1 %v12597_v41  ;;  %v11069_v39 = vld [vmem:[%s12392_s6 + $0x16e0] sm:$0xf0]  ;;  %5727 = vmatmul.bf16.vlgmr.msrb.gmra.mxu2 %v12493_v59 }
 0x241   : > { %5761 = vmatpush.bf16.msra.mxu1 %v10176_v12  ;;  %5775 = vmatpush.bf16.msra.mxu2 %v10688_v13  ;;  %v11563_v42 = vld [vmem:[%s12392_s6 + $0xa24] sm:$0xf]  ;;  %v11072_v44 = vor.u32 %v11963_v38, %v11069_v39 }
 0x242   : > { %5741 = vmatmul.bf16.vlgmr.msrb.gmra.mxu3 %v12509_v8  ;;  %v9469_v35 = vld [vmem:[%s12392_s6 + $0xa60] sm:$0xf0] }
 0x243   : > { %5789 = vmatpush.bf16.msra.mxu3 %v11200_v16  ;;  %5748 = vmatpush.bf16.msra.mxu0 %v9600_v23  ;;  %v11691_v43 = vld [vmem:[%s12392_s6 + $0xe24] sm:$0xf]  ;;  %v9472_v50 = vor.u32 %v11563_v42, %v9469_v35 }
 0x244   : > { %v9981_v45 = vld [vmem:[%s12392_s6 + $0xe60] sm:$0xf0] }
 0x245   : > { %5762 = vmatpush.bf16.msra.mxu1 %v10112_v26  ;;  %5776 = vmatpush.bf16.msra.mxu2 %v10624_v29  ;;  %v11819_v46 = vld [vmem:[%s12392_s6 + $0x1224] sm:$0xf]  ;;  %v9984_v51 = vor.u32 %v11691_v43, %v9981_v45  ;;  %v8643_v45 = vld [vmem:[%s12392_s6 + $0x3a8] sm:$0xf] }
 0x246   : > { %v10493_v47 = vld [vmem:[%s12392_s6 + $0x1260] sm:$0xf0] }
 0x247   : > { %5790 = vmatpush.bf16.msra.mxu3 %v11136_v33  ;;  %v11947_v48 = vld [vmem:[%s12392_s6 + $0x1624] sm:$0xf]  ;;  %5749 = vmatpush.bf16.msra.mxu0 %v9536_v28  ;;  %v10496_v52 = vor.u32 %v11819_v46, %v10493_v47  ;;  %v11364_v46 = vld [vmem:[%s12392_s6 + $0x3e4] sm:$0xf0] }
 0x248   : > { %v11005_v49 = vld [vmem:[%s12392_s6 + $0x1660] sm:$0xf0]  ;;  %v9155_v47 = vld [vmem:[%s12392_s6 + $0x7a8] sm:$0xf] }
 0x249   : > { %5763 = vmatpush.bf16.msra.mxu1 %v10048_v27  ;;  %5777 = vmatpush.bf16.msra.mxu2 %v10560_v40  ;;  %v11547_v53 = vld [vmem:[%s12392_s6 + $0x9a4] sm:$0xf]  ;;  %v11008_v56 = vor.u32 %v11947_v48, %v11005_v49  ;;  %v11492_v49 = vld [vmem:[%s12392_s6 + $0x7e4] sm:$0xf0] }
 0x24a   : > { %v9405_v54 = vld [vmem:[%s12392_s6 + $0x9e0] sm:$0xf0] }
 0x24b   : > { %v11675_v55 = vld [vmem:[%s12392_s6 + $0xda4] sm:$0xf]  ;;  %5791 = vmatpush.bf16.msra.mxu3 %v11072_v44  ;;  %5750 = vmatpush.bf16.msra.mxu0 %v9472_v50  ;;  %v9408_v63 = vor.u32 %v11547_v53, %v9405_v54  ;;  %v9667_v50 = vld [vmem:[%s12392_s6 + $0xba8] sm:$0xf] }
 0x24c   : > { %v9917_v57 = vld [vmem:[%s12392_s6 + $0xde0] sm:$0xf0]  ;;  %v10179_v54 = vld [vmem:[%s12392_s6 + $0xfa8] sm:$0xf] }
 0x24d   : > { %v11803_v58 = vld [vmem:[%s12392_s6 + $0x11a4] sm:$0xf]  ;;  %5764 = vmatpush.bf16.msra.mxu1 %v9984_v51  ;;  %5778 = vmatpush.bf16.msra.mxu2 %v10496_v52  ;;  %v9920_v0 = vor.u32 %v11675_v55, %v9917_v57  ;;  %v11620_v51 = vld [vmem:[%s12392_s6 + $0xbe4] sm:$0xf0] }
 0x24e   : > { %v10429_v60 = vld [vmem:[%s12392_s6 + $0x11e0] sm:$0xf0]  ;;  %v11748_v55 = vld [vmem:[%s12392_s6 + $0xfe4] sm:$0xf0] }
 0x24f   : > { %v11931_v61 = vld [vmem:[%s12392_s6 + $0x15a4] sm:$0xf]  ;;  %v10432_v1 = vor.u32 %v11803_v58, %v10429_v60  ;;  %5792 = vmatpush.bf16.msra.mxu3 %v11008_v56  ;;  %5751 = vmatpush.bf16.msra.mxu0 %v9408_v63  ;;  %v5504_v56 = vpop.f32.mrf.mxu2  ;;  %v8644_v60 = vor.u32 %v11364_v46, %v8643_v45  ;;  %v5478_v63 = vpop.f32.mrf.mxu0  ;;  %v9987_v45 = vld [vmem:[%s12392_s6 + $0xe28] sm:$0xf] }
 0x250   : > { %v10941_v62 = vld [vmem:[%s12392_s6 + $0x15e0] sm:$0xf0]  ;;  %v11700_v46 = vld [vmem:[%s12392_s6 + $0xe64] sm:$0xf0] }
 0x251   : > { %v11531_v2 = vld [vmem:[%s12392_s6 + $0x924] sm:$0xf]  ;;  %v10944_v5 = vor.u32 %v11931_v61, %v10941_v62  ;;  %5765 = vmatpush.bf16.msra.mxu1 %v9920_v0  ;;  %5779 = vmatpush.bf16.msra.mxu2 %v10432_v1  ;;  %v9156_v61 = vor.u32 %v11492_v49, %v9155_v47  ;;  %v9668_v62 = vor.u32 %v11620_v51, %v9667_v50  ;;  %v8579_v0 = vld [vmem:[%s12392_s6 + $0x328] sm:$0xf] }
 0x252   : > { %v9341_v3 = vld [vmem:[%s12392_s6 + $0x960] sm:$0xf0]  ;;  %v11348_v1 = vld [vmem:[%s12392_s6 + $0x364] sm:$0xf0] }
 0x253   : > { %v11659_v4 = vld [vmem:[%s12392_s6 + $0xd24] sm:$0xf]  ;;  %v9344_v12 = vor.u32 %v11531_v2, %v9341_v3  ;;  %5793 = vmatpush.bf16.msra.mxu3 %v10944_v5  ;;  %v9091_v2 = vld [vmem:[%s12392_s6 + $0x728] sm:$0xf]  ;;  %v10180_v3 = vor.u32 %v11748_v55, %v10179_v54 }
 0x254   : > { %v9853_v11 = vld [vmem:[%s12392_s6 + $0xd60] sm:$0xf0]  ;;  %v9603_v5 = vld [vmem:[%s12392_s6 + $0xb28] sm:$0xf] }
 0x255   : > { %v11787_v6 = vld [vmem:[%s12392_s6 + $0x1124] sm:$0xf]  ;;  %v9856_v15 = vor.u32 %v11659_v4, %v9853_v11  ;;  %5752 = vmatpush.bf16.msra.mxu0 %v9344_v12  ;;  %v11476_v4 = vld [vmem:[%s12392_s6 + $0x764] sm:$0xf0] }
 0x256   : > { %v10365_v7 = vld [vmem:[%s12392_s6 + $0x1160] sm:$0xf0]  ;;  %v11604_v11 = vld [vmem:[%s12392_s6 + $0xb64] sm:$0xf0] }
 0x257   : > { %v11915_v9 = vld [vmem:[%s12392_s6 + $0x1524] sm:$0xf]  ;;  %v10368_v16 = vor.u32 %v11787_v6, %v10365_v7  ;;  %5766 = vmatpush.bf16.msra.mxu1 %v9856_v15  ;;  %v5492_v6 = vpop.f32.mrf.mxu1  ;;  %v10115_v7 = vld [vmem:[%s12392_s6 + $0xf28] sm:$0xf]  ;;  %v8580_v15 = vor.u32 %v11348_v1, %v8579_v0 }
 0x258   : > { %v10877_v10 = vld [vmem:[%s12392_s6 + $0x1560] sm:$0xf0]  ;;  %v11300_v54 = vld [vmem:[%s12392_s6 + $0x1e4] sm:$0xf0] }
 0x259   : > { %v13511_v13 = vld [vmem:[%s12398_s9] sm:$0xff]  ;;  %v10880_v22 = vor.u32 %v11915_v9, %v10877_v10  ;;  %5780 = vmatpush.bf16.msra.mxu2 %v10368_v16  ;;  %v11732_v9 = vld [vmem:[%s12392_s6 + $0xf64] sm:$0xf0]  ;;  %v5518_v10 = vpop.f32.mrf.mxu3 }
 0x25a   : > { %v1067_v14 = vperm.slane %v13511_v13, 6  ;;  %v11515_v18 = vld [vmem:[%s12392_s6 + $0x8a4] sm:$0xf]  ;;  %v8899_v55 = vld [vmem:[%s12392_s6 + $0x5a8] sm:$0xf] }
 0x25b   : > { %v9277_v19 = vld [vmem:[%s12392_s6 + $0x8e0] sm:$0xf0]  ;;  %5794 = vmatpush.bf16.msra.mxu3 %v10880_v22  ;;  %v9027_v22 = vld [vmem:[%s12392_s6 + $0x6a8] sm:$0xf] }
 0x25c   : > { %v11643_v21 = vld [vmem:[%s12392_s6 + $0xca4] sm:$0xf]  ;;  %v9280_v33 = vor.u32 %v11515_v18, %v9277_v19  ;;  %v5477_v40 = vadd.f32 %v5476_v17, %v1067_v14  ;;  %v5479_v12 = vadd.f32 %v5478_v63, %v1067_v14  ;;  %v9092_v17 = vor.u32 %v11476_v4, %v9091_v2  ;;  %v8515_v19 = vld [vmem:[%s12392_s6 + $0x2a8] sm:$0xf] }
 0x25d   : > { %v9789_v23 = vld [vmem:[%s12392_s6 + $0xce0] sm:$0xf0]  ;;  %v9604_v18 = vor.u32 %v11604_v11, %v9603_v5  ;;  %v11588_v14 = vld [vmem:[%s12392_s6 + $0xae4] sm:$0xf0] }
 0x25e   : > { %v11771_v26 = vld [vmem:[%s12392_s6 + $0x10a4] sm:$0xf]  ;;  %v9792_v36 = vor.u32 %v11643_v21, %v9789_v23  ;;  %5753 = vmatpush.bf16.msra.mxu0 %v9280_v33  ;;  %v5491_v57 = vadd.f32 %v5490_v30, %v5477_v40  ;;  %v11332_v21 = vld [vmem:[%s12392_s6 + $0x2e4] sm:$0xf0]  ;;  %v10116_v23 = vor.u32 %v11732_v9, %v10115_v7 }
 0x25f   : > { %v10301_v29 = vld [vmem:[%s12392_s6 + $0x10e0] sm:$0xf0]  ;;  %v10051_v30 = vld [vmem:[%s12392_s6 + $0xea8] sm:$0xf]  ;;  %v8516_v33 = vor.u32 %v11332_v21, %v8515_v19  ;;  %v5546_v49 = vpop.f32.mrf.mxu1 }
 0x260   : > { %v11899_v31 = vld [vmem:[%s12392_s6 + $0x14a4] sm:$0xf]  ;;  %v10304_v38 = vor.u32 %v11771_v26, %v10301_v29  ;;  %5767 = vmatpush.bf16.msra.mxu1 %v9792_v36  ;;  %v5505_v16 = vadd.f32 %v5504_v56, %v5491_v57  ;;  %v11460_v26 = vld [vmem:[%s12392_s6 + $0x6e4] sm:$0xf0]  ;;  %v9988_v57 = vor.u32 %v11700_v46, %v9987_v45 }
 0x261   : > { %v10813_v32 = vld [vmem:[%s12392_s6 + $0x14e0] sm:$0xf0]  ;;  %v9539_v29 = vld [vmem:[%s12392_s6 + $0xaa8] sm:$0xf]  ;;  %v5520_v56 = vpop.f32.mrf.mxu3 }
 0x262   : > { %v11499_v34 = vld [vmem:[%s12392_s6 + $0x824] sm:$0xf]  ;;  %v10816_v42 = vor.u32 %v11899_v31, %v10813_v32  ;;  %5781 = vmatpush.bf16.msra.mxu2 %v10304_v38  ;;  %v11716_v31 = vld [vmem:[%s12392_s6 + $0xee4] sm:$0xf0]  ;;  %v5493_v32 = vadd.f32 %v5492_v6, %v5479_v12  ;;  %v9540_v36 = vor.u32 %v11588_v14, %v9539_v29 }
 0x263   : > { %v9213_v20 = vld [vmem:[%s12392_s6 + $0x860] sm:$0xf0]  ;;  %v8451_v38 = vld [vmem:[%s12392_s6 + $0x228] sm:$0xf]  ;;  %v10052_v40 = vor.u32 %v11716_v31, %v10051_v30 }
 0x264   : > { %v11627_v39 = vld [vmem:[%s12392_s6 + $0xc24] sm:$0xf]  ;;  %v9216_v48 = vor.u32 %v11499_v34, %v9213_v20  ;;  %5795 = vmatpush.bf16.msra.mxu3 %v10816_v42  ;;  %v5519_v34 = vadd.f32 %v5518_v10, %v5505_v16  ;;  %v9028_v20 = vor.u32 %v11460_v26, %v9027_v22  ;;  %v11444_v42 = vld [vmem:[%s12392_s6 + $0x664] sm:$0xf0] }
 0x265   : > { %v9725_v28 = vld [vmem:[%s12392_s6 + $0xc60] sm:$0xf0]  ;;  %v9923_v63 = vld [vmem:[%s12392_s6 + $0xda8] sm:$0xf] }
 0x266   : > { %v11755_v27 = vld [vmem:[%s12392_s6 + $0x1024] sm:$0xf]  ;;  %v9728_v52 = vor.u32 %v11627_v39, %v9725_v28  ;;  %5754 = vmatpush.bf16.msra.mxu0 %v9216_v48  ;;  %v11316_v39 = vld [vmem:[%s12392_s6 + $0x264] sm:$0xf0] }
 0x267   : > { %v10237_v35 = vld [vmem:[%s12392_s6 + $0x1060] sm:$0xf0]  ;;  %v8963_v28 = vld [vmem:[%s12392_s6 + $0x628] sm:$0xf]  ;;  %v8452_v48 = vor.u32 %v11316_v39, %v8451_v38  ;;  %v5548_v21 = vpop.f32.mrf.mxu1 }
 0x268   : > { %v11883_v43 = vld [vmem:[%s12392_s6 + $0x1424] sm:$0xf]  ;;  %v10240_v53 = vor.u32 %v11755_v27, %v10237_v35  ;;  %5768 = vmatpush.bf16.msra.mxu1 %v9728_v52  ;;  %v5506_v27 = vpop.f32.mrf.mxu2  ;;  %v9475_v35 = vld [vmem:[%s12392_s6 + $0xa28] sm:$0xf]  ;;  %v8964_v51 = vor.u32 %v11444_v42, %v8963_v28 }
 0x269   : > { %v10749_v44 = vld [vmem:[%s12392_s6 + $0x1460] sm:$0xf0]  ;;  %5755 = vmatmul.bf16.vlgmr.msra.gmra.mxu0 %v12531_v24  ;;  %v5507_v50 = vadd.f32 %v5506_v27, %v5493_v32  ;;  %v11684_v0 = vld [vmem:[%s12392_s6 + $0xde4] sm:$0xf0] }
 0x26a   : > { %v10752_v58 = vor.u32 %v11883_v43, %v10749_v44  ;;  %5782 = vmatpush.bf16.msra.mxu2 %v10240_v53  ;;  %5803 = vmatpush.bf16.msrb.mxu0 %v8644_v60  ;;  %v11572_v43 = vld [vmem:[%s12392_s6 + $0xa64] sm:$0xf0]  ;;  %v5532_v44 = vpop.f32.mrf.mxu0  ;;  %v9924_v7 = vor.u32 %v11684_v0, %v9923_v63  ;;  %v1068_v0 = vperm.slane %v13511_v13, 7 }
 0x26b   : > { %5769 = vmatmul.bf16.vlgmr.msra.gmra.mxu1 %v12533_v25  ;;  %v5533_v47 = vadd.f32 %v5532_v44, %v5519_v34  ;;  %v9476_v52 = vor.u32 %v11572_v43, %v9475_v35  ;;  %v8387_v53 = vld [vmem:[%s12392_s6 + $0x1a8] sm:$0xf]  ;;  %v5521_v2 = vadd.f32 %v5520_v56, %v5507_v50 }
 0x26c   : > { %5796 = vmatpush.bf16.msra.mxu3 %v10752_v58  ;;  %5817 = vmatpush.bf16.msrb.mxu1 %v9156_v61  ;;  %v11428_v60 = vld [vmem:[%s12392_s6 + $0x5e4] sm:$0xf0]  ;;  %v8388_v1 = vor.u32 %v11300_v54, %v8387_v53  ;;  %v11356_v53 = vld [vmem:[%s12392_s6 + $0x3ac] sm:$0xf] }
 0x26d   : > { %5783 = vmatmul.bf16.vlgmr.msra.gmra.mxu2 %v12592_v37  ;;  %v5547_v58 = vadd.f32 %v5546_v49, %v5533_v47  ;;  %v9411_v61 = vld [vmem:[%s12392_s6 + $0x9a8] sm:$0xf]  ;;  %v8645_v54 = vld [vmem:[%s12392_s6 + $0x3e8] sm:$0xf0] }
 0x26e   : > { %5831 = vmatpush.bf16.msrb.mxu2 %v9668_v62  ;;  %5804 = vmatpush.bf16.msrb.mxu0 %v8580_v15  ;;  %v11556_v62 = vld [vmem:[%s12392_s6 + $0x9e4] sm:$0xf0] }
 0x26f   : > { %5797 = vmatmul.bf16.vlgmr.msra.gmra.mxu3 %v12597_v41  ;;  %6318 = vst [vmem:[%s12908_s27 + $0x30] sm:$0xff] %v5547_v58  ;;  %v9412_v4 = vor.u32 %v11556_v62, %v9411_v61  ;;  %v8323_v5 = vld [vmem:[%s12392_s6 + $0x128] sm:$0xf]  ;;  %v11484_v58 = vld [vmem:[%s12392_s6 + $0x7ac] sm:$0xf]  ;;  %v5574_v61 = vpop.f32.mrf.mxu3 }
 0x270   : > { %5845 = vmatpush.bf16.msrb.mxu3 %v10180_v3  ;;  %5818 = vmatpush.bf16.msrb.mxu1 %v9092_v17  ;;  %v8900_v3 = vor.u32 %v11428_v60, %v8899_v55  ;;  %v11284_v11 = vld [vmem:[%s12392_s6 + $0x164] sm:$0xf0]  ;;  %v5560_v55 = vpop.f32.mrf.mxu2  ;;  %v9157_v60 = vld [vmem:[%s12392_s6 + $0x7e8] sm:$0xf0] }
 0x271   : > { %v8835_v6 = vld [vmem:[%s12392_s6 + $0x528] sm:$0xf]  ;;  %v8324_v19 = vor.u32 %v11284_v11, %v8323_v5  ;;  %v9160_v11 = vor.u32 %v11484_v58, %v9157_v60  ;;  %v11292_v58 = vld [vmem:[%s12392_s6 + $0x1ac] sm:$0xf] }
 0x272   : > { %5832 = vmatpush.bf16.msrb.mxu2 %v9604_v18  ;;  %5805 = vmatpush.bf16.msrb.mxu0 %v8516_v33  ;;  %v11412_v9 = vld [vmem:[%s12392_s6 + $0x564] sm:$0xf0]  ;;  %v5534_v15 = vpop.f32.mrf.mxu0  ;;  %v8389_v60 = vld [vmem:[%s12392_s6 + $0x1e8] sm:$0xf0] }
 0x273   : > { %v9347_v10 = vld [vmem:[%s12392_s6 + $0x928] sm:$0xf]  ;;  %v5535_v18 = vadd.f32 %v5534_v15, %v5521_v2  ;;  %v8836_v22 = vor.u32 %v11412_v9, %v8835_v6  ;;  %v8648_v2 = vor.u32 %v11356_v53, %v8645_v54  ;;  %v8581_v9 = vld [vmem:[%s12392_s6 + $0x368] sm:$0xf0]  ;;  %v5561_v15 = vadd.f32 %v5560_v55, %v1068_v0 }
 0x274   : > { %5846 = vmatpush.bf16.msrb.mxu3 %v10116_v23  ;;  %5819 = vmatpush.bf16.msrb.mxu1 %v9028_v20  ;;  %v11540_v12 = vld [vmem:[%s12392_s6 + $0x964] sm:$0xf0] }
 0x275   : > { %v9859_v16 = vld [vmem:[%s12392_s6 + $0xd28] sm:$0xf]  ;;  %v9348_v23 = vor.u32 %v11540_v12, %v9347_v10  ;;  %v5549_v31 = vadd.f32 %v5548_v21, %v5535_v18  ;;  %v11468_v10 = vld [vmem:[%s12392_s6 + $0x72c] sm:$0xf] }
 0x276   : > { %5833 = vmatpush.bf16.msrb.mxu2 %v9540_v36  ;;  %5806 = vmatpush.bf16.msrb.mxu0 %v8452_v48  ;;  %v11668_v17 = vld [vmem:[%s12392_s6 + $0xd64] sm:$0xf0]  ;;  %v9093_v12 = vld [vmem:[%s12392_s6 + $0x768] sm:$0xf0] }
 0x277   : > { %v8259_v26 = vld [vmem:[%s12392_s6 + $0xa8] sm:$0xf]  ;;  %v9860_v30 = vor.u32 %v11668_v17, %v9859_v16  ;;  %6334 = vst [vmem:[%s12908_s27 + $0x7b0] sm:$0xff] %v5549_v31  ;;  %v9029_v31 = vld [vmem:[%s12392_s6 + $0x6e8] sm:$0xf0] }
 0x278   : > { %5847 = vmatpush.bf16.msrb.mxu3 %v10052_v40  ;;  %5820 = vmatpush.bf16.msrb.mxu1 %v8964_v51  ;;  %v11268_v29 = vld [vmem:[%s12392_s6 + $0xe4] sm:$0xf0] }
 0x279   : > { %v8771_v14 = vld [vmem:[%s12392_s6 + $0x4a8] sm:$0xf]  ;;  %v8260_v38 = vor.u32 %v11268_v29, %v8259_v26  ;;  %v11324_v29 = vld [vmem:[%s12392_s6 + $0x2ac] sm:$0xf] }
 0x27a   : > { %5834 = vmatpush.bf16.msrb.mxu2 %v9476_v52  ;;  %5807 = vmatpush.bf16.msrb.mxu0 %v8388_v1  ;;  %v11396_v32 = vld [vmem:[%s12392_s6 + $0x4e4] sm:$0xf0] }
 0x27b   : > { %v9283_v33 = vld [vmem:[%s12392_s6 + $0x8a8] sm:$0xf]  ;;  %v8772_v27 = vor.u32 %v11396_v32, %v8771_v14  ;;  %v8517_v14 = vld [vmem:[%s12392_s6 + $0x2e8] sm:$0xf0]  ;;  %v5575_v32 = vadd.f32 %v5574_v61, %v5561_v15 }
 0x27c   : > { %5848 = vmatpush.bf16.msrb.mxu3 %v9988_v57  ;;  %5821 = vmatpush.bf16.msrb.mxu1 %v8900_v3  ;;  %v11524_v34 = vld [vmem:[%s12392_s6 + $0x8e4] sm:$0xf0] }
 0x27d   : > { %v9795_v20 = vld [vmem:[%s12392_s6 + $0xca8] sm:$0xf]  ;;  %v9284_v40 = vor.u32 %v11524_v34, %v9283_v33  ;;  %v5562_v34 = vpop.f32.mrf.mxu2 }
 0x27e   : > { %5835 = vmatpush.bf16.msrb.mxu2 %v9412_v4  ;;  %v11652_v36 = vld [vmem:[%s12392_s6 + $0xce4] sm:$0xf0]  ;;  %5808 = vmatpush.bf16.msrb.mxu0 %v8324_v19 }
 0x27f   : > { %v8195_v39 = vld [vmem:[%s12392_s6 + $0x28] sm:$0xf]  ;;  %v9796_v44 = vor.u32 %v11652_v36, %v9795_v20  ;;  %v8520_v36 = vor.u32 %v11324_v29, %v8517_v14 }
 0x280   : > { %5849 = vmatpush.bf16.msrb.mxu3 %v9924_v7  ;;  %v11252_v28 = vld [vmem:[%s12392_s6 + $0x64] sm:$0xf0]  ;;  %5822 = vmatpush.bf16.msrb.mxu1 %v8836_v22  ;;  %v11340_v7 = vld [vmem:[%s12392_s6 + $0x32c] sm:$0xf] }
 0x281   : > { %v8707_v42 = vld [vmem:[%s12392_s6 + $0x428] sm:$0xf]  ;;  %v8196_v51 = vor.u32 %v11252_v28, %v8195_v39  ;;  %v8584_v18 = vor.u32 %v11340_v7, %v8581_v9  ;;  %v11276_v9 = vld [vmem:[%s12392_s6 + $0x12c] sm:$0xf] }
 0x282   : > { %5836 = vmatpush.bf16.msrb.mxu2 %v9348_v23  ;;  %v11380_v35 = vld [vmem:[%s12392_s6 + $0x464] sm:$0xf0]  ;;  %5809 = vmatpush.bf16.msrb.mxu0 %v8260_v38  ;;  %v9096_v23 = vor.u32 %v11468_v10, %v9093_v12  ;;  %v5576_v38 = vpop.f32.mrf.mxu3  ;;  %v8325_v10 = vld [vmem:[%s12392_s6 + $0x168] sm:$0xf0] }
 0x283   : > { %v9219_v43 = vld [vmem:[%s12392_s6 + $0x828] sm:$0xf]  ;;  %v8708_v56 = vor.u32 %v11380_v35, %v8707_v42  ;;  %v11308_v35 = vld [vmem:[%s12392_s6 + $0x22c] sm:$0xf] }
 0x284   : > { %5850 = vmatpush.bf16.msrb.mxu3 %v9860_v30  ;;  %v11508_v45 = vld [vmem:[%s12392_s6 + $0x864] sm:$0xf0]  ;;  %5823 = vmatpush.bf16.msrb.mxu1 %v8772_v27  ;;  %v11452_v30 = vld [vmem:[%s12392_s6 + $0x6ac] sm:$0xf] }
 0x285   : > { %v9731_v46 = vld [vmem:[%s12392_s6 + $0xc28] sm:$0xf]  ;;  %v9220_v57 = vor.u32 %v11508_v45, %v9219_v43  ;;  %v8453_v43 = vld [vmem:[%s12392_s6 + $0x268] sm:$0xf0]  ;;  %v5616_v7 = vpop.f32.mrf.mxu2 }
 0x286   : > { %v11636_v47 = vld [vmem:[%s12392_s6 + $0xc64] sm:$0xf0]  ;;  %5837 = vmatpush.bf16.msrb.mxu2 %v9284_v40  ;;  %5810 = vmatpush.bf16.msrb.mxu0 %v8196_v51  ;;  %v9032_v40 = vor.u32 %v11452_v30, %v9029_v31  ;;  %v11436_v45 = vld [vmem:[%s12392_s6 + $0x62c] sm:$0xf] }
 0x287   : > { %v10691_v48 = vld [vmem:[%s12392_s6 + $0x13a8] sm:$0xf]  ;;  %v9732_v62 = vor.u32 %v11636_v47, %v9731_v46  ;;  %v8965_v46 = vld [vmem:[%s12392_s6 + $0x668] sm:$0xf0] }
 0x288   : > { %v11876_v49 = vld [vmem:[%s12392_s6 + $0x13e4] sm:$0xf0]  ;;  %5851 = vmatpush.bf16.msrb.mxu3 %v9796_v44  ;;  %5824 = vmatpush.bf16.msrb.mxu1 %v8708_v56  ;;  %v5588_v44 = vpop.f32.mrf.mxu0  ;;  %v8968_v56 = vor.u32 %v11436_v45, %v8965_v46  ;;  %v11244_v45 = vld [vmem:[%s12392_s6 + $0x2c] sm:$0xf] }
 0x289   : > { %v11203_v50 = vld [vmem:[%s12392_s6 + $0x17a8] sm:$0xf]  ;;  %v10692_v63 = vor.u32 %v11876_v49, %v10691_v48  ;;  %5811 = vmatmul.bf16.vlgmr.msrb.gmra.mxu0 %v12493_v59  ;;  %v5589_v47 = vadd.f32 %v5588_v44, %v5575_v32  ;;  %v5602_v49 = vpop.f32.mrf.mxu1 }
 0x28a   : > { %v12004_v52 = vld [vmem:[%s12392_s6 + $0x17e4] sm:$0xf0]  ;;  %5838 = vmatpush.bf16.msrb.mxu2 %v9220_v57 }
 0x28b   : > { %v11204_v1 = vor.u32 %v12004_v52, %v11203_v50  ;;  %v10627_v3 = vld [vmem:[%s12392_s6 + $0x1328] sm:$0xf]  ;;  %5859 = vmatpush.bf16.msra.mxu0 %v10692_v63  ;;  %5825 = vmatmul.bf16.vlgmr.msrb.gmra.mxu1 %v12509_v8  ;;  %v5563_v50 = vadd.f32 %v5562_v34, %v1068_v0  ;;  %v8456_v52 = vor.u32 %v11308_v35, %v8453_v43  ;;  %v8901_v63 = vld [vmem:[%s12392_s6 + $0x5e8] sm:$0xf0] }
 0x28c   : > { %v11860_v4 = vld [vmem:[%s12392_s6 + $0x1364] sm:$0xf0]  ;;  %5852 = vmatpush.bf16.msrb.mxu3 %v9732_v62  ;;  %v5603_v61 = vadd.f32 %v5602_v49, %v5589_v47  ;;  %v11420_v62 = vld [vmem:[%s12392_s6 + $0x5ac] sm:$0xf] }
 0x28d   : > { %v11139_v5 = vld [vmem:[%s12392_s6 + $0x1728] sm:$0xf]  ;;  %v10628_v16 = vor.u32 %v11860_v4, %v10627_v3  ;;  %5873 = vmatpush.bf16.msra.mxu1 %v11204_v1  ;;  %5839 = vmatmul.bf16.vlgmr.msrb.gmra.mxu2 %v12531_v24  ;;  %v5577_v1 = vadd.f32 %v5576_v38, %v5563_v50  ;;  %v8392_v3 = vor.u32 %v11292_v58, %v8389_v60  ;;  %v11260_v34 = vld [vmem:[%s12392_s6 + $0xac] sm:$0xf]  ;;  %v5618_v47 = vpop.f32.mrf.mxu2 }
 0x28e   : > { %v11988_v6 = vld [vmem:[%s12392_s6 + $0x1764] sm:$0xf0]  ;;  %5887 = vmatpush.bf16.msra.mxu2 %v8648_v2  ;;  %v5617_v12 = vadd.f32 %v5616_v7, %v5603_v61  ;;  %v8773_v38 = vld [vmem:[%s12392_s6 + $0x4e8] sm:$0xf0] }
 0x28f   : > { %v11140_v17 = vor.u32 %v11988_v6, %v11139_v5  ;;  %v10563_v19 = vld [vmem:[%s12392_s6 + $0x12a8] sm:$0xf]  ;;  %5860 = vmatpush.bf16.msra.mxu0 %v10628_v16  ;;  %5853 = vmatmul.bf16.vlgmr.msrb.gmra.mxu3 %v12533_v25  ;;  %v8904_v6 = vor.u32 %v11420_v62, %v8901_v63  ;;  %v5630_v16 = vpop.f32.mrf.mxu3  ;;  %v11372_v49 = vld [vmem:[%s12392_s6 + $0x42c] sm:$0xf] }
 0x290   : > { %v11844_v21 = vld [vmem:[%s12392_s6 + $0x12e4] sm:$0xf0]  ;;  %5901 = vmatpush.bf16.msra.mxu3 %v9160_v11  ;;  %v5590_v15 = vpop.f32.mrf.mxu0  ;;  %v8709_v50 = vld [vmem:[%s12392_s6 + $0x468] sm:$0xf0] }
 0x291   : > { %v11075_v22 = vld [vmem:[%s12392_s6 + $0x16a8] sm:$0xf]  ;;  %v10564_v33 = vor.u32 %v11844_v21, %v10563_v19  ;;  %5874 = vmatpush.bf16.msra.mxu1 %v11140_v17  ;;  %v11404_v17 = vld [vmem:[%s12392_s6 + $0x52c] sm:$0xf]  ;;  %v5604_v32 = vpop.f32.mrf.mxu1 }
 0x292   : > { %v11972_v26 = vld [vmem:[%s12392_s6 + $0x16e4] sm:$0xf0]  ;;  %5888 = vmatpush.bf16.msra.mxu2 %v8584_v18  ;;  %v8837_v18 = vld [vmem:[%s12392_s6 + $0x568] sm:$0xf0] }
 0x293   : > { %v11076_v20 = vor.u32 %v11972_v26, %v11075_v22  ;;  %v10499_v39 = vld [vmem:[%s12392_s6 + $0x1228] sm:$0xf]  ;;  %5861 = vmatpush.bf16.msra.mxu0 %v10564_v33  ;;  %v5591_v22 = vadd.f32 %v5590_v15, %v5577_v1  ;;  %v8328_v26 = vor.u32 %v11276_v9, %v8325_v10  ;;  %v8840_v31 = vor.u32 %v11404_v17, %v8837_v18  ;;  %v11868_v58 = vld [vmem:[%s12392_s6 + $0x13ac] sm:$0xf] }
 0x294   : > { %v11828_v28 = vld [vmem:[%s12392_s6 + $0x1264] sm:$0xf0]  ;;  %5902 = vmatpush.bf16.msra.mxu3 %v9096_v23  ;;  %v5631_v23 = vadd.f32 %v5630_v16, %v5617_v12  ;;  %v10693_v60 = vld [vmem:[%s12392_s6 + $0x13e8] sm:$0xf0]  ;;  %v8712_v1 = vor.u32 %v11372_v49, %v8709_v50 }
 0x295   : > { %v11011_v27 = vld [vmem:[%s12392_s6 + $0x1628] sm:$0xf]  ;;  %v10500_v48 = vor.u32 %v11828_v28, %v10499_v39  ;;  %5875 = vmatpush.bf16.msra.mxu1 %v11076_v20  ;;  %v8261_v20 = vld [vmem:[%s12392_s6 + $0xe8] sm:$0xf0] }
 0x296   : > { %v11956_v42 = vld [vmem:[%s12392_s6 + $0x1664] sm:$0xf0]  ;;  %5889 = vmatpush.bf16.msra.mxu2 %v8520_v36  ;;  %6319 = vst [vmem:[%s12908_s27 + $0x38] sm:$0xff] %v5631_v23  ;;  %v11388_v36 = vld [vmem:[%s12392_s6 + $0x4ac] sm:$0xf]  ;;  %v8264_v35 = vor.u32 %v11260_v34, %v8261_v20 }
 0x297   : > { %v11012_v51 = vor.u32 %v11956_v42, %v11011_v27  ;;  %v10435_v53 = vld [vmem:[%s12392_s6 + $0x11a8] sm:$0xf]  ;;  %5862 = vmatpush.bf16.msra.mxu0 %v10500_v48  ;;  %v8776_v46 = vor.u32 %v11388_v36, %v8773_v38  ;;  %v8197_v48 = vld [vmem:[%s12392_s6 + $0x68] sm:$0xf0] }
 0x298   : > { %v11812_v54 = vld [vmem:[%s12392_s6 + $0x11e4] sm:$0xf0]  ;;  %5903 = vmatpush.bf16.msra.mxu3 %v9032_v40  ;;  %v5605_v40 = vadd.f32 %v5604_v32, %v5591_v22  ;;  %v8200_v63 = vor.u32 %v11244_v45, %v8197_v48  ;;  %v10117_v9 = vld [vmem:[%s12392_s6 + $0xf68] sm:$0xf0] }
 0x299   : > { %v10947_v55 = vld [vmem:[%s12392_s6 + $0x15a8] sm:$0xf]  ;;  %v10436_v13 = vor.u32 %v11812_v54, %v10435_v53  ;;  %5876 = vmatpush.bf16.msra.mxu1 %v11012_v51  ;;  %v11612_v53 = vld [vmem:[%s12392_s6 + $0xbac] sm:$0xf] }
 0x29a   : > { %v11940_v57 = vld [vmem:[%s12392_s6 + $0x15e4] sm:$0xf0]  ;;  %5890 = vmatpush.bf16.msra.mxu2 %v8456_v52  ;;  %v5619_v51 = vadd.f32 %v5618_v47, %v5605_v40  ;;  %v5632_v52 = vpop.f32.mrf.mxu3  ;;  %v9669_v54 = vld [vmem:[%s12392_s6 + $0xbe8] sm:$0xf0] }
 0x29b   : > { %v10371_v0 = vld [vmem:[%s12392_s6 + $0x1128] sm:$0xf]  ;;  %v10948_v2 = vor.u32 %v11940_v57, %v10947_v55  ;;  %5863 = vmatpush.bf16.msra.mxu0 %v10436_v13  ;;  %v11740_v55 = vld [vmem:[%s12392_s6 + $0xfac] sm:$0xf] }
 0x29c   : > { %v11796_v4 = vld [vmem:[%s12392_s6 + $0x1164] sm:$0xf0]  ;;  %5904 = vmatpush.bf16.msra.mxu3 %v8968_v56  ;;  %v10181_v57 = vld [vmem:[%s12392_s6 + $0xfe8] sm:$0xf0]  ;;  %v5633_v61 = vadd.f32 %v5632_v52, %v5619_v51 }
 0x29d   : > { %v10883_v5 = vld [vmem:[%s12392_s6 + $0x1528] sm:$0xf]  ;;  %v10372_v19 = vor.u32 %v11796_v4, %v10371_v0  ;;  %5877 = vmatpush.bf16.msra.mxu1 %v10948_v2  ;;  %v11996_v13 = vld [vmem:[%s12392_s6 + $0x17ac] sm:$0xf]  ;;  %v9672_v2 = vor.u32 %v11612_v53, %v9669_v54  ;;  %v10184_v4 = vor.u32 %v11740_v55, %v10181_v57 }
 0x29e   : > { %v11924_v11 = vld [vmem:[%s12392_s6 + $0x1564] sm:$0xf0]  ;;  %5891 = vmatpush.bf16.msra.mxu2 %v8392_v3  ;;  %v11205_v0 = vld [vmem:[%s12392_s6 + $0x17e8] sm:$0xf0]  ;;  %6335 = vst [vmem:[%s12908_s27 + $0x7b8] sm:$0xff] %v5633_v61 }
 0x29f   : > { %v10884_v21 = vor.u32 %v11924_v11, %v10883_v5  ;;  %v10307_v29 = vld [vmem:[%s12392_s6 + $0x10a8] sm:$0xf]  ;;  %5864 = vmatpush.bf16.msra.mxu0 %v10372_v19  ;;  %v11596_v3 = vld [vmem:[%s12392_s6 + $0xb2c] sm:$0xf]  ;;  %v10696_v5 = vor.u32 %v11868_v58, %v10693_v60  ;;  %v11208_v7 = vor.u32 %v11996_v13, %v11205_v0 }
 0x2a0   : > { %v11780_v14 = vld [vmem:[%s12392_s6 + $0x10e4] sm:$0xf0]  ;;  %5905 = vmatpush.bf16.msra.mxu3 %v8904_v6  ;;  %v9605_v11 = vld [vmem:[%s12392_s6 + $0xb68] sm:$0xf0] }
 0x2a1   : > { %v10819_v30 = vld [vmem:[%s12392_s6 + $0x14a8] sm:$0xf]  ;;  %v10308_v39 = vor.u32 %v11780_v14, %v10307_v29  ;;  %5878 = vmatpush.bf16.msra.mxu1 %v10884_v21  ;;  %v11724_v6 = vld [vmem:[%s12392_s6 + $0xf2c] sm:$0xf]  ;;  %v9608_v17 = vor.u32 %v11596_v3, %v9605_v11 }
 0x2a2   : > { %v11908_v33 = vld [vmem:[%s12392_s6 + $0x14e4] sm:$0xf0]  ;;  %5892 = vmatpush.bf16.msra.mxu2 %v8328_v26  ;;  %v11852_v10 = vld [vmem:[%s12392_s6 + $0x132c] sm:$0xf]  ;;  %v10120_v18 = vor.u32 %v11724_v6, %v10117_v9 }
 0x2a3   : > { %v10243_v28 = vld [vmem:[%s12392_s6 + $0x1028] sm:$0xf]  ;;  %v10820_v42 = vor.u32 %v11908_v33, %v10819_v30  ;;  %5865 = vmatpush.bf16.msra.mxu0 %v10308_v39  ;;  %v10629_v12 = vld [vmem:[%s12392_s6 + $0x1368] sm:$0xf0] }
 0x2a4   : > { %v11764_v27 = vld [vmem:[%s12392_s6 + $0x1064] sm:$0xf0]  ;;  %5906 = vmatpush.bf16.msra.mxu3 %v8840_v31  ;;  %v11980_v15 = vld [vmem:[%s12392_s6 + $0x172c] sm:$0xf]  ;;  %v10632_v19 = vor.u32 %v11852_v10, %v10629_v12  ;;  %v5644_v10 = vpop.f32.mrf.mxu0 }
 0x2a5   : > { %v10755_v43 = vld [vmem:[%s12392_s6 + $0x1428] sm:$0xf]  ;;  %v10244_v56 = vor.u32 %v11764_v27, %v10243_v28  ;;  %5879 = vmatpush.bf16.msra.mxu1 %v10820_v42  ;;  %v11141_v16 = vld [vmem:[%s12392_s6 + $0x1768] sm:$0xf0] }
 0x2a6   : > { %v11892_v44 = vld [vmem:[%s12392_s6 + $0x1464] sm:$0xf0]  ;;  %5893 = vmatpush.bf16.msra.mxu2 %v8264_v35  ;;  %v11580_v21 = vld [vmem:[%s12392_s6 + $0xaac] sm:$0xf]  ;;  %v11144_v26 = vor.u32 %v11980_v15, %v11141_v16 }
 0x2a7   : > { %v10756_v62 = vor.u32 %v11892_v44, %v10755_v43  ;;  %5866 = vmatpush.bf16.msra.mxu0 %v10244_v56  ;;  %v9541_v22 = vld [vmem:[%s12392_s6 + $0xae8] sm:$0xf0] }
 0x2a8   : > { %5907 = vmatpush.bf16.msra.mxu3 %v8776_v46  ;;  %v11708_v23 = vld [vmem:[%s12392_s6 + $0xeac] sm:$0xf]  ;;  %v9544_v33 = vor.u32 %v11580_v21, %v9541_v22  ;;  %v5658_v21 = vpop.f32.mrf.mxu1 }
 0x2a9   : > { %5880 = vmatpush.bf16.msra.mxu1 %v10756_v62  ;;  %v10053_v29 = vld [vmem:[%s12392_s6 + $0xee8] sm:$0xf0] }
 0x2aa   : > { %5894 = vmatpush.bf16.msra.mxu2 %v8200_v63  ;;  %5867 = vmatmul.bf16.vlgmr.msra.gmra.mxu0 %v12592_v37  ;;  %v11836_v14 = vld [vmem:[%s12392_s6 + $0x12ac] sm:$0xf]  ;;  %v10056_v34 = vor.u32 %v11708_v23, %v10053_v29 }
 0x2ab   : > { %5915 = vmatpush.bf16.msrb.mxu0 %v9672_v2  ;;  %v10565_v30 = vld [vmem:[%s12392_s6 + $0x12e8] sm:$0xf0] }
 0x2ac   : > { %5908 = vmatpush.bf16.msra.mxu3 %v8712_v1  ;;  %5881 = vmatmul.bf16.vlgmr.msra.gmra.mxu1 %v12597_v41  ;;  %v11964_v31 = vld [vmem:[%s12392_s6 + $0x16ac] sm:$0xf]  ;;  %v10568_v20 = vor.u32 %v11836_v14, %v10565_v30 }
 0x2ad   : > { %5929 = vmatpush.bf16.msrb.mxu1 %v10184_v4  ;;  %v11077_v32 = vld [vmem:[%s12392_s6 + $0x16e8] sm:$0xf0]  ;;  %5895 = vmatmul.bf16.vlgmr.msra.gmra.mxu2 %v12493_v59 }
 0x2ae   : > { %5943 = vmatpush.bf16.msrb.mxu2 %v10696_v5  ;;  %v11564_v36 = vld [vmem:[%s12392_s6 + $0xa2c] sm:$0xf]  ;;  %v11080_v28 = vor.u32 %v11964_v31, %v11077_v32 }
 0x2af   : > { %5916 = vmatpush.bf16.msrb.mxu0 %v9608_v17  ;;  %5909 = vmatmul.bf16.vlgmr.msra.gmra.mxu3 %v12509_v8  ;;  %v9477_v38 = vld [vmem:[%s12392_s6 + $0xa68] sm:$0xf0] }
 0x2b0   : > { %5957 = vmatpush.bf16.msrb.mxu3 %v11208_v7  ;;  %v11692_v39 = vld [vmem:[%s12392_s6 + $0xe2c] sm:$0xf]  ;;  %v9480_v44 = vor.u32 %v11564_v36, %v9477_v38 }
 0x2b1   : > { %5930 = vmatpush.bf16.msrb.mxu1 %v10120_v18  ;;  %v9989_v27 = vld [vmem:[%s12392_s6 + $0xe68] sm:$0xf0] }
 0x2b2   : > { %5944 = vmatpush.bf16.msrb.mxu2 %v10632_v19  ;;  %v11820_v40 = vld [vmem:[%s12392_s6 + $0x122c] sm:$0xf]  ;;  %v9992_v45 = vor.u32 %v11692_v39, %v9989_v27  ;;  %v8651_v27 = vld [vmem:[%s12392_s6 + $0x3b0] sm:$0xf] }
 0x2b3   : > { %v10501_v42 = vld [vmem:[%s12392_s6 + $0x1268] sm:$0xf0]  ;;  %5917 = vmatpush.bf16.msrb.mxu0 %v9544_v33 }
 0x2b4   : > { %5958 = vmatpush.bf16.msrb.mxu3 %v11144_v26  ;;  %v11948_v35 = vld [vmem:[%s12392_s6 + $0x162c] sm:$0xf]  ;;  %v10504_v46 = vor.u32 %v11820_v40, %v10501_v42  ;;  %v11365_v40 = vld [vmem:[%s12392_s6 + $0x3ec] sm:$0xf0] }
 0x2b5   : > { %v11013_v43 = vld [vmem:[%s12392_s6 + $0x1668] sm:$0xf0]  ;;  %5931 = vmatpush.bf16.msrb.mxu1 %v10056_v34  ;;  %v9163_v42 = vld [vmem:[%s12392_s6 + $0x7b0] sm:$0xf] }
 0x2b6   : > { %5945 = vmatpush.bf16.msrb.mxu2 %v10568_v20  ;;  %v11548_v47 = vld [vmem:[%s12392_s6 + $0x9ac] sm:$0xf]  ;;  %v11016_v50 = vor.u32 %v11948_v35, %v11013_v43  ;;  %v11493_v43 = vld [vmem:[%s12392_s6 + $0x7ec] sm:$0xf0] }
 0x2b7   : > { %v9413_v48 = vld [vmem:[%s12392_s6 + $0x9e8] sm:$0xf0]  ;;  %5918 = vmatpush.bf16.msrb.mxu0 %v9480_v44  ;;  %v9675_v44 = vld [vmem:[%s12392_s6 + $0xbb0] sm:$0xf] }
 0x2b8   : > { %v11676_v49 = vld [vmem:[%s12392_s6 + $0xdac] sm:$0xf]  ;;  %5959 = vmatpush.bf16.msrb.mxu3 %v11080_v28  ;;  %v9416_v56 = vor.u32 %v11548_v47, %v9413_v48  ;;  %v10187_v48 = vld [vmem:[%s12392_s6 + $0xfb0] sm:$0xf] }
 0x2b9   : > { %v9925_v51 = vld [vmem:[%s12392_s6 + $0xde8] sm:$0xf0]  ;;  %5932 = vmatpush.bf16.msrb.mxu1 %v9992_v45  ;;  %v11621_v45 = vld [vmem:[%s12392_s6 + $0xbec] sm:$0xf0] }
 0x2ba   : > { %v11804_v52 = vld [vmem:[%s12392_s6 + $0x11ac] sm:$0xf]  ;;  %5946 = vmatpush.bf16.msrb.mxu2 %v10504_v46  ;;  %v9928_v58 = vor.u32 %v11676_v49, %v9925_v51  ;;  %v11749_v49 = vld [vmem:[%s12392_s6 + $0xfec] sm:$0xf0] }
 0x2bb   : > { %v10437_v53 = vld [vmem:[%s12392_s6 + $0x11e8] sm:$0xf0]  ;;  %5919 = vmatpush.bf16.msrb.mxu0 %v9416_v56  ;;  %v5646_v56 = vpop.f32.mrf.mxu0 }
 0x2bc   : > { %v11932_v54 = vld [vmem:[%s12392_s6 + $0x15ac] sm:$0xf]  ;;  %v10440_v60 = vor.u32 %v11804_v52, %v10437_v53  ;;  %5960 = vmatpush.bf16.msrb.mxu3 %v11016_v50  ;;  %v5672_v50 = vpop.f32.mrf.mxu2  ;;  %v8652_v53 = vor.u32 %v11365_v40, %v8651_v27  ;;  %v9995_v27 = vld [vmem:[%s12392_s6 + $0xe30] sm:$0xf] }
 0x2bd   : > { %v10949_v55 = vld [vmem:[%s12392_s6 + $0x15e8] sm:$0xf0]  ;;  %5933 = vmatpush.bf16.msrb.mxu1 %v9928_v58  ;;  %v11349_v58 = vld [vmem:[%s12392_s6 + $0x36c] sm:$0xf0] }
 0x2be   : > { %v11532_v57 = vld [vmem:[%s12392_s6 + $0x92c] sm:$0xf]  ;;  %v10952_v13 = vor.u32 %v11932_v54, %v10949_v55  ;;  %5947 = vmatpush.bf16.msrb.mxu2 %v10440_v60  ;;  %v9164_v54 = vor.u32 %v11493_v43, %v9163_v42  ;;  %v9676_v55 = vor.u32 %v11621_v45, %v9675_v44  ;;  %v9099_v60 = vld [vmem:[%s12392_s6 + $0x730] sm:$0xf] }
 0x2bf   : > { %v9349_v61 = vld [vmem:[%s12392_s6 + $0x968] sm:$0xf0]  ;;  %v11701_v40 = vld [vmem:[%s12392_s6 + $0xe6c] sm:$0xf0] }
 0x2c0   : > { %v11660_v62 = vld [vmem:[%s12392_s6 + $0xd2c] sm:$0xf]  ;;  %v9352_v5 = vor.u32 %v11532_v57, %v9349_v61  ;;  %5961 = vmatpush.bf16.msrb.mxu3 %v10952_v13  ;;  %v8587_v57 = vld [vmem:[%s12392_s6 + $0x330] sm:$0xf]  ;;  %v10188_v61 = vor.u32 %v11749_v49, %v10187_v48 }
 0x2c1   : > { %v9861_v63 = vld [vmem:[%s12392_s6 + $0xd68] sm:$0xf0]  ;;  %v11605_v13 = vld [vmem:[%s12392_s6 + $0xb6c] sm:$0xf0] }
 0x2c2   : > { %v11788_v0 = vld [vmem:[%s12392_s6 + $0x112c] sm:$0xf]  ;;  %v9864_v6 = vor.u32 %v11660_v62, %v9861_v63  ;;  %5920 = vmatpush.bf16.msrb.mxu0 %v9352_v5  ;;  %v11477_v62 = vld [vmem:[%s12392_s6 + $0x76c] sm:$0xf0] }
 0x2c3   : > { %v10373_v1 = vld [vmem:[%s12392_s6 + $0x1168] sm:$0xf0]  ;;  %v9611_v63 = vld [vmem:[%s12392_s6 + $0xb30] sm:$0xf] }
 0x2c4   : > { %v13730_v2 = vld [vmem:[%s12398_s9 + $0x8] sm:$0xff]  ;;  %v10376_v7 = vor.u32 %v11788_v0, %v10373_v1  ;;  %5934 = vmatpush.bf16.msrb.mxu1 %v9864_v6  ;;  %v5660_v0 = vpop.f32.mrf.mxu1  ;;  %v10123_v1 = vld [vmem:[%s12392_s6 + $0xf30] sm:$0xf] }
 0x2c5   : > { %v11916_v3 = vld [vmem:[%s12392_s6 + $0x152c] sm:$0xf]  ;;  %v1069_v9 = vperm.slane %v13730_v2, 0  ;;  %v11301_v48 = vld [vmem:[%s12392_s6 + $0x1ec] sm:$0xf0] }
 0x2c6   : > { %v10885_v4 = vld [vmem:[%s12392_s6 + $0x1568] sm:$0xf0]  ;;  %5948 = vmatpush.bf16.msrb.mxu2 %v10376_v7  ;;  %v9100_v7 = vor.u32 %v11477_v62, %v9099_v60  ;;  %v8907_v49 = vld [vmem:[%s12392_s6 + $0x5b0] sm:$0xf] }
 0x2c7   : > { %v11516_v11 = vld [vmem:[%s12392_s6 + $0x8ac] sm:$0xf]  ;;  %v10888_v16 = vor.u32 %v11916_v3, %v10885_v4  ;;  %v5645_v20 = vadd.f32 %v5644_v10, %v1069_v9  ;;  %v11733_v3 = vld [vmem:[%s12392_s6 + $0xf6c] sm:$0xf0]  ;;  %v5686_v4 = vpop.f32.mrf.mxu3  ;;  %v5647_v5 = vadd.f32 %v5646_v56, %v1069_v9  ;;  %v9612_v10 = vor.u32 %v11605_v13, %v9611_v63 }
 0x2c8   : > { %v9285_v12 = vld [vmem:[%s12392_s6 + $0x8e8] sm:$0xf0]  ;;  %v11589_v9 = vld [vmem:[%s12392_s6 + $0xaec] sm:$0xf0] }
 0x2c9   : > { %v11644_v15 = vld [vmem:[%s12392_s6 + $0xcac] sm:$0xf]  ;;  %v9288_v26 = vor.u32 %v11516_v11, %v9285_v12  ;;  %5962 = vmatpush.bf16.msrb.mxu3 %v10888_v16  ;;  %v5659_v51 = vadd.f32 %v5658_v21, %v5645_v20  ;;  %v8588_v11 = vor.u32 %v11349_v58, %v8587_v57  ;;  %v8523_v12 = vld [vmem:[%s12392_s6 + $0x2b0] sm:$0xf] }
 0x2ca   : > { %v9797_v17 = vld [vmem:[%s12392_s6 + $0xce8] sm:$0xf0]  ;;  %v9035_v16 = vld [vmem:[%s12392_s6 + $0x6b0] sm:$0xf] }
 0x2cb   : > { %v11772_v18 = vld [vmem:[%s12392_s6 + $0x10ac] sm:$0xf]  ;;  %v9800_v30 = vor.u32 %v11644_v15, %v9797_v17  ;;  %5921 = vmatpush.bf16.msrb.mxu0 %v9288_v26  ;;  %v5673_v6 = vadd.f32 %v5672_v50, %v5659_v51  ;;  %v11333_v15 = vld [vmem:[%s12392_s6 + $0x2ec] sm:$0xf0]  ;;  %v10124_v17 = vor.u32 %v11733_v3, %v10123_v1  ;;  %v9996_v51 = vor.u32 %v11701_v40, %v9995_v27 }
 0x2cc   : > { %v10309_v19 = vld [vmem:[%s12392_s6 + $0x10e8] sm:$0xf0]  ;;  %v10059_v21 = vld [vmem:[%s12392_s6 + $0xeb0] sm:$0xf]  ;;  %v8524_v26 = vor.u32 %v11333_v15, %v8523_v12  ;;  %v5714_v43 = vpop.f32.mrf.mxu1 }
 0x2cd   : > { %v11900_v22 = vld [vmem:[%s12392_s6 + $0x14ac] sm:$0xf]  ;;  %v10312_v31 = vor.u32 %v11772_v18, %v10309_v19  ;;  %5935 = vmatpush.bf16.msrb.mxu1 %v9800_v30  ;;  %v11461_v18 = vld [vmem:[%s12392_s6 + $0x6ec] sm:$0xf0] }
 0x2ce   : > { %v10821_v23 = vld [vmem:[%s12392_s6 + $0x14e8] sm:$0xf0]  ;;  %v9547_v19 = vld [vmem:[%s12392_s6 + $0xab0] sm:$0xf] }
 0x2cf   : > { %v11500_v29 = vld [vmem:[%s12392_s6 + $0x82c] sm:$0xf]  ;;  %v10824_v36 = vor.u32 %v11900_v22, %v10821_v23  ;;  %5949 = vmatpush.bf16.msrb.mxu2 %v10312_v31  ;;  %v11717_v22 = vld [vmem:[%s12392_s6 + $0xeec] sm:$0xf0]  ;;  %v5661_v23 = vadd.f32 %v5660_v0, %v5647_v5  ;;  %v9548_v30 = vor.u32 %v11589_v9, %v9547_v19  ;;  %v5688_v50 = vpop.f32.mrf.mxu3 }
 0x2d0   : > { %v9221_v14 = vld [vmem:[%s12392_s6 + $0x868] sm:$0xf0]  ;;  %v8459_v31 = vld [vmem:[%s12392_s6 + $0x230] sm:$0xf]  ;;  %v10060_v20 = vor.u32 %v11717_v22, %v10059_v21 }
 0x2d1   : > { %v11628_v32 = vld [vmem:[%s12392_s6 + $0xc2c] sm:$0xf]  ;;  %v9224_v35 = vor.u32 %v11500_v29, %v9221_v14  ;;  %5963 = vmatpush.bf16.msrb.mxu3 %v10824_v36  ;;  %v5687_v29 = vadd.f32 %v5686_v4, %v5673_v6  ;;  %v9036_v14 = vor.u32 %v11461_v18, %v9035_v16  ;;  %v11445_v36 = vld [vmem:[%s12392_s6 + $0x66c] sm:$0xf0] }
 0x2d2   : > { %v9733_v33 = vld [vmem:[%s12392_s6 + $0xc68] sm:$0xf0]  ;;  %v9931_v56 = vld [vmem:[%s12392_s6 + $0xdb0] sm:$0xf] }
 0x2d3   : > { %v11756_v34 = vld [vmem:[%s12392_s6 + $0x102c] sm:$0xf]  ;;  %v9736_v46 = vor.u32 %v11628_v32, %v9733_v33  ;;  %5922 = vmatpush.bf16.msrb.mxu0 %v9224_v35  ;;  %v11317_v32 = vld [vmem:[%s12392_s6 + $0x26c] sm:$0xf0] }
 0x2d4   : > { %v10245_v38 = vld [vmem:[%s12392_s6 + $0x1068] sm:$0xf0]  ;;  %v8971_v33 = vld [vmem:[%s12392_s6 + $0x630] sm:$0xf]  ;;  %v8460_v35 = vor.u32 %v11317_v32, %v8459_v31  ;;  %v5716_v15 = vpop.f32.mrf.mxu1 }
 0x2d5   : > { %v11884_v39 = vld [vmem:[%s12392_s6 + $0x142c] sm:$0xf]  ;;  %v10248_v47 = vor.u32 %v11756_v34, %v10245_v38  ;;  %5936 = vmatpush.bf16.msrb.mxu1 %v9736_v46  ;;  %v5674_v34 = vpop.f32.mrf.mxu2  ;;  %v9483_v38 = vld [vmem:[%s12392_s6 + $0xa30] sm:$0xf]  ;;  %v8972_v45 = vor.u32 %v11445_v36, %v8971_v33 }
 0x2d6   : > { %v10757_v28 = vld [vmem:[%s12392_s6 + $0x1468] sm:$0xf0]  ;;  %5923 = vmatmul.bf16.vlgmr.msrb.gmra.mxu0 %v12531_v24  ;;  %v5675_v44 = vadd.f32 %v5674_v34, %v5661_v23  ;;  %v11685_v57 = vld [vmem:[%s12392_s6 + $0xdec] sm:$0xf0] }
 0x2d7   : > { %v10760_v52 = vor.u32 %v11884_v39, %v10757_v28  ;;  %5950 = vmatpush.bf16.msrb.mxu2 %v10248_v47  ;;  %5971 = vmatpush.bf16.msra.mxu0 %v8652_v53  ;;  %v11573_v39 = vld [vmem:[%s12392_s6 + $0xa6c] sm:$0xf0]  ;;  %v5700_v28 = vpop.f32.mrf.mxu0  ;;  %v9932_v1 = vor.u32 %v11685_v57, %v9931_v56  ;;  %v1070_v57 = vperm.slane %v13730_v2, 1 }
 0x2d8   : > { %5937 = vmatmul.bf16.vlgmr.msrb.gmra.mxu1 %v12533_v25  ;;  %v5701_v42 = vadd.f32 %v5700_v28, %v5687_v29  ;;  %v9484_v46 = vor.u32 %v11573_v39, %v9483_v38  ;;  %v8395_v47 = vld [vmem:[%s12392_s6 + $0x1b0] sm:$0xf]  ;;  %v5689_v60 = vadd.f32 %v5688_v50, %v5675_v44 }
 0x2d9   : > { %5964 = vmatpush.bf16.msrb.mxu3 %v10760_v52  ;;  %5985 = vmatpush.bf16.msra.mxu1 %v9164_v54  ;;  %v11429_v53 = vld [vmem:[%s12392_s6 + $0x5ec] sm:$0xf0]  ;;  %v8396_v58 = vor.u32 %v11301_v48, %v8395_v47  ;;  %v11357_v47 = vld [vmem:[%s12392_s6 + $0x3b4] sm:$0xf] }
 0x2da   : > { %5951 = vmatmul.bf16.vlgmr.msrb.gmra.mxu2 %v12592_v37  ;;  %v5715_v52 = vadd.f32 %v5714_v43, %v5701_v42  ;;  %v9419_v54 = vld [vmem:[%s12392_s6 + $0x9b0] sm:$0xf]  ;;  %v8653_v48 = vld [vmem:[%s12392_s6 + $0x3f0] sm:$0xf0] }
 0x2db   : > { %5999 = vmatpush.bf16.msra.mxu2 %v9676_v55  ;;  %5972 = vmatpush.bf16.msra.mxu0 %v8588_v11  ;;  %v11557_v55 = vld [vmem:[%s12392_s6 + $0x9ec] sm:$0xf0] }
 0x2dc   : > { %5965 = vmatmul.bf16.vlgmr.msrb.gmra.mxu3 %v12597_v41  ;;  %6320 = vst [vmem:[%s12908_s27 + $0x40] sm:$0xff] %v5715_v52  ;;  %v9420_v62 = vor.u32 %v11557_v55, %v9419_v54  ;;  %v8331_v63 = vld [vmem:[%s12392_s6 + $0x130] sm:$0xf]  ;;  %v11485_v52 = vld [vmem:[%s12392_s6 + $0x7b4] sm:$0xf]  ;;  %v5742_v54 = vpop.f32.mrf.mxu3 }
 0x2dd   : > { %6013 = vmatpush.bf16.msra.mxu3 %v10188_v61  ;;  %5986 = vmatpush.bf16.msra.mxu1 %v9100_v7  ;;  %v8908_v61 = vor.u32 %v11429_v53, %v8907_v49  ;;  %v11285_v13 = vld [vmem:[%s12392_s6 + $0x16c] sm:$0xf0]  ;;  %v5728_v49 = vpop.f32.mrf.mxu2  ;;  %v9165_v53 = vld [vmem:[%s12392_s6 + $0x7f0] sm:$0xf0] }
 0x2de   : > { %v8843_v0 = vld [vmem:[%s12392_s6 + $0x530] sm:$0xf]  ;;  %v8332_v12 = vor.u32 %v11285_v13, %v8331_v63  ;;  %v9168_v13 = vor.u32 %v11485_v52, %v9165_v53  ;;  %v11293_v52 = vld [vmem:[%s12392_s6 + $0x1b4] sm:$0xf] }
 0x2df   : > { %6000 = vmatpush.bf16.msra.mxu2 %v9612_v10  ;;  %5973 = vmatpush.bf16.msra.mxu0 %v8524_v26  ;;  %v11413_v3 = vld [vmem:[%s12392_s6 + $0x56c] sm:$0xf0]  ;;  %v5702_v11 = vpop.f32.mrf.mxu0  ;;  %v8397_v53 = vld [vmem:[%s12392_s6 + $0x1f0] sm:$0xf0] }
 0x2e0   : > { %v9355_v4 = vld [vmem:[%s12392_s6 + $0x930] sm:$0xf]  ;;  %v5703_v10 = vadd.f32 %v5702_v11, %v5689_v60  ;;  %v8844_v16 = vor.u32 %v11413_v3, %v8843_v0  ;;  %v8656_v60 = vor.u32 %v11357_v47, %v8653_v48  ;;  %v8589_v3 = vld [vmem:[%s12392_s6 + $0x370] sm:$0xf0]  ;;  %v5729_v11 = vadd.f32 %v5728_v49, %v1070_v57 }
 0x2e1   : > { %6014 = vmatpush.bf16.msra.mxu3 %v10124_v17  ;;  %5987 = vmatpush.bf16.msra.mxu1 %v9036_v14  ;;  %v11541_v5 = vld [vmem:[%s12392_s6 + $0x96c] sm:$0xf0] }
 0x2e2   : > { %v9867_v6 = vld [vmem:[%s12392_s6 + $0xd30] sm:$0xf]  ;;  %v9356_v17 = vor.u32 %v11541_v5, %v9355_v4  ;;  %v5717_v22 = vadd.f32 %v5716_v15, %v5703_v10  ;;  %v11469_v4 = vld [vmem:[%s12392_s6 + $0x734] sm:$0xf] }
 0x2e3   : > { %6001 = vmatpush.bf16.msra.mxu2 %v9548_v30  ;;  %5974 = vmatpush.bf16.msra.mxu0 %v8460_v35  ;;  %v11669_v7 = vld [vmem:[%s12392_s6 + $0xd6c] sm:$0xf0]  ;;  %v9101_v5 = vld [vmem:[%s12392_s6 + $0x770] sm:$0xf0] }
 0x2e4   : > { %v8267_v18 = vld [vmem:[%s12392_s6 + $0xb0] sm:$0xf]  ;;  %v9868_v21 = vor.u32 %v11669_v7, %v9867_v6  ;;  %6336 = vst [vmem:[%s12908_s27 + $0x7c0] sm:$0xff] %v5717_v22  ;;  %v9037_v22 = vld [vmem:[%s12392_s6 + $0x6f0] sm:$0xf0] }
 0x2e5   : > { %6015 = vmatpush.bf16.msra.mxu3 %v10060_v20  ;;  %5988 = vmatpush.bf16.msra.mxu1 %v8972_v45  ;;  %v11269_v19 = vld [vmem:[%s12392_s6 + $0xec] sm:$0xf0] }
 0x2e6   : > { %v8779_v9 = vld [vmem:[%s12392_s6 + $0x4b0] sm:$0xf]  ;;  %v8268_v31 = vor.u32 %v11269_v19, %v8267_v18  ;;  %v11325_v19 = vld [vmem:[%s12392_s6 + $0x2b4] sm:$0xf] }
 0x2e7   : > { %6002 = vmatpush.bf16.msra.mxu2 %v9484_v46  ;;  %5975 = vmatpush.bf16.msra.mxu0 %v8396_v58  ;;  %v11397_v23 = vld [vmem:[%s12392_s6 + $0x4ec] sm:$0xf0] }
 0x2e8   : > { %v9291_v26 = vld [vmem:[%s12392_s6 + $0x8b0] sm:$0xf]  ;;  %v8780_v34 = vor.u32 %v11397_v23, %v8779_v9  ;;  %v8525_v9 = vld [vmem:[%s12392_s6 + $0x2f0] sm:$0xf0]  ;;  %v5743_v23 = vadd.f32 %v5742_v54, %v5729_v11 }
 0x2e9   : > { %6016 = vmatpush.bf16.msra.mxu3 %v9996_v51  ;;  %5989 = vmatpush.bf16.msra.mxu1 %v8908_v61  ;;  %v11525_v29 = vld [vmem:[%s12392_s6 + $0x8ec] sm:$0xf0] }
 0x2ea   : > { %v9803_v14 = vld [vmem:[%s12392_s6 + $0xcb0] sm:$0xf]  ;;  %v9292_v20 = vor.u32 %v11525_v29, %v9291_v26  ;;  %v5730_v29 = vpop.f32.mrf.mxu2 }
 0x2eb   : > { %6003 = vmatpush.bf16.msra.mxu2 %v9420_v62  ;;  %v11653_v30 = vld [vmem:[%s12392_s6 + $0xcec] sm:$0xf0]  ;;  %5976 = vmatpush.bf16.msra.mxu0 %v8332_v12 }
 0x2ec   : > { %v8203_v32 = vld [vmem:[%s12392_s6 + $0x30] sm:$0xf]  ;;  %v9804_v28 = vor.u32 %v11653_v30, %v9803_v14  ;;  %v8528_v30 = vor.u32 %v11325_v19, %v8525_v9 }
 0x2ed   : > { %6017 = vmatpush.bf16.msra.mxu3 %v9932_v1  ;;  %v11253_v33 = vld [vmem:[%s12392_s6 + $0x6c] sm:$0xf0]  ;;  %5990 = vmatpush.bf16.msra.mxu1 %v8844_v16  ;;  %v11341_v1 = vld [vmem:[%s12392_s6 + $0x334] sm:$0xf] }
 0x2ee   : > { %v8715_v36 = vld [vmem:[%s12392_s6 + $0x430] sm:$0xf]  ;;  %v8204_v45 = vor.u32 %v11253_v33, %v8203_v32  ;;  %v8592_v10 = vor.u32 %v11341_v1, %v8589_v3 }
 0x2ef   : > { %6004 = vmatpush.bf16.msra.mxu2 %v9356_v17  ;;  %v11381_v38 = vld [vmem:[%s12392_s6 + $0x46c] sm:$0xf0]  ;;  %5977 = vmatpush.bf16.msra.mxu0 %v8268_v31  ;;  %v9104_v17 = vor.u32 %v11469_v4, %v9101_v5  ;;  %v5744_v31 = vpop.f32.mrf.mxu3  ;;  %v11277_v4 = vld [vmem:[%s12392_s6 + $0x134] sm:$0xf] }
 0x2f0   : > { %v9227_v39 = vld [vmem:[%s12392_s6 + $0x830] sm:$0xf]  ;;  %v8716_v50 = vor.u32 %v11381_v38, %v8715_v36  ;;  %v11309_v38 = vld [vmem:[%s12392_s6 + $0x234] sm:$0xf] }
 0x2f1   : > { %6018 = vmatpush.bf16.msra.mxu3 %v9868_v21  ;;  %v11509_v27 = vld [vmem:[%s12392_s6 + $0x86c] sm:$0xf0]  ;;  %5991 = vmatpush.bf16.msra.mxu1 %v8780_v34  ;;  %v11453_v21 = vld [vmem:[%s12392_s6 + $0x6b4] sm:$0xf] }
 0x2f2   : > { %v9739_v40 = vld [vmem:[%s12392_s6 + $0xc30] sm:$0xf]  ;;  %v9228_v51 = vor.u32 %v11509_v27, %v9227_v39  ;;  %v8461_v39 = vld [vmem:[%s12392_s6 + $0x270] sm:$0xf0]  ;;  %v5784_v3 = vpop.f32.mrf.mxu2 }
 0x2f3   : > { %v11637_v42 = vld [vmem:[%s12392_s6 + $0xc6c] sm:$0xf0]  ;;  %6005 = vmatpush.bf16.msra.mxu2 %v9292_v20  ;;  %5978 = vmatpush.bf16.msra.mxu0 %v8204_v45  ;;  %v9040_v20 = vor.u32 %v11453_v21, %v9037_v22  ;;  %v11437_v27 = vld [vmem:[%s12392_s6 + $0x634] sm:$0xf] }
 0x2f4   : > { %v10699_v35 = vld [vmem:[%s12392_s6 + $0x13b0] sm:$0xf]  ;;  %v9740_v55 = vor.u32 %v11637_v42, %v9739_v40  ;;  %v8973_v40 = vld [vmem:[%s12392_s6 + $0x670] sm:$0xf0] }
 0x2f5   : > { %v11877_v43 = vld [vmem:[%s12392_s6 + $0x13ec] sm:$0xf0]  ;;  %6019 = vmatpush.bf16.msra.mxu3 %v9804_v28  ;;  %5992 = vmatpush.bf16.msra.mxu1 %v8716_v50  ;;  %v5756_v28 = vpop.f32.mrf.mxu0  ;;  %v8976_v50 = vor.u32 %v11437_v27, %v8973_v40  ;;  %v8333_v5 = vld [vmem:[%s12392_s6 + $0x170] sm:$0xf0] }
 0x2f6   : > { %v11211_v44 = vld [vmem:[%s12392_s6 + $0x17b0] sm:$0xf]  ;;  %v10700_v56 = vor.u32 %v11877_v43, %v10699_v35  ;;  %5979 = vmatmul.bf16.vlgmr.msra.gmra.mxu0 %v12493_v59  ;;  %v5757_v42 = vadd.f32 %v5756_v28, %v5743_v23  ;;  %v5770_v43 = vpop.f32.mrf.mxu1  ;;  %v8336_v19 = vor.u32 %v11277_v4, %v8333_v5  ;;  %v11245_v40 = vld [vmem:[%s12392_s6 + $0x34] sm:$0xf] }
 0x2f7   : > { %v12005_v46 = vld [vmem:[%s12392_s6 + $0x17ec] sm:$0xf0]  ;;  %6006 = vmatpush.bf16.msra.mxu2 %v9228_v51  ;;  %v10125_v5 = vld [vmem:[%s12392_s6 + $0xf70] sm:$0xf0] }
 0x2f8   : > { %v11212_v58 = vor.u32 %v12005_v46, %v11211_v44  ;;  %v10635_v61 = vld [vmem:[%s12392_s6 + $0x1330] sm:$0xf]  ;;  %6027 = vmatpush.bf16.msrb.mxu0 %v10700_v56  ;;  %5993 = vmatmul.bf16.vlgmr.msra.gmra.mxu1 %v12509_v8  ;;  %v5731_v44 = vadd.f32 %v5730_v29, %v1070_v57  ;;  %v8464_v46 = vor.u32 %v11309_v38, %v8461_v39  ;;  %v8909_v56 = vld [vmem:[%s12392_s6 + $0x5f0] sm:$0xf0] }
 0x2f9   : > { %v11861_v62 = vld [vmem:[%s12392_s6 + $0x136c] sm:$0xf0]  ;;  %6020 = vmatpush.bf16.msra.mxu3 %v9740_v55  ;;  %v5771_v54 = vadd.f32 %v5770_v43, %v5757_v42  ;;  %v11421_v55 = vld [vmem:[%s12392_s6 + $0x5b4] sm:$0xf] }
 0x2fa   : > { %v11147_v63 = vld [vmem:[%s12392_s6 + $0x1730] sm:$0xf]  ;;  %v10636_v6 = vor.u32 %v11861_v62, %v10635_v61  ;;  %6041 = vmatpush.bf16.msrb.mxu1 %v11212_v58  ;;  %6007 = vmatmul.bf16.vlgmr.msra.gmra.mxu2 %v12531_v24  ;;  %v8400_v62 = vor.u32 %v11293_v52, %v8397_v53  ;;  %v8912_v1 = vor.u32 %v11421_v55, %v8909_v56  ;;  %v8205_v43 = vld [vmem:[%s12392_s6 + $0x70] sm:$0xf0] }
 0x2fb   : > { %v11989_v0 = vld [vmem:[%s12392_s6 + $0x176c] sm:$0xf0]  ;;  %6055 = vmatpush.bf16.msrb.mxu2 %v8656_v60  ;;  %v5745_v60 = vadd.f32 %v5744_v31, %v5731_v44  ;;  %v5785_v11 = vadd.f32 %v5784_v3, %v5771_v54  ;;  %v11389_v31 = vld [vmem:[%s12392_s6 + $0x4b4] sm:$0xf] }
 0x2fc   : > { %v11148_v7 = vor.u32 %v11989_v0, %v11147_v63  ;;  %v10571_v12 = vld [vmem:[%s12392_s6 + $0x12b0] sm:$0xf]  ;;  %6028 = vmatpush.bf16.msrb.mxu0 %v10636_v6  ;;  %6021 = vmatmul.bf16.vlgmr.msra.gmra.mxu3 %v12533_v25  ;;  %v11373_v44 = vld [vmem:[%s12392_s6 + $0x434] sm:$0xf] }
 0x2fd   : > { %v11845_v15 = vld [vmem:[%s12392_s6 + $0x12ec] sm:$0xf0]  ;;  %6069 = vmatpush.bf16.msrb.mxu3 %v9168_v13  ;;  %v5758_v6 = vpop.f32.mrf.mxu0  ;;  %v10189_v52 = vld [vmem:[%s12392_s6 + $0xff0] sm:$0xf0] }
 0x2fe   : > { %v11083_v16 = vld [vmem:[%s12392_s6 + $0x16b0] sm:$0xf]  ;;  %v10572_v26 = vor.u32 %v11845_v15, %v10571_v12  ;;  %6042 = vmatpush.bf16.msrb.mxu1 %v11148_v7  ;;  %v5798_v7 = vpop.f32.mrf.mxu3  ;;  %v8845_v12 = vld [vmem:[%s12392_s6 + $0x570] sm:$0xf0] }
 0x2ff   : > { %v11973_v18 = vld [vmem:[%s12392_s6 + $0x16ec] sm:$0xf0]  ;;  %6056 = vmatpush.bf16.msrb.mxu2 %v8592_v10  ;;  %v11405_v10 = vld [vmem:[%s12392_s6 + $0x534] sm:$0xf] }
 0x300   : > { %v11084_v14 = vor.u32 %v11973_v18, %v11083_v16  ;;  %v10507_v32 = vld [vmem:[%s12392_s6 + $0x1230] sm:$0xf]  ;;  %6029 = vmatpush.bf16.msrb.mxu0 %v10572_v26  ;;  %v5799_v18 = vadd.f32 %v5798_v7, %v5785_v11  ;;  %v8848_v23 = vor.u32 %v11405_v10, %v8845_v12  ;;  %v5772_v26 = vpop.f32.mrf.mxu1  ;;  %v11869_v53 = vld [vmem:[%s12392_s6 + $0x13b4] sm:$0xf] }
 0x301   : > { %v11829_v33 = vld [vmem:[%s12392_s6 + $0x126c] sm:$0xf0]  ;;  %6070 = vmatpush.bf16.msrb.mxu3 %v9104_v17  ;;  %v5759_v17 = vadd.f32 %v5758_v6, %v5745_v60  ;;  %v10701_v54 = vld [vmem:[%s12392_s6 + $0x13f0] sm:$0xf0] }
 0x302   : > { %v11019_v34 = vld [vmem:[%s12392_s6 + $0x1630] sm:$0xf]  ;;  %v10508_v35 = vor.u32 %v11829_v33, %v10507_v32  ;;  %6043 = vmatpush.bf16.msrb.mxu1 %v11084_v14  ;;  %v11261_v14 = vld [vmem:[%s12392_s6 + $0xb4] sm:$0xf]  ;;  %6321 = vst [vmem:[%s12908_s27 + $0x48] sm:$0xff] %v5799_v18 }
 0x303   : > { %v11957_v36 = vld [vmem:[%s12392_s6 + $0x166c] sm:$0xf0]  ;;  %6057 = vmatpush.bf16.msrb.mxu2 %v8528_v30  ;;  %v8269_v30 = vld [vmem:[%s12392_s6 + $0xf0] sm:$0xf0] }
 0x304   : > { %v11020_v45 = vor.u32 %v11957_v36, %v11019_v34  ;;  %v10443_v47 = vld [vmem:[%s12392_s6 + $0x11b0] sm:$0xf]  ;;  %6030 = vmatpush.bf16.msrb.mxu0 %v10508_v35  ;;  %v8781_v32 = vld [vmem:[%s12392_s6 + $0x4f0] sm:$0xf0]  ;;  %v5773_v36 = vadd.f32 %v5772_v26, %v5759_v17  ;;  %v8272_v39 = vor.u32 %v11261_v14, %v8269_v30  ;;  %v5786_v35 = vpop.f32.mrf.mxu2 }
 0x305   : > { %v11813_v48 = vld [vmem:[%s12392_s6 + $0x11ec] sm:$0xf0]  ;;  %6071 = vmatpush.bf16.msrb.mxu3 %v9040_v20  ;;  %v8784_v42 = vor.u32 %v11389_v31, %v8781_v32  ;;  %v11213_v60 = vld [vmem:[%s12392_s6 + $0x17f0] sm:$0xf0] }
 0x306   : > { %v10955_v49 = vld [vmem:[%s12392_s6 + $0x15b0] sm:$0xf]  ;;  %v10444_v57 = vor.u32 %v11813_v48, %v10443_v47  ;;  %6044 = vmatpush.bf16.msrb.mxu1 %v11020_v45  ;;  %v8717_v45 = vld [vmem:[%s12392_s6 + $0x470] sm:$0xf0]  ;;  %v5800_v47 = vpop.f32.mrf.mxu3 }
 0x307   : > { %v11941_v51 = vld [vmem:[%s12392_s6 + $0x15ec] sm:$0xf0]  ;;  %6058 = vmatpush.bf16.msrb.mxu2 %v8464_v46  ;;  %v5787_v46 = vadd.f32 %v5786_v35, %v5773_v36  ;;  %v11613_v48 = vld [vmem:[%s12392_s6 + $0xbb4] sm:$0xf] }
 0x308   : > { %v10379_v58 = vld [vmem:[%s12392_s6 + $0x1130] sm:$0xf]  ;;  %v10956_v61 = vor.u32 %v11941_v51, %v10955_v49  ;;  %6031 = vmatpush.bf16.msrb.mxu0 %v10444_v57  ;;  %v9677_v49 = vld [vmem:[%s12392_s6 + $0xbf0] sm:$0xf0]  ;;  %v8208_v57 = vor.u32 %v11245_v40, %v8205_v43 }
 0x309   : > { %v11797_v63 = vld [vmem:[%s12392_s6 + $0x116c] sm:$0xf0]  ;;  %6072 = vmatpush.bf16.msrb.mxu3 %v8976_v50  ;;  %v11741_v50 = vld [vmem:[%s12392_s6 + $0xfb4] sm:$0xf]  ;;  %v5801_v55 = vadd.f32 %v5800_v47, %v5787_v46 }
 0x30a   : > { %v10891_v13 = vld [vmem:[%s12392_s6 + $0x1530] sm:$0xf]  ;;  %v10380_v15 = vor.u32 %v11797_v63, %v10379_v58  ;;  %6045 = vmatpush.bf16.msrb.mxu1 %v10956_v61  ;;  %v11997_v58 = vld [vmem:[%s12392_s6 + $0x17b4] sm:$0xf]  ;;  %v8720_v61 = vor.u32 %v11373_v44, %v8717_v45 }
 0x30b   : > { %v11925_v0 = vld [vmem:[%s12392_s6 + $0x156c] sm:$0xf0]  ;;  %6059 = vmatpush.bf16.msrb.mxu2 %v8400_v62  ;;  %v9680_v62 = vor.u32 %v11613_v48, %v9677_v49  ;;  %v11597_v63 = vld [vmem:[%s12392_s6 + $0xb34] sm:$0xf]  ;;  %6337 = vst [vmem:[%s12908_s27 + $0x7c8] sm:$0xff] %v5801_v55  ;;  %v11216_v4 = vor.u32 %v11997_v58, %v11213_v60 }
 0x30c   : > { %v10892_v16 = vor.u32 %v11925_v0, %v10891_v13  ;;  %v10315_v9 = vld [vmem:[%s12392_s6 + $0x10b0] sm:$0xf]  ;;  %6032 = vmatpush.bf16.msrb.mxu0 %v10380_v15  ;;  %v10192_v13 = vor.u32 %v11741_v50, %v10189_v52  ;;  %v10704_v0 = vor.u32 %v11869_v53, %v10701_v54  ;;  %v11725_v3 = vld [vmem:[%s12392_s6 + $0xf34] sm:$0xf] }
 0x30d   : > { %v11781_v21 = vld [vmem:[%s12392_s6 + $0x10ec] sm:$0xf0]  ;;  %6073 = vmatpush.bf16.msrb.mxu3 %v8912_v1  ;;  %v9613_v1 = vld [vmem:[%s12392_s6 + $0xb70] sm:$0xf0]  ;;  %v10128_v15 = vor.u32 %v11725_v3, %v10125_v5  ;;  %v5812_v5 = vpop.f32.mrf.mxu0 }
 0x30e   : > { %v10827_v22 = vld [vmem:[%s12392_s6 + $0x14b0] sm:$0xf]  ;;  %v10316_v33 = vor.u32 %v11781_v21, %v10315_v9  ;;  %6046 = vmatpush.bf16.msrb.mxu1 %v10892_v16  ;;  %v11853_v11 = vld [vmem:[%s12392_s6 + $0x1334] sm:$0xf]  ;;  %v9616_v12 = vor.u32 %v11597_v63, %v9613_v1  ;;  %v1071_v1 = vperm.slane %v13730_v2, 2 }
 0x30f   : > { %v11909_v29 = vld [vmem:[%s12392_s6 + $0x14ec] sm:$0xf0]  ;;  %6060 = vmatpush.bf16.msrb.mxu2 %v8336_v19  ;;  %v10637_v6 = vld [vmem:[%s12392_s6 + $0x1370] sm:$0xf0]  ;;  %v9555_v2 = vld [vmem:[%s12392_s6 + $0xab8] sm:$0xf] }
 0x310   : > { %v10251_v34 = vld [vmem:[%s12392_s6 + $0x1030] sm:$0xf]  ;;  %v10828_v38 = vor.u32 %v11909_v29, %v10827_v22  ;;  %6033 = vmatpush.bf16.msrb.mxu0 %v10316_v33  ;;  %v11981_v7 = vld [vmem:[%s12392_s6 + $0x1734] sm:$0xf]  ;;  %v10640_v16 = vor.u32 %v11853_v11, %v10637_v6 }
 0x311   : > { %v11765_v20 = vld [vmem:[%s12392_s6 + $0x106c] sm:$0xf0]  ;;  %6074 = vmatpush.bf16.msrb.mxu3 %v8848_v23  ;;  %v11149_v10 = vld [vmem:[%s12392_s6 + $0x1770] sm:$0xf0] }
 0x312   : > { %v10763_v28 = vld [vmem:[%s12392_s6 + $0x1430] sm:$0xf]  ;;  %v10252_v51 = vor.u32 %v11765_v20, %v10251_v34  ;;  %6047 = vmatpush.bf16.msrb.mxu1 %v10828_v38  ;;  %v11581_v17 = vld [vmem:[%s12392_s6 + $0xab4] sm:$0xf]  ;;  %v11152_v9 = vor.u32 %v11981_v7, %v11149_v10 }
 0x313   : > { %v11893_v27 = vld [vmem:[%s12392_s6 + $0x146c] sm:$0xf0]  ;;  %6061 = vmatpush.bf16.msrb.mxu2 %v8272_v39  ;;  %v9549_v18 = vld [vmem:[%s12392_s6 + $0xaf0] sm:$0xf0] }
 0x314   : > { %v10764_v56 = vor.u32 %v11893_v27, %v10763_v28  ;;  %6034 = vmatpush.bf16.msrb.mxu0 %v10252_v51  ;;  %v11709_v19 = vld [vmem:[%s12392_s6 + $0xeb4] sm:$0xf]  ;;  %v9552_v14 = vor.u32 %v11581_v17, %v9549_v18  ;;  %v5826_v17 = vpop.f32.mrf.mxu1 }
 0x315   : > { %6075 = vmatpush.bf16.msrb.mxu3 %v8784_v42  ;;  %v10061_v21 = vld [vmem:[%s12392_s6 + $0xef0] sm:$0xf0] }
 0x316   : > { %6048 = vmatpush.bf16.msrb.mxu1 %v10764_v56  ;;  %v11837_v22 = vld [vmem:[%s12392_s6 + $0x12b4] sm:$0xf]  ;;  %v10064_v30 = vor.u32 %v11709_v19, %v10061_v21 }
 0x317   : > { %6062 = vmatpush.bf16.msrb.mxu2 %v8208_v57  ;;  %6035 = vmatmul.bf16.vlgmr.msrb.gmra.mxu0 %v12592_v37  ;;  %v10573_v23 = vld [vmem:[%s12392_s6 + $0x12f0] sm:$0xf0] }
 0x318   : > { %6083 = vmatpush.bf16.msra.mxu0 %v9680_v62  ;;  %v11965_v26 = vld [vmem:[%s12392_s6 + $0x16b4] sm:$0xf]  ;;  %v10576_v31 = vor.u32 %v11837_v22, %v10573_v23 }
 0x319   : > { %6076 = vmatpush.bf16.msrb.mxu3 %v8720_v61  ;;  %6049 = vmatmul.bf16.vlgmr.msrb.gmra.mxu1 %v12597_v41  ;;  %v11085_v29 = vld [vmem:[%s12392_s6 + $0x16f0] sm:$0xf0] }
 0x31a   : > { %6097 = vmatpush.bf16.msra.mxu1 %v10192_v13  ;;  %6063 = vmatmul.bf16.vlgmr.msrb.gmra.mxu2 %v12493_v59  ;;  %v11565_v32 = vld [vmem:[%s12392_s6 + $0xa34] sm:$0xf]  ;;  %v11088_v20 = vor.u32 %v11965_v26, %v11085_v29 }
 0x31b   : > { %6111 = vmatpush.bf16.msra.mxu2 %v10704_v0  ;;  %v9485_v33 = vld [vmem:[%s12392_s6 + $0xa70] sm:$0xf0] }
 0x31c   : > { %6084 = vmatpush.bf16.msra.mxu0 %v9616_v12  ;;  %6077 = vmatmul.bf16.vlgmr.msrb.gmra.mxu3 %v12509_v8  ;;  %v11693_v34 = vld [vmem:[%s12392_s6 + $0xe34] sm:$0xf]  ;;  %v9488_v40 = vor.u32 %v11565_v32, %v9485_v33 }
 0x31d   : > { %6125 = vmatpush.bf16.msra.mxu3 %v11216_v4  ;;  %v9997_v36 = vld [vmem:[%s12392_s6 + $0xe70] sm:$0xf0] }
 0x31e   : > { %6098 = vmatpush.bf16.msra.mxu1 %v10128_v15  ;;  %v11821_v38 = vld [vmem:[%s12392_s6 + $0x1234] sm:$0xf]  ;;  %v10000_v42 = vor.u32 %v11693_v34, %v9997_v36  ;;  %v8659_v36 = vld [vmem:[%s12392_s6 + $0x3b8] sm:$0xf] }
 0x31f   : > { %6112 = vmatpush.bf16.msra.mxu2 %v10640_v16  ;;  %v10509_v39 = vld [vmem:[%s12392_s6 + $0x1270] sm:$0xf0] }
 0x320   : > { %v11949_v28 = vld [vmem:[%s12392_s6 + $0x1634] sm:$0xf]  ;;  %6085 = vmatpush.bf16.msra.mxu0 %v9552_v14  ;;  %v10512_v35 = vor.u32 %v11821_v38, %v10509_v39  ;;  %v11366_v38 = vld [vmem:[%s12392_s6 + $0x3f4] sm:$0xf0] }
 0x321   : > { %6126 = vmatpush.bf16.msra.mxu3 %v11152_v9  ;;  %v11021_v27 = vld [vmem:[%s12392_s6 + $0x1670] sm:$0xf0]  ;;  %v9171_v39 = vld [vmem:[%s12392_s6 + $0x7b8] sm:$0xf] }
 0x322   : > { %6099 = vmatpush.bf16.msra.mxu1 %v10064_v30  ;;  %v11549_v43 = vld [vmem:[%s12392_s6 + $0x9b4] sm:$0xf]  ;;  %v11024_v46 = vor.u32 %v11949_v28, %v11021_v27  ;;  %v11494_v27 = vld [vmem:[%s12392_s6 + $0x7f4] sm:$0xf0] }
 0x323   : > { %6113 = vmatpush.bf16.msra.mxu2 %v10576_v31  ;;  %v9421_v44 = vld [vmem:[%s12392_s6 + $0x9f0] sm:$0xf0]  ;;  %v5813_v31 = vadd.f32 %v5812_v5, %v1071_v1 }
 0x324   : > { %v11677_v45 = vld [vmem:[%s12392_s6 + $0xdb4] sm:$0xf]  ;;  %6086 = vmatpush.bf16.msra.mxu0 %v9488_v40  ;;  %v9424_v52 = vor.u32 %v11549_v43, %v9421_v44  ;;  %v9683_v40 = vld [vmem:[%s12392_s6 + $0xbb8] sm:$0xf] }
 0x325   : > { %6127 = vmatpush.bf16.msra.mxu3 %v11088_v20  ;;  %v9933_v47 = vld [vmem:[%s12392_s6 + $0xdf0] sm:$0xf0]  ;;  %v10195_v44 = vld [vmem:[%s12392_s6 + $0xfb8] sm:$0xf] }
 0x326   : > { %v11805_v48 = vld [vmem:[%s12392_s6 + $0x11b4] sm:$0xf]  ;;  %6100 = vmatpush.bf16.msra.mxu1 %v10000_v42  ;;  %v9936_v53 = vor.u32 %v11677_v45, %v9933_v47  ;;  %v11622_v42 = vld [vmem:[%s12392_s6 + $0xbf4] sm:$0xf0]  ;;  %v5827_v47 = vadd.f32 %v5826_v17, %v5813_v31 }
 0x327   : > { %v10445_v49 = vld [vmem:[%s12392_s6 + $0x11f0] sm:$0xf0]  ;;  %6114 = vmatpush.bf16.msra.mxu2 %v10512_v35  ;;  %v11750_v45 = vld [vmem:[%s12392_s6 + $0xff4] sm:$0xf0] }
 0x328   : > { %v11933_v50 = vld [vmem:[%s12392_s6 + $0x15b4] sm:$0xf]  ;;  %v10448_v54 = vor.u32 %v11805_v48, %v10445_v49  ;;  %6087 = vmatpush.bf16.msra.mxu0 %v9424_v52  ;;  %v8660_v49 = vor.u32 %v11366_v38, %v8659_v36  ;;  %v5814_v52 = vpop.f32.mrf.mxu0  ;;  %v11718_v17 = vld [vmem:[%s12392_s6 + $0xef4] sm:$0xf0] }
 0x329   : > { %v10957_v51 = vld [vmem:[%s12392_s6 + $0x15f0] sm:$0xf0]  ;;  %6128 = vmatpush.bf16.msra.mxu3 %v11024_v46  ;;  %v5840_v46 = vpop.f32.mrf.mxu2  ;;  %v11446_v31 = vld [vmem:[%s12392_s6 + $0x674] sm:$0xf0] }
 0x32a   : > { %v11533_v55 = vld [vmem:[%s12392_s6 + $0x934] sm:$0xf]  ;;  %v10960_v58 = vor.u32 %v11933_v50, %v10957_v51  ;;  %6101 = vmatpush.bf16.msra.mxu1 %v9936_v53  ;;  %v9172_v50 = vor.u32 %v11494_v27, %v9171_v39  ;;  %v9684_v51 = vor.u32 %v11622_v42, %v9683_v40  ;;  %v8595_v53 = vld [vmem:[%s12392_s6 + $0x338] sm:$0xf] }
 0x32b   : > { %v9357_v56 = vld [vmem:[%s12392_s6 + $0x970] sm:$0xf0]  ;;  %6115 = vmatpush.bf16.msra.mxu2 %v10448_v54  ;;  %v11350_v54 = vld [vmem:[%s12392_s6 + $0x374] sm:$0xf0] }
 0x32c   : > { %v11661_v57 = vld [vmem:[%s12392_s6 + $0xd34] sm:$0xf]  ;;  %v9360_v0 = vor.u32 %v11533_v55, %v9357_v56  ;;  %v9107_v55 = vld [vmem:[%s12392_s6 + $0x738] sm:$0xf]  ;;  %v10196_v56 = vor.u32 %v11750_v45, %v10195_v44 }
 0x32d   : > { %v9869_v60 = vld [vmem:[%s12392_s6 + $0xd70] sm:$0xf0]  ;;  %6129 = vmatpush.bf16.msra.mxu3 %v10960_v58  ;;  %v9619_v58 = vld [vmem:[%s12392_s6 + $0xb38] sm:$0xf] }
 0x32e   : > { %v11789_v61 = vld [vmem:[%s12392_s6 + $0x1134] sm:$0xf]  ;;  %v9872_v3 = vor.u32 %v11661_v57, %v9869_v60  ;;  %6088 = vmatpush.bf16.msra.mxu0 %v9360_v0  ;;  %v11478_v57 = vld [vmem:[%s12392_s6 + $0x774] sm:$0xf0]  ;;  %v5815_v0 = vadd.f32 %v5814_v52, %v1071_v1 }
 0x32f   : > { %v10381_v62 = vld [vmem:[%s12392_s6 + $0x1170] sm:$0xf0]  ;;  %v11606_v60 = vld [vmem:[%s12392_s6 + $0xb74] sm:$0xf0]  ;;  %v9108_v5 = vor.u32 %v11478_v57, %v9107_v55 }
 0x330   : > { %v11917_v63 = vld [vmem:[%s12392_s6 + $0x1534] sm:$0xf]  ;;  %v10384_v4 = vor.u32 %v11789_v61, %v10381_v62  ;;  %6102 = vmatpush.bf16.msra.mxu1 %v9872_v3  ;;  %v5828_v61 = vpop.f32.mrf.mxu1  ;;  %v10131_v62 = vld [vmem:[%s12392_s6 + $0xf38] sm:$0xf]  ;;  %v8596_v3 = vor.u32 %v11350_v54, %v8595_v53 }
 0x331   : > { %v10893_v13 = vld [vmem:[%s12392_s6 + $0x1570] sm:$0xf0]  ;;  %v11590_v1 = vld [vmem:[%s12392_s6 + $0xaf4] sm:$0xf0] }
 0x332   : > { %v11517_v11 = vld [vmem:[%s12392_s6 + $0x8b4] sm:$0xf]  ;;  %v10896_v10 = vor.u32 %v11917_v63, %v10893_v13  ;;  %6116 = vmatpush.bf16.msra.mxu2 %v10384_v4  ;;  %v11734_v63 = vld [vmem:[%s12392_s6 + $0xf74] sm:$0xf0]  ;;  %v5854_v13 = vpop.f32.mrf.mxu3  ;;  %v5841_v4 = vadd.f32 %v5840_v46, %v5827_v47 }
 0x333   : > { %v9293_v6 = vld [vmem:[%s12392_s6 + $0x8f0] sm:$0xf0]  ;;  %v11702_v36 = vld [vmem:[%s12392_s6 + $0xe74] sm:$0xf0] }
 0x334   : > { %v11645_v7 = vld [vmem:[%s12392_s6 + $0xcb4] sm:$0xf]  ;;  %v9296_v9 = vor.u32 %v11517_v11, %v9293_v6  ;;  %6130 = vmatpush.bf16.msra.mxu3 %v10896_v10  ;;  %v9620_v11 = vor.u32 %v11606_v60, %v9619_v58  ;;  %v8531_v6 = vld [vmem:[%s12392_s6 + $0x2b8] sm:$0xf] }
 0x335   : > { %v9805_v12 = vld [vmem:[%s12392_s6 + $0xcf0] sm:$0xf0]  ;;  %v9043_v10 = vld [vmem:[%s12392_s6 + $0x6b8] sm:$0xf] }
 0x336   : > { %v11773_v15 = vld [vmem:[%s12392_s6 + $0x10b4] sm:$0xf]  ;;  %v9808_v23 = vor.u32 %v11645_v7, %v9805_v12  ;;  %6089 = vmatpush.bf16.msra.mxu0 %v9296_v9  ;;  %v11334_v7 = vld [vmem:[%s12392_s6 + $0x2f4] sm:$0xf0]  ;;  %v10132_v12 = vor.u32 %v11734_v63, %v10131_v62  ;;  %v5855_v9 = vadd.f32 %v5854_v13, %v5841_v4 }
 0x337   : > { %v10317_v16 = vld [vmem:[%s12392_s6 + $0x10f0] sm:$0xf0]  ;;  %v8915_v44 = vld [vmem:[%s12392_s6 + $0x5b8] sm:$0xf] }
 0x338   : > { %v11901_v18 = vld [vmem:[%s12392_s6 + $0x14b4] sm:$0xf]  ;;  %v10320_v26 = vor.u32 %v11773_v15, %v10317_v16  ;;  %6103 = vmatpush.bf16.msra.mxu1 %v9808_v23  ;;  %v11462_v15 = vld [vmem:[%s12392_s6 + $0x6f4] sm:$0xf0] }
 0x339   : > { %v10829_v19 = vld [vmem:[%s12392_s6 + $0x14f0] sm:$0xf0]  ;;  %v10067_v16 = vld [vmem:[%s12392_s6 + $0xeb8] sm:$0xf] }
 0x33a   : > { %v11501_v21 = vld [vmem:[%s12392_s6 + $0x834] sm:$0xf]  ;;  %v10832_v32 = vor.u32 %v11901_v18, %v10829_v19  ;;  %6117 = vmatpush.bf16.msra.mxu2 %v10320_v26  ;;  %v5829_v18 = vadd.f32 %v5828_v61, %v5815_v0  ;;  %v8532_v19 = vor.u32 %v11334_v7, %v8531_v6  ;;  %v8467_v23 = vld [vmem:[%s12392_s6 + $0x238] sm:$0xf]  ;;  %v5856_v45 = vpop.f32.mrf.mxu3 }
 0x33b   : > { %v9229_v22 = vld [vmem:[%s12392_s6 + $0x870] sm:$0xf0]  ;;  %v11318_v26 = vld [vmem:[%s12392_s6 + $0x274] sm:$0xf0] }
 0x33c   : > { %v11629_v29 = vld [vmem:[%s12392_s6 + $0xc34] sm:$0xf]  ;;  %v9232_v28 = vor.u32 %v11501_v21, %v9229_v22  ;;  %6131 = vmatpush.bf16.msra.mxu3 %v10832_v32  ;;  %v9044_v21 = vor.u32 %v11462_v15, %v9043_v10  ;;  %v9556_v22 = vor.u32 %v11590_v1, %v9555_v2  ;;  %v9491_v32 = vld [vmem:[%s12392_s6 + $0xa38] sm:$0xf]  ;;  %v8468_v39 = vor.u32 %v11318_v26, %v8467_v23 }
 0x33d   : > { %v9741_v14 = vld [vmem:[%s12392_s6 + $0xc70] sm:$0xf0]  ;;  %v11686_v52 = vld [vmem:[%s12392_s6 + $0xdf4] sm:$0xf0] }
 0x33e   : > { %v11757_v30 = vld [vmem:[%s12392_s6 + $0x1034] sm:$0xf]  ;;  %v9744_v35 = vor.u32 %v11629_v29, %v9741_v14  ;;  %6090 = vmatpush.bf16.msra.mxu0 %v9232_v28  ;;  %v8979_v29 = vld [vmem:[%s12392_s6 + $0x638] sm:$0xf]  ;;  %v5842_v14 = vpop.f32.mrf.mxu2  ;;  %v5882_v28 = vpop.f32.mrf.mxu1 }
 0x33f   : > { %v10253_v33 = vld [vmem:[%s12392_s6 + $0x1070] sm:$0xf0]  ;;  %v5843_v27 = vadd.f32 %v5842_v14, %v5829_v18  ;;  %v8980_v40 = vor.u32 %v11446_v31, %v8979_v29  ;;  %v8339_v57 = vld [vmem:[%s12392_s6 + $0x138] sm:$0xf] }
 0x340   : > { %v11885_v34 = vld [vmem:[%s12392_s6 + $0x1434] sm:$0xf]  ;;  %v10256_v43 = vor.u32 %v11757_v30, %v10253_v33  ;;  %6104 = vmatpush.bf16.msra.mxu1 %v9744_v35  ;;  %v10068_v30 = vor.u32 %v11718_v17, %v10067_v16  ;;  %v11574_v33 = vld [vmem:[%s12392_s6 + $0xa74] sm:$0xf0] }
 0x341   : > { %v10765_v20 = vld [vmem:[%s12392_s6 + $0x1470] sm:$0xf0]  ;;  %6091 = vmatmul.bf16.vlgmr.msra.gmra.mxu0 %v12531_v24  ;;  %v9492_v42 = vor.u32 %v11574_v33, %v9491_v32  ;;  %v8403_v35 = vld [vmem:[%s12392_s6 + $0x1b8] sm:$0xf]  ;;  %v5857_v54 = vadd.f32 %v5856_v45, %v5843_v27 }
 0x342   : > { %v10768_v48 = vor.u32 %v11885_v34, %v10765_v20  ;;  %6118 = vmatpush.bf16.msra.mxu2 %v10256_v43  ;;  %6139 = vmatpush.bf16.msrb.mxu0 %v8660_v49  ;;  %v5868_v34 = vpop.f32.mrf.mxu0  ;;  %v10003_v20 = vld [vmem:[%s12392_s6 + $0xe38] sm:$0xf] }
 0x343   : > { %6105 = vmatmul.bf16.vlgmr.msra.gmra.mxu1 %v12533_v25  ;;  %v5869_v38 = vadd.f32 %v5868_v34, %v5855_v9  ;;  %v11302_v43 = vld [vmem:[%s12392_s6 + $0x1f4] sm:$0xf0]  ;;  %v10004_v46 = vor.u32 %v11702_v36, %v10003_v20 }
 0x344   : > { %6132 = vmatpush.bf16.msra.mxu3 %v10768_v48  ;;  %6153 = vmatpush.bf16.msrb.mxu1 %v9172_v50  ;;  %v11430_v48 = vld [vmem:[%s12392_s6 + $0x5f4] sm:$0xf0]  ;;  %v8404_v53 = vor.u32 %v11302_v43, %v8403_v35  ;;  %v8661_v35 = vld [vmem:[%s12392_s6 + $0x3f8] sm:$0xf0] }
 0x345   : > { %6119 = vmatmul.bf16.vlgmr.msra.gmra.mxu2 %v12592_v37  ;;  %v14012_v47 = vadd.f32 %v5882_v28, %v5869_v38  ;;  %v9427_v49 = vld [vmem:[%s12392_s6 + $0x9b8] sm:$0xf]  ;;  %v8916_v55 = vor.u32 %v11430_v48, %v8915_v44  ;;  %v9173_v48 = vld [vmem:[%s12392_s6 + $0x7f8] sm:$0xf0] }
 0x346   : > { %6167 = vmatpush.bf16.msrb.mxu2 %v9684_v51  ;;  %6140 = vmatpush.bf16.msrb.mxu0 %v8596_v3  ;;  %v11558_v50 = vld [vmem:[%s12392_s6 + $0x9f4] sm:$0xf0]  ;;  %v5884_v6 = vpop.f32.mrf.mxu1  ;;  %v5896_v43 = vpop.f32.mrf.mxu2 }
 0x347   : > { %6133 = vmatmul.bf16.vlgmr.msra.gmra.mxu3 %v12597_v41  ;;  %v9939_v51 = vld [vmem:[%s12392_s6 + $0xdb8] sm:$0xf]  ;;  %6322 = vst [vmem:[%s12908_s27 + $0x50] sm:$0xff] %v14012_v47 }
 0x348   : > { %6181 = vmatpush.bf16.msrb.mxu3 %v10196_v56  ;;  %6154 = vmatpush.bf16.msrb.mxu1 %v9108_v5  ;;  %v9428_v56 = vor.u32 %v11558_v50, %v9427_v49  ;;  %v11286_v58 = vld [vmem:[%s12392_s6 + $0x174] sm:$0xf0]  ;;  %v9940_v61 = vor.u32 %v11686_v52, %v9939_v51  ;;  %v5910_v49 = vpop.f32.mrf.mxu3 }
 0x349   : > { %v8851_v60 = vld [vmem:[%s12392_s6 + $0x538] sm:$0xf] }
 0x34a   : > { %6168 = vmatpush.bf16.msrb.mxu2 %v9620_v11  ;;  %6141 = vmatpush.bf16.msrb.mxu0 %v8532_v19  ;;  %v11414_v62 = vld [vmem:[%s12392_s6 + $0x574] sm:$0xf0]  ;;  %v5870_v0 = vpop.f32.mrf.mxu0  ;;  %v8340_v11 = vor.u32 %v11286_v58, %v8339_v57 }
 0x34b   : > { %v9363_v63 = vld [vmem:[%s12392_s6 + $0x938] sm:$0xf]  ;;  %v5871_v5 = vadd.f32 %v5870_v0, %v5857_v54  ;;  %v8852_v7 = vor.u32 %v11414_v62, %v8851_v60  ;;  %v11342_v62 = vld [vmem:[%s12392_s6 + $0x33c] sm:$0xf] }
 0x34c   : > { %6182 = vmatpush.bf16.msrb.mxu3 %v10132_v12  ;;  %6155 = vmatpush.bf16.msrb.mxu1 %v9044_v21  ;;  %v11542_v13 = vld [vmem:[%s12392_s6 + $0x974] sm:$0xf0]  ;;  %v9109_v0 = vld [vmem:[%s12392_s6 + $0x778] sm:$0xf0] }
 0x34d   : > { %v9875_v3 = vld [vmem:[%s12392_s6 + $0xd38] sm:$0xf]  ;;  %v9364_v10 = vor.u32 %v11542_v13, %v9363_v63  ;;  %v14032_v16 = vadd.f32 %v5884_v6, %v5871_v5  ;;  %v8597_v63 = vld [vmem:[%s12392_s6 + $0x378] sm:$0xf0] }
 0x34e   : > { %6169 = vmatpush.bf16.msrb.mxu2 %v9556_v22  ;;  %6142 = vmatpush.bf16.msrb.mxu0 %v8468_v39  ;;  %v11670_v4 = vld [vmem:[%s12392_s6 + $0xd74] sm:$0xf0]  ;;  %v11470_v13 = vld [vmem:[%s12392_s6 + $0x73c] sm:$0xf] }
 0x34f   : > { %v8275_v12 = vld [vmem:[%s12392_s6 + $0xb8] sm:$0xf]  ;;  %v9876_v1 = vor.u32 %v11670_v4, %v9875_v3  ;;  %6338 = vst [vmem:[%s12908_s27 + $0x7d0] sm:$0xff] %v14032_v16 }
 0x350   : > { %6183 = vmatpush.bf16.msrb.mxu3 %v10068_v30  ;;  %6156 = vmatpush.bf16.msrb.mxu1 %v8980_v40  ;;  %v11270_v15 = vld [vmem:[%s12392_s6 + $0xf4] sm:$0xf0] }
 0x351   : > { %v8787_v2 = vld [vmem:[%s12392_s6 + $0x4b8] sm:$0xf]  ;;  %v8276_v22 = vor.u32 %v11270_v15, %v8275_v12  ;;  %v9112_v12 = vor.u32 %v11470_v13, %v9109_v0 }
 0x352   : > { %6170 = vmatpush.bf16.msrb.mxu2 %v9492_v42  ;;  %6143 = vmatpush.bf16.msrb.mxu0 %v8404_v53  ;;  %v11398_v17 = vld [vmem:[%s12392_s6 + $0x4f4] sm:$0xf0]  ;;  %v11358_v42 = vld [vmem:[%s12392_s6 + $0x3bc] sm:$0xf] }
 0x353   : > { %v9299_v18 = vld [vmem:[%s12392_s6 + $0x8b8] sm:$0xf]  ;;  %v8788_v29 = vor.u32 %v11398_v17, %v8787_v2  ;;  %v11326_v2 = vld [vmem:[%s12392_s6 + $0x2bc] sm:$0xf] }
 0x354   : > { %6184 = vmatpush.bf16.msrb.mxu3 %v10004_v46  ;;  %6157 = vmatpush.bf16.msrb.mxu1 %v8916_v55  ;;  %v11526_v19 = vld [vmem:[%s12392_s6 + $0x8f4] sm:$0xf0]  ;;  %v11486_v46 = vld [vmem:[%s12392_s6 + $0x7bc] sm:$0xf]  ;;  %v8664_v55 = vor.u32 %v11358_v42, %v8661_v35 }
 0x355   : > { %v9811_v9 = vld [vmem:[%s12392_s6 + $0xcb8] sm:$0xf]  ;;  %v9300_v14 = vor.u32 %v11526_v19, %v9299_v18  ;;  %v9176_v60 = vor.u32 %v11486_v46, %v9173_v48  ;;  %v11454_v17 = vld [vmem:[%s12392_s6 + $0x6bc] sm:$0xf] }
 0x356   : > { %6171 = vmatpush.bf16.msrb.mxu2 %v9428_v56  ;;  %v11654_v21 = vld [vmem:[%s12392_s6 + $0xcf4] sm:$0xf0]  ;;  %6144 = vmatpush.bf16.msrb.mxu0 %v8340_v11  ;;  %v8600_v11 = vor.u32 %v11342_v62, %v8597_v63  ;;  %v9045_v18 = vld [vmem:[%s12392_s6 + $0x6f8] sm:$0xf0] }
 0x357   : > { %v8211_v23 = vld [vmem:[%s12392_s6 + $0x38] sm:$0xf]  ;;  %v9812_v33 = vor.u32 %v11654_v21, %v9811_v9  ;;  %v5898_v21 = vpop.f32.mrf.mxu2 }
 0x358   : > { %6185 = vmatpush.bf16.msrb.mxu3 %v9940_v61  ;;  %v11254_v26 = vld [vmem:[%s12392_s6 + $0x74] sm:$0xf0]  ;;  %6158 = vmatpush.bf16.msrb.mxu1 %v8852_v7 }
 0x359   : > { %v8723_v30 = vld [vmem:[%s12392_s6 + $0x438] sm:$0xf]  ;;  %v8212_v27 = vor.u32 %v11254_v26, %v8211_v23  ;;  %v5912_v26 = vpop.f32.mrf.mxu3 }
 0x35a   : > { %6172 = vmatpush.bf16.msrb.mxu2 %v9364_v10  ;;  %v11382_v31 = vld [vmem:[%s12392_s6 + $0x474] sm:$0xf0]  ;;  %6145 = vmatpush.bf16.msrb.mxu0 %v8276_v22 }
 0x35b   : > { %v9235_v32 = vld [vmem:[%s12392_s6 + $0x838] sm:$0xf]  ;;  %v8724_v44 = vor.u32 %v11382_v31, %v8723_v30  ;;  %v9048_v31 = vor.u32 %v11454_v17, %v9045_v18 }
 0x35c   : > { %6186 = vmatpush.bf16.msrb.mxu3 %v9876_v1  ;;  %v11510_v34 = vld [vmem:[%s12392_s6 + $0x874] sm:$0xf0]  ;;  %6159 = vmatpush.bf16.msrb.mxu1 %v8788_v29  ;;  %v8533_v1 = vld [vmem:[%s12392_s6 + $0x2f8] sm:$0xf0] }
 0x35d   : > { %v9747_v20 = vld [vmem:[%s12392_s6 + $0xc38] sm:$0xf]  ;;  %v9236_v45 = vor.u32 %v11510_v34, %v9235_v32  ;;  %v8536_v23 = vor.u32 %v11326_v2, %v8533_v1  ;;  %v8469_v34 = vld [vmem:[%s12392_s6 + $0x278] sm:$0xf0] }
 0x35e   : > { %v11638_v36 = vld [vmem:[%s12392_s6 + $0xc74] sm:$0xf0]  ;;  %6173 = vmatpush.bf16.msrb.mxu2 %v9300_v14  ;;  %6146 = vmatpush.bf16.msrb.mxu0 %v8212_v27  ;;  %v5938_v27 = vpop.f32.mrf.mxu1 }
 0x35f   : > { %v10707_v38 = vld [vmem:[%s12392_s6 + $0x13b8] sm:$0xf]  ;;  %v9748_v50 = vor.u32 %v11638_v36, %v9747_v20  ;;  %v5924_v20 = vpop.f32.mrf.mxu0  ;;  %v11438_v36 = vld [vmem:[%s12392_s6 + $0x63c] sm:$0xf]  ;;  %v5952_v0 = vpop.f32.mrf.mxu2 }
 0x360   : > { %v11878_v39 = vld [vmem:[%s12392_s6 + $0x13f4] sm:$0xf0]  ;;  %6187 = vmatpush.bf16.msrb.mxu3 %v9812_v33  ;;  %6160 = vmatpush.bf16.msrb.mxu1 %v8724_v44  ;;  %v11310_v33 = vld [vmem:[%s12392_s6 + $0x23c] sm:$0xf] }
 0x361   : > { %v11219_v28 = vld [vmem:[%s12392_s6 + $0x17b8] sm:$0xf]  ;;  %v10708_v51 = vor.u32 %v11878_v39, %v10707_v38  ;;  %6147 = vmatmul.bf16.vlgmr.msrb.gmra.mxu0 %v12493_v59  ;;  %v8981_v38 = vld [vmem:[%s12392_s6 + $0x678] sm:$0xf0]  ;;  %v8472_v35 = vor.u32 %v11310_v33, %v8469_v34 }
 0x362   : > { %v12006_v40 = vld [vmem:[%s12392_s6 + $0x17f4] sm:$0xf0]  ;;  %6174 = vmatpush.bf16.msrb.mxu2 %v9236_v45  ;;  %v8984_v46 = vor.u32 %v11438_v36, %v8981_v38 }
 0x363   : > { %v14058_v52 = vld [vmem:[%s12398_s9 + $0x8] sm:$0xff]  ;;  %v11220_v54 = vor.u32 %v12006_v40, %v11219_v28  ;;  %6195 = vmatpush.bf16.msra.mxu0 %v10708_v51  ;;  %6161 = vmatmul.bf16.vlgmr.msrb.gmra.mxu1 %v12509_v8 }
 0x364   : > { %v1072_v53 = vperm.slane %v14058_v52, 3  ;;  %v10643_v56 = vld [vmem:[%s12392_s6 + $0x1338] sm:$0xf]  ;;  %6188 = vmatpush.bf16.msrb.mxu3 %v9748_v50  ;;  %v8405_v50 = vld [vmem:[%s12392_s6 + $0x1f8] sm:$0xf0] }
 0x365   : > { %v11862_v57 = vld [vmem:[%s12392_s6 + $0x1374] sm:$0xf0]  ;;  %6209 = vmatpush.bf16.msra.mxu1 %v11220_v54  ;;  %6175 = vmatmul.bf16.vlgmr.msrb.gmra.mxu2 %v12531_v24  ;;  %v11422_v54 = vld [vmem:[%s12392_s6 + $0x5bc] sm:$0xf] }
 0x366   : > { %v11155_v58 = vld [vmem:[%s12392_s6 + $0x1738] sm:$0xf]  ;;  %v5897_v3 = vadd.f32 %v5896_v43, %v1072_v53  ;;  %v10644_v4 = vor.u32 %v11862_v57, %v10643_v56  ;;  %6223 = vmatpush.bf16.msra.mxu2 %v8664_v55  ;;  %v5899_v40 = vadd.f32 %v5898_v21, %v1072_v53  ;;  %v8917_v55 = vld [vmem:[%s12392_s6 + $0x5f8] sm:$0xf0] }
 0x367   : > { %v11990_v61 = vld [vmem:[%s12392_s6 + $0x1774] sm:$0xf0]  ;;  %6189 = vmatmul.bf16.vlgmr.msrb.gmra.mxu3 %v12533_v25  ;;  %v8920_v13 = vor.u32 %v11422_v54, %v8917_v55  ;;  %v11870_v54 = vld [vmem:[%s12392_s6 + $0x13bc] sm:$0xf] }
 0x368   : > { %v11156_v5 = vor.u32 %v11990_v61, %v11155_v58  ;;  %v10579_v6 = vld [vmem:[%s12392_s6 + $0x12b8] sm:$0xf]  ;;  %6237 = vmatpush.bf16.msra.mxu3 %v9176_v60  ;;  %v5911_v19 = vadd.f32 %v5910_v49, %v5897_v3  ;;  %6196 = vmatpush.bf16.msra.mxu0 %v10644_v4  ;;  %v11294_v49 = vld [vmem:[%s12392_s6 + $0x1bc] sm:$0xf]  ;;  %v5913_v57 = vadd.f32 %v5912_v26, %v5899_v40  ;;  %v5954_v40 = vpop.f32.mrf.mxu2 }
 0x369   : > { %v11846_v7 = vld [vmem:[%s12392_s6 + $0x12f4] sm:$0xf0]  ;;  %v8408_v60 = vor.u32 %v11294_v49, %v8405_v50  ;;  %v11278_v3 = vld [vmem:[%s12392_s6 + $0x13c] sm:$0xf] }
 0x36a   : > { %v11091_v10 = vld [vmem:[%s12392_s6 + $0x16b8] sm:$0xf]  ;;  %v10580_v9 = vor.u32 %v11846_v7, %v10579_v6  ;;  %6210 = vmatpush.bf16.msra.mxu1 %v11156_v5  ;;  %6224 = vmatpush.bf16.msra.mxu2 %v8600_v11  ;;  %v5925_v39 = vadd.f32 %v5924_v20, %v5911_v19  ;;  %v8341_v4 = vld [vmem:[%s12392_s6 + $0x178] sm:$0xf0]  ;;  %v5926_v11 = vpop.f32.mrf.mxu0  ;;  %v5966_v6 = vpop.f32.mrf.mxu3 }
 0x36b   : > { %v11974_v15 = vld [vmem:[%s12392_s6 + $0x16f4] sm:$0xf0]  ;;  %v11406_v7 = vld [vmem:[%s12392_s6 + $0x53c] sm:$0xf]  ;;  %v5927_v2 = vadd.f32 %v5926_v11, %v5913_v57  ;;  %v8344_v17 = vor.u32 %v11278_v3, %v8341_v4 }
 0x36c   : > { %v11092_v22 = vor.u32 %v11974_v15, %v11091_v10  ;;  %v10515_v29 = vld [vmem:[%s12392_s6 + $0x1238] sm:$0xf]  ;;  %6238 = vmatpush.bf16.msra.mxu3 %v9112_v12  ;;  %6197 = vmatpush.bf16.msra.mxu0 %v10580_v9  ;;  %v5939_v51 = vadd.f32 %v5938_v27, %v5925_v39  ;;  %v8853_v10 = vld [vmem:[%s12392_s6 + $0x578] sm:$0xf0] }
 0x36d   : > { %v11830_v14 = vld [vmem:[%s12392_s6 + $0x1274] sm:$0xf0]  ;;  %v8856_v21 = vor.u32 %v11406_v7, %v8853_v10  ;;  %v11262_v26 = vld [vmem:[%s12392_s6 + $0xbc] sm:$0xf] }
 0x36e   : > { %v11027_v30 = vld [vmem:[%s12392_s6 + $0x1638] sm:$0xf]  ;;  %v10516_v28 = vor.u32 %v11830_v14, %v10515_v29  ;;  %6211 = vmatpush.bf16.msra.mxu1 %v11092_v22  ;;  %6225 = vmatpush.bf16.msra.mxu2 %v8536_v23  ;;  %v5953_v5 = vadd.f32 %v5952_v0, %v5939_v51  ;;  %v5940_v22 = vpop.f32.mrf.mxu1  ;;  %v8277_v29 = vld [vmem:[%s12392_s6 + $0xf8] sm:$0xf0] }
 0x36f   : > { %v11958_v32 = vld [vmem:[%s12392_s6 + $0x1674] sm:$0xf0]  ;;  %v11390_v14 = vld [vmem:[%s12392_s6 + $0x4bc] sm:$0xf]  ;;  %v5941_v34 = vadd.f32 %v5940_v22, %v5927_v2  ;;  %v8280_v36 = vor.u32 %v11262_v26, %v8277_v29 }
 0x370   : > { %v11028_v42 = vor.u32 %v11958_v32, %v11027_v30  ;;  %v10451_v43 = vld [vmem:[%s12392_s6 + $0x11b8] sm:$0xf]  ;;  %6239 = vmatpush.bf16.msra.mxu3 %v9048_v31  ;;  %6198 = vmatpush.bf16.msra.mxu0 %v10516_v28  ;;  %v14109_v1 = vadd.f32 %v5966_v6, %v5953_v5  ;;  %v8789_v30 = vld [vmem:[%s12392_s6 + $0x4f8] sm:$0xf0] }
 0x371   : > { %v11814_v44 = vld [vmem:[%s12392_s6 + $0x11f4] sm:$0xf0]  ;;  %v11246_v28 = vld [vmem:[%s12392_s6 + $0x3c] sm:$0xf]  ;;  %v8792_v27 = vor.u32 %v11390_v14, %v8789_v30 }
 0x372   : > { %v10963_v45 = vld [vmem:[%s12392_s6 + $0x15b8] sm:$0xf]  ;;  %v10452_v53 = vor.u32 %v11814_v44, %v10451_v43  ;;  %6212 = vmatpush.bf16.msra.mxu1 %v11028_v42  ;;  %6226 = vmatpush.bf16.msra.mxu2 %v8472_v35  ;;  %6323 = vst [vmem:[%s12908_s27 + $0x58] sm:$0xff] %v14109_v1  ;;  %v8213_v42 = vld [vmem:[%s12392_s6 + $0x78] sm:$0xf0]  ;;  %v5955_v44 = vadd.f32 %v5954_v40, %v5941_v34 }
 0x373   : > { %v11942_v48 = vld [vmem:[%s12392_s6 + $0x15f4] sm:$0xf0]  ;;  %v11374_v35 = vld [vmem:[%s12392_s6 + $0x43c] sm:$0xf]  ;;  %v8216_v57 = vor.u32 %v11246_v28, %v8213_v42 }
 0x374   : > { %v10387_v56 = vld [vmem:[%s12392_s6 + $0x1138] sm:$0xf]  ;;  %v10964_v58 = vor.u32 %v11942_v48, %v10963_v45  ;;  %6240 = vmatpush.bf16.msra.mxu3 %v8984_v46  ;;  %6199 = vmatpush.bf16.msra.mxu0 %v10452_v53  ;;  %v8725_v43 = vld [vmem:[%s12392_s6 + $0x478] sm:$0xf0]  ;;  %v5968_v45 = vpop.f32.mrf.mxu3 }
 0x375   : > { %v11798_v61 = vld [vmem:[%s12392_s6 + $0x1174] sm:$0xf0]  ;;  %v11614_v46 = vld [vmem:[%s12392_s6 + $0xbbc] sm:$0xf]  ;;  %v14135_v53 = vadd.f32 %v5968_v45, %v5955_v44 }
 0x376   : > { %v10899_v62 = vld [vmem:[%s12392_s6 + $0x1538] sm:$0xf]  ;;  %v10388_v12 = vor.u32 %v11798_v61, %v10387_v56  ;;  %6213 = vmatpush.bf16.msra.mxu1 %v10964_v58  ;;  %6227 = vmatpush.bf16.msra.mxu2 %v8408_v60  ;;  %v9685_v48 = vld [vmem:[%s12392_s6 + $0xbf8] sm:$0xf0]  ;;  %v8728_v61 = vor.u32 %v11374_v35, %v8725_v43 }
 0x377   : > { %v11926_v63 = vld [vmem:[%s12392_s6 + $0x1574] sm:$0xf0]  ;;  %v11742_v49 = vld [vmem:[%s12392_s6 + $0xfbc] sm:$0xf]  ;;  %6339 = vst [vmem:[%s12908_s27 + $0x7d8] sm:$0xff] %v14135_v53 }
 0x378   : > { %v10900_v15 = vor.u32 %v11926_v63, %v10899_v62  ;;  %v10323_v18 = vld [vmem:[%s12392_s6 + $0x10b8] sm:$0xf]  ;;  %6241 = vmatpush.bf16.msra.mxu3 %v8920_v13  ;;  %6200 = vmatpush.bf16.msra.mxu0 %v10388_v12  ;;  %v10197_v51 = vld [vmem:[%s12392_s6 + $0xff8] sm:$0xf0]  ;;  %v9688_v62 = vor.u32 %v11614_v46, %v9685_v48 }
 0x379   : > { %v11782_v19 = vld [vmem:[%s12392_s6 + $0x10f4] sm:$0xf0]  ;;  %v10709_v55 = vld [vmem:[%s12392_s6 + $0x13f8] sm:$0xf0]  ;;  %v10200_v13 = vor.u32 %v11742_v49, %v10197_v51 }
 0x37a   : > { %v10835_v9 = vld [vmem:[%s12392_s6 + $0x14b8] sm:$0xf]  ;;  %v10324_v31 = vor.u32 %v11782_v19, %v10323_v18  ;;  %6214 = vmatpush.bf16.msra.mxu1 %v10900_v15  ;;  %6228 = vmatpush.bf16.msra.mxu2 %v8344_v17  ;;  %v11998_v58 = vld [vmem:[%s12392_s6 + $0x17bc] sm:$0xf]  ;;  %v10712_v0 = vor.u32 %v11870_v54, %v10709_v55 }
 0x37b   : > { %v11910_v23 = vld [vmem:[%s12392_s6 + $0x14f4] sm:$0xf0]  ;;  %v11221_v60 = vld [vmem:[%s12392_s6 + $0x17f8] sm:$0xf0] }
 0x37c   : > { %v10259_v32 = vld [vmem:[%s12392_s6 + $0x1038] sm:$0xf]  ;;  %v10836_v20 = vor.u32 %v11910_v23, %v10835_v9  ;;  %6242 = vmatpush.bf16.msra.mxu3 %v8856_v21  ;;  %6201 = vmatpush.bf16.msra.mxu0 %v10324_v31  ;;  %v11598_v63 = vld [vmem:[%s12392_s6 + $0xb3c] sm:$0xf]  ;;  %v11224_v5 = vor.u32 %v11998_v58, %v11221_v60 }
 0x37d   : > { %v11766_v33 = vld [vmem:[%s12392_s6 + $0x1074] sm:$0xf0]  ;;  %v9621_v3 = vld [vmem:[%s12392_s6 + $0xb78] sm:$0xf0] }
 0x37e   : > { %v10771_v38 = vld [vmem:[%s12392_s6 + $0x1438] sm:$0xf]  ;;  %v10260_v50 = vor.u32 %v11766_v33, %v10259_v32  ;;  %6215 = vmatpush.bf16.msra.mxu1 %v10836_v20  ;;  %6229 = vmatpush.bf16.msra.mxu2 %v8280_v36  ;;  %v11726_v4 = vld [vmem:[%s12392_s6 + $0xf3c] sm:$0xf]  ;;  %v9624_v15 = vor.u32 %v11598_v63, %v9621_v3 }
 0x37f   : > { %v11894_v39 = vld [vmem:[%s12392_s6 + $0x1474] sm:$0xf0]  ;;  %v10133_v11 = vld [vmem:[%s12392_s6 + $0xf78] sm:$0xf0] }
 0x380   : > { %v10772_v56 = vor.u32 %v11894_v39, %v10771_v38  ;;  %6243 = vmatpush.bf16.msra.mxu3 %v8792_v27  ;;  %6202 = vmatpush.bf16.msra.mxu0 %v10260_v50  ;;  %v11854_v6 = vld [vmem:[%s12392_s6 + $0x133c] sm:$0xf]  ;;  %v10136_v2 = vor.u32 %v11726_v4, %v10133_v11 }
 0x381   : > { %v10645_v7 = vld [vmem:[%s12392_s6 + $0x1378] sm:$0xf0] }
 0x382   : > { %6216 = vmatpush.bf16.msra.mxu1 %v10772_v56  ;;  %6230 = vmatpush.bf16.msra.mxu2 %v8216_v57  ;;  %v11982_v10 = vld [vmem:[%s12392_s6 + $0x173c] sm:$0xf]  ;;  %v10648_v17 = vor.u32 %v11854_v6, %v10645_v7  ;;  %v5980_v7 = vpop.f32.mrf.mxu0 }
 0x383   : > { %v11157_v12 = vld [vmem:[%s12392_s6 + $0x1778] sm:$0xf0]  ;;  %6203 = vmatmul.bf16.vlgmr.msra.gmra.mxu0 %v12592_v37 }
 0x384   : > { %6244 = vmatpush.bf16.msra.mxu3 %v8728_v61  ;;  %6251 = vmatpush.bf16.msrb.mxu0 %v9688_v62  ;;  %v11582_v18 = vld [vmem:[%s12392_s6 + $0xabc] sm:$0xf]  ;;  %v11160_v21 = vor.u32 %v11982_v10, %v11157_v12 }
 0x385   : > { %v9557_v19 = vld [vmem:[%s12392_s6 + $0xaf8] sm:$0xf0]  ;;  %6217 = vmatmul.bf16.vlgmr.msra.gmra.mxu1 %v12597_v41  ;;  %6231 = vmatmul.bf16.vlgmr.msra.gmra.mxu2 %v12493_v59 }
 0x386   : > { %6265 = vmatpush.bf16.msrb.mxu1 %v10200_v13  ;;  %6279 = vmatpush.bf16.msrb.mxu2 %v10712_v0  ;;  %v11710_v9 = vld [vmem:[%s12392_s6 + $0xebc] sm:$0xf]  ;;  %v9560_v30 = vor.u32 %v11582_v18, %v9557_v19 }
 0x387   : > { %v10069_v22 = vld [vmem:[%s12392_s6 + $0xef8] sm:$0xf0]  ;;  %6245 = vmatmul.bf16.vlgmr.msra.gmra.mxu3 %v12509_v8 }
 0x388   : > { %6293 = vmatpush.bf16.msrb.mxu3 %v11224_v5  ;;  %v11838_v23 = vld [vmem:[%s12392_s6 + $0x12bc] sm:$0xf]  ;;  %6252 = vmatpush.bf16.msrb.mxu0 %v9624_v15  ;;  %v10072_v31 = vor.u32 %v11710_v9, %v10069_v22  ;;  %v1073_v5 = vperm.slane %v14058_v52, 4  ;;  %v5994_v9 = vpop.f32.mrf.mxu1 }
 0x389   : > { %v10581_v26 = vld [vmem:[%s12392_s6 + $0x12f8] sm:$0xf0] }
 0x38a   : > { %v11966_v29 = vld [vmem:[%s12392_s6 + $0x16bc] sm:$0xf]  ;;  %6266 = vmatpush.bf16.msrb.mxu1 %v10136_v2  ;;  %6280 = vmatpush.bf16.msrb.mxu2 %v10648_v17  ;;  %v10584_v32 = vor.u32 %v11838_v23, %v10581_v26 }
 0x38b   : > { %v11093_v14 = vld [vmem:[%s12392_s6 + $0x16f8] sm:$0xf0] }
 0x38c   : > { %v11566_v33 = vld [vmem:[%s12392_s6 + $0xa3c] sm:$0xf]  ;;  %6294 = vmatpush.bf16.msrb.mxu3 %v11160_v21  ;;  %v11096_v59 = vor.u32 %v11966_v29, %v11093_v14  ;;  %6253 = vmatpush.bf16.msrb.mxu0 %v9560_v30 }
 0x38d   : > { %v9493_v34 = vld [vmem:[%s12392_s6 + $0xa78] sm:$0xf0] }
 0x38e   : > { %v11694_v20 = vld [vmem:[%s12392_s6 + $0xe3c] sm:$0xf]  ;;  %v9496_v27 = vor.u32 %v11566_v33, %v9493_v34  ;;  %6267 = vmatpush.bf16.msrb.mxu1 %v10072_v31  ;;  %6281 = vmatpush.bf16.msrb.mxu2 %v10584_v32  ;;  %v5981_v32 = vadd.f32 %v5980_v7, %v1073_v5 }
 0x38f   : > { %v10005_v36 = vld [vmem:[%s12392_s6 + $0xe78] sm:$0xf0] }
 0x390   : > { %v11822_v38 = vld [vmem:[%s12392_s6 + $0x123c] sm:$0xf]  ;;  %v10008_v40 = vor.u32 %v11694_v20, %v10005_v36  ;;  %6295 = vmatpush.bf16.msrb.mxu3 %v11096_v59  ;;  %6254 = vmatpush.bf16.msrb.mxu0 %v9496_v27  ;;  %v6008_v27 = vpop.f32.mrf.mxu2 }
 0x391   : > { %v10517_v39 = vld [vmem:[%s12392_s6 + $0x1278] sm:$0xf0] }
 0x392   : > { %v11950_v28 = vld [vmem:[%s12392_s6 + $0x163c] sm:$0xf]  ;;  %v10520_v42 = vor.u32 %v11822_v38, %v10517_v39  ;;  %6268 = vmatpush.bf16.msrb.mxu1 %v10008_v40  ;;  %v5995_v40 = vadd.f32 %v5994_v9, %v5981_v32 }
 0x393   : > { %v11029_v8 = vld [vmem:[%s12392_s6 + $0x1678] sm:$0xf0] }
 0x394   : > { %v11550_v35 = vld [vmem:[%s12392_s6 + $0x9bc] sm:$0xf]  ;;  %v11032_v45 = vor.u32 %v11950_v28, %v11029_v8  ;;  %6282 = vmatpush.bf16.msrb.mxu2 %v10520_v42 }
 0x395   : > { %v9429_v43 = vld [vmem:[%s12392_s6 + $0x9f8] sm:$0xf0] }
 0x396   : > { %v11678_v44 = vld [vmem:[%s12392_s6 + $0xdbc] sm:$0xf]  ;;  %v9432_v54 = vor.u32 %v11550_v35, %v9429_v43  ;;  %6296 = vmatpush.bf16.msrb.mxu3 %v11032_v45  ;;  %v5982_v35 = vpop.f32.mrf.mxu0  ;;  %v5996_v43 = vpop.f32.mrf.mxu1 }
 0x397   : > { %v9941_v46 = vld [vmem:[%s12392_s6 + $0xdf8] sm:$0xf0]  ;;  %v5983_v45 = vadd.f32 %v5982_v35, %v1073_v5 }
 0x398   : > { %v11806_v48 = vld [vmem:[%s12392_s6 + $0x11bc] sm:$0xf]  ;;  %v9944_v55 = vor.u32 %v11678_v44, %v9941_v46  ;;  %6255 = vmatpush.bf16.msrb.mxu0 %v9432_v54  ;;  %v6022_v44 = vpop.f32.mrf.mxu3  ;;  %v6009_v46 = vadd.f32 %v6008_v27, %v5995_v40 }
 0x399   : > { %v10453_v49 = vld [vmem:[%s12392_s6 + $0x11f8] sm:$0xf0] }
 0x39a   : > { %v11934_v50 = vld [vmem:[%s12392_s6 + $0x15bc] sm:$0xf]  ;;  %v10456_v56 = vor.u32 %v11806_v48, %v10453_v49  ;;  %6269 = vmatpush.bf16.msrb.mxu1 %v9944_v55  ;;  %v5997_v48 = vadd.f32 %v5996_v43, %v5983_v45  ;;  %v6023_v49 = vadd.f32 %v6022_v44, %v6009_v46 }
 0x39b   : > { %v10965_v51 = vld [vmem:[%s12392_s6 + $0x15f8] sm:$0xf0] }
 0x39c   : > { %v11534_v57 = vld [vmem:[%s12392_s6 + $0x93c] sm:$0xf]  ;;  %v10968_v61 = vor.u32 %v11934_v50, %v10965_v51  ;;  %6283 = vmatpush.bf16.msrb.mxu2 %v10456_v56  ;;  %v6010_v50 = vpop.f32.mrf.mxu2 }
 0x39d   : > { %v9365_v58 = vld [vmem:[%s12392_s6 + $0x978] sm:$0xf0]  ;;  %v6011_v56 = vadd.f32 %v6010_v50, %v5997_v48 }
 0x39e   : > { %v11662_v60 = vld [vmem:[%s12392_s6 + $0xd3c] sm:$0xf]  ;;  %v9368_v4 = vor.u32 %v11534_v57, %v9365_v58  ;;  %6297 = vmatpush.bf16.msrb.mxu3 %v10968_v61  ;;  %v6036_v51 = vpop.f32.mrf.mxu0  ;;  %v6050_v55 = vpop.f32.mrf.mxu1 }
 0x39f   : > { %v9877_v62 = vld [vmem:[%s12392_s6 + $0xd78] sm:$0xf0]  ;;  %v6037_v54 = vadd.f32 %v6036_v51, %v6023_v49 }
 0x3a0   : > { %v11790_v63 = vld [vmem:[%s12392_s6 + $0x113c] sm:$0xf]  ;;  %v9880_v11 = vor.u32 %v11662_v60, %v9877_v62  ;;  %6256 = vmatpush.bf16.msrb.mxu0 %v9368_v4  ;;  %v6024_v57 = vpop.f32.mrf.mxu3 }
 0x3a1   : > { %v10389_v13 = vld [vmem:[%s12392_s6 + $0x1178] sm:$0xf0]  ;;  %v14206_v58 = vadd.f32 %v6050_v55, %v6037_v54  ;;  %v14231_v55 = vld [vmem:[%s12908_s27] sm:$0xff] }
 0x3a2   : > { %v11918_v0 = vld [vmem:[%s12392_s6 + $0x153c] sm:$0xf]  ;;  %v10392_v6 = vor.u32 %v11790_v63, %v10389_v13  ;;  %6270 = vmatpush.bf16.msrb.mxu1 %v9880_v11  ;;  %v1074_v63 = vperm.slane %v14058_v52, 5 }
 0x3a3   : > { %v10901_v3 = vld [vmem:[%s12392_s6 + $0x1578] sm:$0xf0]  ;;  %6324 = vst [vmem:[%s12908_s27 + $0x60] sm:$0xff] %v14206_v58 }
 0x3a4   : > { %v11518_v10 = vld [vmem:[%s12392_s6 + $0x8bc] sm:$0xf]  ;;  %v10904_v2 = vor.u32 %v11918_v0, %v10901_v3  ;;  %6284 = vmatpush.bf16.msrb.mxu2 %v10392_v6 }
 0x3a5   : > { %v9301_v12 = vld [vmem:[%s12392_s6 + $0x8f8] sm:$0xf0] }
 0x3a6   : > { %v11646_v15 = vld [vmem:[%s12392_s6 + $0xcbc] sm:$0xf]  ;;  %v9304_v23 = vor.u32 %v11518_v10, %v9301_v12  ;;  %6298 = vmatpush.bf16.msrb.mxu3 %v10904_v2  ;;  %v6038_v60 = vpop.f32.mrf.mxu0  ;;  %v6052_v61 = vpop.f32.mrf.mxu1 }
 0x3a7   : > { %v9813_v17 = vld [vmem:[%s12392_s6 + $0xcf8] sm:$0xf0] }
 0x3a8   : > { %v11774_v18 = vld [vmem:[%s12392_s6 + $0x10bc] sm:$0xf]  ;;  %v9816_v26 = vor.u32 %v11646_v15, %v9813_v17  ;;  %6257 = vmatpush.bf16.msrb.mxu0 %v9304_v23  ;;  %v6078_v62 = vpop.f32.mrf.mxu3 }
 0x3a9   : > { %v10325_v19 = vld [vmem:[%s12392_s6 + $0x10f8] sm:$0xf0] }
 0x3aa   : > { %v11902_v21 = vld [vmem:[%s12392_s6 + $0x14bc] sm:$0xf]  ;;  %v10328_v29 = vor.u32 %v11774_v18, %v10325_v19  ;;  %6271 = vmatpush.bf16.msrb.mxu1 %v9816_v26 }
 0x3ab   : > { %v10837_v22 = vld [vmem:[%s12392_s6 + $0x14f8] sm:$0xf0] }
 0x3ac   : > { %v11502_v14 = vld [vmem:[%s12392_s6 + $0x83c] sm:$0xf]  ;;  %v10840_v33 = vor.u32 %v11902_v21, %v10837_v22  ;;  %6285 = vmatpush.bf16.msrb.mxu2 %v10328_v29 }
 0x3ad   : > { %v9237_v30 = vld [vmem:[%s12392_s6 + $0x878] sm:$0xf0] }
 0x3ae   : > { %v11630_v31 = vld [vmem:[%s12392_s6 + $0xc3c] sm:$0xf]  ;;  %v9240_v39 = vor.u32 %v11502_v14, %v9237_v30  ;;  %6299 = vmatpush.bf16.msrb.mxu3 %v10840_v33 }
 0x3af   : > { %v9749_v34 = vld [vmem:[%s12392_s6 + $0xc78] sm:$0xf0] }
 0x3b0   : > { %v11758_v20 = vld [vmem:[%s12392_s6 + $0x103c] sm:$0xf]  ;;  %v9752_v28 = vor.u32 %v11630_v31, %v9749_v34  ;;  %6258 = vmatpush.bf16.msrb.mxu0 %v9240_v39  ;;  %v6080_v4 = vpop.f32.mrf.mxu3  ;;  %v1075_v31 = vperm.slane %v14058_v52, 6 }
 0x3b1   : > { %v10261_v59 = vld [vmem:[%s12392_s6 + $0x1078] sm:$0xf0] }
 0x3b2   : > { %v11886_v36 = vld [vmem:[%s12392_s6 + $0x143c] sm:$0xf]  ;;  %v10264_v8 = vor.u32 %v11758_v20, %v10261_v59  ;;  %6272 = vmatpush.bf16.msrb.mxu1 %v9752_v28 }
 0x3b3   : > { %v10773_v38 = vld [vmem:[%s12392_s6 + $0x1478] sm:$0xf0]  ;;  %6259 = vmatmul.bf16.vlgmr.msrb.gmra.mxu0 %v12531_v24  ;;  %v6025_v24 = vadd.f32 %v6024_v57, %v6011_v56  ;;  %v14234_v56 = vld [vmem:[%s12908_s27 + $0x8] sm:$0xff] }
 0x3b4   : > { %v10776_v42 = vor.u32 %v11886_v36, %v10773_v38  ;;  %6286 = vmatpush.bf16.msrb.mxu2 %v10264_v8  ;;  %v6346_v57 = vmax.f32 %v14231_v55, %v14234_v56 }
 0x3b5   : > { %6273 = vmatmul.bf16.vlgmr.msrb.gmra.mxu1 %v12533_v25  ;;  %v6039_v25 = vadd.f32 %v6038_v60, %v6025_v24  ;;  %v14241_v24 = vld [vmem:[%s12908_s27 + $0x10] sm:$0xff] }
 0x3b6   : > { %6300 = vmatpush.bf16.msrb.mxu3 %v10776_v42  ;;  %v6347_v60 = vmax.f32 %v14241_v24, %v6346_v57 }
 0x3b7   : > { %6287 = vmatmul.bf16.vlgmr.msrb.gmra.mxu2 %v12592_v37  ;;  %v14210_v37 = vadd.f32 %v6052_v61, %v6039_v25  ;;  %v14245_v25 = vld [vmem:[%s12908_s27 + $0x18] sm:$0xff] }
 0x3b8   : > { %v6348_v61 = vmax.f32 %v14245_v25, %v6347_v60 }
 0x3b9   : > { %6301 = vmatmul.bf16.vlgmr.msrb.gmra.mxu3 %v12597_v41  ;;  %6340 = vst [vmem:[%s12908_s27 + $0x7e0] sm:$0xff] %v14210_v37  ;;  %v6064_v41 = vpop.f32.mrf.mxu2 }
 0x3ba   : > { %v6065_v13 = vadd.f32 %v6064_v41, %v1074_v63 }
 0x3bc   : > { %v6079_v0 = vadd.f32 %v6078_v62, %v6065_v13  ;;  %v14249_v62 = vld [vmem:[%s12908_s27 + $0x20] sm:$0xff] }
 0x3be   : > { %v6092_v5 = vpop.f32.mrf.mxu0 }
 0x3bf   : > { %v6093_v11 = vadd.f32 %v6092_v5, %v6079_v0  ;;  %v14253_v0 = vld [vmem:[%s12908_s27 + $0x780] sm:$0xff]  ;;  %v14261_v5 = vld [vmem:[%s12908_s27 + $0x28] sm:$0xff] }
 0x3c0   : > { %v6106_v6 = vpop.f32.mrf.mxu1 }
 0x3c1   : > { %v6066_v3 = vpop.f32.mrf.mxu2  ;;  %v6107_v10 = vadd.f32 %v6106_v6, %v6093_v11  ;;  %v1076_v6 = vperm.slane %v14058_v52, 7  ;;  %v14282_v52 = vld [vmem:[%s12908_s27 + $0x7a0] sm:$0xff] }
 0x3c2   : > { %v6067_v7 = vadd.f32 %v6066_v3, %v1074_v63  ;;  %v6349_v63 = vmax.f32 %v14249_v62, %v6348_v61  ;;  %v14256_v3 = vld [vmem:[%s12908_s27 + $0x788] sm:$0xff] }
 0x3c4   : > { %v6081_v12 = vadd.f32 %v6080_v4, %v6067_v7  ;;  %v6363_v4 = vmax.f32 %v14253_v0, %v14256_v3  ;;  %v6350_v11 = vmax.f32 %v14261_v5, %v6349_v63  ;;  %v14266_v7 = vld [vmem:[%s12908_s27 + $0x790] sm:$0xff] }
 0x3c6   : > { %v6094_v17 = vpop.f32.mrf.mxu0 }
 0x3c7   : > { %v6095_v19 = vadd.f32 %v6094_v17, %v6081_v12  ;;  %v14270_v12 = vld [vmem:[%s12908_s27 + $0x30] sm:$0xff] }
 0x3c8   : > { %v6108_v21 = vpop.f32.mrf.mxu1 }
 0x3c9   : > { %v6120_v15 = vpop.f32.mrf.mxu2  ;;  %v6109_v22 = vadd.f32 %v6108_v21, %v6095_v19 }
 0x3ca   : > { %v6121_v2 = vadd.f32 %v6120_v15, %v6107_v10  ;;  %v6134_v18 = vpop.f32.mrf.mxu3  ;;  %v6364_v10 = vmax.f32 %v14266_v7, %v6363_v4  ;;  %v6351_v15 = vmax.f32 %v14270_v12, %v6350_v11 }
 0x3cc   : > { %v14215_v9 = vadd.f32 %v6134_v18, %v6121_v2  ;;  %v14274_v2 = vld [vmem:[%s12908_s27 + $0x798] sm:$0xff] }
 0x3cd   : > { %v6365_v17 = vmax.f32 %v14274_v2, %v6364_v10  ;;  %v14278_v18 = vld [vmem:[%s12908_s27 + $0x38] sm:$0xff] }
 0x3ce   : > { %6325 = vst [vmem:[%s12908_s27 + $0x68] sm:$0xff] %v14215_v9  ;;  %v6352_v19 = vmax.f32 %v14278_v18, %v6351_v15 }
 0x3d1   : > { %v6122_v23 = vpop.f32.mrf.mxu2 }
 0x3d2   : > { %v6123_v26 = vadd.f32 %v6122_v23, %v6109_v22  ;;  %v6136_v29 = vpop.f32.mrf.mxu3  ;;  %v6366_v22 = vmax.f32 %v14282_v52, %v6365_v17  ;;  %v14286_v23 = vld [vmem:[%s12908_s27 + $0x40] sm:$0xff] }
 0x3d4   : > { %v14219_v14 = vadd.f32 %v6136_v29, %v6123_v26  ;;  %v6353_v26 = vmax.f32 %v14286_v23, %v6352_v19 }
 0x3d6   : > { %6341 = vst [vmem:[%s12908_s27 + $0x7e8] sm:$0xff] %v14219_v14 }
 0x3de   : > { %v6148_v30 = vpop.f32.mrf.mxu0 }
 0x3df   : > { %v6149_v33 = vadd.f32 %v6148_v30, %v1075_v31  ;;  %v14290_v30 = vld [vmem:[%s12908_s27 + $0x7a8] sm:$0xff] }
 0x3e0   : > { %v6162_v32 = vpop.f32.mrf.mxu1 }
 0x3e1   : > { %v6163_v20 = vadd.f32 %v6162_v32, %v6149_v33  ;;  %v14294_v32 = vld [vmem:[%s12908_s27 + $0x48] sm:$0xff] }
 0x3e2   : > { %v6354_v33 = vmax.f32 %v14294_v32, %v6353_v26 }
 0x3e6   : > { %v6150_v59 = vpop.f32.mrf.mxu0 }
 0x3e7   : > { %v6151_v39 = vadd.f32 %v6150_v59, %v1075_v31  ;;  %v6367_v31 = vmax.f32 %v14290_v30, %v6366_v22 }
 0x3e8   : > { %v6176_v34 = vpop.f32.mrf.mxu2  ;;  %v6164_v36 = vpop.f32.mrf.mxu1 }
 0x3e9   : > { %v6177_v28 = vadd.f32 %v6176_v34, %v6163_v20  ;;  %v6165_v8 = vadd.f32 %v6164_v36, %v6151_v39  ;;  %v14298_v36 = vld [vmem:[%s12908_s27 + $0x7b0] sm:$0xff]  ;;  %v6355_v39 = vmax.f32 %v14012_v47, %v6354_v33 }
 0x3ea   : > { %v6190_v38 = vpop.f32.mrf.mxu3 }
 0x3eb   : > { %v6191_v27 = vadd.f32 %v6190_v38, %v6177_v28  ;;  %v6368_v38 = vmax.f32 %v14298_v36, %v6367_v31 }
 0x3f0   : > { %v6178_v40 = vpop.f32.mrf.mxu2 }
 0x3f1   : > { %v6179_v44 = vadd.f32 %v6178_v40, %v6165_v8 }
 0x3f2   : > { %v6192_v45 = vpop.f32.mrf.mxu3 }
 0x3f3   : > { %v6193_v48 = vadd.f32 %v6192_v45, %v6179_v44 }
 0x400   : > { %v6204_v42 = vpop.f32.mrf.mxu0 }
 0x401   : > { %v6205_v35 = vadd.f32 %v6204_v42, %v6191_v27  ;;  %v14303_v27 = vld [vmem:[%s12908_s27 + $0x7b8] sm:$0xff]  ;;  %v6356_v42 = vmax.f32 %v14109_v1, %v6355_v39 }
 0x402   : > { %v6218_v43 = vpop.f32.mrf.mxu1  ;;  %v6369_v40 = vmax.f32 %v14303_v27, %v6368_v38 }
 0x403   : > { %v14224_v46 = vadd.f32 %v6218_v43, %v6205_v35  ;;  %v14308_v43 = vld [vmem:[%s12908_s27 + $0x7c0] sm:$0xff]  ;;  %v6357_v45 = vmax.f32 %v14206_v58, %v6356_v42 }
 0x404   : > { %v6370_v44 = vmax.f32 %v14308_v43, %v6369_v40 }
 0x405   : > { %6326 = vst [vmem:[%s12908_s27 + $0x70] sm:$0xff] %v14224_v46 }
 0x408   : > { %v6206_v49 = vpop.f32.mrf.mxu0  ;;  %v6232_v41 = vpop.f32.mrf.mxu2 }
 0x409   : > { %v6207_v50 = vadd.f32 %v6206_v49, %v6193_v48  ;;  %v6233_v21 = vadd.f32 %v6232_v41, %v1076_v6 }
 0x40a   : > { %v6220_v51 = vpop.f32.mrf.mxu1  ;;  %v6246_v13 = vpop.f32.mrf.mxu3 }
 0x40b   : > { %v14228_v54 = vadd.f32 %v6220_v51, %v6207_v50  ;;  %v6247_v34 = vadd.f32 %v6246_v13, %v6233_v21  ;;  %v14313_v50 = vld [vmem:[%s12908_s27 + $0x7c8] sm:$0xff]  ;;  %v6358_v51 = vmax.f32 %v14215_v9, %v6357_v45 }
 0x40c   : > { %v6371_v47 = vmax.f32 %v14313_v50, %v6370_v44 }
 0x40d   : > { %6342 = vst [vmem:[%s12908_s27 + $0x7f0] sm:$0xff] %v14228_v54  ;;  %v6359_v13 = vmax.f32 %v14224_v46, %v6358_v51 }
 0x40e   : > { %v6372_v63 = vmax.f32 %v14032_v16, %v6371_v47 }
 0x410   : > { %v6234_v29 = vpop.f32.mrf.mxu2 }
 0x411   : > { %v6235_v35 = vadd.f32 %v6234_v29, %v1076_v6  ;;  %v6373_v6 = vmax.f32 %v14135_v53, %v6372_v63 }
 0x412   : > { %v6248_v20 = vpop.f32.mrf.mxu3 }
 0x413   : > { %v6249_v57 = vadd.f32 %v6248_v20, %v6235_v35  ;;  %v6374_v17 = vmax.f32 %v14210_v37, %v6373_v6  ;;  %v14333_v20 = vld [vmem:[#allocation2] sm:$0xff] }
 0x415   : > { %v6375_v16 = vmax.f32 %v14219_v14, %v6374_v17 }
 0x417   : > { %v6376_v29 = vmax.f32 %v14228_v54, %v6375_v16 }
 0x430   : > { %v6260_v59 = vpop.f32.mrf.mxu0 }
 0x431   : > { %v6261_v28 = vadd.f32 %v6260_v59, %v6247_v34  ;;  %v12297_v34 = vmov 0  }
 0x432   : > { %v6274_v8 = vpop.f32.mrf.mxu1  ;;  %12076 = vset.pattern.permute.xlu1 %v12297_v34  ;;  %12077 = vset.pattern.permute.xlu0 %v12297_v34 }
 0x433   : > { %v6275_v48 = vadd.f32 %v6274_v8, %v6261_v28  ;;  %v14343_v28 = vld [vmem:[#allocation2 + $0x8] sm:$0xff] }
 0x438   : > { %v6262_v41 = vpop.f32.mrf.mxu0 }
 0x439   : > { %v6263_v11 = vadd.f32 %v6262_v41, %v6249_v57 }
 0x43a   : > { %v6288_v49 = vpop.f32.mrf.mxu2  ;;  %v6276_v15 = vpop.f32.mrf.mxu1 }
 0x43b   : > { %v6289_v60 = vadd.f32 %v6288_v49, %v6275_v48  ;;  %v6277_v19 = vadd.f32 %v6276_v15, %v6263_v11 }
 0x43c   : > { %v6302_v61 = vpop.f32.mrf.mxu3 }
 0x43d   : > { %v14319_v4 = vadd.f32 %v6302_v61, %v6289_v60 }
 0x43f   : > { %v6360_v10 = vmax.f32 %v14319_v4, %v6359_v13  ;;  %6327 = vst [vmem:[%s12908_s27 + $0x78] sm:$0xff] %v14319_v4 }
 0x441   : > { %6361 = vmax.xlane.f32.xlu0 %v6360_v10 }
 0x442   : > { %v6290_v21 = vpop.f32.mrf.mxu2 }
 0x443   : > { %v6291_v22 = vadd.f32 %v6290_v21, %v6277_v19  ;;  %v12169_v19 = vld [vmem:[%s12908_s27 + $0x50] sm:$0xff] }
 0x444   : > { %v6304_v26 = vpop.f32.mrf.mxu3 }
 0x445   : > { %v14328_v31 = vadd.f32 %v6304_v26, %v6291_v22 }
 0x447   : > { %v6377_v33 = vmax.f32 %v14328_v31, %v6376_v29  ;;  %6343 = vst [vmem:[%s12908_s27 + $0x7f8] sm:$0xff] %v14328_v31 }
 0x449   : > { %6378 = vmax.xlane.f32.xlu0 %v6377_v33 }
 0x4b4   : > { %v6362_v59 = vpop.xlane.xlu0 %6361 }
 0x4b5   : > { %v14336_v38 = vmax.f32 %v14333_v20, %v6362_v59 }
 0x4b7   : > { %v6384_v39 = vsub.f32 %v14333_v20, %v14336_v38  ;;  %6537 = vst.msk [vmem:[#allocation2] sm:$0xff] %vm6534_vm1, %v14336_v38  ;;  %6394 = vperm.xlu1 %12076, %v14336_v38  }
 0x4bc   : > { %v6379_v8 = vpop.xlane.xlu0 %6378 }
 0x4bd   : > { %v14346_v40 = vmax.f32 %v14343_v28, %v6379_v8 }
 0x4bf   : > { %v6385_v42 = vsub.f32 %v14343_v28, %v14346_v40  ;;  %6538 = vst.msk [vmem:[#allocation2 + $0x8] sm:$0xff] %vm6534_vm1, %v14346_v40  ;;  %6399 = vperm.xlu1 %12076, %v14346_v40  }
 0x529   : > { %v14353_v35 = vpop.permute.xlu1 %6394 }
 0x52a   : > { %v6402_v44 = vsub.f32 %v14231_v55, %v14353_v35  ;;  %v6403_v45 = vsub.f32 %v14234_v56, %v14353_v35  ;;  %v6404_v48 = vsub.f32 %v14241_v24, %v14353_v35  ;;  %v6405_v49 = vsub.f32 %v14245_v25, %v14353_v35 }
 0x52b   : > { %v6406_v57 = vsub.f32 %v14249_v62, %v14353_v35  ;;  %v6407_v61 = vsub.f32 %v14261_v5, %v14353_v35  ;;  %v6408_v56 = vsub.f32 %v14270_v12, %v14353_v35  ;;  %v6409_v25 = vsub.f32 %v14278_v18, %v14353_v35 }
 0x52c   : > { %v6434_v47 = vmul.f32 1.442695, %v6402_v44  ;;  %v6436_v51 = vmul.f32 1.442695, %v6403_v45  ;;  %v6438_v60 = vmul.f32 1.442695, %v6404_v48  ;;  %v6410_v13 = vsub.f32 %v14286_v23, %v14353_v35 }
 0x52d   : > { %v6440_v55 = vmul.f32 1.442695, %v6405_v49  ;;  %v6442_v24 = vmul.f32 1.442695, %v6406_v57  ;;  %v6444_v62 = vmul.f32 1.442695, %v6407_v61  ;;  %v6411_v11 = vsub.f32 %v14294_v32, %v14353_v35 }
 0x52e   : > { %12078 = vpow2.f32 %v6434_v47  ;;  %v6446_v12 = vmul.f32 1.442695, %v6408_v56  ;;  %v6448_v17 = vmul.f32 1.442695, %v6409_v25  ;;  %v6412_v21 = vsub.f32 %v12169_v19, %v14353_v35 }
 0x52f   : > { %12080 = vpow2.f32 %v6436_v51  ;;  %v6450_v23 = vmul.f32 1.442695, %v6410_v13  ;;  %v6452_v32 = vmul.f32 1.442695, %v6411_v11  ;;  %v6414_v8 = vsub.f32 %v14206_v58, %v14353_v35 }
 0x530   : > { %12082 = vpow2.f32 %v6438_v60  ;;  %v6454_v44 = vmul.f32 1.442695, %v6412_v21  ;;  %v6415_v49 = vsub.f32 %v14215_v9, %v14353_v35  ;;  %v6416_v60 = vsub.f32 %v14224_v46, %v14353_v35 }
 0x531   : > { %v14369_v41 = vpop.permute.xlu1 %6399  ;;  %12084 = vpow2.f32 %v6440_v55  ;;  %v6458_v61 = vmul.f32 1.442695, %v6414_v8  ;;  %v6417_v25 = vsub.f32 %v14319_v4, %v14353_v35 }
 0x532   : > { %12086 = vpow2.f32 %v6442_v24  ;;  %v6418_v10 = vsub.f32 %v14253_v0, %v14369_v41  ;;  %v6419_v18 = vsub.f32 %v14256_v3, %v14369_v41  ;;  %v6420_v26 = vsub.f32 %v14266_v7, %v14369_v41 }
 0x533   : > { %12088 = vpow2.f32 %v6444_v62  ;;  %v6413_v0 = vsub.f32 %v14109_v1, %v14353_v35  ;;  %v6421_v3 = vsub.f32 %v14274_v2, %v14369_v41  ;;  %v6422_v7 = vsub.f32 %v14282_v52, %v14369_v41 }
 0x534   : > { %v12079_v63 = vpop.eup %12078  ;;  %12090 = vpow2.f32 %v6446_v12  ;;  %v6466_v33 = vmul.f32 1.442695, %v6418_v10  ;;  %v6468_v59 = vmul.f32 1.442695, %v6419_v18  ;;  %v6470_v1 = vmul.f32 1.442695, %v6420_v26 }
 0x535   : > { %v12081_v5 = vpop.eup %12080  ;;  %12092 = vpow2.f32 %v6448_v17  ;;  %v6456_v47 = vmul.f32 1.442695, %v6413_v0  ;;  %v6423_v57 = vsub.f32 %v14290_v30, %v14369_v41  ;;  %v6472_v58 = vmul.f32 1.442695, %v6421_v3 }
 0x536   : > { %v6498_v6 = vadd.f32 %v12081_v5, %v12079_v63  ;;  %v12083_v15 = vpop.eup %12082  ;;  %12094 = vpow2.f32 %v6450_v23  ;;  %v6424_v56 = vsub.f32 %v14298_v36, %v14369_v41  ;;  %v6474_v9 = vmul.f32 1.442695, %v6422_v7 }
 0x537   : > { %v12085_v22 = vpop.eup %12084  ;;  %12096 = vpow2.f32 %v6452_v32  ;;  %v6460_v30 = vmul.f32 1.442695, %v6415_v49  ;;  %v6425_v46 = vsub.f32 %v14303_v27, %v14369_v41  ;;  %v6476_v13 = vmul.f32 1.442695, %v6423_v57 }
 0x538   : > { %v6499_v16 = vadd.f32 %v12083_v15, %v6498_v6  ;;  %v12087_v34 = vpop.eup %12086  ;;  %12098 = vpow2.f32 %v6466_v33  ;;  %v6462_v11 = vmul.f32 1.442695, %v6416_v60  ;;  %v6426_v6 = vsub.f32 %v14308_v43, %v14369_v41  ;;  %v12170_v43 = vld [vmem:[%s12908_s27 + $0x7d0] sm:$0xff] }
 0x539   : > { %v12089_v48 = vpop.eup %12088  ;;  %12100 = vpow2.f32 %v6468_v59  ;;  %v6478_v4 = vmul.f32 1.442695, %v6424_v56  ;;  %v6464_v10 = vmul.f32 1.442695, %v6417_v25  ;;  %v6427_v27 = vsub.f32 %v14313_v50, %v14369_v41 }
 0x53a   : > { %v6500_v29 = vadd.f32 %v12085_v22, %v6499_v16  ;;  %v12091_v2 = vpop.eup %12090  ;;  %12102 = vpow2.f32 %v6454_v44  ;;  %v6480_v19 = vmul.f32 1.442695, %v6425_v46  ;;  %v6428_v32 = vsub.f32 %v12170_v43, %v14369_v41 }
 0x53b   : > { %v12093_v52 = vpop.eup %12092  ;;  %12104 = vpow2.f32 %v6470_v1  ;;  %v6482_v26 = vmul.f32 1.442695, %v6426_v6  ;;  %v6429_v50 = vsub.f32 %v14135_v53, %v14369_v41  ;;  %v6484_v3 = vmul.f32 1.442695, %v6427_v27 }
 0x53c   : > { %v6501_v45 = vadd.f32 %v12087_v34, %v6500_v29  ;;  %v12095_v24 = vpop.eup %12094  ;;  %12106 = vpow2.f32 %v6456_v47  ;;  %v6486_v7 = vmul.f32 1.442695, %v6428_v32 }
 0x53d   : > { %v12097_v63 = vpop.eup %12096  ;;  %12108 = vpow2.f32 %v6472_v58  ;;  %v6488_v53 = vmul.f32 1.442695, %v6429_v50 }
 0x53e   : > { %v6502_v51 = vadd.f32 %v12089_v48, %v6501_v45  ;;  %v12099_v5 = vpop.eup %12098  ;;  %12110 = vpow2.f32 %v6458_v61  ;;  %v6430_v48 = vsub.f32 %v14210_v37, %v14369_v41 }
 0x53f   : > { %v12101_v36 = vpop.eup %12100  ;;  %12112 = vpow2.f32 %v6474_v9 }
 0x540   : > { %v6503_v55 = vadd.f32 %v12091_v2, %v6502_v51  ;;  %v12103_v35 = vpop.eup %12102  ;;  %12114 = vpow2.f32 %v6460_v30  ;;  %v6515_v17 = vadd.f32 %v12101_v36, %v12099_v5  ;;  %v6431_v2 = vsub.f32 %v14219_v14, %v14369_v41 }
 0x541   : > { %v12105_v18 = vpop.eup %12104  ;;  %12116 = vpow2.f32 %v6476_v13  ;;  %v6490_v37 = vmul.f32 1.442695, %v6430_v48 }
 0x542   : > { %v6504_v62 = vadd.f32 %v12093_v52, %v6503_v55  ;;  %v12107_v21 = vpop.eup %12106  ;;  %12118 = vpow2.f32 %v6462_v11  ;;  %v6516_v16 = vadd.f32 %v12105_v18, %v6515_v17  ;;  %v6432_v55 = vsub.f32 %v14228_v54, %v14369_v41  ;;  %v6382_v18 = vld [vmem:[#allocation3] sm:$0xff] }
 0x543   : > { %v12109_v22 = vpop.eup %12108  ;;  %12120 = vpow2.f32 %v6478_v4  ;;  %v6492_v25 = vmul.f32 1.442695, %v6431_v2 }
 0x544   : > { %v6505_v12 = vadd.f32 %v12095_v24, %v6504_v62  ;;  %v12111_v0 = vpop.eup %12110  ;;  %12122 = vpow2.f32 %v6464_v10  ;;  %v6517_v33 = vadd.f32 %v12109_v22, %v6516_v16  ;;  %v6433_v24 = vsub.f32 %v14328_v31, %v14369_v41  ;;  %v6383_v22 = vld [vmem:[#allocation3 + $0x8] sm:$0xff] }
 0x545   : > { %v12113_v34 = vpop.eup %12112  ;;  %12124 = vpow2.f32 %v6480_v19  ;;  %v6494_v62 = vmul.f32 1.442695, %v6432_v55 }
 0x546   : > { %v6506_v15 = vadd.f32 %v12097_v63, %v6505_v12  ;;  %v12115_v59 = vpop.eup %12114  ;;  %v6518_v44 = vadd.f32 %v12113_v34, %v6517_v33  ;;  %12126 = vpow2.f32 %v6482_v26  ;;  %v6496_v13 = vmul.f32 1.442695, %v6433_v24 }
 0x547   : > { %v12117_v45 = vpop.eup %12116  ;;  %12128 = vpow2.f32 %v6484_v3 }
 0x548   : > { %v6507_v23 = vadd.f32 %v12103_v35, %v6506_v15  ;;  %v12119_v1 = vpop.eup %12118  ;;  %v6519_v47 = vadd.f32 %v12117_v45, %v6518_v44  ;;  %12130 = vpow2.f32 %v6486_v7  ;;  %v6386_v15 = vmul.f32 1.442695, %v6384_v39 }
 0x549   : > { %v12121_v51 = vpop.eup %12120  ;;  %12132 = vpow2.f32 %v6488_v53 }
 0x54a   : > { %v6508_v29 = vadd.f32 %v12107_v21, %v6507_v23  ;;  %v12123_v57 = vpop.eup %12122  ;;  %v6520_v60 = vadd.f32 %v12121_v51, %v6519_v47  ;;  %12134 = vpow2.f32 %v6490_v37  ;;  %v6388_v23 = vmul.f32 1.442695, %v6385_v42 }
 0x54b   : > { %v12125_v61 = vpop.eup %12124  ;;  %12136 = vpow2.f32 %v6492_v25 }
 0x54c   : > { %v6509_v8 = vadd.f32 %v12111_v0, %v6508_v29  ;;  %v6521_v56 = vadd.f32 %v12125_v61, %v6520_v60  ;;  %v12127_v9 = vpop.eup %12126  ;;  %12138 = vpow2.f32 %v6494_v62 }
 0x54d   : > { %v12129_v30 = vpop.eup %12128  ;;  %12140 = vpow2.f32 %v6496_v13 }
 0x54e   : > { %v6510_v49 = vadd.f32 %v12115_v59, %v6509_v8  ;;  %v6522_v14 = vadd.f32 %v12127_v9, %v6521_v56  ;;  %v12131_v46 = vpop.eup %12130  ;;  %12142 = vpow2.f32 %v6386_v15 }
 0x54f   : > { %v12133_v5 = vpop.eup %12132  ;;  %12144 = vpow2.f32 %v6388_v23 }
 0x550   : > { %v6511_v58 = vadd.f32 %v12119_v1, %v6510_v49  ;;  %v6523_v63 = vadd.f32 %v12129_v30, %v6522_v14  ;;  %v12135_v12 = vpop.eup %12134 }
 0x551   : > { %v12137_v6 = vpop.eup %12136 }
 0x552   : > { %v6512_v52 = vadd.f32 %v12123_v57, %v6511_v58  ;;  %v6524_v54 = vadd.f32 %v12131_v46, %v6523_v63  ;;  %v12139_v41 = vpop.eup %12138 }
 0x553   : > { %v12141_v35 = vpop.eup %12140 }
 0x554   : > { %6513 = vadd.xlane.f32.xlu2 %v6512_v52  ;;  %v6525_v11 = vadd.f32 %v12133_v5, %v6524_v54  ;;  %v12143_v17 = vpop.eup %12142 }
 0x555   : > { %v6390_v27 = vmul.f32 %v12143_v17, %v6382_v18  ;;  %v12145_v16 = vpop.eup %12144 }
 0x556   : > { %v6526_v36 = vadd.f32 %v12135_v12, %v6525_v11  ;;  %v6391_v43 = vmul.f32 %v12145_v16, %v6383_v22 }
 0x558   : > { %v6527_v31 = vadd.f32 %v12137_v6, %v6526_v36 }
 0x55a   : > { %v6528_v4 = vadd.f32 %v12139_v41, %v6527_v31 }
 0x55c   : > { %v6529_v10 = vadd.f32 %v12141_v35, %v6528_v4 }
 0x55e   : > { %6530 = vadd.xlane.f32.xlu2 %v6529_v10 }
 0x5c7   : > { %v6514_v19 = vpop.xlane.xlu2 %6513 }
 0x5c8   : > { %v6532_v21 = vadd.f32 %v6514_v19, %v6390_v27 }
 0x5ca   : > { %6535 = vst.msk [vmem:[#allocation3] sm:$0xff] %vm6534_vm1, %v6532_v21 }
 0x5d0   : > { %6542 = sbr.rel (%p11227_p0) target bundleno = 2102 (0x836), region = 48 }
 0x5d1   : > { %v6531_v32 = vpop.xlane.xlu2 %6530 }
 0x5d2   : > { %v6533_v26 = vadd.f32 %v6531_v32, %v6391_v43 }
 0x5d4   : > { %6536 = vst.msk [vmem:[#allocation3 + $0x8] sm:$0xff] %vm6534_vm1, %v6533_v26 }
 0x5d5   : > { %v6545_v20 = vld [vmem:[#allocation3] sm:$0xff]  ;;  %v12298_v38 = vmov 0   ;;  %v6543_v40 = vld [vmem:[#allocation2] sm:$0xff]  ;;  %v6544_v34 = vld [vmem:[#allocation2 + $0x8] sm:$0xff] }
 0x5d6   : > { %12171 = vset.pattern.permute.xlu0 %v12298_v38  ;;  %12172 = vlog2.f32 %v6545_v20  ;;  %v6553_v59 = vld [vmem:[%s17815_s3] sm:$0xff]  ;;  %v6554_v8 = vld [vmem:[%s17815_s3 + $0x8] sm:$0xff]  ;;  %v6555_v44 = vld [vmem:[%s17815_s3 + $0x10] sm:$0xff] }
 0x5d7   : > { %v6556_v45 = vld [vmem:[%s17815_s3 + $0x18] sm:$0xff]  ;;  %v6557_v48 = vld [vmem:[%s17815_s3 + $0x20] sm:$0xff]  ;;  %v6558_v7 = vld [vmem:[%s17815_s3 + $0x28] sm:$0xff] }
 0x5d8   : > { %v6559_v51 = vld [vmem:[%s17815_s3 + $0x30] sm:$0xff]  ;;  %v6560_v53 = vld [vmem:[%s17815_s3 + $0x38] sm:$0xff]  ;;  %v6561_v58 = vld [vmem:[%s17815_s3 + $0x40] sm:$0xff] }
 0x5d9   : > { %v6562_v61 = vld [vmem:[%s17815_s3 + $0x48] sm:$0xff]  ;;  %v6563_v37 = vld [vmem:[%s17815_s3 + $0x50] sm:$0xff]  ;;  %v6564_v56 = vld [vmem:[%s17815_s3 + $0x58] sm:$0xff] }
 0x5da   : > { %v6565_v24 = vld [vmem:[%s17815_s3 + $0x60] sm:$0xff]  ;;  %v6566_v14 = vld [vmem:[%s17815_s3 + $0x68] sm:$0xff]  ;;  %v6567_v62 = vld [vmem:[%s17815_s3 + $0x70] sm:$0xff] }
 0x5db   : > { %v6546_v39 = vld [vmem:[#allocation3 + $0x8] sm:$0xff]  ;;  %v6569_v54 = vld [vmem:[%s17815_s3 + $0x80] sm:$0xff]  ;;  %v6570_v11 = vld [vmem:[%s17815_s3 + $0x88] sm:$0xff] }
 0x5dc   : > { %12174 = vlog2.f32 %v6546_v39  ;;  %v12173_v28 = vpop.eup %12172  ;;  %v6568_v46 = vld [vmem:[%s17815_s3 + $0x78] sm:$0xff]  ;;  %v6571_v36 = vld [vmem:[%s17815_s3 + $0x90] sm:$0xff]  ;;  %v6573_v4 = vld [vmem:[%s17815_s3 + $0xa0] sm:$0xff] }
 0x5dd   : > { %v6548_v42 = vmul.f32 0.6931472, %v12173_v28  ;;  %v6572_v31 = vld [vmem:[%s17815_s3 + $0x98] sm:$0xff]  ;;  %v6574_v10 = vld [vmem:[%s17815_s3 + $0xa8] sm:$0xff]  ;;  %v6575_v17 = vld [vmem:[%s17815_s3 + $0xb0] sm:$0xff] }
 0x5de   : > { %v6576_v27 = vld [vmem:[%s17815_s3 + $0xb8] sm:$0xff]  ;;  %v6577_v21 = vld [vmem:[%s17815_s3 + $0xc0] sm:$0xff]  ;;  %v6578_v16 = vld [vmem:[%s17815_s3 + $0xc8] sm:$0xff] }
 0x5df   : > { %v6551_v29 = vadd.f32 %v6548_v42, %v6543_v40  ;;  %v6579_v43 = vld [vmem:[%s17815_s3 + $0xd0] sm:$0xff]  ;;  %v6580_v26 = vld [vmem:[%s17815_s3 + $0xd8] sm:$0xff]  ;;  %v6581_v38 = vld [vmem:[%s17815_s3 + $0xe0] sm:$0xff] }
 0x5e0   : > { %v6582_v28 = vld [vmem:[%s17815_s3 + $0xe8] sm:$0xff]  ;;  %v6583_v42 = vld [vmem:[%s17815_s3 + $0xf0] sm:$0xff] }
 0x5e1   : > { %7035 = vperm.xlu0 %12171, %v6551_v29   ;;  %v6584_v29 = vld [vmem:[%s17815_s3 + $0xf8] sm:$0xff] }
 0x5e2   : > { %v12175_v0 = vpop.eup %12174 }
 0x5e3   : > { %v6550_v33 = vmul.f32 0.6931472, %v12175_v0 }
 0x5e5   : > { %v6552_v50 = vadd.f32 %v6550_v33, %v6544_v34  ;;  %v6585_v34 = vld [vmem:[%s17815_s3 + $0x100] sm:$0xff] }
 0x5e9   : > { %7040 = vperm.xlu0 %12171, %v6552_v50  }
 0x653   : > { %v14430_v3 = vpop.permute.xlu0 %7035 }
 0x654   : > { %v7043_v1 = vsub.f32 %v6553_v59, %v14430_v3  ;;  %v7044_v49 = vsub.f32 %v6554_v8, %v14430_v3  ;;  %v7045_v47 = vsub.f32 %v6555_v44, %v14430_v3  ;;  %v7046_v2 = vsub.f32 %v6556_v45, %v14430_v3  ;;  %v6586_v59 = vld [vmem:[%s17815_s3 + $0x108] sm:$0xff]  ;;  %v6587_v44 = vld [vmem:[%s17815_s3 + $0x110] sm:$0xff] }
 0x655   : > { %v7047_v57 = vsub.f32 %v6557_v48, %v14430_v3  ;;  %v7048_v60 = vsub.f32 %v6558_v7, %v14430_v3  ;;  %v7049_v55 = vsub.f32 %v6559_v51, %v14430_v3  ;;  %v7050_v52 = vsub.f32 %v6560_v53, %v14430_v3  ;;  %v6588_v48 = vld [vmem:[%s17815_s3 + $0x118] sm:$0xff] }
 0x656   : > { %7523 = vst [vmem:[%s17815_s3] sm:$0xff] %v7043_v1  ;;  %v7051_v9 = vsub.f32 %v6561_v58, %v14430_v3  ;;  %v7052_v25 = vsub.f32 %v6562_v61, %v14430_v3  ;;  %v7053_v30 = vsub.f32 %v6563_v37, %v14430_v3  ;;  %v7054_v63 = vsub.f32 %v6564_v56, %v14430_v3  ;;  %v6589_v1 = vld [vmem:[%s17815_s3 + $0x120] sm:$0xff] }
 0x657   : > { %7524 = vst [vmem:[%s17815_s3 + $0x8] sm:$0xff] %v7044_v49  ;;  %v7055_v13 = vsub.f32 %v6565_v24, %v14430_v3  ;;  %v7056_v5 = vsub.f32 %v6566_v14, %v14430_v3  ;;  %v7057_v12 = vsub.f32 %v6567_v62, %v14430_v3  ;;  %v7058_v6 = vsub.f32 %v6568_v46, %v14430_v3 }
 0x658   : > { %7525 = vst [vmem:[%s17815_s3 + $0x10] sm:$0xff] %v7045_v47  ;;  %v7059_v41 = vsub.f32 %v6569_v54, %v14430_v3  ;;  %v7060_v35 = vsub.f32 %v6570_v11, %v14430_v3  ;;  %v7061_v15 = vsub.f32 %v6571_v36, %v14430_v3  ;;  %v7062_v18 = vsub.f32 %v6572_v31, %v14430_v3  ;;  %v6590_v47 = vld [vmem:[%s17815_s3 + $0x128] sm:$0xff] }
 0x659   : > { %7526 = vst [vmem:[%s17815_s3 + $0x18] sm:$0xff] %v7046_v2  ;;  %v7063_v19 = vsub.f32 %v6573_v4, %v14430_v3  ;;  %v7064_v23 = vsub.f32 %v6574_v10, %v14430_v3  ;;  %v7065_v22 = vsub.f32 %v6575_v17, %v14430_v3  ;;  %v7066_v32 = vsub.f32 %v6576_v27, %v14430_v3  ;;  %v6591_v2 = vld [vmem:[%s17815_s3 + $0x130] sm:$0xff] }
 0x65a   : > { %7527 = vst [vmem:[%s17815_s3 + $0x20] sm:$0xff] %v7047_v57  ;;  %v7067_v20 = vsub.f32 %v6577_v21, %v14430_v3  ;;  %v7068_v39 = vsub.f32 %v6578_v16, %v14430_v3  ;;  %v7069_v40 = vsub.f32 %v6579_v43, %v14430_v3  ;;  %v7070_v0 = vsub.f32 %v6580_v26, %v14430_v3  ;;  %v6592_v57 = vld [vmem:[%s17815_s3 + $0x138] sm:$0xff] }
 0x65b   : > { %7528 = vst [vmem:[%s17815_s3 + $0x28] sm:$0xff] %v7048_v60  ;;  %v7071_v33 = vsub.f32 %v6581_v38, %v14430_v3  ;;  %v7072_v50 = vsub.f32 %v6582_v28, %v14430_v3  ;;  %v7073_v8 = vsub.f32 %v6583_v42, %v14430_v3  ;;  %v7074_v45 = vsub.f32 %v6584_v29, %v14430_v3  ;;  %v6593_v60 = vld [vmem:[%s17815_s3 + $0x140] sm:$0xff] }
 0x65c   : > { %7529 = vst [vmem:[%s17815_s3 + $0x30] sm:$0xff] %v7049_v55  ;;  %v7075_v7 = vsub.f32 %v6585_v34, %v14430_v3  ;;  %v7076_v49 = vsub.f32 %v6586_v59, %v14430_v3  ;;  %v7077_v51 = vsub.f32 %v6587_v44, %v14430_v3  ;;  %v7078_v53 = vsub.f32 %v6588_v48, %v14430_v3  ;;  %v6594_v55 = vld [vmem:[%s17815_s3 + $0x148] sm:$0xff] }
 0x65d   : > { %7530 = vst [vmem:[%s17815_s3 + $0x38] sm:$0xff] %v7050_v52  ;;  %v7079_v58 = vsub.f32 %v6589_v1, %v14430_v3  ;;  %v7080_v61 = vsub.f32 %v6590_v47, %v14430_v3  ;;  %v7081_v37 = vsub.f32 %v6591_v2, %v14430_v3  ;;  %v6595_v52 = vld [vmem:[%s17815_s3 + $0x150] sm:$0xff]  ;;  %v7082_v56 = vsub.f32 %v6592_v57, %v14430_v3 }
 0x65e   : > { %7531 = vst [vmem:[%s17815_s3 + $0x40] sm:$0xff] %v7051_v9  ;;  %v6596_v9 = vld [vmem:[%s17815_s3 + $0x158] sm:$0xff]  ;;  %v7083_v24 = vsub.f32 %v6593_v60, %v14430_v3  ;;  %v7084_v14 = vsub.f32 %v6594_v55, %v14430_v3  ;;  %v7085_v62 = vsub.f32 %v6595_v52, %v14430_v3 }
 0x65f   : > { %7532 = vst [vmem:[%s17815_s3 + $0x48] sm:$0xff] %v7052_v25  ;;  %v6597_v25 = vld [vmem:[%s17815_s3 + $0x160] sm:$0xff]  ;;  %v7086_v46 = vsub.f32 %v6596_v9, %v14430_v3 }
 0x660   : > { %7533 = vst [vmem:[%s17815_s3 + $0x50] sm:$0xff] %v7053_v30  ;;  %v6598_v30 = vld [vmem:[%s17815_s3 + $0x168] sm:$0xff]  ;;  %v7087_v54 = vsub.f32 %v6597_v25, %v14430_v3 }
 0x661   : > { %7534 = vst [vmem:[%s17815_s3 + $0x58] sm:$0xff] %v7054_v63  ;;  %v6599_v63 = vld [vmem:[%s17815_s3 + $0x170] sm:$0xff]  ;;  %v7088_v11 = vsub.f32 %v6598_v30, %v14430_v3 }
 0x662   : > { %7535 = vst [vmem:[%s17815_s3 + $0x60] sm:$0xff] %v7055_v13  ;;  %v6600_v13 = vld [vmem:[%s17815_s3 + $0x178] sm:$0xff]  ;;  %v7089_v36 = vsub.f32 %v6599_v63, %v14430_v3 }
 0x663   : > { %7536 = vst [vmem:[%s17815_s3 + $0x68] sm:$0xff] %v7056_v5  ;;  %v6601_v5 = vld [vmem:[%s17815_s3 + $0x180] sm:$0xff]  ;;  %v7090_v31 = vsub.f32 %v6600_v13, %v14430_v3 }
 0x664   : > { %7537 = vst [vmem:[%s17815_s3 + $0x70] sm:$0xff] %v7057_v12  ;;  %v6602_v12 = vld [vmem:[%s17815_s3 + $0x188] sm:$0xff]  ;;  %v7091_v4 = vsub.f32 %v6601_v5, %v14430_v3 }
 0x665   : > { %7538 = vst [vmem:[%s17815_s3 + $0x78] sm:$0xff] %v7058_v6  ;;  %v6603_v6 = vld [vmem:[%s17815_s3 + $0x190] sm:$0xff]  ;;  %v7092_v10 = vsub.f32 %v6602_v12, %v14430_v3 }
 0x666   : > { %7539 = vst [vmem:[%s17815_s3 + $0x80] sm:$0xff] %v7059_v41  ;;  %v6604_v41 = vld [vmem:[%s17815_s3 + $0x198] sm:$0xff]  ;;  %v7093_v17 = vsub.f32 %v6603_v6, %v14430_v3 }
 0x667   : > { %7540 = vst [vmem:[%s17815_s3 + $0x88] sm:$0xff] %v7060_v35  ;;  %v6605_v35 = vld [vmem:[%s17815_s3 + $0x1a0] sm:$0xff]  ;;  %v7094_v27 = vsub.f32 %v6604_v41, %v14430_v3 }
 0x668   : > { %7541 = vst [vmem:[%s17815_s3 + $0x90] sm:$0xff] %v7061_v15  ;;  %v6606_v15 = vld [vmem:[%s17815_s3 + $0x1a8] sm:$0xff]  ;;  %v7095_v21 = vsub.f32 %v6605_v35, %v14430_v3 }
 0x669   : > { %7542 = vst [vmem:[%s17815_s3 + $0x98] sm:$0xff] %v7062_v18  ;;  %v6607_v18 = vld [vmem:[%s17815_s3 + $0x1b0] sm:$0xff]  ;;  %v7096_v16 = vsub.f32 %v6606_v15, %v14430_v3 }
 0x66a   : > { %7543 = vst [vmem:[%s17815_s3 + $0xa0] sm:$0xff] %v7063_v19  ;;  %v6608_v19 = vld [vmem:[%s17815_s3 + $0x1b8] sm:$0xff]  ;;  %v7097_v43 = vsub.f32 %v6607_v18, %v14430_v3 }
 0x66b   : > { %7544 = vst [vmem:[%s17815_s3 + $0xa8] sm:$0xff] %v7064_v23  ;;  %v6609_v23 = vld [vmem:[%s17815_s3 + $0x1c0] sm:$0xff]  ;;  %v7098_v26 = vsub.f32 %v6608_v19, %v14430_v3 }
 0x66c   : > { %7545 = vst [vmem:[%s17815_s3 + $0xb0] sm:$0xff] %v7065_v22  ;;  %v6610_v22 = vld [vmem:[%s17815_s3 + $0x1c8] sm:$0xff]  ;;  %v7099_v38 = vsub.f32 %v6609_v23, %v14430_v3 }
 0x66d   : > { %7546 = vst [vmem:[%s17815_s3 + $0xb8] sm:$0xff] %v7066_v32  ;;  %v6611_v32 = vld [vmem:[%s17815_s3 + $0x1d0] sm:$0xff]  ;;  %v7100_v28 = vsub.f32 %v6610_v22, %v14430_v3 }
 0x66e   : > { %7547 = vst [vmem:[%s17815_s3 + $0xc0] sm:$0xff] %v7067_v20  ;;  %v6612_v20 = vld [vmem:[%s17815_s3 + $0x1d8] sm:$0xff]  ;;  %v7101_v42 = vsub.f32 %v6611_v32, %v14430_v3 }
 0x66f   : > { %7548 = vst [vmem:[%s17815_s3 + $0xc8] sm:$0xff] %v7068_v39  ;;  %v6613_v39 = vld [vmem:[%s17815_s3 + $0x1e0] sm:$0xff]  ;;  %v7102_v29 = vsub.f32 %v6612_v20, %v14430_v3 }
 0x670   : > { %7549 = vst [vmem:[%s17815_s3 + $0xd0] sm:$0xff] %v7069_v40  ;;  %v6614_v40 = vld [vmem:[%s17815_s3 + $0x1e8] sm:$0xff]  ;;  %v7103_v34 = vsub.f32 %v6613_v39, %v14430_v3 }
 0x671   : > { %7550 = vst [vmem:[%s17815_s3 + $0xd8] sm:$0xff] %v7070_v0  ;;  %v6615_v0 = vld [vmem:[%s17815_s3 + $0x1f0] sm:$0xff]  ;;  %v7104_v59 = vsub.f32 %v6614_v40, %v14430_v3 }
 0x672   : > { %7551 = vst [vmem:[%s17815_s3 + $0xe0] sm:$0xff] %v7071_v33  ;;  %v6616_v33 = vld [vmem:[%s17815_s3 + $0x1f8] sm:$0xff]  ;;  %v7105_v44 = vsub.f32 %v6615_v0, %v14430_v3 }
 0x673   : > { %7552 = vst [vmem:[%s17815_s3 + $0xe8] sm:$0xff] %v7072_v50  ;;  %v6617_v50 = vld [vmem:[%s17815_s3 + $0x200] sm:$0xff]  ;;  %v7106_v48 = vsub.f32 %v6616_v33, %v14430_v3 }
 0x674   : > { %7553 = vst [vmem:[%s17815_s3 + $0xf0] sm:$0xff] %v7073_v8  ;;  %v6618_v8 = vld [vmem:[%s17815_s3 + $0x208] sm:$0xff]  ;;  %v7107_v1 = vsub.f32 %v6617_v50, %v14430_v3 }
 0x675   : > { %7554 = vst [vmem:[%s17815_s3 + $0xf8] sm:$0xff] %v7074_v45  ;;  %v6619_v45 = vld [vmem:[%s17815_s3 + $0x210] sm:$0xff]  ;;  %v7108_v47 = vsub.f32 %v6618_v8, %v14430_v3 }
 0x676   : > { %7555 = vst [vmem:[%s17815_s3 + $0x100] sm:$0xff] %v7075_v7  ;;  %v6620_v7 = vld [vmem:[%s17815_s3 + $0x218] sm:$0xff]  ;;  %v7109_v2 = vsub.f32 %v6619_v45, %v14430_v3 }
 0x677   : > { %7556 = vst [vmem:[%s17815_s3 + $0x108] sm:$0xff] %v7076_v49  ;;  %v6621_v49 = vld [vmem:[%s17815_s3 + $0x220] sm:$0xff]  ;;  %v7110_v57 = vsub.f32 %v6620_v7, %v14430_v3 }
 0x678   : > { %7557 = vst [vmem:[%s17815_s3 + $0x110] sm:$0xff] %v7077_v51  ;;  %v6622_v51 = vld [vmem:[%s17815_s3 + $0x228] sm:$0xff]  ;;  %v7111_v60 = vsub.f32 %v6621_v49, %v14430_v3 }
 0x679   : > { %7558 = vst [vmem:[%s17815_s3 + $0x118] sm:$0xff] %v7078_v53  ;;  %v6623_v53 = vld [vmem:[%s17815_s3 + $0x230] sm:$0xff]  ;;  %v7112_v55 = vsub.f32 %v6622_v51, %v14430_v3 }
 0x67a   : > { %7559 = vst [vmem:[%s17815_s3 + $0x120] sm:$0xff] %v7079_v58  ;;  %v6624_v58 = vld [vmem:[%s17815_s3 + $0x238] sm:$0xff]  ;;  %v7113_v52 = vsub.f32 %v6623_v53, %v14430_v3 }
 0x67b   : > { %7560 = vst [vmem:[%s17815_s3 + $0x128] sm:$0xff] %v7080_v61  ;;  %v6625_v61 = vld [vmem:[%s17815_s3 + $0x240] sm:$0xff]  ;;  %v7114_v9 = vsub.f32 %v6624_v58, %v14430_v3 }
 0x67c   : > { %7561 = vst [vmem:[%s17815_s3 + $0x130] sm:$0xff] %v7081_v37  ;;  %v6626_v37 = vld [vmem:[%s17815_s3 + $0x248] sm:$0xff]  ;;  %v7115_v25 = vsub.f32 %v6625_v61, %v14430_v3 }
 0x67d   : > { %7562 = vst [vmem:[%s17815_s3 + $0x138] sm:$0xff] %v7082_v56  ;;  %v6627_v56 = vld [vmem:[%s17815_s3 + $0x250] sm:$0xff]  ;;  %v7116_v30 = vsub.f32 %v6626_v37, %v14430_v3 }
 0x67e   : > { %7563 = vst [vmem:[%s17815_s3 + $0x140] sm:$0xff] %v7083_v24  ;;  %v6628_v24 = vld [vmem:[%s17815_s3 + $0x258] sm:$0xff]  ;;  %v7117_v63 = vsub.f32 %v6627_v56, %v14430_v3 }
 0x67f   : > { %7564 = vst [vmem:[%s17815_s3 + $0x148] sm:$0xff] %v7084_v14  ;;  %v6629_v14 = vld [vmem:[%s17815_s3 + $0x260] sm:$0xff]  ;;  %v7118_v13 = vsub.f32 %v6628_v24, %v14430_v3 }
 0x680   : > { %7565 = vst [vmem:[%s17815_s3 + $0x150] sm:$0xff] %v7085_v62  ;;  %v6630_v62 = vld [vmem:[%s17815_s3 + $0x268] sm:$0xff]  ;;  %v7119_v5 = vsub.f32 %v6629_v14, %v14430_v3 }
 0x681   : > { %7566 = vst [vmem:[%s17815_s3 + $0x158] sm:$0xff] %v7086_v46  ;;  %v6631_v46 = vld [vmem:[%s17815_s3 + $0x270] sm:$0xff]  ;;  %v7120_v12 = vsub.f32 %v6630_v62, %v14430_v3 }
 0x682   : > { %7567 = vst [vmem:[%s17815_s3 + $0x160] sm:$0xff] %v7087_v54  ;;  %v6632_v54 = vld [vmem:[%s17815_s3 + $0x278] sm:$0xff]  ;;  %v7121_v6 = vsub.f32 %v6631_v46, %v14430_v3 }
 0x683   : > { %7568 = vst [vmem:[%s17815_s3 + $0x168] sm:$0xff] %v7088_v11  ;;  %v6633_v11 = vld [vmem:[%s17815_s3 + $0x280] sm:$0xff]  ;;  %v7122_v41 = vsub.f32 %v6632_v54, %v14430_v3 }
 0x684   : > { %7569 = vst [vmem:[%s17815_s3 + $0x170] sm:$0xff] %v7089_v36  ;;  %v6634_v36 = vld [vmem:[%s17815_s3 + $0x288] sm:$0xff]  ;;  %v7123_v35 = vsub.f32 %v6633_v11, %v14430_v3 }
 0x685   : > { %7570 = vst [vmem:[%s17815_s3 + $0x178] sm:$0xff] %v7090_v31  ;;  %v6635_v31 = vld [vmem:[%s17815_s3 + $0x290] sm:$0xff]  ;;  %v7124_v15 = vsub.f32 %v6634_v36, %v14430_v3 }
 0x686   : > { %7571 = vst [vmem:[%s17815_s3 + $0x180] sm:$0xff] %v7091_v4  ;;  %v6636_v4 = vld [vmem:[%s17815_s3 + $0x298] sm:$0xff]  ;;  %v7125_v18 = vsub.f32 %v6635_v31, %v14430_v3 }
 0x687   : > { %7572 = vst [vmem:[%s17815_s3 + $0x188] sm:$0xff] %v7092_v10  ;;  %v6637_v10 = vld [vmem:[%s17815_s3 + $0x2a0] sm:$0xff]  ;;  %v7126_v19 = vsub.f32 %v6636_v4, %v14430_v3 }
 0x688   : > { %7573 = vst [vmem:[%s17815_s3 + $0x190] sm:$0xff] %v7093_v17  ;;  %v6638_v17 = vld [vmem:[%s17815_s3 + $0x2a8] sm:$0xff]  ;;  %v7127_v23 = vsub.f32 %v6637_v10, %v14430_v3 }
 0x689   : > { %7574 = vst [vmem:[%s17815_s3 + $0x198] sm:$0xff] %v7094_v27  ;;  %v6639_v27 = vld [vmem:[%s17815_s3 + $0x2b0] sm:$0xff]  ;;  %v7128_v22 = vsub.f32 %v6638_v17, %v14430_v3 }
 0x68a   : > { %7575 = vst [vmem:[%s17815_s3 + $0x1a0] sm:$0xff] %v7095_v21  ;;  %v6640_v21 = vld [vmem:[%s17815_s3 + $0x2b8] sm:$0xff]  ;;  %v7129_v32 = vsub.f32 %v6639_v27, %v14430_v3 }
 0x68b   : > { %7576 = vst [vmem:[%s17815_s3 + $0x1a8] sm:$0xff] %v7096_v16  ;;  %v6641_v16 = vld [vmem:[%s17815_s3 + $0x2c0] sm:$0xff]  ;;  %v7130_v20 = vsub.f32 %v6640_v21, %v14430_v3 }
 0x68c   : > { %7577 = vst [vmem:[%s17815_s3 + $0x1b0] sm:$0xff] %v7097_v43  ;;  %v6642_v43 = vld [vmem:[%s17815_s3 + $0x2c8] sm:$0xff]  ;;  %v7131_v39 = vsub.f32 %v6641_v16, %v14430_v3 }
 0x68d   : > { %7578 = vst [vmem:[%s17815_s3 + $0x1b8] sm:$0xff] %v7098_v26  ;;  %v6643_v26 = vld [vmem:[%s17815_s3 + $0x2d0] sm:$0xff]  ;;  %v7132_v40 = vsub.f32 %v6642_v43, %v14430_v3 }
 0x68e   : > { %7579 = vst [vmem:[%s17815_s3 + $0x1c0] sm:$0xff] %v7099_v38  ;;  %v6644_v38 = vld [vmem:[%s17815_s3 + $0x2d8] sm:$0xff]  ;;  %v7133_v0 = vsub.f32 %v6643_v26, %v14430_v3 }
 0x68f   : > { %7580 = vst [vmem:[%s17815_s3 + $0x1c8] sm:$0xff] %v7100_v28  ;;  %v6645_v28 = vld [vmem:[%s17815_s3 + $0x2e0] sm:$0xff]  ;;  %v7134_v33 = vsub.f32 %v6644_v38, %v14430_v3 }
 0x690   : > { %7581 = vst [vmem:[%s17815_s3 + $0x1d0] sm:$0xff] %v7101_v42  ;;  %v6646_v42 = vld [vmem:[%s17815_s3 + $0x2e8] sm:$0xff]  ;;  %v7135_v50 = vsub.f32 %v6645_v28, %v14430_v3 }
 0x691   : > { %7582 = vst [vmem:[%s17815_s3 + $0x1d8] sm:$0xff] %v7102_v29  ;;  %v6647_v29 = vld [vmem:[%s17815_s3 + $0x2f0] sm:$0xff]  ;;  %v7136_v8 = vsub.f32 %v6646_v42, %v14430_v3 }
 0x692   : > { %7583 = vst [vmem:[%s17815_s3 + $0x1e0] sm:$0xff] %v7103_v34  ;;  %v6648_v34 = vld [vmem:[%s17815_s3 + $0x2f8] sm:$0xff]  ;;  %v7137_v45 = vsub.f32 %v6647_v29, %v14430_v3 }
 0x693   : > { %7584 = vst [vmem:[%s17815_s3 + $0x1e8] sm:$0xff] %v7104_v59  ;;  %v6649_v59 = vld [vmem:[%s17815_s3 + $0x300] sm:$0xff]  ;;  %v7138_v7 = vsub.f32 %v6648_v34, %v14430_v3 }
 0x694   : > { %7585 = vst [vmem:[%s17815_s3 + $0x1f0] sm:$0xff] %v7105_v44  ;;  %v6650_v44 = vld [vmem:[%s17815_s3 + $0x308] sm:$0xff]  ;;  %v7139_v49 = vsub.f32 %v6649_v59, %v14430_v3 }
 0x695   : > { %7586 = vst [vmem:[%s17815_s3 + $0x1f8] sm:$0xff] %v7106_v48  ;;  %v6651_v48 = vld [vmem:[%s17815_s3 + $0x310] sm:$0xff]  ;;  %v7140_v51 = vsub.f32 %v6650_v44, %v14430_v3 }
 0x696   : > { %7587 = vst [vmem:[%s17815_s3 + $0x200] sm:$0xff] %v7107_v1  ;;  %v6652_v1 = vld [vmem:[%s17815_s3 + $0x318] sm:$0xff]  ;;  %v7141_v53 = vsub.f32 %v6651_v48, %v14430_v3 }
 0x697   : > { %7588 = vst [vmem:[%s17815_s3 + $0x208] sm:$0xff] %v7108_v47  ;;  %v6653_v47 = vld [vmem:[%s17815_s3 + $0x320] sm:$0xff]  ;;  %v7142_v58 = vsub.f32 %v6652_v1, %v14430_v3 }
 0x698   : > { %7589 = vst [vmem:[%s17815_s3 + $0x210] sm:$0xff] %v7109_v2  ;;  %v6654_v2 = vld [vmem:[%s17815_s3 + $0x328] sm:$0xff]  ;;  %v7143_v61 = vsub.f32 %v6653_v47, %v14430_v3 }
 0x699   : > { %7590 = vst [vmem:[%s17815_s3 + $0x218] sm:$0xff] %v7110_v57  ;;  %v6655_v57 = vld [vmem:[%s17815_s3 + $0x330] sm:$0xff]  ;;  %v7144_v37 = vsub.f32 %v6654_v2, %v14430_v3 }
 0x69a   : > { %7591 = vst [vmem:[%s17815_s3 + $0x220] sm:$0xff] %v7111_v60  ;;  %v6656_v60 = vld [vmem:[%s17815_s3 + $0x338] sm:$0xff]  ;;  %v7145_v56 = vsub.f32 %v6655_v57, %v14430_v3 }
 0x69b   : > { %7592 = vst [vmem:[%s17815_s3 + $0x228] sm:$0xff] %v7112_v55  ;;  %v6657_v55 = vld [vmem:[%s17815_s3 + $0x340] sm:$0xff]  ;;  %v7146_v24 = vsub.f32 %v6656_v60, %v14430_v3 }
 0x69c   : > { %7593 = vst [vmem:[%s17815_s3 + $0x230] sm:$0xff] %v7113_v52  ;;  %v6658_v52 = vld [vmem:[%s17815_s3 + $0x348] sm:$0xff]  ;;  %v7147_v14 = vsub.f32 %v6657_v55, %v14430_v3 }
 0x69d   : > { %7594 = vst [vmem:[%s17815_s3 + $0x238] sm:$0xff] %v7114_v9  ;;  %v6659_v9 = vld [vmem:[%s17815_s3 + $0x350] sm:$0xff]  ;;  %v7148_v62 = vsub.f32 %v6658_v52, %v14430_v3 }
 0x69e   : > { %7595 = vst [vmem:[%s17815_s3 + $0x240] sm:$0xff] %v7115_v25  ;;  %v6660_v25 = vld [vmem:[%s17815_s3 + $0x358] sm:$0xff]  ;;  %v7149_v46 = vsub.f32 %v6659_v9, %v14430_v3 }
 0x69f   : > { %7596 = vst [vmem:[%s17815_s3 + $0x248] sm:$0xff] %v7116_v30  ;;  %v6661_v30 = vld [vmem:[%s17815_s3 + $0x360] sm:$0xff]  ;;  %v7150_v54 = vsub.f32 %v6660_v25, %v14430_v3 }
 0x6a0   : > { %7597 = vst [vmem:[%s17815_s3 + $0x250] sm:$0xff] %v7117_v63  ;;  %v6662_v63 = vld [vmem:[%s17815_s3 + $0x368] sm:$0xff]  ;;  %v7151_v11 = vsub.f32 %v6661_v30, %v14430_v3 }
 0x6a1   : > { %7598 = vst [vmem:[%s17815_s3 + $0x258] sm:$0xff] %v7118_v13  ;;  %v6663_v13 = vld [vmem:[%s17815_s3 + $0x370] sm:$0xff]  ;;  %v7152_v36 = vsub.f32 %v6662_v63, %v14430_v3 }
 0x6a2   : > { %7599 = vst [vmem:[%s17815_s3 + $0x260] sm:$0xff] %v7119_v5  ;;  %v6664_v5 = vld [vmem:[%s17815_s3 + $0x378] sm:$0xff]  ;;  %v7153_v31 = vsub.f32 %v6663_v13, %v14430_v3 }
 0x6a3   : > { %7600 = vst [vmem:[%s17815_s3 + $0x268] sm:$0xff] %v7120_v12  ;;  %v6665_v12 = vld [vmem:[%s17815_s3 + $0x380] sm:$0xff]  ;;  %v7154_v4 = vsub.f32 %v6664_v5, %v14430_v3 }
 0x6a4   : > { %7601 = vst [vmem:[%s17815_s3 + $0x270] sm:$0xff] %v7121_v6  ;;  %v6666_v6 = vld [vmem:[%s17815_s3 + $0x388] sm:$0xff]  ;;  %v7155_v10 = vsub.f32 %v6665_v12, %v14430_v3 }
 0x6a5   : > { %7602 = vst [vmem:[%s17815_s3 + $0x278] sm:$0xff] %v7122_v41  ;;  %v6667_v41 = vld [vmem:[%s17815_s3 + $0x390] sm:$0xff]  ;;  %v7156_v17 = vsub.f32 %v6666_v6, %v14430_v3 }
 0x6a6   : > { %7603 = vst [vmem:[%s17815_s3 + $0x280] sm:$0xff] %v7123_v35  ;;  %v6668_v35 = vld [vmem:[%s17815_s3 + $0x398] sm:$0xff]  ;;  %v7157_v27 = vsub.f32 %v6667_v41, %v14430_v3 }
 0x6a7   : > { %7604 = vst [vmem:[%s17815_s3 + $0x288] sm:$0xff] %v7124_v15  ;;  %v6669_v15 = vld [vmem:[%s17815_s3 + $0x3a0] sm:$0xff]  ;;  %v7158_v21 = vsub.f32 %v6668_v35, %v14430_v3 }
 0x6a8   : > { %7605 = vst [vmem:[%s17815_s3 + $0x290] sm:$0xff] %v7125_v18  ;;  %v6670_v18 = vld [vmem:[%s17815_s3 + $0x3a8] sm:$0xff]  ;;  %v7159_v16 = vsub.f32 %v6669_v15, %v14430_v3 }
 0x6a9   : > { %7606 = vst [vmem:[%s17815_s3 + $0x298] sm:$0xff] %v7126_v19  ;;  %v6671_v19 = vld [vmem:[%s17815_s3 + $0x3b0] sm:$0xff]  ;;  %v7160_v43 = vsub.f32 %v6670_v18, %v14430_v3 }
 0x6aa   : > { %7607 = vst [vmem:[%s17815_s3 + $0x2a0] sm:$0xff] %v7127_v23  ;;  %v6672_v23 = vld [vmem:[%s17815_s3 + $0x3b8] sm:$0xff]  ;;  %v7161_v26 = vsub.f32 %v6671_v19, %v14430_v3 }
 0x6ab   : > { %7608 = vst [vmem:[%s17815_s3 + $0x2a8] sm:$0xff] %v7128_v22  ;;  %v6673_v22 = vld [vmem:[%s17815_s3 + $0x3c0] sm:$0xff]  ;;  %v7162_v38 = vsub.f32 %v6672_v23, %v14430_v3 }
 0x6ac   : > { %7609 = vst [vmem:[%s17815_s3 + $0x2b0] sm:$0xff] %v7129_v32  ;;  %v6674_v32 = vld [vmem:[%s17815_s3 + $0x3c8] sm:$0xff]  ;;  %v7163_v28 = vsub.f32 %v6673_v22, %v14430_v3 }
 0x6ad   : > { %7610 = vst [vmem:[%s17815_s3 + $0x2b8] sm:$0xff] %v7130_v20  ;;  %v6675_v20 = vld [vmem:[%s17815_s3 + $0x3d0] sm:$0xff]  ;;  %v7164_v42 = vsub.f32 %v6674_v32, %v14430_v3 }
 0x6ae   : > { %7611 = vst [vmem:[%s17815_s3 + $0x2c0] sm:$0xff] %v7131_v39  ;;  %v6676_v39 = vld [vmem:[%s17815_s3 + $0x3d8] sm:$0xff]  ;;  %v7165_v29 = vsub.f32 %v6675_v20, %v14430_v3 }
 0x6af   : > { %7612 = vst [vmem:[%s17815_s3 + $0x2c8] sm:$0xff] %v7132_v40  ;;  %v6677_v40 = vld [vmem:[%s17815_s3 + $0x3e0] sm:$0xff]  ;;  %v7166_v34 = vsub.f32 %v6676_v39, %v14430_v3 }
 0x6b0   : > { %7613 = vst [vmem:[%s17815_s3 + $0x2d0] sm:$0xff] %v7133_v0  ;;  %v6678_v0 = vld [vmem:[%s17815_s3 + $0x3e8] sm:$0xff]  ;;  %v7167_v59 = vsub.f32 %v6677_v40, %v14430_v3 }
 0x6b1   : > { %7614 = vst [vmem:[%s17815_s3 + $0x2d8] sm:$0xff] %v7134_v33  ;;  %v6679_v33 = vld [vmem:[%s17815_s3 + $0x3f0] sm:$0xff]  ;;  %v7168_v44 = vsub.f32 %v6678_v0, %v14430_v3 }
 0x6b2   : > { %7615 = vst [vmem:[%s17815_s3 + $0x2e0] sm:$0xff] %v7135_v50  ;;  %v6680_v50 = vld [vmem:[%s17815_s3 + $0x3f8] sm:$0xff]  ;;  %v7169_v48 = vsub.f32 %v6679_v33, %v14430_v3 }
 0x6b3   : > { %7616 = vst [vmem:[%s17815_s3 + $0x2e8] sm:$0xff] %v7136_v8  ;;  %v6681_v8 = vld [vmem:[%s17815_s3 + $0x400] sm:$0xff]  ;;  %v7170_v1 = vsub.f32 %v6680_v50, %v14430_v3 }
 0x6b4   : > { %7617 = vst [vmem:[%s17815_s3 + $0x2f0] sm:$0xff] %v7137_v45  ;;  %v6682_v45 = vld [vmem:[%s17815_s3 + $0x408] sm:$0xff]  ;;  %v7171_v47 = vsub.f32 %v6681_v8, %v14430_v3 }
 0x6b5   : > { %7618 = vst [vmem:[%s17815_s3 + $0x2f8] sm:$0xff] %v7138_v7  ;;  %v6683_v7 = vld [vmem:[%s17815_s3 + $0x410] sm:$0xff]  ;;  %v7172_v2 = vsub.f32 %v6682_v45, %v14430_v3 }
 0x6b6   : > { %7619 = vst [vmem:[%s17815_s3 + $0x300] sm:$0xff] %v7139_v49  ;;  %v6684_v49 = vld [vmem:[%s17815_s3 + $0x418] sm:$0xff]  ;;  %v7173_v57 = vsub.f32 %v6683_v7, %v14430_v3 }
 0x6b7   : > { %7620 = vst [vmem:[%s17815_s3 + $0x308] sm:$0xff] %v7140_v51  ;;  %v6685_v51 = vld [vmem:[%s17815_s3 + $0x420] sm:$0xff]  ;;  %v7174_v60 = vsub.f32 %v6684_v49, %v14430_v3 }
 0x6b8   : > { %7621 = vst [vmem:[%s17815_s3 + $0x310] sm:$0xff] %v7141_v53  ;;  %v6686_v53 = vld [vmem:[%s17815_s3 + $0x428] sm:$0xff]  ;;  %v7175_v55 = vsub.f32 %v6685_v51, %v14430_v3 }
 0x6b9   : > { %7622 = vst [vmem:[%s17815_s3 + $0x318] sm:$0xff] %v7142_v58  ;;  %v6687_v58 = vld [vmem:[%s17815_s3 + $0x430] sm:$0xff]  ;;  %v7176_v52 = vsub.f32 %v6686_v53, %v14430_v3 }
 0x6ba   : > { %7623 = vst [vmem:[%s17815_s3 + $0x320] sm:$0xff] %v7143_v61  ;;  %v6688_v61 = vld [vmem:[%s17815_s3 + $0x438] sm:$0xff]  ;;  %v7177_v9 = vsub.f32 %v6687_v58, %v14430_v3 }
 0x6bb   : > { %7624 = vst [vmem:[%s17815_s3 + $0x328] sm:$0xff] %v7144_v37  ;;  %v6689_v37 = vld [vmem:[%s17815_s3 + $0x440] sm:$0xff]  ;;  %v7178_v25 = vsub.f32 %v6688_v61, %v14430_v3 }
 0x6bc   : > { %7625 = vst [vmem:[%s17815_s3 + $0x330] sm:$0xff] %v7145_v56  ;;  %v6690_v56 = vld [vmem:[%s17815_s3 + $0x448] sm:$0xff]  ;;  %v7179_v30 = vsub.f32 %v6689_v37, %v14430_v3 }
 0x6bd   : > { %7626 = vst [vmem:[%s17815_s3 + $0x338] sm:$0xff] %v7146_v24  ;;  %v6691_v24 = vld [vmem:[%s17815_s3 + $0x450] sm:$0xff]  ;;  %v7180_v63 = vsub.f32 %v6690_v56, %v14430_v3 }
 0x6be   : > { %7627 = vst [vmem:[%s17815_s3 + $0x340] sm:$0xff] %v7147_v14  ;;  %v6692_v14 = vld [vmem:[%s17815_s3 + $0x458] sm:$0xff]  ;;  %v7181_v13 = vsub.f32 %v6691_v24, %v14430_v3 }
 0x6bf   : > { %7628 = vst [vmem:[%s17815_s3 + $0x348] sm:$0xff] %v7148_v62  ;;  %v6693_v62 = vld [vmem:[%s17815_s3 + $0x460] sm:$0xff]  ;;  %v7182_v5 = vsub.f32 %v6692_v14, %v14430_v3 }
 0x6c0   : > { %7629 = vst [vmem:[%s17815_s3 + $0x350] sm:$0xff] %v7149_v46  ;;  %v6694_v46 = vld [vmem:[%s17815_s3 + $0x468] sm:$0xff]  ;;  %v7183_v12 = vsub.f32 %v6693_v62, %v14430_v3 }
 0x6c1   : > { %7630 = vst [vmem:[%s17815_s3 + $0x358] sm:$0xff] %v7150_v54  ;;  %v6695_v54 = vld [vmem:[%s17815_s3 + $0x470] sm:$0xff]  ;;  %v7184_v6 = vsub.f32 %v6694_v46, %v14430_v3 }
 0x6c2   : > { %7631 = vst [vmem:[%s17815_s3 + $0x360] sm:$0xff] %v7151_v11  ;;  %v6696_v11 = vld [vmem:[%s17815_s3 + $0x478] sm:$0xff]  ;;  %v7185_v41 = vsub.f32 %v6695_v54, %v14430_v3 }
 0x6c3   : > { %7632 = vst [vmem:[%s17815_s3 + $0x368] sm:$0xff] %v7152_v36  ;;  %v6697_v36 = vld [vmem:[%s17815_s3 + $0x480] sm:$0xff]  ;;  %v7186_v35 = vsub.f32 %v6696_v11, %v14430_v3 }
 0x6c4   : > { %7633 = vst [vmem:[%s17815_s3 + $0x370] sm:$0xff] %v7153_v31  ;;  %v6698_v31 = vld [vmem:[%s17815_s3 + $0x488] sm:$0xff]  ;;  %v7187_v15 = vsub.f32 %v6697_v36, %v14430_v3 }
 0x6c5   : > { %7634 = vst [vmem:[%s17815_s3 + $0x378] sm:$0xff] %v7154_v4  ;;  %v6699_v4 = vld [vmem:[%s17815_s3 + $0x490] sm:$0xff]  ;;  %v7188_v18 = vsub.f32 %v6698_v31, %v14430_v3 }
 0x6c6   : > { %7635 = vst [vmem:[%s17815_s3 + $0x380] sm:$0xff] %v7155_v10  ;;  %v6700_v10 = vld [vmem:[%s17815_s3 + $0x498] sm:$0xff]  ;;  %v7189_v19 = vsub.f32 %v6699_v4, %v14430_v3 }
 0x6c7   : > { %7636 = vst [vmem:[%s17815_s3 + $0x388] sm:$0xff] %v7156_v17  ;;  %v6701_v17 = vld [vmem:[%s17815_s3 + $0x4a0] sm:$0xff]  ;;  %v7190_v23 = vsub.f32 %v6700_v10, %v14430_v3 }
 0x6c8   : > { %7637 = vst [vmem:[%s17815_s3 + $0x390] sm:$0xff] %v7157_v27  ;;  %v6702_v27 = vld [vmem:[%s17815_s3 + $0x4a8] sm:$0xff]  ;;  %v7191_v22 = vsub.f32 %v6701_v17, %v14430_v3 }
 0x6c9   : > { %7638 = vst [vmem:[%s17815_s3 + $0x398] sm:$0xff] %v7158_v21  ;;  %v6703_v21 = vld [vmem:[%s17815_s3 + $0x4b0] sm:$0xff]  ;;  %v7192_v32 = vsub.f32 %v6702_v27, %v14430_v3 }
 0x6ca   : > { %7639 = vst [vmem:[%s17815_s3 + $0x3a0] sm:$0xff] %v7159_v16  ;;  %v6704_v16 = vld [vmem:[%s17815_s3 + $0x4b8] sm:$0xff]  ;;  %v7193_v20 = vsub.f32 %v6703_v21, %v14430_v3 }
 0x6cb   : > { %7640 = vst [vmem:[%s17815_s3 + $0x3a8] sm:$0xff] %v7160_v43  ;;  %v6705_v43 = vld [vmem:[%s17815_s3 + $0x4c0] sm:$0xff]  ;;  %v7194_v39 = vsub.f32 %v6704_v16, %v14430_v3 }
 0x6cc   : > { %7641 = vst [vmem:[%s17815_s3 + $0x3b0] sm:$0xff] %v7161_v26  ;;  %v6706_v26 = vld [vmem:[%s17815_s3 + $0x4c8] sm:$0xff]  ;;  %v7195_v40 = vsub.f32 %v6705_v43, %v14430_v3 }
 0x6cd   : > { %7642 = vst [vmem:[%s17815_s3 + $0x3b8] sm:$0xff] %v7162_v38  ;;  %v6707_v38 = vld [vmem:[%s17815_s3 + $0x4d0] sm:$0xff]  ;;  %v7196_v0 = vsub.f32 %v6706_v26, %v14430_v3 }
 0x6ce   : > { %7643 = vst [vmem:[%s17815_s3 + $0x3c0] sm:$0xff] %v7163_v28  ;;  %v6708_v28 = vld [vmem:[%s17815_s3 + $0x4d8] sm:$0xff]  ;;  %v7197_v33 = vsub.f32 %v6707_v38, %v14430_v3 }
 0x6cf   : > { %7644 = vst [vmem:[%s17815_s3 + $0x3c8] sm:$0xff] %v7164_v42  ;;  %v6709_v42 = vld [vmem:[%s17815_s3 + $0x4e0] sm:$0xff]  ;;  %v7198_v50 = vsub.f32 %v6708_v28, %v14430_v3 }
 0x6d0   : > { %7645 = vst [vmem:[%s17815_s3 + $0x3d0] sm:$0xff] %v7165_v29  ;;  %v6710_v29 = vld [vmem:[%s17815_s3 + $0x4e8] sm:$0xff]  ;;  %v7199_v8 = vsub.f32 %v6709_v42, %v14430_v3 }
 0x6d1   : > { %7646 = vst [vmem:[%s17815_s3 + $0x3d8] sm:$0xff] %v7166_v34  ;;  %v6711_v34 = vld [vmem:[%s17815_s3 + $0x4f0] sm:$0xff]  ;;  %v7200_v45 = vsub.f32 %v6710_v29, %v14430_v3 }
 0x6d2   : > { %7647 = vst [vmem:[%s17815_s3 + $0x3e0] sm:$0xff] %v7167_v59  ;;  %v6712_v59 = vld [vmem:[%s17815_s3 + $0x4f8] sm:$0xff]  ;;  %v7201_v7 = vsub.f32 %v6711_v34, %v14430_v3 }
 0x6d3   : > { %7648 = vst [vmem:[%s17815_s3 + $0x3e8] sm:$0xff] %v7168_v44  ;;  %v6713_v44 = vld [vmem:[%s17815_s3 + $0x500] sm:$0xff]  ;;  %v7202_v49 = vsub.f32 %v6712_v59, %v14430_v3 }
 0x6d4   : > { %7649 = vst [vmem:[%s17815_s3 + $0x3f0] sm:$0xff] %v7169_v48  ;;  %v6714_v48 = vld [vmem:[%s17815_s3 + $0x508] sm:$0xff]  ;;  %v7203_v51 = vsub.f32 %v6713_v44, %v14430_v3 }
 0x6d5   : > { %7650 = vst [vmem:[%s17815_s3 + $0x3f8] sm:$0xff] %v7170_v1  ;;  %v6715_v1 = vld [vmem:[%s17815_s3 + $0x510] sm:$0xff]  ;;  %v7204_v53 = vsub.f32 %v6714_v48, %v14430_v3 }
 0x6d6   : > { %7651 = vst [vmem:[%s17815_s3 + $0x400] sm:$0xff] %v7171_v47  ;;  %v6716_v47 = vld [vmem:[%s17815_s3 + $0x518] sm:$0xff]  ;;  %v7205_v58 = vsub.f32 %v6715_v1, %v14430_v3 }
 0x6d7   : > { %7652 = vst [vmem:[%s17815_s3 + $0x408] sm:$0xff] %v7172_v2  ;;  %v6717_v2 = vld [vmem:[%s17815_s3 + $0x520] sm:$0xff]  ;;  %v7206_v61 = vsub.f32 %v6716_v47, %v14430_v3 }
 0x6d8   : > { %7653 = vst [vmem:[%s17815_s3 + $0x410] sm:$0xff] %v7173_v57  ;;  %v6718_v57 = vld [vmem:[%s17815_s3 + $0x528] sm:$0xff]  ;;  %v7207_v37 = vsub.f32 %v6717_v2, %v14430_v3 }
 0x6d9   : > { %7654 = vst [vmem:[%s17815_s3 + $0x418] sm:$0xff] %v7174_v60  ;;  %v6719_v60 = vld [vmem:[%s17815_s3 + $0x530] sm:$0xff]  ;;  %v7208_v56 = vsub.f32 %v6718_v57, %v14430_v3 }
 0x6da   : > { %7655 = vst [vmem:[%s17815_s3 + $0x420] sm:$0xff] %v7175_v55  ;;  %v6720_v55 = vld [vmem:[%s17815_s3 + $0x538] sm:$0xff]  ;;  %v7209_v24 = vsub.f32 %v6719_v60, %v14430_v3 }
 0x6db   : > { %7656 = vst [vmem:[%s17815_s3 + $0x428] sm:$0xff] %v7176_v52  ;;  %v6721_v52 = vld [vmem:[%s17815_s3 + $0x540] sm:$0xff]  ;;  %v7210_v14 = vsub.f32 %v6720_v55, %v14430_v3 }
 0x6dc   : > { %7657 = vst [vmem:[%s17815_s3 + $0x430] sm:$0xff] %v7177_v9  ;;  %v6722_v9 = vld [vmem:[%s17815_s3 + $0x548] sm:$0xff]  ;;  %v7211_v62 = vsub.f32 %v6721_v52, %v14430_v3 }
 0x6dd   : > { %7658 = vst [vmem:[%s17815_s3 + $0x438] sm:$0xff] %v7178_v25  ;;  %v6723_v25 = vld [vmem:[%s17815_s3 + $0x550] sm:$0xff]  ;;  %v7212_v46 = vsub.f32 %v6722_v9, %v14430_v3 }
 0x6de   : > { %7659 = vst [vmem:[%s17815_s3 + $0x440] sm:$0xff] %v7179_v30  ;;  %v6724_v30 = vld [vmem:[%s17815_s3 + $0x558] sm:$0xff]  ;;  %v7213_v54 = vsub.f32 %v6723_v25, %v14430_v3 }
 0x6df   : > { %7660 = vst [vmem:[%s17815_s3 + $0x448] sm:$0xff] %v7180_v63  ;;  %v6725_v63 = vld [vmem:[%s17815_s3 + $0x560] sm:$0xff]  ;;  %v7214_v11 = vsub.f32 %v6724_v30, %v14430_v3 }
 0x6e0   : > { %7661 = vst [vmem:[%s17815_s3 + $0x450] sm:$0xff] %v7181_v13  ;;  %v6726_v13 = vld [vmem:[%s17815_s3 + $0x568] sm:$0xff]  ;;  %v7215_v36 = vsub.f32 %v6725_v63, %v14430_v3 }
 0x6e1   : > { %7662 = vst [vmem:[%s17815_s3 + $0x458] sm:$0xff] %v7182_v5  ;;  %v6727_v5 = vld [vmem:[%s17815_s3 + $0x570] sm:$0xff]  ;;  %v7216_v31 = vsub.f32 %v6726_v13, %v14430_v3 }
 0x6e2   : > { %7663 = vst [vmem:[%s17815_s3 + $0x460] sm:$0xff] %v7183_v12  ;;  %v6728_v12 = vld [vmem:[%s17815_s3 + $0x578] sm:$0xff]  ;;  %v7217_v4 = vsub.f32 %v6727_v5, %v14430_v3 }
 0x6e3   : > { %7664 = vst [vmem:[%s17815_s3 + $0x468] sm:$0xff] %v7184_v6  ;;  %v6729_v6 = vld [vmem:[%s17815_s3 + $0x580] sm:$0xff]  ;;  %v7218_v10 = vsub.f32 %v6728_v12, %v14430_v3 }
 0x6e4   : > { %7665 = vst [vmem:[%s17815_s3 + $0x470] sm:$0xff] %v7185_v41  ;;  %v6730_v41 = vld [vmem:[%s17815_s3 + $0x588] sm:$0xff]  ;;  %v7219_v17 = vsub.f32 %v6729_v6, %v14430_v3 }
 0x6e5   : > { %7666 = vst [vmem:[%s17815_s3 + $0x478] sm:$0xff] %v7186_v35  ;;  %v6731_v35 = vld [vmem:[%s17815_s3 + $0x590] sm:$0xff]  ;;  %v7220_v27 = vsub.f32 %v6730_v41, %v14430_v3 }
 0x6e6   : > { %7667 = vst [vmem:[%s17815_s3 + $0x480] sm:$0xff] %v7187_v15  ;;  %v6732_v15 = vld [vmem:[%s17815_s3 + $0x598] sm:$0xff]  ;;  %v7221_v21 = vsub.f32 %v6731_v35, %v14430_v3 }
 0x6e7   : > { %7668 = vst [vmem:[%s17815_s3 + $0x488] sm:$0xff] %v7188_v18  ;;  %v6733_v18 = vld [vmem:[%s17815_s3 + $0x5a0] sm:$0xff]  ;;  %v7222_v16 = vsub.f32 %v6732_v15, %v14430_v3 }
 0x6e8   : > { %7669 = vst [vmem:[%s17815_s3 + $0x490] sm:$0xff] %v7189_v19  ;;  %v6734_v19 = vld [vmem:[%s17815_s3 + $0x5a8] sm:$0xff]  ;;  %v7223_v43 = vsub.f32 %v6733_v18, %v14430_v3 }
 0x6e9   : > { %7670 = vst [vmem:[%s17815_s3 + $0x498] sm:$0xff] %v7190_v23  ;;  %v6735_v23 = vld [vmem:[%s17815_s3 + $0x5b0] sm:$0xff]  ;;  %v7224_v26 = vsub.f32 %v6734_v19, %v14430_v3 }
 0x6ea   : > { %7671 = vst [vmem:[%s17815_s3 + $0x4a0] sm:$0xff] %v7191_v22  ;;  %v6736_v22 = vld [vmem:[%s17815_s3 + $0x5b8] sm:$0xff]  ;;  %v7225_v38 = vsub.f32 %v6735_v23, %v14430_v3 }
 0x6eb   : > { %7672 = vst [vmem:[%s17815_s3 + $0x4a8] sm:$0xff] %v7192_v32  ;;  %v6737_v32 = vld [vmem:[%s17815_s3 + $0x5c0] sm:$0xff]  ;;  %v7226_v28 = vsub.f32 %v6736_v22, %v14430_v3 }
 0x6ec   : > { %7673 = vst [vmem:[%s17815_s3 + $0x4b0] sm:$0xff] %v7193_v20  ;;  %v6738_v20 = vld [vmem:[%s17815_s3 + $0x5c8] sm:$0xff]  ;;  %v7227_v42 = vsub.f32 %v6737_v32, %v14430_v3 }
 0x6ed   : > { %7674 = vst [vmem:[%s17815_s3 + $0x4b8] sm:$0xff] %v7194_v39  ;;  %v6739_v39 = vld [vmem:[%s17815_s3 + $0x5d0] sm:$0xff]  ;;  %v7228_v29 = vsub.f32 %v6738_v20, %v14430_v3 }
 0x6ee   : > { %7675 = vst [vmem:[%s17815_s3 + $0x4c0] sm:$0xff] %v7195_v40  ;;  %v6740_v40 = vld [vmem:[%s17815_s3 + $0x5d8] sm:$0xff]  ;;  %v7229_v34 = vsub.f32 %v6739_v39, %v14430_v3 }
 0x6ef   : > { %7676 = vst [vmem:[%s17815_s3 + $0x4c8] sm:$0xff] %v7196_v0  ;;  %v6741_v0 = vld [vmem:[%s17815_s3 + $0x5e0] sm:$0xff]  ;;  %v7230_v59 = vsub.f32 %v6740_v40, %v14430_v3 }
 0x6f0   : > { %7677 = vst [vmem:[%s17815_s3 + $0x4d0] sm:$0xff] %v7197_v33  ;;  %v6742_v33 = vld [vmem:[%s17815_s3 + $0x5e8] sm:$0xff]  ;;  %v7231_v44 = vsub.f32 %v6741_v0, %v14430_v3 }
 0x6f1   : > { %7678 = vst [vmem:[%s17815_s3 + $0x4d8] sm:$0xff] %v7198_v50  ;;  %v6743_v50 = vld [vmem:[%s17815_s3 + $0x5f0] sm:$0xff]  ;;  %v7232_v48 = vsub.f32 %v6742_v33, %v14430_v3 }
 0x6f2   : > { %7679 = vst [vmem:[%s17815_s3 + $0x4e0] sm:$0xff] %v7199_v8  ;;  %v6744_v8 = vld [vmem:[%s17815_s3 + $0x5f8] sm:$0xff]  ;;  %v7233_v1 = vsub.f32 %v6743_v50, %v14430_v3 }
 0x6f3   : > { %7680 = vst [vmem:[%s17815_s3 + $0x4e8] sm:$0xff] %v7200_v45  ;;  %v6745_v45 = vld [vmem:[%s17815_s3 + $0x600] sm:$0xff]  ;;  %v7234_v47 = vsub.f32 %v6744_v8, %v14430_v3 }
 0x6f4   : > { %7681 = vst [vmem:[%s17815_s3 + $0x4f0] sm:$0xff] %v7201_v7  ;;  %v6746_v7 = vld [vmem:[%s17815_s3 + $0x608] sm:$0xff]  ;;  %v7235_v2 = vsub.f32 %v6745_v45, %v14430_v3 }
 0x6f5   : > { %7682 = vst [vmem:[%s17815_s3 + $0x4f8] sm:$0xff] %v7202_v49  ;;  %v6747_v49 = vld [vmem:[%s17815_s3 + $0x610] sm:$0xff]  ;;  %v7236_v57 = vsub.f32 %v6746_v7, %v14430_v3 }
 0x6f6   : > { %7683 = vst [vmem:[%s17815_s3 + $0x500] sm:$0xff] %v7203_v51  ;;  %v6748_v51 = vld [vmem:[%s17815_s3 + $0x618] sm:$0xff]  ;;  %v7237_v60 = vsub.f32 %v6747_v49, %v14430_v3 }
 0x6f7   : > { %7684 = vst [vmem:[%s17815_s3 + $0x508] sm:$0xff] %v7204_v53  ;;  %v6749_v53 = vld [vmem:[%s17815_s3 + $0x620] sm:$0xff]  ;;  %v7238_v55 = vsub.f32 %v6748_v51, %v14430_v3 }
 0x6f8   : > { %7685 = vst [vmem:[%s17815_s3 + $0x510] sm:$0xff] %v7205_v58  ;;  %v6750_v58 = vld [vmem:[%s17815_s3 + $0x628] sm:$0xff]  ;;  %v7239_v52 = vsub.f32 %v6749_v53, %v14430_v3 }
 0x6f9   : > { %7686 = vst [vmem:[%s17815_s3 + $0x518] sm:$0xff] %v7206_v61  ;;  %v6751_v61 = vld [vmem:[%s17815_s3 + $0x630] sm:$0xff]  ;;  %v7240_v9 = vsub.f32 %v6750_v58, %v14430_v3 }
 0x6fa   : > { %7687 = vst [vmem:[%s17815_s3 + $0x520] sm:$0xff] %v7207_v37  ;;  %v6752_v37 = vld [vmem:[%s17815_s3 + $0x638] sm:$0xff]  ;;  %v7241_v25 = vsub.f32 %v6751_v61, %v14430_v3 }
 0x6fb   : > { %7688 = vst [vmem:[%s17815_s3 + $0x528] sm:$0xff] %v7208_v56  ;;  %v6753_v56 = vld [vmem:[%s17815_s3 + $0x640] sm:$0xff]  ;;  %v7242_v30 = vsub.f32 %v6752_v37, %v14430_v3 }
 0x6fc   : > { %7689 = vst [vmem:[%s17815_s3 + $0x530] sm:$0xff] %v7209_v24  ;;  %v6754_v24 = vld [vmem:[%s17815_s3 + $0x648] sm:$0xff]  ;;  %v7243_v63 = vsub.f32 %v6753_v56, %v14430_v3 }
 0x6fd   : > { %7690 = vst [vmem:[%s17815_s3 + $0x538] sm:$0xff] %v7210_v14  ;;  %v6755_v14 = vld [vmem:[%s17815_s3 + $0x650] sm:$0xff]  ;;  %v7244_v13 = vsub.f32 %v6754_v24, %v14430_v3 }
 0x6fe   : > { %7691 = vst [vmem:[%s17815_s3 + $0x540] sm:$0xff] %v7211_v62  ;;  %v6756_v62 = vld [vmem:[%s17815_s3 + $0x658] sm:$0xff]  ;;  %v7245_v5 = vsub.f32 %v6755_v14, %v14430_v3 }
 0x6ff   : > { %7692 = vst [vmem:[%s17815_s3 + $0x548] sm:$0xff] %v7212_v46  ;;  %v6757_v46 = vld [vmem:[%s17815_s3 + $0x660] sm:$0xff]  ;;  %v7246_v12 = vsub.f32 %v6756_v62, %v14430_v3 }
 0x700   : > { %7693 = vst [vmem:[%s17815_s3 + $0x550] sm:$0xff] %v7213_v54  ;;  %v6758_v54 = vld [vmem:[%s17815_s3 + $0x668] sm:$0xff]  ;;  %v7247_v6 = vsub.f32 %v6757_v46, %v14430_v3 }
 0x701   : > { %7694 = vst [vmem:[%s17815_s3 + $0x558] sm:$0xff] %v7214_v11  ;;  %v6759_v11 = vld [vmem:[%s17815_s3 + $0x670] sm:$0xff]  ;;  %v7248_v41 = vsub.f32 %v6758_v54, %v14430_v3 }
 0x702   : > { %7695 = vst [vmem:[%s17815_s3 + $0x560] sm:$0xff] %v7215_v36  ;;  %v6760_v36 = vld [vmem:[%s17815_s3 + $0x678] sm:$0xff]  ;;  %v7249_v35 = vsub.f32 %v6759_v11, %v14430_v3 }
 0x703   : > { %7696 = vst [vmem:[%s17815_s3 + $0x568] sm:$0xff] %v7216_v31  ;;  %v6761_v31 = vld [vmem:[%s17815_s3 + $0x680] sm:$0xff]  ;;  %v7250_v15 = vsub.f32 %v6760_v36, %v14430_v3 }
 0x704   : > { %7697 = vst [vmem:[%s17815_s3 + $0x570] sm:$0xff] %v7217_v4  ;;  %v6762_v4 = vld [vmem:[%s17815_s3 + $0x688] sm:$0xff]  ;;  %v7251_v18 = vsub.f32 %v6761_v31, %v14430_v3 }
 0x705   : > { %7698 = vst [vmem:[%s17815_s3 + $0x578] sm:$0xff] %v7218_v10  ;;  %v6763_v10 = vld [vmem:[%s17815_s3 + $0x690] sm:$0xff]  ;;  %v7252_v19 = vsub.f32 %v6762_v4, %v14430_v3  ;;  %v6793_v4 = vld [vmem:[%s17815_s3 + $0x780] sm:$0xff] }
 0x706   : > { %7699 = vst [vmem:[%s17815_s3 + $0x580] sm:$0xff] %v7219_v17  ;;  %v6764_v17 = vld [vmem:[%s17815_s3 + $0x698] sm:$0xff]  ;;  %v7253_v23 = vsub.f32 %v6763_v10, %v14430_v3  ;;  %v6794_v10 = vld [vmem:[%s17815_s3 + $0x788] sm:$0xff] }
 0x707   : > { %7700 = vst [vmem:[%s17815_s3 + $0x588] sm:$0xff] %v7220_v27  ;;  %v6765_v27 = vld [vmem:[%s17815_s3 + $0x6a0] sm:$0xff]  ;;  %v7254_v22 = vsub.f32 %v6764_v17, %v14430_v3  ;;  %v6795_v17 = vld [vmem:[%s17815_s3 + $0x790] sm:$0xff] }
 0x708   : > { %7701 = vst [vmem:[%s17815_s3 + $0x590] sm:$0xff] %v7221_v21  ;;  %v6766_v21 = vld [vmem:[%s17815_s3 + $0x6a8] sm:$0xff]  ;;  %v7255_v32 = vsub.f32 %v6765_v27, %v14430_v3  ;;  %v6796_v27 = vld [vmem:[%s17815_s3 + $0x798] sm:$0xff] }
 0x709   : > { %7702 = vst [vmem:[%s17815_s3 + $0x598] sm:$0xff] %v7222_v16  ;;  %v6767_v16 = vld [vmem:[%s17815_s3 + $0x6b0] sm:$0xff]  ;;  %v7256_v20 = vsub.f32 %v6766_v21, %v14430_v3  ;;  %v6797_v21 = vld [vmem:[%s17815_s3 + $0x7a0] sm:$0xff] }
 0x70a   : > { %7703 = vst [vmem:[%s17815_s3 + $0x5a0] sm:$0xff] %v7223_v43  ;;  %v6768_v43 = vld [vmem:[%s17815_s3 + $0x6b8] sm:$0xff]  ;;  %v7257_v39 = vsub.f32 %v6767_v16, %v14430_v3 }
 0x70b   : > { %7704 = vst [vmem:[%s17815_s3 + $0x5a8] sm:$0xff] %v7224_v26  ;;  %v6769_v26 = vld [vmem:[%s17815_s3 + $0x6c0] sm:$0xff]  ;;  %v7258_v40 = vsub.f32 %v6768_v43, %v14430_v3 }
 0x70c   : > { %7705 = vst [vmem:[%s17815_s3 + $0x5b0] sm:$0xff] %v7225_v38  ;;  %v6770_v38 = vld [vmem:[%s17815_s3 + $0x6c8] sm:$0xff]  ;;  %v7259_v0 = vsub.f32 %v6769_v26, %v14430_v3 }
 0x70d   : > { %7706 = vst [vmem:[%s17815_s3 + $0x5b8] sm:$0xff] %v7226_v28  ;;  %v6771_v28 = vld [vmem:[%s17815_s3 + $0x6d0] sm:$0xff]  ;;  %v7260_v33 = vsub.f32 %v6770_v38, %v14430_v3 }
 0x70e   : > { %7707 = vst [vmem:[%s17815_s3 + $0x5c0] sm:$0xff] %v7227_v42  ;;  %v6772_v42 = vld [vmem:[%s17815_s3 + $0x6d8] sm:$0xff]  ;;  %v7261_v50 = vsub.f32 %v6771_v28, %v14430_v3 }
 0x70f   : > { %7708 = vst [vmem:[%s17815_s3 + $0x5c8] sm:$0xff] %v7228_v29  ;;  %v6773_v29 = vld [vmem:[%s17815_s3 + $0x6e0] sm:$0xff]  ;;  %v7262_v8 = vsub.f32 %v6772_v42, %v14430_v3 }
 0x710   : > { %7709 = vst [vmem:[%s17815_s3 + $0x5d0] sm:$0xff] %v7229_v34  ;;  %v6774_v34 = vld [vmem:[%s17815_s3 + $0x6e8] sm:$0xff]  ;;  %v7263_v45 = vsub.f32 %v6773_v29, %v14430_v3 }
 0x711   : > { %7710 = vst [vmem:[%s17815_s3 + $0x5d8] sm:$0xff] %v7230_v59  ;;  %v6775_v59 = vld [vmem:[%s17815_s3 + $0x6f0] sm:$0xff]  ;;  %v7264_v7 = vsub.f32 %v6774_v34, %v14430_v3 }
 0x712   : > { %7711 = vst [vmem:[%s17815_s3 + $0x5e0] sm:$0xff] %v7231_v44  ;;  %v6776_v44 = vld [vmem:[%s17815_s3 + $0x6f8] sm:$0xff]  ;;  %v7265_v49 = vsub.f32 %v6775_v59, %v14430_v3 }
 0x713   : > { %7712 = vst [vmem:[%s17815_s3 + $0x5e8] sm:$0xff] %v7232_v48  ;;  %v6777_v48 = vld [vmem:[%s17815_s3 + $0x700] sm:$0xff]  ;;  %v7266_v51 = vsub.f32 %v6776_v44, %v14430_v3 }
 0x714   : > { %7713 = vst [vmem:[%s17815_s3 + $0x5f0] sm:$0xff] %v7233_v1  ;;  %v6778_v1 = vld [vmem:[%s17815_s3 + $0x708] sm:$0xff]  ;;  %v7267_v53 = vsub.f32 %v6777_v48, %v14430_v3 }
 0x715   : > { %7714 = vst [vmem:[%s17815_s3 + $0x5f8] sm:$0xff] %v7234_v47  ;;  %v6779_v47 = vld [vmem:[%s17815_s3 + $0x710] sm:$0xff]  ;;  %v7268_v58 = vsub.f32 %v6778_v1, %v14430_v3 }
 0x716   : > { %7715 = vst [vmem:[%s17815_s3 + $0x600] sm:$0xff] %v7235_v2  ;;  %v6780_v2 = vld [vmem:[%s17815_s3 + $0x718] sm:$0xff]  ;;  %v7269_v61 = vsub.f32 %v6779_v47, %v14430_v3 }
 0x717   : > { %7716 = vst [vmem:[%s17815_s3 + $0x608] sm:$0xff] %v7236_v57  ;;  %v6781_v57 = vld [vmem:[%s17815_s3 + $0x720] sm:$0xff]  ;;  %v7270_v37 = vsub.f32 %v6780_v2, %v14430_v3 }
 0x718   : > { %7717 = vst [vmem:[%s17815_s3 + $0x610] sm:$0xff] %v7237_v60  ;;  %v6782_v60 = vld [vmem:[%s17815_s3 + $0x728] sm:$0xff]  ;;  %v7271_v56 = vsub.f32 %v6781_v57, %v14430_v3 }
 0x719   : > { %7718 = vst [vmem:[%s17815_s3 + $0x618] sm:$0xff] %v7238_v55  ;;  %v6783_v55 = vld [vmem:[%s17815_s3 + $0x730] sm:$0xff]  ;;  %v7272_v24 = vsub.f32 %v6782_v60, %v14430_v3 }
 0x71a   : > { %7719 = vst [vmem:[%s17815_s3 + $0x620] sm:$0xff] %v7239_v52  ;;  %v6784_v52 = vld [vmem:[%s17815_s3 + $0x738] sm:$0xff]  ;;  %v7273_v14 = vsub.f32 %v6783_v55, %v14430_v3 }
 0x71b   : > { %7720 = vst [vmem:[%s17815_s3 + $0x628] sm:$0xff] %v7240_v9  ;;  %v6785_v9 = vld [vmem:[%s17815_s3 + $0x740] sm:$0xff]  ;;  %v7274_v62 = vsub.f32 %v6784_v52, %v14430_v3 }
 0x71c   : > { %7721 = vst [vmem:[%s17815_s3 + $0x630] sm:$0xff] %v7241_v25  ;;  %v6786_v25 = vld [vmem:[%s17815_s3 + $0x748] sm:$0xff]  ;;  %v7275_v46 = vsub.f32 %v6785_v9, %v14430_v3 }
 0x71d   : > { %7722 = vst [vmem:[%s17815_s3 + $0x638] sm:$0xff] %v7242_v30  ;;  %v6787_v30 = vld [vmem:[%s17815_s3 + $0x750] sm:$0xff]  ;;  %v7276_v54 = vsub.f32 %v6786_v25, %v14430_v3 }
 0x71e   : > { %7723 = vst [vmem:[%s17815_s3 + $0x640] sm:$0xff] %v7243_v63  ;;  %v6788_v63 = vld [vmem:[%s17815_s3 + $0x758] sm:$0xff]  ;;  %v7277_v11 = vsub.f32 %v6787_v30, %v14430_v3 }
 0x71f   : > { %7724 = vst [vmem:[%s17815_s3 + $0x648] sm:$0xff] %v7244_v13  ;;  %v6789_v13 = vld [vmem:[%s17815_s3 + $0x760] sm:$0xff]  ;;  %v7278_v36 = vsub.f32 %v6788_v63, %v14430_v3 }
 0x720   : > { %7725 = vst [vmem:[%s17815_s3 + $0x650] sm:$0xff] %v7245_v5  ;;  %v6790_v5 = vld [vmem:[%s17815_s3 + $0x768] sm:$0xff]  ;;  %v7279_v31 = vsub.f32 %v6789_v13, %v14430_v3 }
 0x721   : > { %7726 = vst [vmem:[%s17815_s3 + $0x658] sm:$0xff] %v7246_v12  ;;  %v6791_v12 = vld [vmem:[%s17815_s3 + $0x770] sm:$0xff] }
 0x722   : > { %7727 = vst [vmem:[%s17815_s3 + $0x660] sm:$0xff] %v7247_v6  ;;  %v6792_v6 = vld [vmem:[%s17815_s3 + $0x778] sm:$0xff] }
 0x723   : > { %7728 = vst [vmem:[%s17815_s3 + $0x668] sm:$0xff] %v7248_v41  ;;  %v16088_v41 = vpop.permute.xlu0 %7040 }
 0x724   : > { %7729 = vst [vmem:[%s17815_s3 + $0x670] sm:$0xff] %v7249_v35  ;;  %v7280_v35 = vsub.f32 %v6790_v5, %v14430_v3  ;;  %v7285_v16 = vsub.f32 %v6795_v17, %v16088_v41  ;;  %v7286_v43 = vsub.f32 %v6796_v27, %v16088_v41  ;;  %v7287_v26 = vsub.f32 %v6797_v21, %v16088_v41 }
 0x725   : > { %7730 = vst [vmem:[%s17815_s3 + $0x678] sm:$0xff] %v7250_v15  ;;  %v7281_v15 = vsub.f32 %v6791_v12, %v14430_v3 }
 0x726   : > { %7731 = vst [vmem:[%s17815_s3 + $0x680] sm:$0xff] %v7251_v18  ;;  %v7282_v18 = vsub.f32 %v6792_v6, %v14430_v3  ;;  %v7284_v3 = vsub.f32 %v6794_v10, %v16088_v41 }
 0x727   : > { %7732 = vst [vmem:[%s17815_s3 + $0x688] sm:$0xff] %v7252_v19  ;;  %v7283_v19 = vsub.f32 %v6793_v4, %v16088_v41 }
 0x728   : > { %7733 = vst [vmem:[%s17815_s3 + $0x690] sm:$0xff] %v7253_v23  ;;  %v6798_v23 = vld [vmem:[%s17815_s3 + $0x7a8] sm:$0xff] }
 0x729   : > { %7734 = vst [vmem:[%s17815_s3 + $0x698] sm:$0xff] %v7254_v22  ;;  %v6799_v22 = vld [vmem:[%s17815_s3 + $0x7b0] sm:$0xff]  ;;  %v7288_v38 = vsub.f32 %v6798_v23, %v16088_v41 }
 0x72a   : > { %7735 = vst [vmem:[%s17815_s3 + $0x6a0] sm:$0xff] %v7255_v32  ;;  %v6800_v32 = vld [vmem:[%s17815_s3 + $0x7b8] sm:$0xff]  ;;  %v7289_v28 = vsub.f32 %v6799_v22, %v16088_v41 }
 0x72b   : > { %7736 = vst [vmem:[%s17815_s3 + $0x6a8] sm:$0xff] %v7256_v20  ;;  %v6801_v20 = vld [vmem:[%s17815_s3 + $0x7c0] sm:$0xff]  ;;  %v7290_v42 = vsub.f32 %v6800_v32, %v16088_v41 }
 0x72c   : > { %7737 = vst [vmem:[%s17815_s3 + $0x6b0] sm:$0xff] %v7257_v39  ;;  %v6802_v39 = vld [vmem:[%s17815_s3 + $0x7c8] sm:$0xff]  ;;  %v7291_v29 = vsub.f32 %v6801_v20, %v16088_v41 }
 0x72d   : > { %7738 = vst [vmem:[%s17815_s3 + $0x6b8] sm:$0xff] %v7258_v40  ;;  %v6803_v40 = vld [vmem:[%s17815_s3 + $0x7d0] sm:$0xff]  ;;  %v7292_v34 = vsub.f32 %v6802_v39, %v16088_v41 }
 0x72e   : > { %7739 = vst [vmem:[%s17815_s3 + $0x6c0] sm:$0xff] %v7259_v0  ;;  %v6804_v0 = vld [vmem:[%s17815_s3 + $0x7d8] sm:$0xff]  ;;  %v7293_v59 = vsub.f32 %v6803_v40, %v16088_v41 }
 0x72f   : > { %7740 = vst [vmem:[%s17815_s3 + $0x6c8] sm:$0xff] %v7260_v33  ;;  %v6805_v33 = vld [vmem:[%s17815_s3 + $0x7e0] sm:$0xff]  ;;  %v7294_v44 = vsub.f32 %v6804_v0, %v16088_v41 }
 0x730   : > { %7741 = vst [vmem:[%s17815_s3 + $0x6d0] sm:$0xff] %v7261_v50  ;;  %v6806_v50 = vld [vmem:[%s17815_s3 + $0x7e8] sm:$0xff]  ;;  %v7295_v48 = vsub.f32 %v6805_v33, %v16088_v41 }
 0x731   : > { %7742 = vst [vmem:[%s17815_s3 + $0x6d8] sm:$0xff] %v7262_v8  ;;  %v6807_v8 = vld [vmem:[%s17815_s3 + $0x7f0] sm:$0xff]  ;;  %v7296_v1 = vsub.f32 %v6806_v50, %v16088_v41 }
 0x732   : > { %7743 = vst [vmem:[%s17815_s3 + $0x6e0] sm:$0xff] %v7263_v45  ;;  %v6808_v45 = vld [vmem:[%s17815_s3 + $0x7f8] sm:$0xff]  ;;  %v7297_v47 = vsub.f32 %v6807_v8, %v16088_v41 }
 0x733   : > { %7744 = vst [vmem:[%s17815_s3 + $0x6e8] sm:$0xff] %v7264_v7  ;;  %v6809_v7 = vld [vmem:[%s17815_s3 + $0x800] sm:$0xff]  ;;  %v7298_v2 = vsub.f32 %v6808_v45, %v16088_v41 }
 0x734   : > { %7745 = vst [vmem:[%s17815_s3 + $0x6f0] sm:$0xff] %v7265_v49  ;;  %v6810_v49 = vld [vmem:[%s17815_s3 + $0x808] sm:$0xff]  ;;  %v7299_v57 = vsub.f32 %v6809_v7, %v16088_v41 }
 0x735   : > { %7746 = vst [vmem:[%s17815_s3 + $0x6f8] sm:$0xff] %v7266_v51  ;;  %v6811_v51 = vld [vmem:[%s17815_s3 + $0x810] sm:$0xff]  ;;  %v7300_v60 = vsub.f32 %v6810_v49, %v16088_v41 }
 0x736   : > { %7747 = vst [vmem:[%s17815_s3 + $0x700] sm:$0xff] %v7267_v53  ;;  %v6812_v53 = vld [vmem:[%s17815_s3 + $0x818] sm:$0xff]  ;;  %v7301_v55 = vsub.f32 %v6811_v51, %v16088_v41 }
 0x737   : > { %7748 = vst [vmem:[%s17815_s3 + $0x708] sm:$0xff] %v7268_v58  ;;  %v6813_v58 = vld [vmem:[%s17815_s3 + $0x820] sm:$0xff]  ;;  %v7302_v52 = vsub.f32 %v6812_v53, %v16088_v41 }
 0x738   : > { %7749 = vst [vmem:[%s17815_s3 + $0x710] sm:$0xff] %v7269_v61  ;;  %v6814_v61 = vld [vmem:[%s17815_s3 + $0x828] sm:$0xff]  ;;  %v7303_v9 = vsub.f32 %v6813_v58, %v16088_v41 }
 0x739   : > { %7750 = vst [vmem:[%s17815_s3 + $0x718] sm:$0xff] %v7270_v37  ;;  %v6815_v37 = vld [vmem:[%s17815_s3 + $0x830] sm:$0xff]  ;;  %v7304_v25 = vsub.f32 %v6814_v61, %v16088_v41 }
 0x73a   : > { %7751 = vst [vmem:[%s17815_s3 + $0x720] sm:$0xff] %v7271_v56  ;;  %v6816_v56 = vld [vmem:[%s17815_s3 + $0x838] sm:$0xff]  ;;  %v7305_v30 = vsub.f32 %v6815_v37, %v16088_v41 }
 0x73b   : > { %7752 = vst [vmem:[%s17815_s3 + $0x728] sm:$0xff] %v7272_v24  ;;  %v6817_v24 = vld [vmem:[%s17815_s3 + $0x840] sm:$0xff]  ;;  %v7306_v63 = vsub.f32 %v6816_v56, %v16088_v41 }
 0x73c   : > { %7753 = vst [vmem:[%s17815_s3 + $0x730] sm:$0xff] %v7273_v14  ;;  %v6818_v14 = vld [vmem:[%s17815_s3 + $0x848] sm:$0xff]  ;;  %v7307_v13 = vsub.f32 %v6817_v24, %v16088_v41 }
 0x73d   : > { %7754 = vst [vmem:[%s17815_s3 + $0x738] sm:$0xff] %v7274_v62  ;;  %v6819_v62 = vld [vmem:[%s17815_s3 + $0x850] sm:$0xff]  ;;  %v7308_v5 = vsub.f32 %v6818_v14, %v16088_v41 }
 0x73e   : > { %7755 = vst [vmem:[%s17815_s3 + $0x740] sm:$0xff] %v7275_v46  ;;  %v6820_v46 = vld [vmem:[%s17815_s3 + $0x858] sm:$0xff]  ;;  %v7309_v12 = vsub.f32 %v6819_v62, %v16088_v41 }
 0x73f   : > { %7756 = vst [vmem:[%s17815_s3 + $0x748] sm:$0xff] %v7276_v54  ;;  %v6821_v54 = vld [vmem:[%s17815_s3 + $0x860] sm:$0xff]  ;;  %v7310_v6 = vsub.f32 %v6820_v46, %v16088_v41 }
 0x740   : > { %7757 = vst [vmem:[%s17815_s3 + $0x750] sm:$0xff] %v7277_v11  ;;  %v6822_v11 = vld [vmem:[%s17815_s3 + $0x868] sm:$0xff]  ;;  %v7311_v4 = vsub.f32 %v6821_v54, %v16088_v41 }
 0x741   : > { %7758 = vst [vmem:[%s17815_s3 + $0x758] sm:$0xff] %v7278_v36  ;;  %v6823_v36 = vld [vmem:[%s17815_s3 + $0x870] sm:$0xff]  ;;  %v7312_v10 = vsub.f32 %v6822_v11, %v16088_v41 }
 0x742   : > { %7759 = vst [vmem:[%s17815_s3 + $0x760] sm:$0xff] %v7279_v31  ;;  %v6824_v31 = vld [vmem:[%s17815_s3 + $0x878] sm:$0xff]  ;;  %v7313_v17 = vsub.f32 %v6823_v36, %v16088_v41 }
 0x743   : > { %7760 = vst [vmem:[%s17815_s3 + $0x768] sm:$0xff] %v7280_v35  ;;  %v6825_v35 = vld [vmem:[%s17815_s3 + $0x880] sm:$0xff]  ;;  %v7314_v27 = vsub.f32 %v6824_v31, %v16088_v41 }
 0x744   : > { %7761 = vst [vmem:[%s17815_s3 + $0x770] sm:$0xff] %v7281_v15  ;;  %v6826_v15 = vld [vmem:[%s17815_s3 + $0x888] sm:$0xff]  ;;  %v7315_v21 = vsub.f32 %v6825_v35, %v16088_v41 }
 0x745   : > { %7762 = vst [vmem:[%s17815_s3 + $0x778] sm:$0xff] %v7282_v18  ;;  %v6827_v18 = vld [vmem:[%s17815_s3 + $0x890] sm:$0xff]  ;;  %v7316_v23 = vsub.f32 %v6826_v15, %v16088_v41 }
 0x746   : > { %7763 = vst [vmem:[%s17815_s3 + $0x780] sm:$0xff] %v7283_v19  ;;  %v6828_v19 = vld [vmem:[%s17815_s3 + $0x898] sm:$0xff]  ;;  %v7317_v22 = vsub.f32 %v6827_v18, %v16088_v41 }
 0x747   : > { %7764 = vst [vmem:[%s17815_s3 + $0x788] sm:$0xff] %v7284_v3  ;;  %v6829_v3 = vld [vmem:[%s17815_s3 + $0x8a0] sm:$0xff]  ;;  %v7318_v32 = vsub.f32 %v6828_v19, %v16088_v41 }
 0x748   : > { %7765 = vst [vmem:[%s17815_s3 + $0x790] sm:$0xff] %v7285_v16  ;;  %v6830_v16 = vld [vmem:[%s17815_s3 + $0x8a8] sm:$0xff]  ;;  %v7319_v20 = vsub.f32 %v6829_v3, %v16088_v41 }
 0x749   : > { %7766 = vst [vmem:[%s17815_s3 + $0x798] sm:$0xff] %v7286_v43  ;;  %v6831_v43 = vld [vmem:[%s17815_s3 + $0x8b0] sm:$0xff]  ;;  %v7320_v39 = vsub.f32 %v6830_v16, %v16088_v41 }
 0x74a   : > { %7767 = vst [vmem:[%s17815_s3 + $0x7a0] sm:$0xff] %v7287_v26  ;;  %v6832_v26 = vld [vmem:[%s17815_s3 + $0x8b8] sm:$0xff]  ;;  %v7321_v40 = vsub.f32 %v6831_v43, %v16088_v41 }
 0x74b   : > { %7768 = vst [vmem:[%s17815_s3 + $0x7a8] sm:$0xff] %v7288_v38  ;;  %v6833_v38 = vld [vmem:[%s17815_s3 + $0x8c0] sm:$0xff]  ;;  %v7322_v0 = vsub.f32 %v6832_v26, %v16088_v41 }
 0x74c   : > { %7769 = vst [vmem:[%s17815_s3 + $0x7b0] sm:$0xff] %v7289_v28  ;;  %v6834_v28 = vld [vmem:[%s17815_s3 + $0x8c8] sm:$0xff]  ;;  %v7323_v33 = vsub.f32 %v6833_v38, %v16088_v41 }
 0x74d   : > { %7770 = vst [vmem:[%s17815_s3 + $0x7b8] sm:$0xff] %v7290_v42  ;;  %v6835_v42 = vld [vmem:[%s17815_s3 + $0x8d0] sm:$0xff]  ;;  %v7324_v50 = vsub.f32 %v6834_v28, %v16088_v41 }
 0x74e   : > { %7771 = vst [vmem:[%s17815_s3 + $0x7c0] sm:$0xff] %v7291_v29  ;;  %v6836_v29 = vld [vmem:[%s17815_s3 + $0x8d8] sm:$0xff]  ;;  %v7325_v8 = vsub.f32 %v6835_v42, %v16088_v41 }
 0x74f   : > { %7772 = vst [vmem:[%s17815_s3 + $0x7c8] sm:$0xff] %v7292_v34  ;;  %v6837_v34 = vld [vmem:[%s17815_s3 + $0x8e0] sm:$0xff]  ;;  %v7326_v45 = vsub.f32 %v6836_v29, %v16088_v41 }
 0x750   : > { %7773 = vst [vmem:[%s17815_s3 + $0x7d0] sm:$0xff] %v7293_v59  ;;  %v6838_v59 = vld [vmem:[%s17815_s3 + $0x8e8] sm:$0xff]  ;;  %v7327_v7 = vsub.f32 %v6837_v34, %v16088_v41 }
 0x751   : > { %7774 = vst [vmem:[%s17815_s3 + $0x7d8] sm:$0xff] %v7294_v44  ;;  %v6839_v44 = vld [vmem:[%s17815_s3 + $0x8f0] sm:$0xff]  ;;  %v7328_v49 = vsub.f32 %v6838_v59, %v16088_v41 }
 0x752   : > { %7775 = vst [vmem:[%s17815_s3 + $0x7e0] sm:$0xff] %v7295_v48  ;;  %v6840_v48 = vld [vmem:[%s17815_s3 + $0x8f8] sm:$0xff]  ;;  %v7329_v51 = vsub.f32 %v6839_v44, %v16088_v41 }
 0x753   : > { %7776 = vst [vmem:[%s17815_s3 + $0x7e8] sm:$0xff] %v7296_v1  ;;  %v6841_v1 = vld [vmem:[%s17815_s3 + $0x900] sm:$0xff]  ;;  %v7330_v53 = vsub.f32 %v6840_v48, %v16088_v41 }
 0x754   : > { %7777 = vst [vmem:[%s17815_s3 + $0x7f0] sm:$0xff] %v7297_v47  ;;  %v6842_v47 = vld [vmem:[%s17815_s3 + $0x908] sm:$0xff]  ;;  %v7331_v58 = vsub.f32 %v6841_v1, %v16088_v41 }
 0x755   : > { %7778 = vst [vmem:[%s17815_s3 + $0x7f8] sm:$0xff] %v7298_v2  ;;  %v6843_v2 = vld [vmem:[%s17815_s3 + $0x910] sm:$0xff]  ;;  %v7332_v61 = vsub.f32 %v6842_v47, %v16088_v41 }
 0x756   : > { %7779 = vst [vmem:[%s17815_s3 + $0x800] sm:$0xff] %v7299_v57  ;;  %v6844_v57 = vld [vmem:[%s17815_s3 + $0x918] sm:$0xff]  ;;  %v7333_v37 = vsub.f32 %v6843_v2, %v16088_v41 }
 0x757   : > { %7780 = vst [vmem:[%s17815_s3 + $0x808] sm:$0xff] %v7300_v60  ;;  %v6845_v60 = vld [vmem:[%s17815_s3 + $0x920] sm:$0xff]  ;;  %v7334_v56 = vsub.f32 %v6844_v57, %v16088_v41 }
 0x758   : > { %7781 = vst [vmem:[%s17815_s3 + $0x810] sm:$0xff] %v7301_v55  ;;  %v6846_v55 = vld [vmem:[%s17815_s3 + $0x928] sm:$0xff]  ;;  %v7335_v24 = vsub.f32 %v6845_v60, %v16088_v41 }
 0x759   : > { %7782 = vst [vmem:[%s17815_s3 + $0x818] sm:$0xff] %v7302_v52  ;;  %v6847_v52 = vld [vmem:[%s17815_s3 + $0x930] sm:$0xff]  ;;  %v7336_v14 = vsub.f32 %v6846_v55, %v16088_v41 }
 0x75a   : > { %7783 = vst [vmem:[%s17815_s3 + $0x820] sm:$0xff] %v7303_v9  ;;  %v6848_v9 = vld [vmem:[%s17815_s3 + $0x938] sm:$0xff]  ;;  %v7337_v62 = vsub.f32 %v6847_v52, %v16088_v41 }
 0x75b   : > { %7784 = vst [vmem:[%s17815_s3 + $0x828] sm:$0xff] %v7304_v25  ;;  %v6849_v25 = vld [vmem:[%s17815_s3 + $0x940] sm:$0xff]  ;;  %v7338_v46 = vsub.f32 %v6848_v9, %v16088_v41 }
 0x75c   : > { %7785 = vst [vmem:[%s17815_s3 + $0x830] sm:$0xff] %v7305_v30  ;;  %v6850_v30 = vld [vmem:[%s17815_s3 + $0x948] sm:$0xff]  ;;  %v7339_v54 = vsub.f32 %v6849_v25, %v16088_v41 }
 0x75d   : > { %7786 = vst [vmem:[%s17815_s3 + $0x838] sm:$0xff] %v7306_v63  ;;  %v6851_v63 = vld [vmem:[%s17815_s3 + $0x950] sm:$0xff]  ;;  %v7340_v11 = vsub.f32 %v6850_v30, %v16088_v41 }
 0x75e   : > { %7787 = vst [vmem:[%s17815_s3 + $0x840] sm:$0xff] %v7307_v13  ;;  %v6852_v13 = vld [vmem:[%s17815_s3 + $0x958] sm:$0xff]  ;;  %v7341_v36 = vsub.f32 %v6851_v63, %v16088_v41 }
 0x75f   : > { %7788 = vst [vmem:[%s17815_s3 + $0x848] sm:$0xff] %v7308_v5  ;;  %v6853_v5 = vld [vmem:[%s17815_s3 + $0x960] sm:$0xff]  ;;  %v7342_v31 = vsub.f32 %v6852_v13, %v16088_v41 }
 0x760   : > { %7789 = vst [vmem:[%s17815_s3 + $0x850] sm:$0xff] %v7309_v12  ;;  %v6854_v12 = vld [vmem:[%s17815_s3 + $0x968] sm:$0xff]  ;;  %v7343_v35 = vsub.f32 %v6853_v5, %v16088_v41 }
 0x761   : > { %7790 = vst [vmem:[%s17815_s3 + $0x858] sm:$0xff] %v7310_v6  ;;  %v6855_v6 = vld [vmem:[%s17815_s3 + $0x970] sm:$0xff]  ;;  %v7344_v15 = vsub.f32 %v6854_v12, %v16088_v41 }
 0x762   : > { %7791 = vst [vmem:[%s17815_s3 + $0x860] sm:$0xff] %v7311_v4  ;;  %v6856_v4 = vld [vmem:[%s17815_s3 + $0x978] sm:$0xff]  ;;  %v7345_v18 = vsub.f32 %v6855_v6, %v16088_v41 }
 0x763   : > { %7792 = vst [vmem:[%s17815_s3 + $0x868] sm:$0xff] %v7312_v10  ;;  %v6857_v10 = vld [vmem:[%s17815_s3 + $0x980] sm:$0xff]  ;;  %v7346_v19 = vsub.f32 %v6856_v4, %v16088_v41 }
 0x764   : > { %7793 = vst [vmem:[%s17815_s3 + $0x870] sm:$0xff] %v7313_v17  ;;  %v6858_v17 = vld [vmem:[%s17815_s3 + $0x988] sm:$0xff]  ;;  %v7347_v3 = vsub.f32 %v6857_v10, %v16088_v41 }
 0x765   : > { %7794 = vst [vmem:[%s17815_s3 + $0x878] sm:$0xff] %v7314_v27  ;;  %v6859_v27 = vld [vmem:[%s17815_s3 + $0x990] sm:$0xff]  ;;  %v7348_v16 = vsub.f32 %v6858_v17, %v16088_v41 }
 0x766   : > { %7795 = vst [vmem:[%s17815_s3 + $0x880] sm:$0xff] %v7315_v21  ;;  %v6860_v21 = vld [vmem:[%s17815_s3 + $0x998] sm:$0xff]  ;;  %v7349_v43 = vsub.f32 %v6859_v27, %v16088_v41 }
 0x767   : > { %7796 = vst [vmem:[%s17815_s3 + $0x888] sm:$0xff] %v7316_v23  ;;  %v6861_v23 = vld [vmem:[%s17815_s3 + $0x9a0] sm:$0xff]  ;;  %v7350_v26 = vsub.f32 %v6860_v21, %v16088_v41 }
 0x768   : > { %7797 = vst [vmem:[%s17815_s3 + $0x890] sm:$0xff] %v7317_v22  ;;  %v6862_v22 = vld [vmem:[%s17815_s3 + $0x9a8] sm:$0xff]  ;;  %v7351_v38 = vsub.f32 %v6861_v23, %v16088_v41 }
 0x769   : > { %7798 = vst [vmem:[%s17815_s3 + $0x898] sm:$0xff] %v7318_v32  ;;  %v6863_v32 = vld [vmem:[%s17815_s3 + $0x9b0] sm:$0xff]  ;;  %v7352_v28 = vsub.f32 %v6862_v22, %v16088_v41 }
 0x76a   : > { %7799 = vst [vmem:[%s17815_s3 + $0x8a0] sm:$0xff] %v7319_v20  ;;  %v6864_v20 = vld [vmem:[%s17815_s3 + $0x9b8] sm:$0xff]  ;;  %v7353_v42 = vsub.f32 %v6863_v32, %v16088_v41 }
 0x76b   : > { %7800 = vst [vmem:[%s17815_s3 + $0x8a8] sm:$0xff] %v7320_v39  ;;  %v6865_v39 = vld [vmem:[%s17815_s3 + $0x9c0] sm:$0xff]  ;;  %v7354_v29 = vsub.f32 %v6864_v20, %v16088_v41 }
 0x76c   : > { %7801 = vst [vmem:[%s17815_s3 + $0x8b0] sm:$0xff] %v7321_v40  ;;  %v6866_v40 = vld [vmem:[%s17815_s3 + $0x9c8] sm:$0xff]  ;;  %v7355_v34 = vsub.f32 %v6865_v39, %v16088_v41 }
 0x76d   : > { %7802 = vst [vmem:[%s17815_s3 + $0x8b8] sm:$0xff] %v7322_v0  ;;  %v6867_v0 = vld [vmem:[%s17815_s3 + $0x9d0] sm:$0xff]  ;;  %v7356_v59 = vsub.f32 %v6866_v40, %v16088_v41 }
 0x76e   : > { %7803 = vst [vmem:[%s17815_s3 + $0x8c0] sm:$0xff] %v7323_v33  ;;  %v6868_v33 = vld [vmem:[%s17815_s3 + $0x9d8] sm:$0xff]  ;;  %v7357_v44 = vsub.f32 %v6867_v0, %v16088_v41 }
 0x76f   : > { %7804 = vst [vmem:[%s17815_s3 + $0x8c8] sm:$0xff] %v7324_v50  ;;  %v6869_v50 = vld [vmem:[%s17815_s3 + $0x9e0] sm:$0xff]  ;;  %v7358_v48 = vsub.f32 %v6868_v33, %v16088_v41 }
 0x770   : > { %7805 = vst [vmem:[%s17815_s3 + $0x8d0] sm:$0xff] %v7325_v8  ;;  %v6870_v8 = vld [vmem:[%s17815_s3 + $0x9e8] sm:$0xff]  ;;  %v7359_v1 = vsub.f32 %v6869_v50, %v16088_v41 }
 0x771   : > { %7806 = vst [vmem:[%s17815_s3 + $0x8d8] sm:$0xff] %v7326_v45  ;;  %v6871_v45 = vld [vmem:[%s17815_s3 + $0x9f0] sm:$0xff]  ;;  %v7360_v47 = vsub.f32 %v6870_v8, %v16088_v41 }
 0x772   : > { %7807 = vst [vmem:[%s17815_s3 + $0x8e0] sm:$0xff] %v7327_v7  ;;  %v6872_v7 = vld [vmem:[%s17815_s3 + $0x9f8] sm:$0xff]  ;;  %v7361_v2 = vsub.f32 %v6871_v45, %v16088_v41 }
 0x773   : > { %7808 = vst [vmem:[%s17815_s3 + $0x8e8] sm:$0xff] %v7328_v49  ;;  %v6873_v49 = vld [vmem:[%s17815_s3 + $0xa00] sm:$0xff]  ;;  %v7362_v57 = vsub.f32 %v6872_v7, %v16088_v41 }
 0x774   : > { %7809 = vst [vmem:[%s17815_s3 + $0x8f0] sm:$0xff] %v7329_v51  ;;  %v6874_v51 = vld [vmem:[%s17815_s3 + $0xa08] sm:$0xff]  ;;  %v7363_v60 = vsub.f32 %v6873_v49, %v16088_v41 }
 0x775   : > { %7810 = vst [vmem:[%s17815_s3 + $0x8f8] sm:$0xff] %v7330_v53  ;;  %v6875_v53 = vld [vmem:[%s17815_s3 + $0xa10] sm:$0xff]  ;;  %v7364_v55 = vsub.f32 %v6874_v51, %v16088_v41 }
 0x776   : > { %7811 = vst [vmem:[%s17815_s3 + $0x900] sm:$0xff] %v7331_v58  ;;  %v6876_v58 = vld [vmem:[%s17815_s3 + $0xa18] sm:$0xff]  ;;  %v7365_v52 = vsub.f32 %v6875_v53, %v16088_v41 }
 0x777   : > { %7812 = vst [vmem:[%s17815_s3 + $0x908] sm:$0xff] %v7332_v61  ;;  %v6877_v61 = vld [vmem:[%s17815_s3 + $0xa20] sm:$0xff]  ;;  %v7366_v9 = vsub.f32 %v6876_v58, %v16088_v41 }
 0x778   : > { %7813 = vst [vmem:[%s17815_s3 + $0x910] sm:$0xff] %v7333_v37  ;;  %v6878_v37 = vld [vmem:[%s17815_s3 + $0xa28] sm:$0xff]  ;;  %v7367_v25 = vsub.f32 %v6877_v61, %v16088_v41 }
 0x779   : > { %7814 = vst [vmem:[%s17815_s3 + $0x918] sm:$0xff] %v7334_v56  ;;  %v6879_v56 = vld [vmem:[%s17815_s3 + $0xa30] sm:$0xff]  ;;  %v7368_v30 = vsub.f32 %v6878_v37, %v16088_v41 }
 0x77a   : > { %7815 = vst [vmem:[%s17815_s3 + $0x920] sm:$0xff] %v7335_v24  ;;  %v6880_v24 = vld [vmem:[%s17815_s3 + $0xa38] sm:$0xff]  ;;  %v7369_v63 = vsub.f32 %v6879_v56, %v16088_v41 }
 0x77b   : > { %7816 = vst [vmem:[%s17815_s3 + $0x928] sm:$0xff] %v7336_v14  ;;  %v6881_v14 = vld [vmem:[%s17815_s3 + $0xa40] sm:$0xff]  ;;  %v7370_v13 = vsub.f32 %v6880_v24, %v16088_v41 }
 0x77c   : > { %7817 = vst [vmem:[%s17815_s3 + $0x930] sm:$0xff] %v7337_v62  ;;  %v6882_v62 = vld [vmem:[%s17815_s3 + $0xa48] sm:$0xff]  ;;  %v7371_v5 = vsub.f32 %v6881_v14, %v16088_v41 }
 0x77d   : > { %7818 = vst [vmem:[%s17815_s3 + $0x938] sm:$0xff] %v7338_v46  ;;  %v6883_v46 = vld [vmem:[%s17815_s3 + $0xa50] sm:$0xff]  ;;  %v7372_v12 = vsub.f32 %v6882_v62, %v16088_v41 }
 0x77e   : > { %7819 = vst [vmem:[%s17815_s3 + $0x940] sm:$0xff] %v7339_v54  ;;  %v6884_v54 = vld [vmem:[%s17815_s3 + $0xa58] sm:$0xff]  ;;  %v7373_v6 = vsub.f32 %v6883_v46, %v16088_v41 }
 0x77f   : > { %7820 = vst [vmem:[%s17815_s3 + $0x948] sm:$0xff] %v7340_v11  ;;  %v6885_v11 = vld [vmem:[%s17815_s3 + $0xa60] sm:$0xff]  ;;  %v7374_v4 = vsub.f32 %v6884_v54, %v16088_v41 }
 0x780   : > { %7821 = vst [vmem:[%s17815_s3 + $0x950] sm:$0xff] %v7341_v36  ;;  %v6886_v36 = vld [vmem:[%s17815_s3 + $0xa68] sm:$0xff]  ;;  %v7375_v10 = vsub.f32 %v6885_v11, %v16088_v41 }
 0x781   : > { %7822 = vst [vmem:[%s17815_s3 + $0x958] sm:$0xff] %v7342_v31  ;;  %v6887_v31 = vld [vmem:[%s17815_s3 + $0xa70] sm:$0xff]  ;;  %v7376_v17 = vsub.f32 %v6886_v36, %v16088_v41 }
 0x782   : > { %7823 = vst [vmem:[%s17815_s3 + $0x960] sm:$0xff] %v7343_v35  ;;  %v6888_v35 = vld [vmem:[%s17815_s3 + $0xa78] sm:$0xff]  ;;  %v7377_v27 = vsub.f32 %v6887_v31, %v16088_v41 }
 0x783   : > { %7824 = vst [vmem:[%s17815_s3 + $0x968] sm:$0xff] %v7344_v15  ;;  %v6889_v15 = vld [vmem:[%s17815_s3 + $0xa80] sm:$0xff]  ;;  %v7378_v21 = vsub.f32 %v6888_v35, %v16088_v41 }
 0x784   : > { %7825 = vst [vmem:[%s17815_s3 + $0x970] sm:$0xff] %v7345_v18  ;;  %v6890_v18 = vld [vmem:[%s17815_s3 + $0xa88] sm:$0xff]  ;;  %v7379_v23 = vsub.f32 %v6889_v15, %v16088_v41 }
 0x785   : > { %7826 = vst [vmem:[%s17815_s3 + $0x978] sm:$0xff] %v7346_v19  ;;  %v6891_v19 = vld [vmem:[%s17815_s3 + $0xa90] sm:$0xff]  ;;  %v7380_v22 = vsub.f32 %v6890_v18, %v16088_v41 }
 0x786   : > { %7827 = vst [vmem:[%s17815_s3 + $0x980] sm:$0xff] %v7347_v3  ;;  %v6892_v3 = vld [vmem:[%s17815_s3 + $0xa98] sm:$0xff]  ;;  %v7381_v32 = vsub.f32 %v6891_v19, %v16088_v41 }
 0x787   : > { %7828 = vst [vmem:[%s17815_s3 + $0x988] sm:$0xff] %v7348_v16  ;;  %v6893_v16 = vld [vmem:[%s17815_s3 + $0xaa0] sm:$0xff]  ;;  %v7382_v20 = vsub.f32 %v6892_v3, %v16088_v41 }
 0x788   : > { %7829 = vst [vmem:[%s17815_s3 + $0x990] sm:$0xff] %v7349_v43  ;;  %v6894_v43 = vld [vmem:[%s17815_s3 + $0xaa8] sm:$0xff]  ;;  %v7383_v39 = vsub.f32 %v6893_v16, %v16088_v41 }
 0x789   : > { %7830 = vst [vmem:[%s17815_s3 + $0x998] sm:$0xff] %v7350_v26  ;;  %v6895_v26 = vld [vmem:[%s17815_s3 + $0xab0] sm:$0xff]  ;;  %v7384_v40 = vsub.f32 %v6894_v43, %v16088_v41 }
 0x78a   : > { %7831 = vst [vmem:[%s17815_s3 + $0x9a0] sm:$0xff] %v7351_v38  ;;  %v6896_v38 = vld [vmem:[%s17815_s3 + $0xab8] sm:$0xff]  ;;  %v7385_v0 = vsub.f32 %v6895_v26, %v16088_v41 }
 0x78b   : > { %7832 = vst [vmem:[%s17815_s3 + $0x9a8] sm:$0xff] %v7352_v28  ;;  %v6897_v28 = vld [vmem:[%s17815_s3 + $0xac0] sm:$0xff]  ;;  %v7386_v33 = vsub.f32 %v6896_v38, %v16088_v41 }
 0x78c   : > { %7833 = vst [vmem:[%s17815_s3 + $0x9b0] sm:$0xff] %v7353_v42  ;;  %v6898_v42 = vld [vmem:[%s17815_s3 + $0xac8] sm:$0xff]  ;;  %v7387_v50 = vsub.f32 %v6897_v28, %v16088_v41 }
 0x78d   : > { %7834 = vst [vmem:[%s17815_s3 + $0x9b8] sm:$0xff] %v7354_v29  ;;  %v6899_v29 = vld [vmem:[%s17815_s3 + $0xad0] sm:$0xff]  ;;  %v7388_v8 = vsub.f32 %v6898_v42, %v16088_v41 }
 0x78e   : > { %7835 = vst [vmem:[%s17815_s3 + $0x9c0] sm:$0xff] %v7355_v34  ;;  %v6900_v34 = vld [vmem:[%s17815_s3 + $0xad8] sm:$0xff]  ;;  %v7389_v45 = vsub.f32 %v6899_v29, %v16088_v41 }
 0x78f   : > { %7836 = vst [vmem:[%s17815_s3 + $0x9c8] sm:$0xff] %v7356_v59  ;;  %v6901_v59 = vld [vmem:[%s17815_s3 + $0xae0] sm:$0xff]  ;;  %v7390_v7 = vsub.f32 %v6900_v34, %v16088_v41 }
 0x790   : > { %7837 = vst [vmem:[%s17815_s3 + $0x9d0] sm:$0xff] %v7357_v44  ;;  %v6902_v44 = vld [vmem:[%s17815_s3 + $0xae8] sm:$0xff]  ;;  %v7391_v49 = vsub.f32 %v6901_v59, %v16088_v41 }
 0x791   : > { %7838 = vst [vmem:[%s17815_s3 + $0x9d8] sm:$0xff] %v7358_v48  ;;  %v6903_v48 = vld [vmem:[%s17815_s3 + $0xaf0] sm:$0xff]  ;;  %v7392_v51 = vsub.f32 %v6902_v44, %v16088_v41 }
 0x792   : > { %7839 = vst [vmem:[%s17815_s3 + $0x9e0] sm:$0xff] %v7359_v1  ;;  %v6904_v1 = vld [vmem:[%s17815_s3 + $0xaf8] sm:$0xff]  ;;  %v7393_v53 = vsub.f32 %v6903_v48, %v16088_v41 }
 0x793   : > { %7840 = vst [vmem:[%s17815_s3 + $0x9e8] sm:$0xff] %v7360_v47  ;;  %v6905_v47 = vld [vmem:[%s17815_s3 + $0xb00] sm:$0xff]  ;;  %v7394_v58 = vsub.f32 %v6904_v1, %v16088_v41 }
 0x794   : > { %7841 = vst [vmem:[%s17815_s3 + $0x9f0] sm:$0xff] %v7361_v2  ;;  %v6906_v2 = vld [vmem:[%s17815_s3 + $0xb08] sm:$0xff]  ;;  %v7395_v61 = vsub.f32 %v6905_v47, %v16088_v41 }
 0x795   : > { %7842 = vst [vmem:[%s17815_s3 + $0x9f8] sm:$0xff] %v7362_v57  ;;  %v6907_v57 = vld [vmem:[%s17815_s3 + $0xb10] sm:$0xff]  ;;  %v7396_v37 = vsub.f32 %v6906_v2, %v16088_v41 }
 0x796   : > { %7843 = vst [vmem:[%s17815_s3 + $0xa00] sm:$0xff] %v7363_v60  ;;  %v6908_v60 = vld [vmem:[%s17815_s3 + $0xb18] sm:$0xff]  ;;  %v7397_v56 = vsub.f32 %v6907_v57, %v16088_v41 }
 0x797   : > { %7844 = vst [vmem:[%s17815_s3 + $0xa08] sm:$0xff] %v7364_v55  ;;  %v6909_v55 = vld [vmem:[%s17815_s3 + $0xb20] sm:$0xff]  ;;  %v7398_v24 = vsub.f32 %v6908_v60, %v16088_v41 }
 0x798   : > { %7845 = vst [vmem:[%s17815_s3 + $0xa10] sm:$0xff] %v7365_v52  ;;  %v6910_v52 = vld [vmem:[%s17815_s3 + $0xb28] sm:$0xff]  ;;  %v7399_v14 = vsub.f32 %v6909_v55, %v16088_v41 }
 0x799   : > { %7846 = vst [vmem:[%s17815_s3 + $0xa18] sm:$0xff] %v7366_v9  ;;  %v6911_v9 = vld [vmem:[%s17815_s3 + $0xb30] sm:$0xff]  ;;  %v7400_v62 = vsub.f32 %v6910_v52, %v16088_v41 }
 0x79a   : > { %7847 = vst [vmem:[%s17815_s3 + $0xa20] sm:$0xff] %v7367_v25  ;;  %v6912_v25 = vld [vmem:[%s17815_s3 + $0xb38] sm:$0xff]  ;;  %v7401_v46 = vsub.f32 %v6911_v9, %v16088_v41 }
 0x79b   : > { %7848 = vst [vmem:[%s17815_s3 + $0xa28] sm:$0xff] %v7368_v30  ;;  %v6913_v30 = vld [vmem:[%s17815_s3 + $0xb40] sm:$0xff]  ;;  %v7402_v54 = vsub.f32 %v6912_v25, %v16088_v41 }
 0x79c   : > { %7849 = vst [vmem:[%s17815_s3 + $0xa30] sm:$0xff] %v7369_v63  ;;  %v6914_v63 = vld [vmem:[%s17815_s3 + $0xb48] sm:$0xff]  ;;  %v7403_v11 = vsub.f32 %v6913_v30, %v16088_v41 }
 0x79d   : > { %7850 = vst [vmem:[%s17815_s3 + $0xa38] sm:$0xff] %v7370_v13  ;;  %v6915_v13 = vld [vmem:[%s17815_s3 + $0xb50] sm:$0xff]  ;;  %v7404_v36 = vsub.f32 %v6914_v63, %v16088_v41 }
 0x79e   : > { %7851 = vst [vmem:[%s17815_s3 + $0xa40] sm:$0xff] %v7371_v5  ;;  %v6916_v5 = vld [vmem:[%s17815_s3 + $0xb58] sm:$0xff]  ;;  %v7405_v31 = vsub.f32 %v6915_v13, %v16088_v41 }
 0x79f   : > { %7852 = vst [vmem:[%s17815_s3 + $0xa48] sm:$0xff] %v7372_v12  ;;  %v6917_v12 = vld [vmem:[%s17815_s3 + $0xb60] sm:$0xff]  ;;  %v7406_v35 = vsub.f32 %v6916_v5, %v16088_v41 }
 0x7a0   : > { %7853 = vst [vmem:[%s17815_s3 + $0xa50] sm:$0xff] %v7373_v6  ;;  %v6918_v6 = vld [vmem:[%s17815_s3 + $0xb68] sm:$0xff]  ;;  %v7407_v15 = vsub.f32 %v6917_v12, %v16088_v41 }
 0x7a1   : > { %7854 = vst [vmem:[%s17815_s3 + $0xa58] sm:$0xff] %v7374_v4  ;;  %v6919_v4 = vld [vmem:[%s17815_s3 + $0xb70] sm:$0xff]  ;;  %v7408_v18 = vsub.f32 %v6918_v6, %v16088_v41 }
 0x7a2   : > { %7855 = vst [vmem:[%s17815_s3 + $0xa60] sm:$0xff] %v7375_v10  ;;  %v6920_v10 = vld [vmem:[%s17815_s3 + $0xb78] sm:$0xff]  ;;  %v7409_v19 = vsub.f32 %v6919_v4, %v16088_v41 }
 0x7a3   : > { %7856 = vst [vmem:[%s17815_s3 + $0xa68] sm:$0xff] %v7376_v17  ;;  %v6921_v17 = vld [vmem:[%s17815_s3 + $0xb80] sm:$0xff]  ;;  %v7410_v3 = vsub.f32 %v6920_v10, %v16088_v41 }
 0x7a4   : > { %7857 = vst [vmem:[%s17815_s3 + $0xa70] sm:$0xff] %v7377_v27  ;;  %v6922_v27 = vld [vmem:[%s17815_s3 + $0xb88] sm:$0xff]  ;;  %v7411_v16 = vsub.f32 %v6921_v17, %v16088_v41 }
 0x7a5   : > { %7858 = vst [vmem:[%s17815_s3 + $0xa78] sm:$0xff] %v7378_v21  ;;  %v6923_v21 = vld [vmem:[%s17815_s3 + $0xb90] sm:$0xff]  ;;  %v7412_v43 = vsub.f32 %v6922_v27, %v16088_v41 }
 0x7a6   : > { %7859 = vst [vmem:[%s17815_s3 + $0xa80] sm:$0xff] %v7379_v23  ;;  %v6924_v23 = vld [vmem:[%s17815_s3 + $0xb98] sm:$0xff]  ;;  %v7413_v26 = vsub.f32 %v6923_v21, %v16088_v41 }
 0x7a7   : > { %7860 = vst [vmem:[%s17815_s3 + $0xa88] sm:$0xff] %v7380_v22  ;;  %v6925_v22 = vld [vmem:[%s17815_s3 + $0xba0] sm:$0xff]  ;;  %v7414_v38 = vsub.f32 %v6924_v23, %v16088_v41 }
 0x7a8   : > { %7861 = vst [vmem:[%s17815_s3 + $0xa90] sm:$0xff] %v7381_v32  ;;  %v6926_v32 = vld [vmem:[%s17815_s3 + $0xba8] sm:$0xff]  ;;  %v7415_v28 = vsub.f32 %v6925_v22, %v16088_v41 }
 0x7a9   : > { %7862 = vst [vmem:[%s17815_s3 + $0xa98] sm:$0xff] %v7382_v20  ;;  %v6927_v20 = vld [vmem:[%s17815_s3 + $0xbb0] sm:$0xff]  ;;  %v7416_v42 = vsub.f32 %v6926_v32, %v16088_v41 }
 0x7aa   : > { %7863 = vst [vmem:[%s17815_s3 + $0xaa0] sm:$0xff] %v7383_v39  ;;  %v6928_v39 = vld [vmem:[%s17815_s3 + $0xbb8] sm:$0xff]  ;;  %v7417_v29 = vsub.f32 %v6927_v20, %v16088_v41 }
 0x7ab   : > { %7864 = vst [vmem:[%s17815_s3 + $0xaa8] sm:$0xff] %v7384_v40  ;;  %v6929_v40 = vld [vmem:[%s17815_s3 + $0xbc0] sm:$0xff]  ;;  %v7418_v34 = vsub.f32 %v6928_v39, %v16088_v41 }
 0x7ac   : > { %7865 = vst [vmem:[%s17815_s3 + $0xab0] sm:$0xff] %v7385_v0  ;;  %v6930_v0 = vld [vmem:[%s17815_s3 + $0xbc8] sm:$0xff]  ;;  %v7419_v59 = vsub.f32 %v6929_v40, %v16088_v41 }
 0x7ad   : > { %7866 = vst [vmem:[%s17815_s3 + $0xab8] sm:$0xff] %v7386_v33  ;;  %v6931_v33 = vld [vmem:[%s17815_s3 + $0xbd0] sm:$0xff]  ;;  %v7420_v44 = vsub.f32 %v6930_v0, %v16088_v41 }
 0x7ae   : > { %7867 = vst [vmem:[%s17815_s3 + $0xac0] sm:$0xff] %v7387_v50  ;;  %v6932_v50 = vld [vmem:[%s17815_s3 + $0xbd8] sm:$0xff]  ;;  %v7421_v48 = vsub.f32 %v6931_v33, %v16088_v41 }
 0x7af   : > { %7868 = vst [vmem:[%s17815_s3 + $0xac8] sm:$0xff] %v7388_v8  ;;  %v6933_v8 = vld [vmem:[%s17815_s3 + $0xbe0] sm:$0xff]  ;;  %v7422_v1 = vsub.f32 %v6932_v50, %v16088_v41 }
 0x7b0   : > { %7869 = vst [vmem:[%s17815_s3 + $0xad0] sm:$0xff] %v7389_v45  ;;  %v6934_v45 = vld [vmem:[%s17815_s3 + $0xbe8] sm:$0xff]  ;;  %v7423_v47 = vsub.f32 %v6933_v8, %v16088_v41 }
 0x7b1   : > { %7870 = vst [vmem:[%s17815_s3 + $0xad8] sm:$0xff] %v7390_v7  ;;  %v6935_v7 = vld [vmem:[%s17815_s3 + $0xbf0] sm:$0xff]  ;;  %v7424_v2 = vsub.f32 %v6934_v45, %v16088_v41 }
 0x7b2   : > { %7871 = vst [vmem:[%s17815_s3 + $0xae0] sm:$0xff] %v7391_v49  ;;  %v6936_v49 = vld [vmem:[%s17815_s3 + $0xbf8] sm:$0xff]  ;;  %v7425_v57 = vsub.f32 %v6935_v7, %v16088_v41 }
 0x7b3   : > { %7872 = vst [vmem:[%s17815_s3 + $0xae8] sm:$0xff] %v7392_v51  ;;  %v6937_v51 = vld [vmem:[%s17815_s3 + $0xc00] sm:$0xff]  ;;  %v7426_v60 = vsub.f32 %v6936_v49, %v16088_v41 }
 0x7b4   : > { %7873 = vst [vmem:[%s17815_s3 + $0xaf0] sm:$0xff] %v7393_v53  ;;  %v6938_v53 = vld [vmem:[%s17815_s3 + $0xc08] sm:$0xff]  ;;  %v7427_v55 = vsub.f32 %v6937_v51, %v16088_v41 }
 0x7b5   : > { %7874 = vst [vmem:[%s17815_s3 + $0xaf8] sm:$0xff] %v7394_v58  ;;  %v6939_v58 = vld [vmem:[%s17815_s3 + $0xc10] sm:$0xff]  ;;  %v7428_v52 = vsub.f32 %v6938_v53, %v16088_v41 }
 0x7b6   : > { %7875 = vst [vmem:[%s17815_s3 + $0xb00] sm:$0xff] %v7395_v61  ;;  %v6940_v61 = vld [vmem:[%s17815_s3 + $0xc18] sm:$0xff]  ;;  %v7429_v9 = vsub.f32 %v6939_v58, %v16088_v41 }
 0x7b7   : > { %7876 = vst [vmem:[%s17815_s3 + $0xb08] sm:$0xff] %v7396_v37  ;;  %v6941_v37 = vld [vmem:[%s17815_s3 + $0xc20] sm:$0xff]  ;;  %v7430_v25 = vsub.f32 %v6940_v61, %v16088_v41 }
 0x7b8   : > { %7877 = vst [vmem:[%s17815_s3 + $0xb10] sm:$0xff] %v7397_v56  ;;  %v6942_v56 = vld [vmem:[%s17815_s3 + $0xc28] sm:$0xff]  ;;  %v7431_v30 = vsub.f32 %v6941_v37, %v16088_v41 }
 0x7b9   : > { %7878 = vst [vmem:[%s17815_s3 + $0xb18] sm:$0xff] %v7398_v24  ;;  %v6943_v24 = vld [vmem:[%s17815_s3 + $0xc30] sm:$0xff]  ;;  %v7432_v63 = vsub.f32 %v6942_v56, %v16088_v41 }
 0x7ba   : > { %7879 = vst [vmem:[%s17815_s3 + $0xb20] sm:$0xff] %v7399_v14  ;;  %v6944_v14 = vld [vmem:[%s17815_s3 + $0xc38] sm:$0xff]  ;;  %v7433_v13 = vsub.f32 %v6943_v24, %v16088_v41 }
 0x7bb   : > { %7880 = vst [vmem:[%s17815_s3 + $0xb28] sm:$0xff] %v7400_v62  ;;  %v6945_v62 = vld [vmem:[%s17815_s3 + $0xc40] sm:$0xff]  ;;  %v7434_v5 = vsub.f32 %v6944_v14, %v16088_v41 }
 0x7bc   : > { %7881 = vst [vmem:[%s17815_s3 + $0xb30] sm:$0xff] %v7401_v46  ;;  %v6946_v46 = vld [vmem:[%s17815_s3 + $0xc48] sm:$0xff]  ;;  %v7435_v12 = vsub.f32 %v6945_v62, %v16088_v41 }
 0x7bd   : > { %7882 = vst [vmem:[%s17815_s3 + $0xb38] sm:$0xff] %v7402_v54  ;;  %v6947_v54 = vld [vmem:[%s17815_s3 + $0xc50] sm:$0xff]  ;;  %v7436_v6 = vsub.f32 %v6946_v46, %v16088_v41 }
 0x7be   : > { %7883 = vst [vmem:[%s17815_s3 + $0xb40] sm:$0xff] %v7403_v11  ;;  %v6948_v11 = vld [vmem:[%s17815_s3 + $0xc58] sm:$0xff]  ;;  %v7437_v4 = vsub.f32 %v6947_v54, %v16088_v41 }
 0x7bf   : > { %7884 = vst [vmem:[%s17815_s3 + $0xb48] sm:$0xff] %v7404_v36  ;;  %v6949_v36 = vld [vmem:[%s17815_s3 + $0xc60] sm:$0xff]  ;;  %v7438_v10 = vsub.f32 %v6948_v11, %v16088_v41 }
 0x7c0   : > { %7885 = vst [vmem:[%s17815_s3 + $0xb50] sm:$0xff] %v7405_v31  ;;  %v6950_v31 = vld [vmem:[%s17815_s3 + $0xc68] sm:$0xff]  ;;  %v7439_v17 = vsub.f32 %v6949_v36, %v16088_v41 }
 0x7c1   : > { %7886 = vst [vmem:[%s17815_s3 + $0xb58] sm:$0xff] %v7406_v35  ;;  %v6951_v35 = vld [vmem:[%s17815_s3 + $0xc70] sm:$0xff]  ;;  %v7440_v27 = vsub.f32 %v6950_v31, %v16088_v41 }
 0x7c2   : > { %7887 = vst [vmem:[%s17815_s3 + $0xb60] sm:$0xff] %v7407_v15  ;;  %v6952_v15 = vld [vmem:[%s17815_s3 + $0xc78] sm:$0xff]  ;;  %v7441_v21 = vsub.f32 %v6951_v35, %v16088_v41 }
 0x7c3   : > { %7888 = vst [vmem:[%s17815_s3 + $0xb68] sm:$0xff] %v7408_v18  ;;  %v6953_v18 = vld [vmem:[%s17815_s3 + $0xc80] sm:$0xff]  ;;  %v7442_v23 = vsub.f32 %v6952_v15, %v16088_v41 }
 0x7c4   : > { %7889 = vst [vmem:[%s17815_s3 + $0xb70] sm:$0xff] %v7409_v19  ;;  %v6954_v19 = vld [vmem:[%s17815_s3 + $0xc88] sm:$0xff]  ;;  %v7443_v22 = vsub.f32 %v6953_v18, %v16088_v41 }
 0x7c5   : > { %7890 = vst [vmem:[%s17815_s3 + $0xb78] sm:$0xff] %v7410_v3  ;;  %v6955_v3 = vld [vmem:[%s17815_s3 + $0xc90] sm:$0xff]  ;;  %v7444_v32 = vsub.f32 %v6954_v19, %v16088_v41 }
 0x7c6   : > { %7891 = vst [vmem:[%s17815_s3 + $0xb80] sm:$0xff] %v7411_v16  ;;  %v6956_v16 = vld [vmem:[%s17815_s3 + $0xc98] sm:$0xff]  ;;  %v7445_v20 = vsub.f32 %v6955_v3, %v16088_v41 }
 0x7c7   : > { %7892 = vst [vmem:[%s17815_s3 + $0xb88] sm:$0xff] %v7412_v43  ;;  %v6957_v43 = vld [vmem:[%s17815_s3 + $0xca0] sm:$0xff]  ;;  %v7446_v39 = vsub.f32 %v6956_v16, %v16088_v41 }
 0x7c8   : > { %7893 = vst [vmem:[%s17815_s3 + $0xb90] sm:$0xff] %v7413_v26  ;;  %v6958_v26 = vld [vmem:[%s17815_s3 + $0xca8] sm:$0xff]  ;;  %v7447_v40 = vsub.f32 %v6957_v43, %v16088_v41 }
 0x7c9   : > { %7894 = vst [vmem:[%s17815_s3 + $0xb98] sm:$0xff] %v7414_v38  ;;  %v6959_v38 = vld [vmem:[%s17815_s3 + $0xcb0] sm:$0xff]  ;;  %v7448_v0 = vsub.f32 %v6958_v26, %v16088_v41 }
 0x7ca   : > { %7895 = vst [vmem:[%s17815_s3 + $0xba0] sm:$0xff] %v7415_v28  ;;  %v6960_v28 = vld [vmem:[%s17815_s3 + $0xcb8] sm:$0xff]  ;;  %v7449_v33 = vsub.f32 %v6959_v38, %v16088_v41 }
 0x7cb   : > { %7896 = vst [vmem:[%s17815_s3 + $0xba8] sm:$0xff] %v7416_v42  ;;  %v6961_v42 = vld [vmem:[%s17815_s3 + $0xcc0] sm:$0xff]  ;;  %v7450_v50 = vsub.f32 %v6960_v28, %v16088_v41 }
 0x7cc   : > { %7897 = vst [vmem:[%s17815_s3 + $0xbb0] sm:$0xff] %v7417_v29  ;;  %v6962_v29 = vld [vmem:[%s17815_s3 + $0xcc8] sm:$0xff]  ;;  %v7451_v8 = vsub.f32 %v6961_v42, %v16088_v41 }
 0x7cd   : > { %7898 = vst [vmem:[%s17815_s3 + $0xbb8] sm:$0xff] %v7418_v34  ;;  %v6963_v34 = vld [vmem:[%s17815_s3 + $0xcd0] sm:$0xff]  ;;  %v7452_v45 = vsub.f32 %v6962_v29, %v16088_v41 }
 0x7ce   : > { %7899 = vst [vmem:[%s17815_s3 + $0xbc0] sm:$0xff] %v7419_v59  ;;  %v6964_v59 = vld [vmem:[%s17815_s3 + $0xcd8] sm:$0xff]  ;;  %v7453_v7 = vsub.f32 %v6963_v34, %v16088_v41 }
 0x7cf   : > { %7900 = vst [vmem:[%s17815_s3 + $0xbc8] sm:$0xff] %v7420_v44  ;;  %v6965_v44 = vld [vmem:[%s17815_s3 + $0xce0] sm:$0xff]  ;;  %v7454_v49 = vsub.f32 %v6964_v59, %v16088_v41 }
 0x7d0   : > { %7901 = vst [vmem:[%s17815_s3 + $0xbd0] sm:$0xff] %v7421_v48  ;;  %v6966_v48 = vld [vmem:[%s17815_s3 + $0xce8] sm:$0xff]  ;;  %v7455_v51 = vsub.f32 %v6965_v44, %v16088_v41 }
 0x7d1   : > { %7902 = vst [vmem:[%s17815_s3 + $0xbd8] sm:$0xff] %v7422_v1  ;;  %v6967_v1 = vld [vmem:[%s17815_s3 + $0xcf0] sm:$0xff]  ;;  %v7456_v53 = vsub.f32 %v6966_v48, %v16088_v41 }
 0x7d2   : > { %7903 = vst [vmem:[%s17815_s3 + $0xbe0] sm:$0xff] %v7423_v47  ;;  %v6968_v47 = vld [vmem:[%s17815_s3 + $0xcf8] sm:$0xff]  ;;  %v7457_v58 = vsub.f32 %v6967_v1, %v16088_v41 }
 0x7d3   : > { %7904 = vst [vmem:[%s17815_s3 + $0xbe8] sm:$0xff] %v7424_v2  ;;  %v6969_v2 = vld [vmem:[%s17815_s3 + $0xd00] sm:$0xff]  ;;  %v7458_v61 = vsub.f32 %v6968_v47, %v16088_v41 }
 0x7d4   : > { %7905 = vst [vmem:[%s17815_s3 + $0xbf0] sm:$0xff] %v7425_v57  ;;  %v6970_v57 = vld [vmem:[%s17815_s3 + $0xd08] sm:$0xff]  ;;  %v7459_v37 = vsub.f32 %v6969_v2, %v16088_v41 }
 0x7d5   : > { %7906 = vst [vmem:[%s17815_s3 + $0xbf8] sm:$0xff] %v7426_v60  ;;  %v6971_v60 = vld [vmem:[%s17815_s3 + $0xd10] sm:$0xff]  ;;  %v7460_v56 = vsub.f32 %v6970_v57, %v16088_v41 }
 0x7d6   : > { %7907 = vst [vmem:[%s17815_s3 + $0xc00] sm:$0xff] %v7427_v55  ;;  %v6972_v55 = vld [vmem:[%s17815_s3 + $0xd18] sm:$0xff]  ;;  %v7461_v24 = vsub.f32 %v6971_v60, %v16088_v41 }
 0x7d7   : > { %7908 = vst [vmem:[%s17815_s3 + $0xc08] sm:$0xff] %v7428_v52  ;;  %v6973_v52 = vld [vmem:[%s17815_s3 + $0xd20] sm:$0xff]  ;;  %v7462_v14 = vsub.f32 %v6972_v55, %v16088_v41 }
 0x7d8   : > { %7909 = vst [vmem:[%s17815_s3 + $0xc10] sm:$0xff] %v7429_v9  ;;  %v6974_v9 = vld [vmem:[%s17815_s3 + $0xd28] sm:$0xff]  ;;  %v7463_v62 = vsub.f32 %v6973_v52, %v16088_v41 }
 0x7d9   : > { %7910 = vst [vmem:[%s17815_s3 + $0xc18] sm:$0xff] %v7430_v25  ;;  %v6975_v25 = vld [vmem:[%s17815_s3 + $0xd30] sm:$0xff]  ;;  %v7464_v46 = vsub.f32 %v6974_v9, %v16088_v41 }
 0x7da   : > { %7911 = vst [vmem:[%s17815_s3 + $0xc20] sm:$0xff] %v7431_v30  ;;  %v6976_v30 = vld [vmem:[%s17815_s3 + $0xd38] sm:$0xff]  ;;  %v7465_v54 = vsub.f32 %v6975_v25, %v16088_v41 }
 0x7db   : > { %7912 = vst [vmem:[%s17815_s3 + $0xc28] sm:$0xff] %v7432_v63  ;;  %v6977_v63 = vld [vmem:[%s17815_s3 + $0xd40] sm:$0xff]  ;;  %v7466_v11 = vsub.f32 %v6976_v30, %v16088_v41 }
 0x7dc   : > { %7913 = vst [vmem:[%s17815_s3 + $0xc30] sm:$0xff] %v7433_v13  ;;  %v6978_v13 = vld [vmem:[%s17815_s3 + $0xd48] sm:$0xff]  ;;  %v7467_v36 = vsub.f32 %v6977_v63, %v16088_v41 }
 0x7dd   : > { %7914 = vst [vmem:[%s17815_s3 + $0xc38] sm:$0xff] %v7434_v5  ;;  %v6979_v5 = vld [vmem:[%s17815_s3 + $0xd50] sm:$0xff]  ;;  %v7468_v31 = vsub.f32 %v6978_v13, %v16088_v41 }
 0x7de   : > { %7915 = vst [vmem:[%s17815_s3 + $0xc40] sm:$0xff] %v7435_v12  ;;  %v6980_v12 = vld [vmem:[%s17815_s3 + $0xd58] sm:$0xff]  ;;  %v7469_v35 = vsub.f32 %v6979_v5, %v16088_v41 }
 0x7df   : > { %7916 = vst [vmem:[%s17815_s3 + $0xc48] sm:$0xff] %v7436_v6  ;;  %v6981_v6 = vld [vmem:[%s17815_s3 + $0xd60] sm:$0xff]  ;;  %v7470_v15 = vsub.f32 %v6980_v12, %v16088_v41 }
 0x7e0   : > { %7917 = vst [vmem:[%s17815_s3 + $0xc50] sm:$0xff] %v7437_v4  ;;  %v6982_v4 = vld [vmem:[%s17815_s3 + $0xd68] sm:$0xff]  ;;  %v7471_v18 = vsub.f32 %v6981_v6, %v16088_v41 }
 0x7e1   : > { %7918 = vst [vmem:[%s17815_s3 + $0xc58] sm:$0xff] %v7438_v10  ;;  %v6983_v10 = vld [vmem:[%s17815_s3 + $0xd70] sm:$0xff]  ;;  %v7472_v19 = vsub.f32 %v6982_v4, %v16088_v41 }
 0x7e2   : > { %7919 = vst [vmem:[%s17815_s3 + $0xc60] sm:$0xff] %v7439_v17  ;;  %v6984_v17 = vld [vmem:[%s17815_s3 + $0xd78] sm:$0xff]  ;;  %v7473_v3 = vsub.f32 %v6983_v10, %v16088_v41 }
 0x7e3   : > { %7920 = vst [vmem:[%s17815_s3 + $0xc68] sm:$0xff] %v7440_v27  ;;  %v6985_v27 = vld [vmem:[%s17815_s3 + $0xd80] sm:$0xff]  ;;  %v7474_v16 = vsub.f32 %v6984_v17, %v16088_v41 }
 0x7e4   : > { %7921 = vst [vmem:[%s17815_s3 + $0xc70] sm:$0xff] %v7441_v21  ;;  %v6986_v21 = vld [vmem:[%s17815_s3 + $0xd88] sm:$0xff]  ;;  %v7475_v43 = vsub.f32 %v6985_v27, %v16088_v41 }
 0x7e5   : > { %7922 = vst [vmem:[%s17815_s3 + $0xc78] sm:$0xff] %v7442_v23  ;;  %v6987_v23 = vld [vmem:[%s17815_s3 + $0xd90] sm:$0xff]  ;;  %v7476_v26 = vsub.f32 %v6986_v21, %v16088_v41 }
 0x7e6   : > { %7923 = vst [vmem:[%s17815_s3 + $0xc80] sm:$0xff] %v7443_v22  ;;  %v6988_v22 = vld [vmem:[%s17815_s3 + $0xd98] sm:$0xff]  ;;  %v7477_v38 = vsub.f32 %v6987_v23, %v16088_v41 }
 0x7e7   : > { %7924 = vst [vmem:[%s17815_s3 + $0xc88] sm:$0xff] %v7444_v32  ;;  %v6989_v32 = vld [vmem:[%s17815_s3 + $0xda0] sm:$0xff]  ;;  %v7478_v28 = vsub.f32 %v6988_v22, %v16088_v41 }
 0x7e8   : > { %7925 = vst [vmem:[%s17815_s3 + $0xc90] sm:$0xff] %v7445_v20  ;;  %v6990_v20 = vld [vmem:[%s17815_s3 + $0xda8] sm:$0xff]  ;;  %v7479_v42 = vsub.f32 %v6989_v32, %v16088_v41 }
 0x7e9   : > { %7926 = vst [vmem:[%s17815_s3 + $0xc98] sm:$0xff] %v7446_v39  ;;  %v6991_v39 = vld [vmem:[%s17815_s3 + $0xdb0] sm:$0xff]  ;;  %v7480_v29 = vsub.f32 %v6990_v20, %v16088_v41 }
 0x7ea   : > { %7927 = vst [vmem:[%s17815_s3 + $0xca0] sm:$0xff] %v7447_v40  ;;  %v6992_v40 = vld [vmem:[%s17815_s3 + $0xdb8] sm:$0xff]  ;;  %v7481_v34 = vsub.f32 %v6991_v39, %v16088_v41 }
 0x7eb   : > { %7928 = vst [vmem:[%s17815_s3 + $0xca8] sm:$0xff] %v7448_v0  ;;  %v6993_v0 = vld [vmem:[%s17815_s3 + $0xdc0] sm:$0xff]  ;;  %v7482_v59 = vsub.f32 %v6992_v40, %v16088_v41 }
 0x7ec   : > { %7929 = vst [vmem:[%s17815_s3 + $0xcb0] sm:$0xff] %v7449_v33  ;;  %v6994_v33 = vld [vmem:[%s17815_s3 + $0xdc8] sm:$0xff]  ;;  %v7483_v44 = vsub.f32 %v6993_v0, %v16088_v41 }
 0x7ed   : > { %7930 = vst [vmem:[%s17815_s3 + $0xcb8] sm:$0xff] %v7450_v50  ;;  %v6995_v50 = vld [vmem:[%s17815_s3 + $0xdd0] sm:$0xff]  ;;  %v7484_v48 = vsub.f32 %v6994_v33, %v16088_v41 }
 0x7ee   : > { %7931 = vst [vmem:[%s17815_s3 + $0xcc0] sm:$0xff] %v7451_v8  ;;  %v6996_v8 = vld [vmem:[%s17815_s3 + $0xdd8] sm:$0xff]  ;;  %v7485_v1 = vsub.f32 %v6995_v50, %v16088_v41 }
 0x7ef   : > { %7932 = vst [vmem:[%s17815_s3 + $0xcc8] sm:$0xff] %v7452_v45  ;;  %v6997_v45 = vld [vmem:[%s17815_s3 + $0xde0] sm:$0xff]  ;;  %v7486_v47 = vsub.f32 %v6996_v8, %v16088_v41 }
 0x7f0   : > { %7933 = vst [vmem:[%s17815_s3 + $0xcd0] sm:$0xff] %v7453_v7  ;;  %v6998_v7 = vld [vmem:[%s17815_s3 + $0xde8] sm:$0xff]  ;;  %v7487_v2 = vsub.f32 %v6997_v45, %v16088_v41 }
 0x7f1   : > { %7934 = vst [vmem:[%s17815_s3 + $0xcd8] sm:$0xff] %v7454_v49  ;;  %v6999_v49 = vld [vmem:[%s17815_s3 + $0xdf0] sm:$0xff]  ;;  %v7488_v57 = vsub.f32 %v6998_v7, %v16088_v41 }
 0x7f2   : > { %7935 = vst [vmem:[%s17815_s3 + $0xce0] sm:$0xff] %v7455_v51  ;;  %v7000_v51 = vld [vmem:[%s17815_s3 + $0xdf8] sm:$0xff]  ;;  %v7489_v60 = vsub.f32 %v6999_v49, %v16088_v41 }
 0x7f3   : > { %7936 = vst [vmem:[%s17815_s3 + $0xce8] sm:$0xff] %v7456_v53  ;;  %v7001_v53 = vld [vmem:[%s17815_s3 + $0xe00] sm:$0xff]  ;;  %v7490_v55 = vsub.f32 %v7000_v51, %v16088_v41 }
 0x7f4   : > { %7937 = vst [vmem:[%s17815_s3 + $0xcf0] sm:$0xff] %v7457_v58  ;;  %v7002_v58 = vld [vmem:[%s17815_s3 + $0xe08] sm:$0xff]  ;;  %v7491_v52 = vsub.f32 %v7001_v53, %v16088_v41 }
 0x7f5   : > { %7938 = vst [vmem:[%s17815_s3 + $0xcf8] sm:$0xff] %v7458_v61  ;;  %v7003_v61 = vld [vmem:[%s17815_s3 + $0xe10] sm:$0xff]  ;;  %v7492_v9 = vsub.f32 %v7002_v58, %v16088_v41 }
 0x7f6   : > { %7939 = vst [vmem:[%s17815_s3 + $0xd00] sm:$0xff] %v7459_v37  ;;  %v7004_v37 = vld [vmem:[%s17815_s3 + $0xe18] sm:$0xff]  ;;  %v7493_v25 = vsub.f32 %v7003_v61, %v16088_v41 }
 0x7f7   : > { %7940 = vst [vmem:[%s17815_s3 + $0xd08] sm:$0xff] %v7460_v56  ;;  %v7005_v56 = vld [vmem:[%s17815_s3 + $0xe20] sm:$0xff]  ;;  %v7494_v30 = vsub.f32 %v7004_v37, %v16088_v41 }
 0x7f8   : > { %7941 = vst [vmem:[%s17815_s3 + $0xd10] sm:$0xff] %v7461_v24  ;;  %v7006_v24 = vld [vmem:[%s17815_s3 + $0xe28] sm:$0xff]  ;;  %v7495_v63 = vsub.f32 %v7005_v56, %v16088_v41 }
 0x7f9   : > { %7942 = vst [vmem:[%s17815_s3 + $0xd18] sm:$0xff] %v7462_v14  ;;  %v7007_v14 = vld [vmem:[%s17815_s3 + $0xe30] sm:$0xff]  ;;  %v7496_v13 = vsub.f32 %v7006_v24, %v16088_v41 }
 0x7fa   : > { %7943 = vst [vmem:[%s17815_s3 + $0xd20] sm:$0xff] %v7463_v62  ;;  %v7008_v62 = vld [vmem:[%s17815_s3 + $0xe38] sm:$0xff]  ;;  %v7497_v5 = vsub.f32 %v7007_v14, %v16088_v41 }
 0x7fb   : > { %7944 = vst [vmem:[%s17815_s3 + $0xd28] sm:$0xff] %v7464_v46  ;;  %v7009_v46 = vld [vmem:[%s17815_s3 + $0xe40] sm:$0xff]  ;;  %v7498_v12 = vsub.f32 %v7008_v62, %v16088_v41 }
 0x7fc   : > { %7945 = vst [vmem:[%s17815_s3 + $0xd30] sm:$0xff] %v7465_v54  ;;  %v7010_v54 = vld [vmem:[%s17815_s3 + $0xe48] sm:$0xff]  ;;  %v7499_v6 = vsub.f32 %v7009_v46, %v16088_v41 }
 0x7fd   : > { %7946 = vst [vmem:[%s17815_s3 + $0xd38] sm:$0xff] %v7466_v11  ;;  %v7011_v11 = vld [vmem:[%s17815_s3 + $0xe50] sm:$0xff]  ;;  %v7500_v4 = vsub.f32 %v7010_v54, %v16088_v41 }
 0x7fe   : > { %7947 = vst [vmem:[%s17815_s3 + $0xd40] sm:$0xff] %v7467_v36  ;;  %v7012_v36 = vld [vmem:[%s17815_s3 + $0xe58] sm:$0xff]  ;;  %v7501_v10 = vsub.f32 %v7011_v11, %v16088_v41 }
 0x7ff   : > { %7948 = vst [vmem:[%s17815_s3 + $0xd48] sm:$0xff] %v7468_v31  ;;  %v7013_v31 = vld [vmem:[%s17815_s3 + $0xe60] sm:$0xff]  ;;  %v7502_v17 = vsub.f32 %v7012_v36, %v16088_v41 }
 0x800   : > { %7949 = vst [vmem:[%s17815_s3 + $0xd50] sm:$0xff] %v7469_v35  ;;  %v7014_v35 = vld [vmem:[%s17815_s3 + $0xe68] sm:$0xff]  ;;  %v7503_v27 = vsub.f32 %v7013_v31, %v16088_v41 }
 0x801   : > { %7950 = vst [vmem:[%s17815_s3 + $0xd58] sm:$0xff] %v7470_v15  ;;  %v7015_v15 = vld [vmem:[%s17815_s3 + $0xe70] sm:$0xff]  ;;  %v7504_v21 = vsub.f32 %v7014_v35, %v16088_v41 }
 0x802   : > { %7951 = vst [vmem:[%s17815_s3 + $0xd60] sm:$0xff] %v7471_v18  ;;  %v7016_v18 = vld [vmem:[%s17815_s3 + $0xe78] sm:$0xff]  ;;  %v7505_v23 = vsub.f32 %v7015_v15, %v16088_v41 }
 0x803   : > { %7952 = vst [vmem:[%s17815_s3 + $0xd68] sm:$0xff] %v7472_v19  ;;  %v7017_v19 = vld [vmem:[%s17815_s3 + $0xe80] sm:$0xff]  ;;  %v7506_v22 = vsub.f32 %v7016_v18, %v16088_v41 }
 0x804   : > { %7953 = vst [vmem:[%s17815_s3 + $0xd70] sm:$0xff] %v7473_v3  ;;  %v7018_v3 = vld [vmem:[%s17815_s3 + $0xe88] sm:$0xff]  ;;  %v7507_v32 = vsub.f32 %v7017_v19, %v16088_v41 }
 0x805   : > { %7954 = vst [vmem:[%s17815_s3 + $0xd78] sm:$0xff] %v7474_v16  ;;  %v7019_v16 = vld [vmem:[%s17815_s3 + $0xe90] sm:$0xff]  ;;  %v7508_v20 = vsub.f32 %v7018_v3, %v16088_v41 }
 0x806   : > { %7955 = vst [vmem:[%s17815_s3 + $0xd80] sm:$0xff] %v7475_v43  ;;  %v7020_v43 = vld [vmem:[%s17815_s3 + $0xe98] sm:$0xff]  ;;  %v7509_v39 = vsub.f32 %v7019_v16, %v16088_v41 }
 0x807   : > { %7956 = vst [vmem:[%s17815_s3 + $0xd88] sm:$0xff] %v7476_v26  ;;  %v7021_v26 = vld [vmem:[%s17815_s3 + $0xea0] sm:$0xff]  ;;  %v7510_v40 = vsub.f32 %v7020_v43, %v16088_v41 }
 0x808   : > { %7957 = vst [vmem:[%s17815_s3 + $0xd90] sm:$0xff] %v7477_v38  ;;  %v7022_v38 = vld [vmem:[%s17815_s3 + $0xea8] sm:$0xff]  ;;  %v7511_v0 = vsub.f32 %v7021_v26, %v16088_v41 }
 0x809   : > { %7958 = vst [vmem:[%s17815_s3 + $0xd98] sm:$0xff] %v7478_v28  ;;  %v7023_v28 = vld [vmem:[%s17815_s3 + $0xeb0] sm:$0xff]  ;;  %v7512_v33 = vsub.f32 %v7022_v38, %v16088_v41 }
 0x80a   : > { %7959 = vst [vmem:[%s17815_s3 + $0xda0] sm:$0xff] %v7479_v42  ;;  %v7024_v42 = vld [vmem:[%s17815_s3 + $0xeb8] sm:$0xff]  ;;  %v7513_v50 = vsub.f32 %v7023_v28, %v16088_v41 }
 0x80b   : > { %7960 = vst [vmem:[%s17815_s3 + $0xda8] sm:$0xff] %v7480_v29  ;;  %v7025_v29 = vld [vmem:[%s17815_s3 + $0xec0] sm:$0xff]  ;;  %v7514_v8 = vsub.f32 %v7024_v42, %v16088_v41 }
 0x80c   : > { %7961 = vst [vmem:[%s17815_s3 + $0xdb0] sm:$0xff] %v7481_v34  ;;  %v7026_v34 = vld [vmem:[%s17815_s3 + $0xec8] sm:$0xff]  ;;  %v7515_v45 = vsub.f32 %v7025_v29, %v16088_v41 }
 0x80d   : > { %7962 = vst [vmem:[%s17815_s3 + $0xdb8] sm:$0xff] %v7482_v59  ;;  %v7027_v59 = vld [vmem:[%s17815_s3 + $0xed0] sm:$0xff]  ;;  %v7516_v7 = vsub.f32 %v7026_v34, %v16088_v41 }
 0x80e   : > { %7963 = vst [vmem:[%s17815_s3 + $0xdc0] sm:$0xff] %v7483_v44  ;;  %v7028_v44 = vld [vmem:[%s17815_s3 + $0xed8] sm:$0xff]  ;;  %v7517_v49 = vsub.f32 %v7027_v59, %v16088_v41 }
 0x80f   : > { %7964 = vst [vmem:[%s17815_s3 + $0xdc8] sm:$0xff] %v7484_v48  ;;  %v7029_v48 = vld [vmem:[%s17815_s3 + $0xee0] sm:$0xff]  ;;  %v7518_v51 = vsub.f32 %v7028_v44, %v16088_v41 }
 0x810   : > { %7965 = vst [vmem:[%s17815_s3 + $0xdd0] sm:$0xff] %v7485_v1  ;;  %v7030_v1 = vld [vmem:[%s17815_s3 + $0xee8] sm:$0xff]  ;;  %v7519_v53 = vsub.f32 %v7029_v48, %v16088_v41 }
 0x811   : > { %7966 = vst [vmem:[%s17815_s3 + $0xdd8] sm:$0xff] %v7486_v47  ;;  %v7031_v47 = vld [vmem:[%s17815_s3 + $0xef0] sm:$0xff] }
 0x812   : > { %7967 = vst [vmem:[%s17815_s3 + $0xde0] sm:$0xff] %v7487_v2  ;;  %v7032_v2 = vld [vmem:[%s17815_s3 + $0xef8] sm:$0xff]  ;;  %v7521_v58 = vsub.f32 %v7031_v47, %v16088_v41 }
 0x813   : > { %7968 = vst [vmem:[%s17815_s3 + $0xde8] sm:$0xff] %v7488_v57  ;;  %v7520_v57 = vsub.f32 %v7030_v1, %v16088_v41 }
 0x814   : > { %7969 = vst [vmem:[%s17815_s3 + $0xdf0] sm:$0xff] %v7489_v60  ;;  %v7522_v60 = vsub.f32 %v7032_v2, %v16088_v41 }
 0x815   : > { %7970 = vst [vmem:[%s17815_s3 + $0xdf8] sm:$0xff] %v7490_v55 }
 0x816   : > { %7971 = vst [vmem:[%s17815_s3 + $0xe00] sm:$0xff] %v7491_v52 }
 0x817   : > { %7972 = vst [vmem:[%s17815_s3 + $0xe08] sm:$0xff] %v7492_v9 }
 0x818   : > { %7973 = vst [vmem:[%s17815_s3 + $0xe10] sm:$0xff] %v7493_v25 }
 0x819   : > { %7974 = vst [vmem:[%s17815_s3 + $0xe18] sm:$0xff] %v7494_v30 }
 0x81a   : > { %7975 = vst [vmem:[%s17815_s3 + $0xe20] sm:$0xff] %v7495_v63 }
 0x81b   : > { %7976 = vst [vmem:[%s17815_s3 + $0xe28] sm:$0xff] %v7496_v13 }
 0x81c   : > { %7977 = vst [vmem:[%s17815_s3 + $0xe30] sm:$0xff] %v7497_v5 }
 0x81d   : > { %7978 = vst [vmem:[%s17815_s3 + $0xe38] sm:$0xff] %v7498_v12 }
 0x81e   : > { %7979 = vst [vmem:[%s17815_s3 + $0xe40] sm:$0xff] %v7499_v6 }
 0x81f   : > { %7980 = vst [vmem:[%s17815_s3 + $0xe48] sm:$0xff] %v7500_v4 }
 0x820   : > { %7981 = vst [vmem:[%s17815_s3 + $0xe50] sm:$0xff] %v7501_v10 }
 0x821   : > { %7982 = vst [vmem:[%s17815_s3 + $0xe58] sm:$0xff] %v7502_v17 }
 0x822   : > { %7983 = vst [vmem:[%s17815_s3 + $0xe60] sm:$0xff] %v7503_v27 }
 0x823   : > { %7984 = vst [vmem:[%s17815_s3 + $0xe68] sm:$0xff] %v7504_v21 }
 0x824   : > { %7985 = vst [vmem:[%s17815_s3 + $0xe70] sm:$0xff] %v7505_v23 }
 0x825   : > { %7986 = vst [vmem:[%s17815_s3 + $0xe78] sm:$0xff] %v7506_v22 }
 0x826   : > { %7987 = vst [vmem:[%s17815_s3 + $0xe80] sm:$0xff] %v7507_v32 }
 0x827   : > { %7988 = vst [vmem:[%s17815_s3 + $0xe88] sm:$0xff] %v7508_v20 }
 0x828   : > { %7989 = vst [vmem:[%s17815_s3 + $0xe90] sm:$0xff] %v7509_v39 }
 0x829   : > { %7990 = vst [vmem:[%s17815_s3 + $0xe98] sm:$0xff] %v7510_v40 }
 0x82a   : > { %7991 = vst [vmem:[%s17815_s3 + $0xea0] sm:$0xff] %v7511_v0 }
 0x82b   : > { %7992 = vst [vmem:[%s17815_s3 + $0xea8] sm:$0xff] %v7512_v33 }
 0x82c   : > { %7993 = vst [vmem:[%s17815_s3 + $0xeb0] sm:$0xff] %v7513_v50 }
 0x82d   : > { %7994 = vst [vmem:[%s17815_s3 + $0xeb8] sm:$0xff] %v7514_v8 }
 0x82e   : > { %7995 = vst [vmem:[%s17815_s3 + $0xec0] sm:$0xff] %v7515_v45 }
 0x82f   : > { %7996 = vst [vmem:[%s17815_s3 + $0xec8] sm:$0xff] %v7516_v7 }
 0x830   : > { %7997 = vst [vmem:[%s17815_s3 + $0xed0] sm:$0xff] %v7517_v49 }
 0x831   : > { %7998 = vst [vmem:[%s17815_s3 + $0xed8] sm:$0xff] %v7518_v51 }
 0x832   : > { %7999 = vst [vmem:[%s17815_s3 + $0xee0] sm:$0xff] %v7519_v53 }
 0x833   : > { %8000 = vst [vmem:[%s17815_s3 + $0xee8] sm:$0xff] %v7520_v57 }
 0x834   : > { %8001 = vst [vmem:[%s17815_s3 + $0xef0] sm:$0xff] %v7521_v58 }
 0x835   : > { %8002 = vst [vmem:[%s17815_s3 + $0xef8] sm:$0xff] %v7522_v60 }
 0x836 PF: > { %s19_s17 = sadd.s32 1, %s12290_s17   ;;  %s17818_s12 = smov %s12274_s13 }
 0x837   : > { %p16_p1 = scmp.ge.s32.totalorder %s19_s17, 17   ;;  %s17819_s13 = smov %s12278_s14 }
 0x838   : > { %s17820_s14 = smov %s12364_s23  ;;  %s17821_s15 = smov %s12286_s16 }
 0x839   : > { %s17822_s16 = smov %s17824_s19  ;;  %18 = sbr.rel (!%p16_p1) target bundleno = 6 (0x6), region = 97 }
 0x83e   :  { %8027 = vsyncpa [#allocation5], 1 }
 0x83f   :  { %8029 = vsyncpa [#allocation5 + $0x1], 1 }
 0x840   :  { %8030 = vsyncpa [#allocation7], 1 }
 0x841   :  { %8032 = vsyncpa [#allocation7 + $0x1], 1 }

</bundles_post_ra>
